<compile_context>
chip_gen: v7x
topology: tpu7x:2x2x1
jax: 0.10.0
libtpu: 0.0.40
codegen_flags: <defaults>
</compile_context>

<pallas_src>
import functools

import jax
import jax.numpy as jnp
from jax.experimental import pallas as pl
from jax.experimental.pallas import tpu as pltpu


def _round_up(x, m):
    return (x + m - 1) // m * m


# ----------------------------------------------------------------------------
# Kernel 1: fused conv stack (conv1+ReLU, conv2+ReLU, conv3+ReLU).
# Grid = (B // n_img,).  Weights stay VMEM-resident, per-image activations
# live in VMEM scratch, only the 49 valid conv3 rows go back to HBM.
#
# Layout (per image):
#   x      : 4 parity planes, each (110, 64C); row r = 11*a + b is conv1
#            output position (oh, ow) = (2a+pa, 2b+pb) with its full 8x8xC
#            receptive field im2col'ed along K (b = 10 is a zero-padded
#            garbage column).
#   conv1  : plane p slab (110, 32), one fused K=64C dot per plane.
#   conv2  : full-width slab (97, 64); row r2 = 11*oh2 + ow2' (valid ow2'<=8).
#            Tap (ki,kj) = contiguous slice of plane ((ki%2)*2 + kj%2) at
#            offset 11*(ki//2) + kj//2.
#   conv3  : full-width slab (73, 64); row r3 = 11*oh3 + ow3' (valid ow3'<=6).
#            Tap (ki,kj) = contiguous slice of conv2 slab at offset 11*ki+kj.
#   output : the 49 valid rows (oh3, ow3), channels as lanes.
# Garbage columns only ever feed other garbage columns and stay finite.
# ----------------------------------------------------------------------------
def _conv_stack_kernel(x_ref, w1_ref, b1_ref, w2_ref, b2_ref, w3_ref, b3_ref,
                       o_ref, a1_ref, a2_ref, a3_ref, *, n_img):
    f32 = jnp.float32
    bf16 = jnp.bfloat16

    @pl.loop(0, n_img)
    def _(n):
        # ---- conv1: one fused K=(4*16*C) dot per output parity plane. ----
        for p in range(4):
            acc1 = jnp.dot(x_ref[4 * n + p], w1_ref[...],
                           preferred_element_type=f32)        # (110, 32)
            a1_ref[p] = jnp.maximum(acc1 + b1_ref[...], 0.0).astype(bf16)

        # ---- conv2: 4x4 stride-2; 16 contiguous-slice taps, no decimation
        # matmul.  Accumulate in f32. ----
        acc2 = jnp.zeros((97, 64), f32)
        for ki in range(4):
            for kj in range(4):
                pln = (ki % 2) * 2 + (kj % 2)
                off = 11 * (ki // 2) + (kj // 2)
                blk = (ki * 4 + kj) * 32
                acc2 = acc2 + jnp.dot(a1_ref[pln, off:off + 97, :],
                                      w2_ref[blk:blk + 32, :],
                                      preferred_element_type=f32)  # (97, 64)
        a2_ref[...] = jnp.maximum(acc2 + b2_ref[...], 0.0).astype(bf16)

        # ---- conv3: 3x3 stride-1; 9 contiguous-slice taps. ----
        acc3 = jnp.zeros((73, 64), f32)
        for ki in range(3):
            for kj in range(3):
                off = 11 * ki + kj
                blk = (ki * 3 + kj) * 64
                acc3 = acc3 + jnp.dot(a2_ref[off:off + 73, :],
                                      w3_ref[blk:blk + 64, :],
                                      preferred_element_type=f32)  # (73, 64)
        a3_ref[...] = jnp.maximum(acc3 + b3_ref[...], 0.0).astype(bf16)

        # Emit only the 49 valid rows (ow3' <= 6 of each 11-wide row group).
        for i in range(7):
            o_ref[n, 7 * i:7 * i + 7, :] = a3_ref[11 * i:11 * i + 7, :]


def conv_stack(p, xin, *, n_img):
    """xin: (Bp*4, 110, 64C) bf16 parity-split im2col -> (Bp, 49, 64) bf16."""
    rows, _, K = xin.shape
    Bp = rows // 4
    steps = Bp // n_img
    kernel = functools.partial(_conv_stack_kernel, n_img=n_img)
    return pl.pallas_call(
        kernel,
        out_shape=jax.ShapeDtypeStruct((Bp, 49, 64), jnp.bfloat16),
        grid=(steps,),
        in_specs=[
            pl.BlockSpec((n_img * 4, 110, K), lambda i: (i, 0, 0)),
            pl.BlockSpec((K, 32), lambda i: (0, 0)),
            pl.BlockSpec((1, 32), lambda i: (0, 0)),
            pl.BlockSpec((512, 64), lambda i: (0, 0)),
            pl.BlockSpec((1, 64), lambda i: (0, 0)),
            pl.BlockSpec((576, 64), lambda i: (0, 0)),
            pl.BlockSpec((1, 64), lambda i: (0, 0)),
        ],
        out_specs=pl.BlockSpec((n_img, 49, 64), lambda i: (i, 0, 0)),
        scratch_shapes=[pltpu.VMEM((4, 110, 32), jnp.bfloat16),
                        pltpu.VMEM((97, 64), jnp.bfloat16),
                        pltpu.VMEM((73, 64), jnp.bfloat16)],
        compiler_params=pltpu.CompilerParams(dimension_semantics=("parallel",)),
    )(xin, p["w1"], p["b1"], p["w2"], p["b2"], p["w3"], p["b3"])


# ----------------------------------------------------------------------------
# Kernel 2: fused FC head:  out = relu(h @ W4 + b4) @ W5 + b5
# Grid over M (batch-row) tiles; weights as untiled resident blocks.
# ----------------------------------------------------------------------------
def _fc_head_kernel(h_ref, w4_ref, b4_ref, w5_ref, b5_ref, o_ref):
    y1 = jnp.dot(h_ref[...], w4_ref[...], preferred_element_type=jnp.float32)
    y1 = jnp.maximum(y1 + b4_ref[...], 0.0).astype(jnp.bfloat16)
    y2 = jnp.dot(y1, w5_ref[...], preferred_element_type=jnp.float32)
    o_ref[...] = y2 + b5_ref[...]


def fc_head(p, h, *, out_dim):
    """h: (B, 3136) bf16 -> (B, out_dim) f32."""
    B, K = h.shape
    tm = min(512, _round_up(max(B, 1), 16))   # bf16 sublane packing (16)
    Bp = _round_up(B, tm)
    if Bp != B:
        h = jnp.pad(h, ((0, Bp - B), (0, 0)))
    out = pl.pallas_call(
        _fc_head_kernel,
        out_shape=jax.ShapeDtypeStruct((Bp, 128), jnp.float32),
        grid=(Bp // tm,),
        in_specs=[
            pl.BlockSpec((tm, K), lambda i: (i, 0)),
            pl.BlockSpec((K, 512), lambda i: (0, 0)),
            pl.BlockSpec((1, 512), lambda i: (0, 0)),
            pl.BlockSpec((512, 128), lambda i: (0, 0)),
            pl.BlockSpec((1, 128), lambda i: (0, 0)),
        ],
        out_specs=pl.BlockSpec((tm, 128), lambda i: (i, 0)),
        compiler_params=pltpu.CompilerParams(dimension_semantics=("parallel",)),
    )(h, p["w4"], p["b4"], p["w5"], p["b5"])
    return out[:B, :out_dim]


# ----------------------------------------------------------------------------
# Parameter init (PyTorch layout) + one-time kernel-layout preparation.
# ----------------------------------------------------------------------------
def init_ddqnet_params(key, input_dim, output_dim):
    c, h, w = input_dim
    if h != 84:
        raise ValueError(f"Expecting input height: 84, got: {h}")
    if w != 84:
        raise ValueError(f"Expecting input width: 84, got: {w}")

    def _init(key, shape, fan_in):
        bound = 1.0 / jnp.sqrt(jnp.float32(fan_in))
        return jax.random.uniform(key, shape, jnp.float32, -bound, bound)

    ks = jax.random.split(key, 10)
    online = {
        "conv1_w": _init(ks[0], (32, c, 8, 8), c * 8 * 8),
        "conv1_b": _init(ks[1], (32,), c * 8 * 8),
        "conv2_w": _init(ks[2], (64, 32, 4, 4), 32 * 4 * 4),
        "conv2_b": _init(ks[3], (64,), 32 * 4 * 4),
        "conv3_w": _init(ks[4], (64, 64, 3, 3), 64 * 3 * 3),
        "conv3_b": _init(ks[5], (64,), 64 * 3 * 3),
        "fc1_w": _init(ks[6], (512, 3136), 3136),
        "fc1_b": _init(ks[7], (512,), 3136),
        "fc2_w": _init(ks[8], (output_dim, 512), 512),
        "fc2_b": _init(ks[9], (output_dim,), 512),
    }
    target = jax.tree_util.tree_map(lambda a: a, online)  # frozen copy
    return {"online": online, "target": target}


def prepare_params(raw):
    """One-time repack of PyTorch-layout weights into kernel layout (bf16)."""
    bf16 = jnp.bfloat16
    C = raw["conv1_w"].shape[1]
    # conv1 fused-K weight: rows ordered (bi, bj, di, dj, c); kh=4*bi+di,
    # kw=4*bj+dj.  Matches the im2col K order produced by _preprocess.
    w1 = (raw["conv1_w"].reshape(32, C, 2, 4, 2, 4)
          .transpose(2, 4, 3, 5, 1, 0).reshape(64 * C, 32))
    # conv2 / conv3: rows ordered (ki, kj, cin).
    w2 = raw["conv2_w"].transpose(2, 3, 1, 0).reshape(16 * 32, 64)
    w3 = raw["conv3_w"].transpose(2, 3, 1, 0).reshape(9 * 64, 64)
    # fc1: fold the PyTorch NCHW-flatten permutation into the weight matrix:
    # kernel feature index = (oh3*7 + ow3)*64 + c, PyTorch = c*49 + oh3*7 + ow3.
    w4 = (raw["fc1_w"].reshape(512, 64, 7, 7)
          .transpose(2, 3, 1, 0).reshape(3136, 512))
    # fc2: pre-transpose and pad N to 128 lanes (lane-dense store).
    out_dim = raw["fc2_w"].shape[0]
    w5 = jnp.pad(raw["fc2_w"].T, ((0, 0), (0, 128 - out_dim)))
    b5 = jnp.pad(raw["fc2_b"], (0, 128 - out_dim))
    return {
        "w1": w1.astype(bf16), "b1": raw["conv1_b"].reshape(1, 32),
        "w2": w2.astype(bf16), "b2": raw["conv2_b"].reshape(1, 64),
        "w3": w3.astype(bf16), "b3": raw["conv3_b"].reshape(1, 64),
        "w4": w4.astype(bf16), "b4": raw["fc1_b"].reshape(1, 512),
        "w5": w5.astype(bf16), "b5": b5.reshape(1, 128),
    }


# ----------------------------------------------------------------------------
# Forward pass.
# ----------------------------------------------------------------------------
def _preprocess(x, n_img):
    """(B, C, 84, 84) f32 -> (Bp*4, 110, 64C) bf16 parity-split conv1 im2col.

    Space-to-depth(4) turns conv1 into a 2x2/stride-1 conv on a 21x21 grid.
    For each conv1-output parity plane (pa, pb) we concatenate the 4 taps of
    that 2x2 window along K (im2col) and lay rows out full-width (width 11,
    last column zero-padded garbage).
    """
    B, C, H, W = x.shape
    xs = (x.reshape(B, C, 21, 4, 21, 4)
          .transpose(0, 2, 4, 3, 5, 1)          # (B, 21, 21, 4, 4, C)
          .reshape(B, 21, 21, 16 * C)
          .astype(jnp.bfloat16))
    planes = []
    for pa in (0, 1):
        for pb in (0, 1):
            taps = [xs[:, pa + bi:pa + bi + 20:2, pb + bj:pb + bj + 20:2, :]
                    for bi in (0, 1) for bj in (0, 1)]       # 4 x (B,10,10,16C)
            t = jnp.concatenate(taps, axis=-1)               # (B, 10, 10, 64C)
            t = jnp.pad(t, ((0, 0), (0, 0), (0, 1), (0, 0)))  # width 10 -> 11
            planes.append(t.reshape(B, 110, 64 * C))
    xin = jnp.stack(planes, axis=1)                           # (B, 4, 110, 64C)
    Bp = _round_up(B, n_img)
    if Bp != B:
        xin = jnp.pad(xin, ((0, Bp - B), (0, 0), (0, 0), (0, 0)))
    return xin.reshape(Bp * 4, 110, 64 * C), Bp


def ddqnet_forward(params, x, model, out_dim):
    """x: (B, C, 84, 84) f32, model in {'online', 'target'} (static)."""
    p = params[model]
    B = x.shape[0]
    # <=16 images per grid step keeps VMEM well under default scoped limits on
    # every generation; >=2 grid steps whenever B>=2 so v7x uses both cores.
    n_img = max(1, min(16, B // 2))
    xin, Bp = _preprocess(x, n_img)
    a3 = conv_stack(p, xin, n_img=n_img)          # (Bp, 49, 64) bf16
    h = a3.reshape(Bp, 49 * 64)                   # free row-major reshape
    q = fc_head(p, h, out_dim=out_dim)            # (Bp, out_dim) f32
    return q[:B]


# ----------------------------------------------------------------------------
# Pure-JAX f32 reference (PyTorch semantics) for a correctness check.
# ----------------------------------------------------------------------------
def _ref_forward(p, x):
    def conv(x, w, b, s):
        y = jax.lax.conv_general_dilated(
            x, w, (s, s), "VALID",
            dimension_numbers=("NCHW", "OIHW", "NCHW"))
        return y + b[None, :, None, None]

    y = jnp.maximum(conv(x, p["conv1_w"], p["conv1_b"], 4), 0.0)
    y = jnp.maximum(conv(y, p["conv2_w"], p["conv2_b"], 2), 0.0)
    y = jnp.maximum(conv(y, p["conv3_w"], p["conv3_b"], 1), 0.0)
    y = y.reshape(y.shape[0], -1)                 # NCHW flatten
    y = jnp.maximum(y @ p["fc1_w"].T + p["fc1_b"], 0.0)
    return y @ p["fc2_w"].T + p["fc2_b"]


if __name__ == "__main__":
    # The module requires 84x84 spatial input; small batch / 4-frame stack.
    C, H, W = 4, 84, 84
    OUTPUT_DIM = 6

    key = jax.random.PRNGKey(0)
    k_params, k_x1, k_x2 = jax.random.split(key, 3)

    raw_params = init_ddqnet_params(k_params, (C, H, W), OUTPUT_DIM)
    params = {m: prepare_params(raw_params[m]) for m in ("online", "target")}
    fwd = jax.jit(ddqnet_forward, static_argnames=("model", "out_dim"))

    # B=2: one image per step, two parallel grid steps.
    x1 = jax.random.uniform(k_x1, (2, C, H, W), jnp.float32)
    q_online = fwd(params, x1, model="online", out_dim=OUTPUT_DIM)
    q_target = fwd(params, x1, model="target", out_dim=OUTPUT_DIM)
    jax.block_until_ready((q_online, q_target))
    assert q_online.shape == (2, OUTPUT_DIM)
    assert q_target.shape == (2, OUTPUT_DIM)
    assert bool(jnp.all(jnp.isfinite(q_online)))
    # target params are a copy of online -> identical outputs.
    assert bool(jnp.allclose(q_online, q_target, atol=1e-6))
    q_ref = _ref_forward(raw_params["online"], x1)
    err1 = float(jnp.max(jnp.abs(q_online - q_ref)))
    assert err1 < 2e-2, f"mismatch vs reference (B=2): {err1}"

    # B=5: exercises the in-kernel image loop (n_img=2) and batch padding.
    x2 = jax.random.uniform(k_x2, (5, C, H, W), jnp.float32)
    q2 = fwd(params, x2, model="online", out_dim=OUTPUT_DIM)
    jax.block_until_ready(q2)
    assert q2.shape == (5, OUTPUT_DIM)
    q2_ref = _ref_forward(raw_params["online"], x2)
    err2 = float(jnp.max(jnp.abs(q2 - q2_ref)))
    assert err2 < 2e-2, f"mismatch vs reference (B=5): {err2}"

    print("KERNEL_OK")
</pallas_src>

<mosaic_0001>
module attributes {stable_mosaic.version = 11 : i64} {
  func.func @_conv_stack_kernel(%arg0: i32, %arg1: memref<4x110x256xbf16, #tpu.memory_space<vmem>>, %arg2: memref<256x32xbf16, #tpu.memory_space<vmem>>, %arg3: memref<1x32xf32, #tpu.memory_space<vmem>>, %arg4: memref<512x64xbf16, #tpu.memory_space<vmem>>, %arg5: memref<1x64xf32, #tpu.memory_space<vmem>>, %arg6: memref<576x64xbf16, #tpu.memory_space<vmem>>, %arg7: memref<1x64xf32, #tpu.memory_space<vmem>>, %arg8: memref<1x49x64xbf16, #tpu.memory_space<vmem>>, %arg9: memref<4x110x32xbf16, #tpu.memory_space<vmem>>, %arg10: memref<97x64xbf16, #tpu.memory_space<vmem>>, %arg11: memref<73x64xbf16, #tpu.memory_space<vmem>>) attributes {dimension_semantics = [#tpu.dimension_semantics<parallel>], iteration_bounds = array<i64: 2>, scalar_prefetch = 0 : i64, scratch_operands = 3 : i64, tpu.core_type = #tpu.core_type<tc>, window_params = [{transform_indices = @transform_0, window_bounds = array<i64: 4, 110, 256>}, {pipeline_mode = #tpu.pipeline_mode<synchronous>, transform_indices = @transform_1, window_bounds = array<i64: 256, 32>}, {pipeline_mode = #tpu.pipeline_mode<synchronous>, transform_indices = @transform_2, window_bounds = array<i64: 1, 32>}, {pipeline_mode = #tpu.pipeline_mode<synchronous>, transform_indices = @transform_3, window_bounds = array<i64: 512, 64>}, {pipeline_mode = #tpu.pipeline_mode<synchronous>, transform_indices = @transform_4, window_bounds = array<i64: 1, 64>}, {pipeline_mode = #tpu.pipeline_mode<synchronous>, transform_indices = @transform_5, window_bounds = array<i64: 576, 64>}, {pipeline_mode = #tpu.pipeline_mode<synchronous>, transform_indices = @transform_6, window_bounds = array<i64: 1, 64>}, {transform_indices = @transform_7, window_bounds = array<i64: 1, 49, 64>}]} {
    %c0_i32 = arith.constant 0 : i32
    %c1_i32 = arith.constant 1 : i32
    %0 = arith.muli %c0_i32, %c1_i32 : i32
    %c0_i32_0 = arith.constant 0 : i32
    %1 = arith.addi %c0_i32_0, %0 : i32
    %c4_i32 = arith.constant 4 : i32
    %2 = arith.muli %c4_i32, %1 : i32
    %c0_i32_1 = arith.constant 0 : i32
    %3 = arith.addi %2, %c0_i32_1 : i32
    %4 = arith.index_cast %3 : i32 to index
    %c0 = arith.constant 0 : index
    %c0_2 = arith.constant 0 : index
    %5 = vector.load %arg1[%4, %c0, %c0_2] : memref<4x110x256xbf16, #tpu.memory_space<vmem>>, vector<1x110x256xbf16>
    %6 = vector.shape_cast %5 : vector<1x110x256xbf16> to vector<110x256xbf16>
    %c0_3 = arith.constant 0 : index
    %c0_4 = arith.constant 0 : index
    %7 = vector.load %arg2[%c0_3, %c0_4] : memref<256x32xbf16, #tpu.memory_space<vmem>>, vector<256x32xbf16>
    %cst = arith.constant dense<0.000000e+00> : vector<110x32xf32>
    %8 = tpu.matmul %6, %7, %cst {dimension_numbers = #tpu.dot_dimension_numbers<[1], [0], [0], [1], [0, 0, 1, 1], [], []>} : vector<110x256xbf16>, vector<256x32xbf16>, vector<110x32xf32> -> vector<110x32xf32>
    %c0_5 = arith.constant 0 : index
    %c0_6 = arith.constant 0 : index
    %9 = vector.load %arg3[%c0_5, %c0_6] : memref<1x32xf32, #tpu.memory_space<vmem>>, vector<1x32xf32>
    %10 = vector.broadcast %9 : vector<1x32xf32> to vector<110x32xf32>
    %11 = arith.addf %8, %10 : vector<110x32xf32>
    %cst_7 = arith.constant 0.000000e+00 : f32
    %12 = vector.broadcast %cst_7 : f32 to vector<110x32xf32>
    %13 = arith.maximumf %11, %12 : vector<110x32xf32>
    %14 = arith.truncf %13 : vector<110x32xf32> to vector<110x32xbf16>
    %c0_8 = arith.constant 0 : index
    %c0_9 = arith.constant 0 : index
    %c0_10 = arith.constant 0 : index
    %15 = vector.load %arg9[%c0_8, %c0_9, %c0_10] : memref<4x110x32xbf16, #tpu.memory_space<vmem>>, vector<1x110x32xbf16>
    %16 = vector.shape_cast %15 : vector<1x110x32xbf16> to vector<110x32xbf16>
    %17 = vector.shape_cast %14 : vector<110x32xbf16> to vector<1x110x32xbf16>
    tpu.vector_store %arg9[%c0_8, %c0_9, %c0_10], %17 {strides = array<i32>} : memref<4x110x32xbf16, #tpu.memory_space<vmem>>, vector<1x110x32xbf16>,
    %c4_i32_11 = arith.constant 4 : i32
    %18 = arith.muli %c4_i32_11, %1 : i32
    %c1_i32_12 = arith.constant 1 : i32
    %19 = arith.addi %18, %c1_i32_12 : i32
    %20 = arith.index_cast %19 : i32 to index
    %c0_13 = arith.constant 0 : index
    %c0_14 = arith.constant 0 : index
    %21 = vector.load %arg1[%20, %c0_13, %c0_14] : memref<4x110x256xbf16, #tpu.memory_space<vmem>>, vector<1x110x256xbf16>
    %22 = vector.shape_cast %21 : vector<1x110x256xbf16> to vector<110x256xbf16>
    %c0_15 = arith.constant 0 : index
    %c0_16 = arith.constant 0 : index
    %23 = vector.load %arg2[%c0_15, %c0_16] : memref<256x32xbf16, #tpu.memory_space<vmem>>, vector<256x32xbf16>
    %cst_17 = arith.constant dense<0.000000e+00> : vector<110x32xf32>
    %24 = tpu.matmul %22, %23, %cst_17 {dimension_numbers = #tpu.dot_dimension_numbers<[1], [0], [0], [1], [0, 0, 1, 1], [], []>} : vector<110x256xbf16>, vector<256x32xbf16>, vector<110x32xf32> -> vector<110x32xf32>
    %c0_18 = arith.constant 0 : index
    %c0_19 = arith.constant 0 : index
    %25 = vector.load %arg3[%c0_18, %c0_19] : memref<1x32xf32, #tpu.memory_space<vmem>>, vector<1x32xf32>
    %26 = vector.broadcast %25 : vector<1x32xf32> to vector<110x32xf32>
    %27 = arith.addf %24, %26 : vector<110x32xf32>
    %cst_20 = arith.constant 0.000000e+00 : f32
    %28 = vector.broadcast %cst_20 : f32 to vector<110x32xf32>
    %29 = arith.maximumf %27, %28 : vector<110x32xf32>
    %30 = arith.truncf %29 : vector<110x32xf32> to vector<110x32xbf16>
    %c1 = arith.constant 1 : index
    %c0_21 = arith.constant 0 : index
    %c0_22 = arith.constant 0 : index
    %31 = vector.load %arg9[%c1, %c0_21, %c0_22] : memref<4x110x32xbf16, #tpu.memory_space<vmem>>, vector<1x110x32xbf16>
    %32 = vector.shape_cast %31 : vector<1x110x32xbf16> to vector<110x32xbf16>
    %33 = vector.shape_cast %30 : vector<110x32xbf16> to vector<1x110x32xbf16>
    tpu.vector_store %arg9[%c1, %c0_21, %c0_22], %33 {strides = array<i32>} : memref<4x110x32xbf16, #tpu.memory_space<vmem>>, vector<1x110x32xbf16>,
    %c4_i32_23 = arith.constant 4 : i32
    %34 = arith.muli %c4_i32_23, %1 : i32
    %c2_i32 = arith.constant 2 : i32
    %35 = arith.addi %34, %c2_i32 : i32
    %36 = arith.index_cast %35 : i32 to index
    %c0_24 = arith.constant 0 : index
    %c0_25 = arith.constant 0 : index
    %37 = vector.load %arg1[%36, %c0_24, %c0_25] : memref<4x110x256xbf16, #tpu.memory_space<vmem>>, vector<1x110x256xbf16>
    %38 = vector.shape_cast %37 : vector<1x110x256xbf16> to vector<110x256xbf16>
    %c0_26 = arith.constant 0 : index
    %c0_27 = arith.constant 0 : index
    %39 = vector.load %arg2[%c0_26, %c0_27] : memref<256x32xbf16, #tpu.memory_space<vmem>>, vector<256x32xbf16>
    %cst_28 = arith.constant dense<0.000000e+00> : vector<110x32xf32>
    %40 = tpu.matmul %38, %39, %cst_28 {dimension_numbers = #tpu.dot_dimension_numbers<[1], [0], [0], [1], [0, 0, 1, 1], [], []>} : vector<110x256xbf16>, vector<256x32xbf16>, vector<110x32xf32> -> vector<110x32xf32>
    %c0_29 = arith.constant 0 : index
    %c0_30 = arith.constant 0 : index
    %41 = vector.load %arg3[%c0_29, %c0_30] : memref<1x32xf32, #tpu.memory_space<vmem>>, vector<1x32xf32>
    %42 = vector.broadcast %41 : vector<1x32xf32> to vector<110x32xf32>
    %43 = arith.addf %40, %42 : vector<110x32xf32>
    %cst_31 = arith.constant 0.000000e+00 : f32
    %44 = vector.broadcast %cst_31 : f32 to vector<110x32xf32>
    %45 = arith.maximumf %43, %44 : vector<110x32xf32>
    %46 = arith.truncf %45 : vector<110x32xf32> to vector<110x32xbf16>
    %c2 = arith.constant 2 : index
    %c0_32 = arith.constant 0 : index
    %c0_33 = arith.constant 0 : index
    %47 = vector.load %arg9[%c2, %c0_32, %c0_33] : memref<4x110x32xbf16, #tpu.memory_space<vmem>>, vector<1x110x32xbf16>
    %48 = vector.shape_cast %47 : vector<1x110x32xbf16> to vector<110x32xbf16>
    %49 = vector.shape_cast %46 : vector<110x32xbf16> to vector<1x110x32xbf16>
    tpu.vector_store %arg9[%c2, %c0_32, %c0_33], %49 {strides = array<i32>} : memref<4x110x32xbf16, #tpu.memory_space<vmem>>, vector<1x110x32xbf16>,
    %c4_i32_34 = arith.constant 4 : i32
    %50 = arith.muli %c4_i32_34, %1 : i32
    %c3_i32 = arith.constant 3 : i32
    %51 = arith.addi %50, %c3_i32 : i32
    %52 = arith.index_cast %51 : i32 to index
    %c0_35 = arith.constant 0 : index
    %c0_36 = arith.constant 0 : index
    %53 = vector.load %arg1[%52, %c0_35, %c0_36] : memref<4x110x256xbf16, #tpu.memory_space<vmem>>, vector<1x110x256xbf16>
    %54 = vector.shape_cast %53 : vector<1x110x256xbf16> to vector<110x256xbf16>
    %c0_37 = arith.constant 0 : index
    %c0_38 = arith.constant 0 : index
    %55 = vector.load %arg2[%c0_37, %c0_38] : memref<256x32xbf16, #tpu.memory_space<vmem>>, vector<256x32xbf16>
    %cst_39 = arith.constant dense<0.000000e+00> : vector<110x32xf32>
    %56 = tpu.matmul %54, %55, %cst_39 {dimension_numbers = #tpu.dot_dimension_numbers<[1], [0], [0], [1], [0, 0, 1, 1], [], []>} : vector<110x256xbf16>, vector<256x32xbf16>, vector<110x32xf32> -> vector<110x32xf32>
    %c0_40 = arith.constant 0 : index
    %c0_41 = arith.constant 0 : index
    %57 = vector.load %arg3[%c0_40, %c0_41] : memref<1x32xf32, #tpu.memory_space<vmem>>, vector<1x32xf32>
    %58 = vector.broadcast %57 : vector<1x32xf32> to vector<110x32xf32>
    %59 = arith.addf %56, %58 : vector<110x32xf32>
    %cst_42 = arith.constant 0.000000e+00 : f32
    %60 = vector.broadcast %cst_42 : f32 to vector<110x32xf32>
    %61 = arith.maximumf %59, %60 : vector<110x32xf32>
    %62 = arith.truncf %61 : vector<110x32xf32> to vector<110x32xbf16>
    %c3 = arith.constant 3 : index
    %c0_43 = arith.constant 0 : index
    %c0_44 = arith.constant 0 : index
    %63 = vector.load %arg9[%c3, %c0_43, %c0_44] : memref<4x110x32xbf16, #tpu.memory_space<vmem>>, vector<1x110x32xbf16>
    %64 = vector.shape_cast %63 : vector<1x110x32xbf16> to vector<110x32xbf16>
    %65 = vector.shape_cast %62 : vector<110x32xbf16> to vector<1x110x32xbf16>
    tpu.vector_store %arg9[%c3, %c0_43, %c0_44], %65 {strides = array<i32>} : memref<4x110x32xbf16, #tpu.memory_space<vmem>>, vector<1x110x32xbf16>,
    %cst_45 = arith.constant 0.000000e+00 : f32
    %66 = vector.broadcast %cst_45 : f32 to vector<97x64xf32>
    %c0_46 = arith.constant 0 : index
    %c0_47 = arith.constant 0 : index
    %c0_48 = arith.constant 0 : index
    %67 = vector.load %arg9[%c0_46, %c0_47, %c0_48] : memref<4x110x32xbf16, #tpu.memory_space<vmem>>, vector<1x97x32xbf16>
    %68 = vector.shape_cast %67 : vector<1x97x32xbf16> to vector<97x32xbf16>
    %c0_49 = arith.constant 0 : index
    %c0_50 = arith.constant 0 : index
    %69 = vector.load %arg4[%c0_49, %c0_50] : memref<512x64xbf16, #tpu.memory_space<vmem>>, vector<32x64xbf16>
    %cst_51 = arith.constant dense<0.000000e+00> : vector<97x64xf32>
    %70 = tpu.matmul %68, %69, %cst_51 {dimension_numbers = #tpu.dot_dimension_numbers<[1], [0], [0], [1], [0, 0, 1, 1], [], []>} : vector<97x32xbf16>, vector<32x64xbf16>, vector<97x64xf32> -> vector<97x64xf32>
    %71 = arith.addf %66, %70 : vector<97x64xf32>
    %c1_52 = arith.constant 1 : index
    %c0_53 = arith.constant 0 : index
    %c0_54 = arith.constant 0 : index
    %72 = vector.load %arg9[%c1_52, %c0_53, %c0_54] : memref<4x110x32xbf16, #tpu.memory_space<vmem>>, vector<1x97x32xbf16>
    %73 = vector.shape_cast %72 : vector<1x97x32xbf16> to vector<97x32xbf16>
    %c32 = arith.constant 32 : index
    %c0_55 = arith.constant 0 : index
    %74 = vector.load %arg4[%c32, %c0_55] : memref<512x64xbf16, #tpu.memory_space<vmem>>, vector<32x64xbf16>
    %cst_56 = arith.constant dense<0.000000e+00> : vector<97x64xf32>
    %75 = tpu.matmul %73, %74, %cst_56 {dimension_numbers = #tpu.dot_dimension_numbers<[1], [0], [0], [1], [0, 0, 1, 1], [], []>} : vector<97x32xbf16>, vector<32x64xbf16>, vector<97x64xf32> -> vector<97x64xf32>
    %76 = arith.addf %71, %75 : vector<97x64xf32>
    %c0_57 = arith.constant 0 : index
    %c1_58 = arith.constant 1 : index
    %c0_59 = arith.constant 0 : index
    %77 = vector.load %arg9[%c0_57, %c1_58, %c0_59] : memref<4x110x32xbf16, #tpu.memory_space<vmem>>, vector<1x97x32xbf16>
    %78 = vector.shape_cast %77 : vector<1x97x32xbf16> to vector<97x32xbf16>
    %c64 = arith.constant 64 : index
    %c0_60 = arith.constant 0 : index
    %79 = vector.load %arg4[%c64, %c0_60] : memref<512x64xbf16, #tpu.memory_space<vmem>>, vector<32x64xbf16>
    %cst_61 = arith.constant dense<0.000000e+00> : vector<97x64xf32>
    %80 = tpu.matmul %78, %79, %cst_61 {dimension_numbers = #tpu.dot_dimension_numbers<[1], [0], [0], [1], [0, 0, 1, 1], [], []>} : vector<97x32xbf16>, vector<32x64xbf16>, vector<97x64xf32> -> vector<97x64xf32>
    %81 = arith.addf %76, %80 : vector<97x64xf32>
    %c1_62 = arith.constant 1 : index
    %c1_63 = arith.constant 1 : index
    %c0_64 = arith.constant 0 : index
    %82 = vector.load %arg9[%c1_62, %c1_63, %c0_64] : memref<4x110x32xbf16, #tpu.memory_space<vmem>>, vector<1x97x32xbf16>
    %83 = vector.shape_cast %82 : vector<1x97x32xbf16> to vector<97x32xbf16>
    %c96 = arith.constant 96 : index
    %c0_65 = arith.constant 0 : index
    %84 = vector.load %arg4[%c96, %c0_65] : memref<512x64xbf16, #tpu.memory_space<vmem>>, vector<32x64xbf16>
    %cst_66 = arith.constant dense<0.000000e+00> : vector<97x64xf32>
    %85 = tpu.matmul %83, %84, %cst_66 {dimension_numbers = #tpu.dot_dimension_numbers<[1], [0], [0], [1], [0, 0, 1, 1], [], []>} : vector<97x32xbf16>, vector<32x64xbf16>, vector<97x64xf32> -> vector<97x64xf32>
    %86 = arith.addf %81, %85 : vector<97x64xf32>
    %c2_67 = arith.constant 2 : index
    %c0_68 = arith.constant 0 : index
    %c0_69 = arith.constant 0 : index
    %87 = vector.load %arg9[%c2_67, %c0_68, %c0_69] : memref<4x110x32xbf16, #tpu.memory_space<vmem>>, vector<1x97x32xbf16>
    %88 = vector.shape_cast %87 : vector<1x97x32xbf16> to vector<97x32xbf16>
    %c128 = arith.constant 128 : index
    %c0_70 = arith.constant 0 : index
    %89 = vector.load %arg4[%c128, %c0_70] : memref<512x64xbf16, #tpu.memory_space<vmem>>, vector<32x64xbf16>
    %cst_71 = arith.constant dense<0.000000e+00> : vector<97x64xf32>
    %90 = tpu.matmul %88, %89, %cst_71 {dimension_numbers = #tpu.dot_dimension_numbers<[1], [0], [0], [1], [0, 0, 1, 1], [], []>} : vector<97x32xbf16>, vector<32x64xbf16>, vector<97x64xf32> -> vector<97x64xf32>
    %91 = arith.addf %86, %90 : vector<97x64xf32>
    %c3_72 = arith.constant 3 : index
    %c0_73 = arith.constant 0 : index
    %c0_74 = arith.constant 0 : index
    %92 = vector.load %arg9[%c3_72, %c0_73, %c0_74] : memref<4x110x32xbf16, #tpu.memory_space<vmem>>, vector<1x97x32xbf16>
    %93 = vector.shape_cast %92 : vector<1x97x32xbf16> to vector<97x32xbf16>
    %c160 = arith.constant 160 : index
    %c0_75 = arith.constant 0 : index
    %94 = vector.load %arg4[%c160, %c0_75] : memref<512x64xbf16, #tpu.memory_space<vmem>>, vector<32x64xbf16>
    %cst_76 = arith.constant dense<0.000000e+00> : vector<97x64xf32>
    %95 = tpu.matmul %93, %94, %cst_76 {dimension_numbers = #tpu.dot_dimension_numbers<[1], [0], [0], [1], [0, 0, 1, 1], [], []>} : vector<97x32xbf16>, vector<32x64xbf16>, vector<97x64xf32> -> vector<97x64xf32>
    %96 = arith.addf %91, %95 : vector<97x64xf32>
    %c2_77 = arith.constant 2 : index
    %c1_78 = arith.constant 1 : index
    %c0_79 = arith.constant 0 : index
    %97 = vector.load %arg9[%c2_77, %c1_78, %c0_79] : memref<4x110x32xbf16, #tpu.memory_space<vmem>>, vector<1x97x32xbf16>
    %98 = vector.shape_cast %97 : vector<1x97x32xbf16> to vector<97x32xbf16>
    %c192 = arith.constant 192 : index
    %c0_80 = arith.constant 0 : index
    %99 = vector.load %arg4[%c192, %c0_80] : memref<512x64xbf16, #tpu.memory_space<vmem>>, vector<32x64xbf16>
    %cst_81 = arith.constant dense<0.000000e+00> : vector<97x64xf32>
    %100 = tpu.matmul %98, %99, %cst_81 {dimension_numbers = #tpu.dot_dimension_numbers<[1], [0], [0], [1], [0, 0, 1, 1], [], []>} : vector<97x32xbf16>, vector<32x64xbf16>, vector<97x64xf32> -> vector<97x64xf32>
    %101 = arith.addf %96, %100 : vector<97x64xf32>
    %c3_82 = arith.constant 3 : index
    %c1_83 = arith.constant 1 : index
    %c0_84 = arith.constant 0 : index
    %102 = vector.load %arg9[%c3_82, %c1_83, %c0_84] : memref<4x110x32xbf16, #tpu.memory_space<vmem>>, vector<1x97x32xbf16>
    %103 = vector.shape_cast %102 : vector<1x97x32xbf16> to vector<97x32xbf16>
    %c224 = arith.constant 224 : index
    %c0_85 = arith.constant 0 : index
    %104 = vector.load %arg4[%c224, %c0_85] : memref<512x64xbf16, #tpu.memory_space<vmem>>, vector<32x64xbf16>
    %cst_86 = arith.constant dense<0.000000e+00> : vector<97x64xf32>
    %105 = tpu.matmul %103, %104, %cst_86 {dimension_numbers = #tpu.dot_dimension_numbers<[1], [0], [0], [1], [0, 0, 1, 1], [], []>} : vector<97x32xbf16>, vector<32x64xbf16>, vector<97x64xf32> -> vector<97x64xf32>
    %106 = arith.addf %101, %105 : vector<97x64xf32>
    %c0_87 = arith.constant 0 : index
    %c11 = arith.constant 11 : index
    %c0_88 = arith.constant 0 : index
    %107 = vector.load %arg9[%c0_87, %c11, %c0_88] : memref<4x110x32xbf16, #tpu.memory_space<vmem>>, vector<1x97x32xbf16>
    %108 = vector.shape_cast %107 : vector<1x97x32xbf16> to vector<97x32xbf16>
    %c256 = arith.constant 256 : index
    %c0_89 = arith.constant 0 : index
    %109 = vector.load %arg4[%c256, %c0_89] : memref<512x64xbf16, #tpu.memory_space<vmem>>, vector<32x64xbf16>
    %cst_90 = arith.constant dense<0.000000e+00> : vector<97x64xf32>
    %110 = tpu.matmul %108, %109, %cst_90 {dimension_numbers = #tpu.dot_dimension_numbers<[1], [0], [0], [1], [0, 0, 1, 1], [], []>} : vector<97x32xbf16>, vector<32x64xbf16>, vector<97x64xf32> -> vector<97x64xf32>
    %111 = arith.addf %106, %110 : vector<97x64xf32>
    %c1_91 = arith.constant 1 : index
    %c11_92 = arith.constant 11 : index
    %c0_93 = arith.constant 0 : index
    %112 = vector.load %arg9[%c1_91, %c11_92, %c0_93] : memref<4x110x32xbf16, #tpu.memory_space<vmem>>, vector<1x97x32xbf16>
    %113 = vector.shape_cast %112 : vector<1x97x32xbf16> to vector<97x32xbf16>
    %c288 = arith.constant 288 : index
    %c0_94 = arith.constant 0 : index
    %114 = vector.load %arg4[%c288, %c0_94] : memref<512x64xbf16, #tpu.memory_space<vmem>>, vector<32x64xbf16>
    %cst_95 = arith.constant dense<0.000000e+00> : vector<97x64xf32>
    %115 = tpu.matmul %113, %114, %cst_95 {dimension_numbers = #tpu.dot_dimension_numbers<[1], [0], [0], [1], [0, 0, 1, 1], [], []>} : vector<97x32xbf16>, vector<32x64xbf16>, vector<97x64xf32> -> vector<97x64xf32>
    %116 = arith.addf %111, %115 : vector<97x64xf32>
    %c0_96 = arith.constant 0 : index
    %c12 = arith.constant 12 : index
    %c0_97 = arith.constant 0 : index
    %117 = vector.load %arg9[%c0_96, %c12, %c0_97] : memref<4x110x32xbf16, #tpu.memory_space<vmem>>, vector<1x97x32xbf16>
    %118 = vector.shape_cast %117 : vector<1x97x32xbf16> to vector<97x32xbf16>
    %c320 = arith.constant 320 : index
    %c0_98 = arith.constant 0 : index
    %119 = vector.load %arg4[%c320, %c0_98] : memref<512x64xbf16, #tpu.memory_space<vmem>>, vector<32x64xbf16>
    %cst_99 = arith.constant dense<0.000000e+00> : vector<97x64xf32>
    %120 = tpu.matmul %118, %119, %cst_99 {dimension_numbers = #tpu.dot_dimension_numbers<[1], [0], [0], [1], [0, 0, 1, 1], [], []>} : vector<97x32xbf16>, vector<32x64xbf16>, vector<97x64xf32> -> vector<97x64xf32>
    %121 = arith.addf %116, %120 : vector<97x64xf32>
    %c1_100 = arith.constant 1 : index
    %c12_101 = arith.constant 12 : index
    %c0_102 = arith.constant 0 : index
    %122 = vector.load %arg9[%c1_100, %c12_101, %c0_102] : memref<4x110x32xbf16, #tpu.memory_space<vmem>>, vector<1x97x32xbf16>
    %123 = vector.shape_cast %122 : vector<1x97x32xbf16> to vector<97x32xbf16>
    %c352 = arith.constant 352 : index
    %c0_103 = arith.constant 0 : index
    %124 = vector.load %arg4[%c352, %c0_103] : memref<512x64xbf16, #tpu.memory_space<vmem>>, vector<32x64xbf16>
    %cst_104 = arith.constant dense<0.000000e+00> : vector<97x64xf32>
    %125 = tpu.matmul %123, %124, %cst_104 {dimension_numbers = #tpu.dot_dimension_numbers<[1], [0], [0], [1], [0, 0, 1, 1], [], []>} : vector<97x32xbf16>, vector<32x64xbf16>, vector<97x64xf32> -> vector<97x64xf32>
    %126 = arith.addf %121, %125 : vector<97x64xf32>
    %c2_105 = arith.constant 2 : index
    %c11_106 = arith.constant 11 : index
    %c0_107 = arith.constant 0 : index
    %127 = vector.load %arg9[%c2_105, %c11_106, %c0_107] : memref<4x110x32xbf16, #tpu.memory_space<vmem>>, vector<1x97x32xbf16>
    %128 = vector.shape_cast %127 : vector<1x97x32xbf16> to vector<97x32xbf16>
    %c384 = arith.constant 384 : index
    %c0_108 = arith.constant 0 : index
    %129 = vector.load %arg4[%c384, %c0_108] : memref<512x64xbf16, #tpu.memory_space<vmem>>, vector<32x64xbf16>
    %cst_109 = arith.constant dense<0.000000e+00> : vector<97x64xf32>
    %130 = tpu.matmul %128, %129, %cst_109 {dimension_numbers = #tpu.dot_dimension_numbers<[1], [0], [0], [1], [0, 0, 1, 1], [], []>} : vector<97x32xbf16>, vector<32x64xbf16>, vector<97x64xf32> -> vector<97x64xf32>
    %131 = arith.addf %126, %130 : vector<97x64xf32>
    %c3_110 = arith.constant 3 : index
    %c11_111 = arith.constant 11 : index
    %c0_112 = arith.constant 0 : index
    %132 = vector.load %arg9[%c3_110, %c11_111, %c0_112] : memref<4x110x32xbf16, #tpu.memory_space<vmem>>, vector<1x97x32xbf16>
    %133 = vector.shape_cast %132 : vector<1x97x32xbf16> to vector<97x32xbf16>
    %c416 = arith.constant 416 : index
    %c0_113 = arith.constant 0 : index
    %134 = vector.load %arg4[%c416, %c0_113] : memref<512x64xbf16, #tpu.memory_space<vmem>>, vector<32x64xbf16>
    %cst_114 = arith.constant dense<0.000000e+00> : vector<97x64xf32>
    %135 = tpu.matmul %133, %134, %cst_114 {dimension_numbers = #tpu.dot_dimension_numbers<[1], [0], [0], [1], [0, 0, 1, 1], [], []>} : vector<97x32xbf16>, vector<32x64xbf16>, vector<97x64xf32> -> vector<97x64xf32>
    %136 = arith.addf %131, %135 : vector<97x64xf32>
    %c2_115 = arith.constant 2 : index
    %c12_116 = arith.constant 12 : index
    %c0_117 = arith.constant 0 : index
    %137 = vector.load %arg9[%c2_115, %c12_116, %c0_117] : memref<4x110x32xbf16, #tpu.memory_space<vmem>>, vector<1x97x32xbf16>
    %138 = vector.shape_cast %137 : vector<1x97x32xbf16> to vector<97x32xbf16>
    %c448 = arith.constant 448 : index
    %c0_118 = arith.constant 0 : index
    %139 = vector.load %arg4[%c448, %c0_118] : memref<512x64xbf16, #tpu.memory_space<vmem>>, vector<32x64xbf16>
    %cst_119 = arith.constant dense<0.000000e+00> : vector<97x64xf32>
    %140 = tpu.matmul %138, %139, %cst_119 {dimension_numbers = #tpu.dot_dimension_numbers<[1], [0], [0], [1], [0, 0, 1, 1], [], []>} : vector<97x32xbf16>, vector<32x64xbf16>, vector<97x64xf32> -> vector<97x64xf32>
    %141 = arith.addf %136, %140 : vector<97x64xf32>
    %c3_120 = arith.constant 3 : index
    %c12_121 = arith.constant 12 : index
    %c0_122 = arith.constant 0 : index
    %142 = vector.load %arg9[%c3_120, %c12_121, %c0_122] : memref<4x110x32xbf16, #tpu.memory_space<vmem>>, vector<1x97x32xbf16>
    %143 = vector.shape_cast %142 : vector<1x97x32xbf16> to vector<97x32xbf16>
    %c480 = arith.constant 480 : index
    %c0_123 = arith.constant 0 : index
    %144 = vector.load %arg4[%c480, %c0_123] : memref<512x64xbf16, #tpu.memory_space<vmem>>, vector<32x64xbf16>
    %cst_124 = arith.constant dense<0.000000e+00> : vector<97x64xf32>
    %145 = tpu.matmul %143, %144, %cst_124 {dimension_numbers = #tpu.dot_dimension_numbers<[1], [0], [0], [1], [0, 0, 1, 1], [], []>} : vector<97x32xbf16>, vector<32x64xbf16>, vector<97x64xf32> -> vector<97x64xf32>
    %146 = arith.addf %141, %145 : vector<97x64xf32>
    %c0_125 = arith.constant 0 : index
    %c0_126 = arith.constant 0 : index
    %147 = vector.load %arg5[%c0_125, %c0_126] : memref<1x64xf32, #tpu.memory_space<vmem>>, vector<1x64xf32>
    %148 = vector.broadcast %147 : vector<1x64xf32> to vector<97x64xf32>
    %149 = arith.addf %146, %148 : vector<97x64xf32>
    %cst_127 = arith.constant 0.000000e+00 : f32
    %150 = vector.broadcast %cst_127 : f32 to vector<97x64xf32>
    %151 = arith.maximumf %149, %150 : vector<97x64xf32>
    %152 = arith.truncf %151 : vector<97x64xf32> to vector<97x64xbf16>
    %c0_128 = arith.constant 0 : index
    %c0_129 = arith.constant 0 : index
    %153 = vector.load %arg10[%c0_128, %c0_129] : memref<97x64xbf16, #tpu.memory_space<vmem>>, vector<97x64xbf16>
    tpu.vector_store %arg10[%c0_128, %c0_129], %152 {strides = array<i32>} : memref<97x64xbf16, #tpu.memory_space<vmem>>, vector<97x64xbf16>,
    %cst_130 = arith.constant 0.000000e+00 : f32
    %154 = vector.broadcast %cst_130 : f32 to vector<73x64xf32>
    %c0_131 = arith.constant 0 : index
    %c0_132 = arith.constant 0 : index
    %155 = vector.load %arg10[%c0_131, %c0_132] : memref<97x64xbf16, #tpu.memory_space<vmem>>, vector<73x64xbf16>
    %c0_133 = arith.constant 0 : index
    %c0_134 = arith.constant 0 : index
    %156 = vector.load %arg6[%c0_133, %c0_134] : memref<576x64xbf16, #tpu.memory_space<vmem>>, vector<64x64xbf16>
    %cst_135 = arith.constant dense<0.000000e+00> : vector<73x64xf32>
    %157 = tpu.matmul %155, %156, %cst_135 {dimension_numbers = #tpu.dot_dimension_numbers<[1], [0], [0], [1], [0, 0, 1, 1], [], []>} : vector<73x64xbf16>, vector<64x64xbf16>, vector<73x64xf32> -> vector<73x64xf32>
    %158 = arith.addf %154, %157 : vector<73x64xf32>
    %c1_136 = arith.constant 1 : index
    %c0_137 = arith.constant 0 : index
    %159 = vector.load %arg10[%c1_136, %c0_137] : memref<97x64xbf16, #tpu.memory_space<vmem>>, vector<73x64xbf16>
    %c64_138 = arith.constant 64 : index
    %c0_139 = arith.constant 0 : index
    %160 = vector.load %arg6[%c64_138, %c0_139] : memref<576x64xbf16, #tpu.memory_space<vmem>>, vector<64x64xbf16>
    %cst_140 = arith.constant dense<0.000000e+00> : vector<73x64xf32>
    %161 = tpu.matmul %159, %160, %cst_140 {dimension_numbers = #tpu.dot_dimension_numbers<[1], [0], [0], [1], [0, 0, 1, 1], [], []>} : vector<73x64xbf16>, vector<64x64xbf16>, vector<73x64xf32> -> vector<73x64xf32>
    %162 = arith.addf %158, %161 : vector<73x64xf32>
    %c2_141 = arith.constant 2 : index
    %c0_142 = arith.constant 0 : index
    %163 = vector.load %arg10[%c2_141, %c0_142] : memref<97x64xbf16, #tpu.memory_space<vmem>>, vector<73x64xbf16>
    %c128_143 = arith.constant 128 : index
    %c0_144 = arith.constant 0 : index
    %164 = vector.load %arg6[%c128_143, %c0_144] : memref<576x64xbf16, #tpu.memory_space<vmem>>, vector<64x64xbf16>
    %cst_145 = arith.constant dense<0.000000e+00> : vector<73x64xf32>
    %165 = tpu.matmul %163, %164, %cst_145 {dimension_numbers = #tpu.dot_dimension_numbers<[1], [0], [0], [1], [0, 0, 1, 1], [], []>} : vector<73x64xbf16>, vector<64x64xbf16>, vector<73x64xf32> -> vector<73x64xf32>
    %166 = arith.addf %162, %165 : vector<73x64xf32>
    %c11_146 = arith.constant 11 : index
    %c0_147 = arith.constant 0 : index
    %167 = vector.load %arg10[%c11_146, %c0_147] : memref<97x64xbf16, #tpu.memory_space<vmem>>, vector<73x64xbf16>
    %c192_148 = arith.constant 192 : index
    %c0_149 = arith.constant 0 : index
    %168 = vector.load %arg6[%c192_148, %c0_149] : memref<576x64xbf16, #tpu.memory_space<vmem>>, vector<64x64xbf16>
    %cst_150 = arith.constant dense<0.000000e+00> : vector<73x64xf32>
    %169 = tpu.matmul %167, %168, %cst_150 {dimension_numbers = #tpu.dot_dimension_numbers<[1], [0], [0], [1], [0, 0, 1, 1], [], []>} : vector<73x64xbf16>, vector<64x64xbf16>, vector<73x64xf32> -> vector<73x64xf32>
    %170 = arith.addf %166, %169 : vector<73x64xf32>
    %c12_151 = arith.constant 12 : index
    %c0_152 = arith.constant 0 : index
    %171 = vector.load %arg10[%c12_151, %c0_152] : memref<97x64xbf16, #tpu.memory_space<vmem>>, vector<73x64xbf16>
    %c256_153 = arith.constant 256 : index
    %c0_154 = arith.constant 0 : index
    %172 = vector.load %arg6[%c256_153, %c0_154] : memref<576x64xbf16, #tpu.memory_space<vmem>>, vector<64x64xbf16>
    %cst_155 = arith.constant dense<0.000000e+00> : vector<73x64xf32>
    %173 = tpu.matmul %171, %172, %cst_155 {dimension_numbers = #tpu.dot_dimension_numbers<[1], [0], [0], [1], [0, 0, 1, 1], [], []>} : vector<73x64xbf16>, vector<64x64xbf16>, vector<73x64xf32> -> vector<73x64xf32>
    %174 = arith.addf %170, %173 : vector<73x64xf32>
    %c13 = arith.constant 13 : index
    %c0_156 = arith.constant 0 : index
    %175 = vector.load %arg10[%c13, %c0_156] : memref<97x64xbf16, #tpu.memory_space<vmem>>, vector<73x64xbf16>
    %c320_157 = arith.constant 320 : index
    %c0_158 = arith.constant 0 : index
    %176 = vector.load %arg6[%c320_157, %c0_158] : memref<576x64xbf16, #tpu.memory_space<vmem>>, vector<64x64xbf16>
    %cst_159 = arith.constant dense<0.000000e+00> : vector<73x64xf32>
    %177 = tpu.matmul %175, %176, %cst_159 {dimension_numbers = #tpu.dot_dimension_numbers<[1], [0], [0], [1], [0, 0, 1, 1], [], []>} : vector<73x64xbf16>, vector<64x64xbf16>, vector<73x64xf32> -> vector<73x64xf32>
    %178 = arith.addf %174, %177 : vector<73x64xf32>
    %c22 = arith.constant 22 : index
    %c0_160 = arith.constant 0 : index
    %179 = vector.load %arg10[%c22, %c0_160] : memref<97x64xbf16, #tpu.memory_space<vmem>>, vector<73x64xbf16>
    %c384_161 = arith.constant 384 : index
    %c0_162 = arith.constant 0 : index
    %180 = vector.load %arg6[%c384_161, %c0_162] : memref<576x64xbf16, #tpu.memory_space<vmem>>, vector<64x64xbf16>
    %cst_163 = arith.constant dense<0.000000e+00> : vector<73x64xf32>
    %181 = tpu.matmul %179, %180, %cst_163 {dimension_numbers = #tpu.dot_dimension_numbers<[1], [0], [0], [1], [0, 0, 1, 1], [], []>} : vector<73x64xbf16>, vector<64x64xbf16>, vector<73x64xf32> -> vector<73x64xf32>
    %182 = arith.addf %178, %181 : vector<73x64xf32>
    %c23 = arith.constant 23 : index
    %c0_164 = arith.constant 0 : index
    %183 = vector.load %arg10[%c23, %c0_164] : memref<97x64xbf16, #tpu.memory_space<vmem>>, vector<73x64xbf16>
    %c448_165 = arith.constant 448 : index
    %c0_166 = arith.constant 0 : index
    %184 = vector.load %arg6[%c448_165, %c0_166] : memref<576x64xbf16, #tpu.memory_space<vmem>>, vector<64x64xbf16>
    %cst_167 = arith.constant dense<0.000000e+00> : vector<73x64xf32>
    %185 = tpu.matmul %183, %184, %cst_167 {dimension_numbers = #tpu.dot_dimension_numbers<[1], [0], [0], [1], [0, 0, 1, 1], [], []>} : vector<73x64xbf16>, vector<64x64xbf16>, vector<73x64xf32> -> vector<73x64xf32>
    %186 = arith.addf %182, %185 : vector<73x64xf32>
    %c24 = arith.constant 24 : index
    %c0_168 = arith.constant 0 : index
    %187 = vector.load %arg10[%c24, %c0_168] : memref<97x64xbf16, #tpu.memory_space<vmem>>, vector<73x64xbf16>
    %c512 = arith.constant 512 : index
    %c0_169 = arith.constant 0 : index
    %188 = vector.load %arg6[%c512, %c0_169] : memref<576x64xbf16, #tpu.memory_space<vmem>>, vector<64x64xbf16>
    %cst_170 = arith.constant dense<0.000000e+00> : vector<73x64xf32>
    %189 = tpu.matmul %187, %188, %cst_170 {dimension_numbers = #tpu.dot_dimension_numbers<[1], [0], [0], [1], [0, 0, 1, 1], [], []>} : vector<73x64xbf16>, vector<64x64xbf16>, vector<73x64xf32> -> vector<73x64xf32>
    %190 = arith.addf %186, %189 : vector<73x64xf32>
    %c0_171 = arith.constant 0 : index
    %c0_172 = arith.constant 0 : index
    %191 = vector.load %arg7[%c0_171, %c0_172] : memref<1x64xf32, #tpu.memory_space<vmem>>, vector<1x64xf32>
    %192 = vector.broadcast %191 : vector<1x64xf32> to vector<73x64xf32>
    %193 = arith.addf %190, %192 : vector<73x64xf32>
    %cst_173 = arith.constant 0.000000e+00 : f32
    %194 = vector.broadcast %cst_173 : f32 to vector<73x64xf32>
    %195 = arith.maximumf %193, %194 : vector<73x64xf32>
    %196 = arith.truncf %195 : vector<73x64xf32> to vector<73x64xbf16>
    %c0_174 = arith.constant 0 : index
    %c0_175 = arith.constant 0 : index
    %197 = vector.load %arg11[%c0_174, %c0_175] : memref<73x64xbf16, #tpu.memory_space<vmem>>, vector<73x64xbf16>
    tpu.vector_store %arg11[%c0_174, %c0_175], %196 {strides = array<i32>} : memref<73x64xbf16, #tpu.memory_space<vmem>>, vector<73x64xbf16>,
    %c0_176 = arith.constant 0 : index
    %c0_177 = arith.constant 0 : index
    %198 = vector.load %arg11[%c0_176, %c0_177] : memref<73x64xbf16, #tpu.memory_space<vmem>>, vector<7x64xbf16>
    %199 = arith.index_cast %1 : i32 to index
    %c0_178 = arith.constant 0 : index
    %c0_179 = arith.constant 0 : index
    %200 = vector.load %arg8[%199, %c0_178, %c0_179] : memref<1x49x64xbf16, #tpu.memory_space<vmem>>, vector<1x7x64xbf16>
    %201 = vector.shape_cast %200 : vector<1x7x64xbf16> to vector<7x64xbf16>
    %202 = vector.shape_cast %198 : vector<7x64xbf16> to vector<1x7x64xbf16>
    tpu.vector_store %arg8[%199, %c0_178, %c0_179], %202 {strides = array<i32>} : memref<1x49x64xbf16, #tpu.memory_space<vmem>>, vector<1x7x64xbf16>,
    %c11_180 = arith.constant 11 : index
    %c0_181 = arith.constant 0 : index
    %203 = vector.load %arg11[%c11_180, %c0_181] : memref<73x64xbf16, #tpu.memory_space<vmem>>, vector<7x64xbf16>
    %204 = arith.index_cast %1 : i32 to index
    %c7 = arith.constant 7 : index
    %c0_182 = arith.constant 0 : index
    %205 = vector.load %arg8[%204, %c7, %c0_182] : memref<1x49x64xbf16, #tpu.memory_space<vmem>>, vector<1x7x64xbf16>
    %206 = vector.shape_cast %205 : vector<1x7x64xbf16> to vector<7x64xbf16>
    %207 = vector.shape_cast %203 : vector<7x64xbf16> to vector<1x7x64xbf16>
    tpu.vector_store %arg8[%204, %c7, %c0_182], %207 {strides = array<i32>} : memref<1x49x64xbf16, #tpu.memory_space<vmem>>, vector<1x7x64xbf16>,
    %c22_183 = arith.constant 22 : index
    %c0_184 = arith.constant 0 : index
    %208 = vector.load %arg11[%c22_183, %c0_184] : memref<73x64xbf16, #tpu.memory_space<vmem>>, vector<7x64xbf16>
    %209 = arith.index_cast %1 : i32 to index
    %c14 = arith.constant 14 : index
    %c0_185 = arith.constant 0 : index
    %210 = vector.load %arg8[%209, %c14, %c0_185] : memref<1x49x64xbf16, #tpu.memory_space<vmem>>, vector<1x7x64xbf16>
    %211 = vector.shape_cast %210 : vector<1x7x64xbf16> to vector<7x64xbf16>
    %212 = vector.shape_cast %208 : vector<7x64xbf16> to vector<1x7x64xbf16>
    tpu.vector_store %arg8[%209, %c14, %c0_185], %212 {strides = array<i32>} : memref<1x49x64xbf16, #tpu.memory_space<vmem>>, vector<1x7x64xbf16>,
    %c33 = arith.constant 33 : index
    %c0_186 = arith.constant 0 : index
    %213 = vector.load %arg11[%c33, %c0_186] : memref<73x64xbf16, #tpu.memory_space<vmem>>, vector<7x64xbf16>
    %214 = arith.index_cast %1 : i32 to index
    %c21 = arith.constant 21 : index
    %c0_187 = arith.constant 0 : index
    %215 = vector.load %arg8[%214, %c21, %c0_187] : memref<1x49x64xbf16, #tpu.memory_space<vmem>>, vector<1x7x64xbf16>
    %216 = vector.shape_cast %215 : vector<1x7x64xbf16> to vector<7x64xbf16>
    %217 = vector.shape_cast %213 : vector<7x64xbf16> to vector<1x7x64xbf16>
    tpu.vector_store %arg8[%214, %c21, %c0_187], %217 {strides = array<i32>} : memref<1x49x64xbf16, #tpu.memory_space<vmem>>, vector<1x7x64xbf16>,
    %c44 = arith.constant 44 : index
    %c0_188 = arith.constant 0 : index
    %218 = vector.load %arg11[%c44, %c0_188] : memref<73x64xbf16, #tpu.memory_space<vmem>>, vector<7x64xbf16>
    %219 = arith.index_cast %1 : i32 to index
    %c28 = arith.constant 28 : index
    %c0_189 = arith.constant 0 : index
    %220 = vector.load %arg8[%219, %c28, %c0_189] : memref<1x49x64xbf16, #tpu.memory_space<vmem>>, vector<1x7x64xbf16>
    %221 = vector.shape_cast %220 : vector<1x7x64xbf16> to vector<7x64xbf16>
    %222 = vector.shape_cast %218 : vector<7x64xbf16> to vector<1x7x64xbf16>
    tpu.vector_store %arg8[%219, %c28, %c0_189], %222 {strides = array<i32>} : memref<1x49x64xbf16, #tpu.memory_space<vmem>>, vector<1x7x64xbf16>,
    %c55 = arith.constant 55 : index
    %c0_190 = arith.constant 0 : index
    %223 = vector.load %arg11[%c55, %c0_190] : memref<73x64xbf16, #tpu.memory_space<vmem>>, vector<7x64xbf16>
    %224 = arith.index_cast %1 : i32 to index
    %c35 = arith.constant 35 : index
    %c0_191 = arith.constant 0 : index
    %225 = vector.load %arg8[%224, %c35, %c0_191] : memref<1x49x64xbf16, #tpu.memory_space<vmem>>, vector<1x7x64xbf16>
    %226 = vector.shape_cast %225 : vector<1x7x64xbf16> to vector<7x64xbf16>
    %227 = vector.shape_cast %223 : vector<7x64xbf16> to vector<1x7x64xbf16>
    tpu.vector_store %arg8[%224, %c35, %c0_191], %227 {strides = array<i32>} : memref<1x49x64xbf16, #tpu.memory_space<vmem>>, vector<1x7x64xbf16>,
    %c66 = arith.constant 66 : index
    %c0_192 = arith.constant 0 : index
    %228 = vector.load %arg11[%c66, %c0_192] : memref<73x64xbf16, #tpu.memory_space<vmem>>, vector<7x64xbf16>
    %229 = arith.index_cast %1 : i32 to index
    %c42 = arith.constant 42 : index
    %c0_193 = arith.constant 0 : index
    %230 = vector.load %arg8[%229, %c42, %c0_193] : memref<1x49x64xbf16, #tpu.memory_space<vmem>>, vector<1x7x64xbf16>
    %231 = vector.shape_cast %230 : vector<1x7x64xbf16> to vector<7x64xbf16>
    %232 = vector.shape_cast %228 : vector<7x64xbf16> to vector<1x7x64xbf16>
    tpu.vector_store %arg8[%229, %c42, %c0_193], %232 {strides = array<i32>} : memref<1x49x64xbf16, #tpu.memory_space<vmem>>, vector<1x7x64xbf16>,
    %c1_i32_194 = arith.constant 1 : i32
    return
  }
  func.func @transform_0(%arg0: i32) -> (i32, i32, i32) {
    %c0_i32 = arith.constant 0 : i32
    %c0_i32_0 = arith.constant 0 : i32
    %c0_i32_1 = arith.constant 0 : i32
    return %arg0, %c0_i32, %c0_i32_0 : i32, i32, i32
  }
  func.func @transform_1(%arg0: i32) -> (i32, i32) {
    %c0_i32 = arith.constant 0 : i32
    %c0_i32_0 = arith.constant 0 : i32
    %c0_i32_1 = arith.constant 0 : i32
    return %c0_i32, %c0_i32_0 : i32, i32
  }
  func.func @transform_2(%arg0: i32) -> (i32, i32) {
    %c0_i32 = arith.constant 0 : i32
    %c0_i32_0 = arith.constant 0 : i32
    %c0_i32_1 = arith.constant 0 : i32
    return %c0_i32, %c0_i32_0 : i32, i32
  }
  func.func @transform_3(%arg0: i32) -> (i32, i32) {
    %c0_i32 = arith.constant 0 : i32
    %c0_i32_0 = arith.constant 0 : i32
    %c0_i32_1 = arith.constant 0 : i32
    return %c0_i32, %c0_i32_0 : i32, i32
  }
  func.func @transform_4(%arg0: i32) -> (i32, i32) {
    %c0_i32 = arith.constant 0 : i32
    %c0_i32_0 = arith.constant 0 : i32
    %c0_i32_1 = arith.constant 0 : i32
    return %c0_i32, %c0_i32_0 : i32, i32
  }
  func.func @transform_5(%arg0: i32) -> (i32, i32) {
    %c0_i32 = arith.constant 0 : i32
    %c0_i32_0 = arith.constant 0 : i32
    %c0_i32_1 = arith.constant 0 : i32
    return %c0_i32, %c0_i32_0 : i32, i32
  }
  func.func @transform_6(%arg0: i32) -> (i32, i32) {
    %c0_i32 = arith.constant 0 : i32
    %c0_i32_0 = arith.constant 0 : i32
    %c0_i32_1 = arith.constant 0 : i32
    return %c0_i32, %c0_i32_0 : i32, i32
  }
  func.func @transform_7(%arg0: i32) -> (i32, i32, i32) {
    %c0_i32 = arith.constant 0 : i32
    %c0_i32_0 = arith.constant 0 : i32
    %c0_i32_1 = arith.constant 0 : i32
    return %arg0, %c0_i32, %c0_i32_0 : i32, i32, i32
  }
}

module attributes {stable_mosaic.version = 11 : i64} {
  func.func @_fc_head_kernel(%arg0: i32, %arg1: memref<16x3136xbf16, #tpu.memory_space<vmem>>, %arg2: memref<3136x512xbf16, #tpu.memory_space<vmem>>, %arg3: memref<1x512xf32, #tpu.memory_space<vmem>>, %arg4: memref<512x128xbf16, #tpu.memory_space<vmem>>, %arg5: memref<1x128xf32, #tpu.memory_space<vmem>>, %arg6: memref<16x128xf32, #tpu.memory_space<vmem>>) attributes {dimension_semantics = [#tpu.dimension_semantics<parallel>], iteration_bounds = array<i64: 1>, scalar_prefetch = 0 : i64, scratch_operands = 0 : i64, tpu.core_type = #tpu.core_type<tc>, window_params = [{transform_indices = @transform_0, window_bounds = array<i64: 16, 3136>}, {pipeline_mode = #tpu.pipeline_mode<synchronous>, transform_indices = @transform_1, window_bounds = array<i64: 3136, 512>}, {pipeline_mode = #tpu.pipeline_mode<synchronous>, transform_indices = @transform_2, window_bounds = array<i64: 1, 512>}, {pipeline_mode = #tpu.pipeline_mode<synchronous>, transform_indices = @transform_3, window_bounds = array<i64: 512, 128>}, {pipeline_mode = #tpu.pipeline_mode<synchronous>, transform_indices = @transform_4, window_bounds = array<i64: 1, 128>}, {transform_indices = @transform_5, window_bounds = array<i64: 16, 128>}]} {
    %c0 = arith.constant 0 : index
    %c0_0 = arith.constant 0 : index
    %0 = vector.load %arg1[%c0, %c0_0] : memref<16x3136xbf16, #tpu.memory_space<vmem>>, vector<16x3136xbf16>
    %c0_1 = arith.constant 0 : index
    %c0_2 = arith.constant 0 : index
    %1 = vector.load %arg2[%c0_1, %c0_2] : memref<3136x512xbf16, #tpu.memory_space<vmem>>, vector<3136x512xbf16>
    %cst = arith.constant dense<0.000000e+00> : vector<16x512xf32>
    %2 = tpu.matmul %0, %1, %cst {dimension_numbers = #tpu.dot_dimension_numbers<[1], [0], [0], [1], [0, 0, 1, 1], [], []>} : vector<16x3136xbf16>, vector<3136x512xbf16>, vector<16x512xf32> -> vector<16x512xf32>
    %c0_3 = arith.constant 0 : index
    %c0_4 = arith.constant 0 : index
    %3 = vector.load %arg3[%c0_3, %c0_4] : memref<1x512xf32, #tpu.memory_space<vmem>>, vector<1x512xf32>
    %4 = vector.broadcast %3 : vector<1x512xf32> to vector<16x512xf32>
    %5 = arith.addf %2, %4 : vector<16x512xf32>
    %cst_5 = arith.constant 0.000000e+00 : f32
    %6 = vector.broadcast %cst_5 : f32 to vector<16x512xf32>
    %7 = arith.maximumf %5, %6 : vector<16x512xf32>
    %8 = arith.truncf %7 : vector<16x512xf32> to vector<16x512xbf16>
    %c0_6 = arith.constant 0 : index
    %c0_7 = arith.constant 0 : index
    %9 = vector.load %arg4[%c0_6, %c0_7] : memref<512x128xbf16, #tpu.memory_space<vmem>>, vector<512x128xbf16>
    %cst_8 = arith.constant dense<0.000000e+00> : vector<16x128xf32>
    %10 = tpu.matmul %8, %9, %cst_8 {dimension_numbers = #tpu.dot_dimension_numbers<[1], [0], [0], [1], [0, 0, 1, 1], [], []>} : vector<16x512xbf16>, vector<512x128xbf16>, vector<16x128xf32> -> vector<16x128xf32>
    %c0_9 = arith.constant 0 : index
    %c0_10 = arith.constant 0 : index
    %11 = vector.load %arg5[%c0_9, %c0_10] : memref<1x128xf32, #tpu.memory_space<vmem>>, vector<1x128xf32>
    %12 = vector.broadcast %11 : vector<1x128xf32> to vector<16x128xf32>
    %13 = arith.addf %10, %12 : vector<16x128xf32>
    %c0_11 = arith.constant 0 : index
    %c0_12 = arith.constant 0 : index
    %14 = vector.load %arg6[%c0_11, %c0_12] : memref<16x128xf32, #tpu.memory_space<vmem>>, vector<16x128xf32>
    tpu.vector_store %arg6[%c0_11, %c0_12], %13 {strides = array<i32>} : memref<16x128xf32, #tpu.memory_space<vmem>>, vector<16x128xf32>,
    return
  }
  func.func @transform_0(%arg0: i32) -> (i32, i32) {
    %c0_i32 = arith.constant 0 : i32
    %c0_i32_0 = arith.constant 0 : i32
    return %arg0, %c0_i32 : i32, i32
  }
  func.func @transform_1(%arg0: i32) -> (i32, i32) {
    %c0_i32 = arith.constant 0 : i32
    %c0_i32_0 = arith.constant 0 : i32
    %c0_i32_1 = arith.constant 0 : i32
    return %c0_i32, %c0_i32_0 : i32, i32
  }
  func.func @transform_2(%arg0: i32) -> (i32, i32) {
    %c0_i32 = arith.constant 0 : i32
    %c0_i32_0 = arith.constant 0 : i32
    %c0_i32_1 = arith.constant 0 : i32
    return %c0_i32, %c0_i32_0 : i32, i32
  }
  func.func @transform_3(%arg0: i32) -> (i32, i32) {
    %c0_i32 = arith.constant 0 : i32
    %c0_i32_0 = arith.constant 0 : i32
    %c0_i32_1 = arith.constant 0 : i32
    return %c0_i32, %c0_i32_0 : i32, i32
  }
  func.func @transform_4(%arg0: i32) -> (i32, i32) {
    %c0_i32 = arith.constant 0 : i32
    %c0_i32_0 = arith.constant 0 : i32
    %c0_i32_1 = arith.constant 0 : i32
    return %c0_i32, %c0_i32_0 : i32, i32
  }
  func.func @transform_5(%arg0: i32) -> (i32, i32) {
    %c0_i32 = arith.constant 0 : i32
    %c0_i32_0 = arith.constant 0 : i32
    return %arg0, %c0_i32 : i32, i32
  }
}

</mosaic_0001>

<bundles_post_ra>
// kernel: ddqnet_forward.3
= control target key start
LH: loop header
LB: loop body
LE: loop exit
PB: predicated region body
PF: predicated region fallthrough
CT: control target
= control target key end

     0   :  { %vm4898_vm0 = vcmask 523264   ;;  %s11187_s1 = inlined_call_operand.vmem [shape: bf16[3136,512], index: 1, kind: input, shape index: {}]   ;;  %s11188_s0 = inlined_call_operand.vmem [shape: bf16[16,3136], index: 0, kind: input, shape index: {}]   ;;  %s11189_s3 = inlined_call_operand.vmem [shape: bf16[512,128], index: 3, kind: input, shape index: {}]   ;;  %s11190_s2 = inlined_call_operand.vmem [shape: f32[1,512], index: 2, kind: input, shape index: {}]   ;;  %s11191_s4 = inlined_call_operand.vmem [shape: f32[1,128], index: 4, kind: input, shape index: {}]   ;;  %s11192_s5 = inlined_call_operand.vmem [shape: f32[16,128], index: 5, kind: output, shape index: {}]  }
   0x1   :  { %v7376_v0 = vld [vmem:[%s11187_s1 + $0x4] ss:$16 sps:$4 sm:$0xff]   ;;  %v7378_v1 = vld [vmem:[%s11187_s1 + $0xc] ss:$16 sps:$4 sm:$0xff]   ;;  %v7380_v2 = vld [vmem:[%s11187_s1] ss:$16 sps:$4 sm:$0xff]  }
   0x2   :  { %4902 = vmatprep.subr.bf16.mxu0 %v7376_v0  ;;  %v7381_v3 = vld [vmem:[%s11187_s1 + $0x8] ss:$16 sps:$4 sm:$0xff]   ;;  %5461 = vmatprep.subr.bf16.mxu1 %v7378_v1  ;;  %v7382_v4 = vld [vmem:[%s11187_s1 + $0x24] ss:$16 sps:$4 sm:$0xff]   ;;  %v7384_v5 = vld [vmem:[%s11187_s1 + $0x2c] ss:$16 sps:$4 sm:$0xff]  }
   0x3   :  { %4903 = vmatpush1.bf16.msra.mxu0 %v7380_v2  ;;  %5462 = vmatpush1.bf16.msra.mxu1 %v7381_v3  ;;  %v7386_v6 = vld [vmem:[%s11187_s1 + $0x20] ss:$16 sps:$4 sm:$0xff]   ;;  %v7387_v7 = vld [vmem:[%s11187_s1 + $0x28] ss:$16 sps:$4 sm:$0xff]   ;;  %v7388_v8 = vld [vmem:[%s11187_s1 + $0x44] ss:$16 sps:$4 sm:$0xff]  }
   0x4   :  { %4904 = vmatprep.subr.bf16.mxu0 %v7382_v4  ;;  %5463 = vmatprep.subr.bf16.mxu1 %v7384_v5  ;;  %v7390_v9 = vld [vmem:[%s11187_s1 + $0x4c] ss:$16 sps:$4 sm:$0xff]   ;;  %v7392_v10 = vld [vmem:[%s11187_s1 + $0x40] ss:$16 sps:$4 sm:$0xff]   ;;  %v7393_v11 = vld [vmem:[%s11187_s1 + $0x48] ss:$16 sps:$4 sm:$0xff]  }
   0x5   :  { %v7394_v12 = vld [vmem:[%s11187_s1 + $0x64] ss:$16 sps:$4 sm:$0xff]   ;;  %v7396_v13 = vld [vmem:[%s11187_s1 + $0x6c] ss:$16 sps:$4 sm:$0xff]   ;;  %v7398_v14 = vld [vmem:[%s11187_s1 + $0x60] ss:$16 sps:$4 sm:$0xff]  }
   0x6   :  { %v7399_v15 = vld [vmem:[%s11187_s1 + $0x68] ss:$16 sps:$4 sm:$0xff]   ;;  %v7400_v16 = vld [vmem:[%s11187_s1 + $0x84] ss:$16 sps:$4 sm:$0xff]   ;;  %v7402_v17 = vld [vmem:[%s11187_s1 + $0x8c] ss:$16 sps:$4 sm:$0xff]  }
   0x7   :  { %4905 = vmatpush1.bf16.msra.mxu0 %v7386_v6  ;;  %5464 = vmatpush1.bf16.msra.mxu1 %v7387_v7  ;;  %v7404_v18 = vld [vmem:[%s11187_s1 + $0x80] ss:$16 sps:$4 sm:$0xff]   ;;  %v7405_v19 = vld [vmem:[%s11187_s1 + $0x88] ss:$16 sps:$4 sm:$0xff]   ;;  %v7406_v20 = vld [vmem:[%s11187_s1 + $0xa4] ss:$16 sps:$4 sm:$0xff]  }
   0x8   :  { %4906 = vmatprep.subr.bf16.mxu0 %v7388_v8  ;;  %5465 = vmatprep.subr.bf16.mxu1 %v7390_v9  ;;  %v7408_v21 = vld [vmem:[%s11187_s1 + $0xac] ss:$16 sps:$4 sm:$0xff]   ;;  %v7410_v22 = vld [vmem:[%s11187_s1 + $0xa0] ss:$16 sps:$4 sm:$0xff]   ;;  %v7411_v23 = vld [vmem:[%s11187_s1 + $0xa8] ss:$16 sps:$4 sm:$0xff]  }
   0x9   :  { %v7412_v24 = vld [vmem:[%s11187_s1 + $0xc4] ss:$16 sps:$4 sm:$0xff]   ;;  %v7414_v25 = vld [vmem:[%s11187_s1 + $0xcc] ss:$16 sps:$4 sm:$0xff]   ;;  %v7416_v26 = vld [vmem:[%s11187_s1 + $0xc0] ss:$16 sps:$4 sm:$0xff]  }
   0xa   :  { %v7417_v27 = vld [vmem:[%s11187_s1 + $0xc8] ss:$16 sps:$4 sm:$0xff]   ;;  %v7418_v28 = vld [vmem:[%s11187_s1 + $0xe4] ss:$16 sps:$4 sm:$0xff]   ;;  %v7420_v29 = vld [vmem:[%s11187_s1 + $0xec] ss:$16 sps:$4 sm:$0xff]  }
   0xb   :  { %4907 = vmatpush1.bf16.msra.mxu0 %v7392_v10  ;;  %5466 = vmatpush1.bf16.msra.mxu1 %v7393_v11  ;;  %v7422_v30 = vld [vmem:[%s11187_s1 + $0xe0] ss:$16 sps:$4 sm:$0xff]   ;;  %v7423_v31 = vld [vmem:[%s11187_s1 + $0xe8] ss:$16 sps:$4 sm:$0xff]   ;;  %v7424_v32 = vld [vmem:[%s11187_s1 + $0x104] ss:$16 sps:$4 sm:$0xff]  }
   0xc   :  { %4908 = vmatprep.subr.bf16.mxu0 %v7394_v12  ;;  %5467 = vmatprep.subr.bf16.mxu1 %v7396_v13  ;;  %v7426_v33 = vld [vmem:[%s11187_s1 + $0x10c] ss:$16 sps:$4 sm:$0xff]   ;;  %v7428_v34 = vld [vmem:[%s11187_s1 + $0x100] ss:$16 sps:$4 sm:$0xff]   ;;  %v7429_v35 = vld [vmem:[%s11187_s1 + $0x108] ss:$16 sps:$4 sm:$0xff]  }
   0xd   :  { %v7430_v36 = vld [vmem:[%s11187_s1 + $0x124] ss:$16 sps:$4 sm:$0xff]   ;;  %v7432_v37 = vld [vmem:[%s11187_s1 + $0x12c] ss:$16 sps:$4 sm:$0xff]   ;;  %v7434_v38 = vld [vmem:[%s11187_s1 + $0x120] ss:$16 sps:$4 sm:$0xff]  }
   0xe   :  { %v7435_v39 = vld [vmem:[%s11187_s1 + $0x128] ss:$16 sps:$4 sm:$0xff]   ;;  %v7436_v40 = vld [vmem:[%s11187_s1 + $0x144] ss:$16 sps:$4 sm:$0xff]   ;;  %v7438_v41 = vld [vmem:[%s11187_s1 + $0x14c] ss:$16 sps:$4 sm:$0xff]  }
   0xf   :  { %4909 = vmatpush1.bf16.msra.mxu0 %v7398_v14  ;;  %5468 = vmatpush1.bf16.msra.mxu1 %v7399_v15  ;;  %v7440_v42 = vld [vmem:[%s11187_s1 + $0x140] ss:$16 sps:$4 sm:$0xff]   ;;  %v7441_v43 = vld [vmem:[%s11187_s1 + $0x148] ss:$16 sps:$4 sm:$0xff]   ;;  %v7442_v44 = vld [vmem:[%s11187_s1 + $0x164] ss:$16 sps:$4 sm:$0xff]  }
  0x10   :  { %4910 = vmatprep.subr.bf16.mxu0 %v7400_v16  ;;  %5469 = vmatprep.subr.bf16.mxu1 %v7402_v17  ;;  %v7444_v45 = vld [vmem:[%s11187_s1 + $0x16c] ss:$16 sps:$4 sm:$0xff]   ;;  %v7446_v46 = vld [vmem:[%s11187_s1 + $0x160] ss:$16 sps:$4 sm:$0xff]   ;;  %v7447_v47 = vld [vmem:[%s11187_s1 + $0x168] ss:$16 sps:$4 sm:$0xff]  }
  0x11   :  { %v7474_v48 = vld [vmem:[%s11188_s0 + $0x4] ss:$100 sps:$4 sm:$0xff]   ;;  %v7450_v50 = vld [vmem:[%s11187_s1 + $0x18c] ss:$16 sps:$4 sm:$0xff]   ;;  %v7452_v51 = vld [vmem:[%s11187_s1 + $0x180] ss:$16 sps:$4 sm:$0xff]  }
  0x12   :  { %v7448_v49 = vld [vmem:[%s11187_s1 + $0x184] ss:$16 sps:$4 sm:$0xff]   ;;  %4934 = vmatprep.mubr.bf16.mxu0 %v7474_v48  ;;  %5493 = vmatprep.mubr.bf16.mxu1 %v7474_v48  ;;  %v7453_v52 = vld [vmem:[%s11187_s1 + $0x188] ss:$16 sps:$4 sm:$0xff]   ;;  %v7456_v54 = vld [vmem:[%s11187_s1 + $0x1ac] ss:$16 sps:$4 sm:$0xff]  }
  0x13   :  { %4911 = vmatpush1.bf16.msra.mxu0 %v7404_v18  ;;  %5470 = vmatpush1.bf16.msra.mxu1 %v7405_v19  ;;  %v7454_v53 = vld [vmem:[%s11187_s1 + $0x1a4] ss:$16 sps:$4 sm:$0xff]   ;;  %v7458_v55 = vld [vmem:[%s11187_s1 + $0x1a0] ss:$16 sps:$4 sm:$0xff]   ;;  %v7459_v56 = vld [vmem:[%s11187_s1 + $0x1a8] ss:$16 sps:$4 sm:$0xff]  }
  0x14   :  { %4912 = vmatprep.subr.bf16.mxu0 %v7406_v20  ;;  %5471 = vmatprep.subr.bf16.mxu1 %v7408_v21  ;;  %v7460_v57 = vld [vmem:[%s11187_s1 + $0x1c4] ss:$16 sps:$4 sm:$0xff]   ;;  %v7462_v58 = vld [vmem:[%s11187_s1 + $0x1cc] ss:$16 sps:$4 sm:$0xff]   ;;  %v7464_v59 = vld [vmem:[%s11187_s1 + $0x1c0] ss:$16 sps:$4 sm:$0xff]  }
  0x15   :  { %v7465_v60 = vld [vmem:[%s11187_s1 + $0x1c8] ss:$16 sps:$4 sm:$0xff]   ;;  %v7466_v61 = vld [vmem:[%s11187_s1 + $0x1e4] ss:$16 sps:$4 sm:$0xff]   ;;  %v7468_v62 = vld [vmem:[%s11187_s1 + $0x1ec] ss:$16 sps:$4 sm:$0xff]  }
  0x16   :  { %v7470_v63 = vld [vmem:[%s11187_s1 + $0x1e0] ss:$16 sps:$4 sm:$0xff]   ;;  %v7471_v0 = vld [vmem:[%s11187_s1 + $0x1e8] ss:$16 sps:$4 sm:$0xff]   ;;  %v7477_v1 = vld [vmem:[%s11187_s1 + $0x204] ss:$16 sps:$4 sm:$0xff]  }
  0x17   :  { %4913 = vmatpush1.bf16.msra.mxu0 %v7410_v22  ;;  %5472 = vmatpush1.bf16.msra.mxu1 %v7411_v23  ;;  %v7480_v2 = vld [vmem:[%s11187_s1 + $0x20c] ss:$16 sps:$4 sm:$0xff]   ;;  %v7472_v3 = vld [vmem:[%s11188_s0] ss:$100 sps:$4 sm:$0xff]   ;;  %v7478_v5 = vld [vmem:[%s11187_s1 + $0x208] ss:$16 sps:$4 sm:$0xff]  }
  0x18   :  { %4914 = vmatprep.subr.bf16.mxu0 %v7412_v24  ;;  %5473 = vmatprep.subr.bf16.mxu1 %v7414_v25  ;;  %v7475_v4 = vld [vmem:[%s11187_s1 + $0x200] ss:$16 sps:$4 sm:$0xff]   ;;  %v7483_v6 = vld [vmem:[%s11187_s1 + $0x224] ss:$16 sps:$4 sm:$0xff]   ;;  %v7486_v7 = vld [vmem:[%s11187_s1 + $0x22c] ss:$16 sps:$4 sm:$0xff]  }
  0x19   :  { %v7481_v8 = vld [vmem:[%s11187_s1 + $0x220] ss:$16 sps:$4 sm:$0xff]   ;;  %v7484_v9 = vld [vmem:[%s11187_s1 + $0x228] ss:$16 sps:$4 sm:$0xff]   ;;  %v7489_v10 = vld [vmem:[%s11187_s1 + $0x244] ss:$16 sps:$4 sm:$0xff]  }
  0x1a   :  { %v7492_v11 = vld [vmem:[%s11187_s1 + $0x24c] ss:$16 sps:$4 sm:$0xff]   ;;  %v7487_v12 = vld [vmem:[%s11187_s1 + $0x240] ss:$16 sps:$4 sm:$0xff]   ;;  %v7490_v13 = vld [vmem:[%s11187_s1 + $0x248] ss:$16 sps:$4 sm:$0xff]  }
  0x1b   :  { %4915 = vmatpush1.bf16.msra.mxu0 %v7416_v26  ;;  %5474 = vmatpush1.bf16.msra.mxu1 %v7417_v27  ;;  %v7495_v14 = vld [vmem:[%s11187_s1 + $0x264] ss:$16 sps:$4 sm:$0xff]   ;;  %v7498_v15 = vld [vmem:[%s11187_s1 + $0x26c] ss:$16 sps:$4 sm:$0xff]   ;;  %v7493_v16 = vld [vmem:[%s11187_s1 + $0x260] ss:$16 sps:$4 sm:$0xff]  }
  0x1c   :  { %4916 = vmatprep.subr.bf16.mxu0 %v7418_v28  ;;  %5475 = vmatprep.subr.bf16.mxu1 %v7420_v29  ;;  %v7496_v17 = vld [vmem:[%s11187_s1 + $0x268] ss:$16 sps:$4 sm:$0xff]   ;;  %v7501_v18 = vld [vmem:[%s11187_s1 + $0x284] ss:$16 sps:$4 sm:$0xff]   ;;  %v7504_v19 = vld [vmem:[%s11187_s1 + $0x28c] ss:$16 sps:$4 sm:$0xff]  }
  0x1d   :  { %v7499_v20 = vld [vmem:[%s11187_s1 + $0x280] ss:$16 sps:$4 sm:$0xff]   ;;  %v7502_v21 = vld [vmem:[%s11187_s1 + $0x288] ss:$16 sps:$4 sm:$0xff]   ;;  %v7507_v22 = vld [vmem:[%s11187_s1 + $0x2a4] ss:$16 sps:$4 sm:$0xff]  }
  0x1e   :  { %v7510_v23 = vld [vmem:[%s11187_s1 + $0x2ac] ss:$16 sps:$4 sm:$0xff]   ;;  %v7505_v24 = vld [vmem:[%s11187_s1 + $0x2a0] ss:$16 sps:$4 sm:$0xff]   ;;  %v7508_v25 = vld [vmem:[%s11187_s1 + $0x2a8] ss:$16 sps:$4 sm:$0xff]  }
  0x1f   :  { %4917 = vmatpush1.bf16.msra.mxu0 %v7422_v30  ;;  %5476 = vmatpush1.bf16.msra.mxu1 %v7423_v31  ;;  %v7513_v26 = vld [vmem:[%s11187_s1 + $0x2c4] ss:$16 sps:$4 sm:$0xff]   ;;  %v7516_v27 = vld [vmem:[%s11187_s1 + $0x2cc] ss:$16 sps:$4 sm:$0xff]   ;;  %v7511_v28 = vld [vmem:[%s11187_s1 + $0x2c0] ss:$16 sps:$4 sm:$0xff]  }
  0x20   :  { %4918 = vmatprep.subr.bf16.mxu0 %v7424_v32  ;;  %5477 = vmatprep.subr.bf16.mxu1 %v7426_v33  ;;  %v7514_v29 = vld [vmem:[%s11187_s1 + $0x2c8] ss:$16 sps:$4 sm:$0xff]   ;;  %v7573_v30 = vld [vmem:[%s11188_s0 + $0xc] ss:$100 sps:$4 sm:$0xff]   ;;  %v7519_v31 = vld [vmem:[%s11187_s1 + $0x2e4] ss:$16 sps:$4 sm:$0xff]  }
  0x21   :  { %v7522_v32 = vld [vmem:[%s11187_s1 + $0x2ec] ss:$16 sps:$4 sm:$0xff]   ;;  %v7517_v33 = vld [vmem:[%s11187_s1 + $0x2e0] ss:$16 sps:$4 sm:$0xff]  }
  0x22   :  { %v7546_v48 = vld [vmem:[%s11187_s1 + $0x36c] ss:$16 sps:$4 sm:$0xff]  }
  0x23   :  { %4919 = vmatpush1.bf16.msra.mxu0 %v7428_v34  ;;  %5478 = vmatpush1.bf16.msra.mxu1 %v7429_v35  ;;  %v7520_v34 = vld [vmem:[%s11187_s1 + $0x2e8] ss:$16 sps:$4 sm:$0xff]   ;;  %v7525_v35 = vld [vmem:[%s11187_s1 + $0x304] ss:$16 sps:$4 sm:$0xff]  }
  0x24   :  { %4920 = vmatprep.subr.bf16.mxu0 %v7430_v36  ;;  %5479 = vmatprep.subr.bf16.mxu1 %v7432_v37  ;;  %v7528_v36 = vld [vmem:[%s11187_s1 + $0x30c] ss:$16 sps:$4 sm:$0xff]   ;;  %v7523_v37 = vld [vmem:[%s11187_s1 + $0x300] ss:$16 sps:$4 sm:$0xff]  }
  0x27   :  { %4921 = vmatpush1.bf16.msra.mxu0 %v7434_v38  ;;  %5480 = vmatpush1.bf16.msra.mxu1 %v7435_v39  ;;  %v7526_v38 = vld [vmem:[%s11187_s1 + $0x308] ss:$16 sps:$4 sm:$0xff]   ;;  %v7531_v39 = vld [vmem:[%s11187_s1 + $0x324] ss:$16 sps:$4 sm:$0xff]  }
  0x28   :  { %4922 = vmatprep.subr.bf16.mxu0 %v7436_v40  ;;  %5481 = vmatprep.subr.bf16.mxu1 %v7438_v41  ;;  %v7534_v40 = vld [vmem:[%s11187_s1 + $0x32c] ss:$16 sps:$4 sm:$0xff]   ;;  %v7529_v41 = vld [vmem:[%s11187_s1 + $0x320] ss:$16 sps:$4 sm:$0xff]  }
  0x2b   :  { %4923 = vmatpush1.bf16.msra.mxu0 %v7440_v42  ;;  %5482 = vmatpush1.bf16.msra.mxu1 %v7441_v43  ;;  %v7532_v42 = vld [vmem:[%s11187_s1 + $0x328] ss:$16 sps:$4 sm:$0xff]   ;;  %v7537_v43 = vld [vmem:[%s11187_s1 + $0x344] ss:$16 sps:$4 sm:$0xff]  }
  0x2c   :  { %4924 = vmatprep.subr.bf16.mxu0 %v7442_v44  ;;  %5483 = vmatprep.subr.bf16.mxu1 %v7444_v45  ;;  %v7540_v44 = vld [vmem:[%s11187_s1 + $0x34c] ss:$16 sps:$4 sm:$0xff]   ;;  %v7535_v45 = vld [vmem:[%s11187_s1 + $0x340] ss:$16 sps:$4 sm:$0xff]  }
  0x2f   :  { %4925 = vmatpush1.bf16.msra.mxu0 %v7446_v46  ;;  %5484 = vmatpush1.bf16.msra.mxu1 %v7447_v47  ;;  %v7538_v46 = vld [vmem:[%s11187_s1 + $0x348] ss:$16 sps:$4 sm:$0xff]   ;;  %v7543_v47 = vld [vmem:[%s11187_s1 + $0x364] ss:$16 sps:$4 sm:$0xff]  }
  0x30   :  { %4926 = vmatprep.subr.bf16.mxu0 %v7448_v49  ;;  %5485 = vmatprep.subr.bf16.mxu1 %v7450_v50  ;;  %v7541_v49 = vld [vmem:[%s11187_s1 + $0x360] ss:$16 sps:$4 sm:$0xff]   ;;  %v7544_v50 = vld [vmem:[%s11187_s1 + $0x368] ss:$16 sps:$4 sm:$0xff]  }
  0x33   :  { %4927 = vmatpush1.bf16.msra.mxu0 %v7452_v51  ;;  %5486 = vmatpush1.bf16.msra.mxu1 %v7453_v52  ;;  %v7549_v51 = vld [vmem:[%s11187_s1 + $0x384] ss:$16 sps:$4 sm:$0xff]   ;;  %v7552_v52 = vld [vmem:[%s11187_s1 + $0x38c] ss:$16 sps:$4 sm:$0xff]  }
  0x34   :  { %4928 = vmatprep.subr.bf16.mxu0 %v7454_v53  ;;  %5487 = vmatprep.subr.bf16.mxu1 %v7456_v54  ;;  %v7547_v53 = vld [vmem:[%s11187_s1 + $0x380] ss:$16 sps:$4 sm:$0xff]   ;;  %v7550_v54 = vld [vmem:[%s11187_s1 + $0x388] ss:$16 sps:$4 sm:$0xff]  }
  0x37   :  { %4929 = vmatpush1.bf16.msra.mxu0 %v7458_v55  ;;  %5488 = vmatpush1.bf16.msra.mxu1 %v7459_v56  ;;  %v7555_v55 = vld [vmem:[%s11187_s1 + $0x3a4] ss:$16 sps:$4 sm:$0xff]   ;;  %v7558_v56 = vld [vmem:[%s11187_s1 + $0x3ac] ss:$16 sps:$4 sm:$0xff]  }
  0x38   :  { %4930 = vmatprep.subr.bf16.mxu0 %v7460_v57  ;;  %5489 = vmatprep.subr.bf16.mxu1 %v7462_v58  ;;  %v7553_v57 = vld [vmem:[%s11187_s1 + $0x3a0] ss:$16 sps:$4 sm:$0xff]   ;;  %v7556_v58 = vld [vmem:[%s11187_s1 + $0x3a8] ss:$16 sps:$4 sm:$0xff]  }
  0x3b   :  { %4931 = vmatpush1.bf16.msra.mxu0 %v7464_v59  ;;  %5490 = vmatpush1.bf16.msra.mxu1 %v7465_v60  ;;  %v7561_v59 = vld [vmem:[%s11187_s1 + $0x3c4] ss:$16 sps:$4 sm:$0xff]   ;;  %v7564_v60 = vld [vmem:[%s11187_s1 + $0x3cc] ss:$16 sps:$4 sm:$0xff]  }
  0x3c   :  { %4932 = vmatprep.subr.bf16.mxu0 %v7466_v61  ;;  %5491 = vmatprep.subr.bf16.mxu1 %v7468_v62  ;;  %v7559_v61 = vld [vmem:[%s11187_s1 + $0x3c0] ss:$16 sps:$4 sm:$0xff]   ;;  %v7562_v62 = vld [vmem:[%s11187_s1 + $0x3c8] ss:$16 sps:$4 sm:$0xff]  }
  0x3f   :  { %4933 = vmatpush1.bf16.msra.mxu0 %v7470_v63  ;;  %5492 = vmatpush1.bf16.msra.mxu1 %v7471_v0  ;;  %v7567_v63 = vld [vmem:[%s11187_s1 + $0x3e4] ss:$16 sps:$4 sm:$0xff]   ;;  %v7570_v0 = vld [vmem:[%s11187_s1 + $0x3ec] ss:$16 sps:$4 sm:$0xff]  }
  0x40   :  { %4945 = vmatprep.subr.bf16.mxu0 %v7477_v1  ;;  %5504 = vmatprep.subr.bf16.mxu1 %v7480_v2  ;;  %v7565_v1 = vld [vmem:[%s11187_s1 + $0x3e0] ss:$16 sps:$4 sm:$0xff]   ;;  %v7568_v2 = vld [vmem:[%s11187_s1 + $0x3e8] ss:$16 sps:$4 sm:$0xff]  }
  0x42   :  { %4935 = vmatmul.mubr.bf16.vlgmr.msra.gmra.mrb[0].mxu0 %v7472_v3  ;;  %5494 = vmatmul.mubr.bf16.vlgmr.msra.gmra.mrb[0].mxu1 %v7472_v3  ;;  %v7576_v3 = vld [vmem:[%s11187_s1 + $0x404] ss:$16 sps:$4 sm:$0xff]  }
  0x43   :  { %4946 = vmatpush1.bf16.msra.mxu0 %v7475_v4  ;;  %5505 = vmatpush1.bf16.msra.mxu1 %v7478_v5  ;;  %v7579_v4 = vld [vmem:[%s11187_s1 + $0x40c] ss:$16 sps:$4 sm:$0xff]  }
  0x44   :  { %4947 = vmatprep.subr.bf16.mxu0 %v7483_v6  ;;  %5506 = vmatprep.subr.bf16.mxu1 %v7486_v7  ;;  %v7571_v5 = vld [vmem:[%s11188_s0 + $0x8] ss:$100 sps:$4 sm:$0xff]   ;;  %v7574_v6 = vld [vmem:[%s11187_s1 + $0x400] ss:$16 sps:$4 sm:$0xff]  }
  0x45   :  { %4977 = vmatprep.mubr.bf16.mxu0 %v7573_v30  ;;  %5536 = vmatprep.mubr.bf16.mxu1 %v7573_v30  ;;  %v7577_v7 = vld [vmem:[%s11187_s1 + $0x408] ss:$16 sps:$4 sm:$0xff]   ;;  %v7615_v30 = vld [vmem:[%s11187_s1 + $0x4cc] ss:$16 sps:$4 sm:$0xff]  }
  0x47   :  { %4948 = vmatpush1.bf16.msra.mxu0 %v7481_v8  ;;  %5507 = vmatpush1.bf16.msra.mxu1 %v7484_v9  ;;  %v7582_v8 = vld [vmem:[%s11187_s1 + $0x424] ss:$16 sps:$4 sm:$0xff]   ;;  %v7585_v9 = vld [vmem:[%s11187_s1 + $0x42c] ss:$16 sps:$4 sm:$0xff]  }
  0x48   :  { %4949 = vmatprep.subr.bf16.mxu0 %v7489_v10  ;;  %5508 = vmatprep.subr.bf16.mxu1 %v7492_v11  ;;  %v7580_v10 = vld [vmem:[%s11187_s1 + $0x420] ss:$16 sps:$4 sm:$0xff]   ;;  %v7583_v11 = vld [vmem:[%s11187_s1 + $0x428] ss:$16 sps:$4 sm:$0xff]  }
  0x4b   :  { %4950 = vmatpush1.bf16.msra.mxu0 %v7487_v12  ;;  %5509 = vmatpush1.bf16.msra.mxu1 %v7490_v13  ;;  %v7672_v12 = vld [vmem:[%s11188_s0 + $0x14] ss:$100 sps:$4 sm:$0xff]  }
  0x4c   :  { %4951 = vmatprep.subr.bf16.mxu0 %v7495_v14  ;;  %5510 = vmatprep.subr.bf16.mxu1 %v7498_v15  ;;  %v7588_v13 = vld [vmem:[%s11187_s1 + $0x444] ss:$16 sps:$4 sm:$0xff]   ;;  %v7591_v14 = vld [vmem:[%s11187_s1 + $0x44c] ss:$16 sps:$4 sm:$0xff]   ;;  %v7586_v15 = vld [vmem:[%s11187_s1 + $0x440] ss:$16 sps:$4 sm:$0xff]  }
  0x4f   :  { %4952 = vmatpush1.bf16.msra.mxu0 %v7493_v16  ;;  %5511 = vmatpush1.bf16.msra.mxu1 %v7496_v17  ;;  %v7589_v16 = vld [vmem:[%s11187_s1 + $0x448] ss:$16 sps:$4 sm:$0xff]   ;;  %v7594_v17 = vld [vmem:[%s11187_s1 + $0x464] ss:$16 sps:$4 sm:$0xff]  }
  0x50   :  { %4953 = vmatprep.subr.bf16.mxu0 %v7501_v18  ;;  %5512 = vmatprep.subr.bf16.mxu1 %v7504_v19  ;;  %v7597_v18 = vld [vmem:[%s11187_s1 + $0x46c] ss:$16 sps:$4 sm:$0xff]   ;;  %v7592_v19 = vld [vmem:[%s11187_s1 + $0x460] ss:$16 sps:$4 sm:$0xff]  }
  0x53   :  { %4954 = vmatpush1.bf16.msra.mxu0 %v7499_v20  ;;  %5513 = vmatpush1.bf16.msra.mxu1 %v7502_v21  ;;  %v7595_v20 = vld [vmem:[%s11187_s1 + $0x468] ss:$16 sps:$4 sm:$0xff]   ;;  %v7600_v21 = vld [vmem:[%s11187_s1 + $0x484] ss:$16 sps:$4 sm:$0xff]  }
  0x54   :  { %4955 = vmatprep.subr.bf16.mxu0 %v7507_v22  ;;  %5514 = vmatprep.subr.bf16.mxu1 %v7510_v23  ;;  %v7603_v22 = vld [vmem:[%s11187_s1 + $0x48c] ss:$16 sps:$4 sm:$0xff]   ;;  %v7598_v23 = vld [vmem:[%s11187_s1 + $0x480] ss:$16 sps:$4 sm:$0xff]  }
  0x57   :  { %4956 = vmatpush1.bf16.msra.mxu0 %v7505_v24  ;;  %5515 = vmatpush1.bf16.msra.mxu1 %v7508_v25  ;;  %v7601_v24 = vld [vmem:[%s11187_s1 + $0x488] ss:$16 sps:$4 sm:$0xff]   ;;  %v7606_v25 = vld [vmem:[%s11187_s1 + $0x4a4] ss:$16 sps:$4 sm:$0xff]  }
  0x58   :  { %4957 = vmatprep.subr.bf16.mxu0 %v7513_v26  ;;  %5516 = vmatprep.subr.bf16.mxu1 %v7516_v27  ;;  %v7609_v26 = vld [vmem:[%s11187_s1 + $0x4ac] ss:$16 sps:$4 sm:$0xff]   ;;  %v7604_v27 = vld [vmem:[%s11187_s1 + $0x4a0] ss:$16 sps:$4 sm:$0xff]  }
  0x5b   :  { %4958 = vmatpush1.bf16.msra.mxu0 %v7511_v28  ;;  %5517 = vmatpush1.bf16.msra.mxu1 %v7514_v29  ;;  %v7607_v28 = vld [vmem:[%s11187_s1 + $0x4a8] ss:$16 sps:$4 sm:$0xff]   ;;  %v7612_v29 = vld [vmem:[%s11187_s1 + $0x4c4] ss:$16 sps:$4 sm:$0xff]  }
  0x5c   :  { %4959 = vmatprep.subr.bf16.mxu0 %v7519_v31  ;;  %5518 = vmatprep.subr.bf16.mxu1 %v7522_v32  ;;  %v7610_v31 = vld [vmem:[%s11187_s1 + $0x4c0] ss:$16 sps:$4 sm:$0xff]   ;;  %v7613_v32 = vld [vmem:[%s11187_s1 + $0x4c8] ss:$16 sps:$4 sm:$0xff]  }
  0x5f   :  { %4960 = vmatpush1.bf16.msra.mxu0 %v7517_v33  ;;  %5519 = vmatpush1.bf16.msra.mxu1 %v7520_v34  ;;  %v7618_v33 = vld [vmem:[%s11187_s1 + $0x4e4] ss:$16 sps:$4 sm:$0xff]   ;;  %v7621_v34 = vld [vmem:[%s11187_s1 + $0x4ec] ss:$16 sps:$4 sm:$0xff]  }
  0x60   :  { %4961 = vmatprep.subr.bf16.mxu0 %v7525_v35  ;;  %5520 = vmatprep.subr.bf16.mxu1 %v7528_v36  ;;  %v7616_v35 = vld [vmem:[%s11187_s1 + $0x4e0] ss:$16 sps:$4 sm:$0xff]   ;;  %v7619_v36 = vld [vmem:[%s11187_s1 + $0x4e8] ss:$16 sps:$4 sm:$0xff]  }
  0x63   :  { %4962 = vmatpush1.bf16.msra.mxu0 %v7523_v37  ;;  %5521 = vmatpush1.bf16.msra.mxu1 %v7526_v38  ;;  %v7624_v37 = vld [vmem:[%s11187_s1 + $0x504] ss:$16 sps:$4 sm:$0xff]   ;;  %v7627_v38 = vld [vmem:[%s11187_s1 + $0x50c] ss:$16 sps:$4 sm:$0xff]  }
  0x64   :  { %4963 = vmatprep.subr.bf16.mxu0 %v7531_v39  ;;  %5522 = vmatprep.subr.bf16.mxu1 %v7534_v40  ;;  %v7622_v39 = vld [vmem:[%s11187_s1 + $0x500] ss:$16 sps:$4 sm:$0xff]   ;;  %v7625_v40 = vld [vmem:[%s11187_s1 + $0x508] ss:$16 sps:$4 sm:$0xff]  }
  0x67   :  { %4964 = vmatpush1.bf16.msra.mxu0 %v7529_v41  ;;  %5523 = vmatpush1.bf16.msra.mxu1 %v7532_v42  ;;  %v7630_v41 = vld [vmem:[%s11187_s1 + $0x524] ss:$16 sps:$4 sm:$0xff]   ;;  %v7633_v42 = vld [vmem:[%s11187_s1 + $0x52c] ss:$16 sps:$4 sm:$0xff]  }
  0x68   :  { %4965 = vmatprep.subr.bf16.mxu0 %v7537_v43  ;;  %5524 = vmatprep.subr.bf16.mxu1 %v7540_v44  ;;  %v7628_v43 = vld [vmem:[%s11187_s1 + $0x520] ss:$16 sps:$4 sm:$0xff]   ;;  %v7631_v44 = vld [vmem:[%s11187_s1 + $0x528] ss:$16 sps:$4 sm:$0xff]  }
  0x6b   :  { %4966 = vmatpush1.bf16.msra.mxu0 %v7535_v45  ;;  %5525 = vmatpush1.bf16.msra.mxu1 %v7538_v46  ;;  %v7636_v45 = vld [vmem:[%s11187_s1 + $0x544] ss:$16 sps:$4 sm:$0xff]   ;;  %v7639_v46 = vld [vmem:[%s11187_s1 + $0x54c] ss:$16 sps:$4 sm:$0xff]  }
  0x6c   :  { %4967 = vmatprep.subr.bf16.mxu0 %v7543_v47  ;;  %5526 = vmatprep.subr.bf16.mxu1 %v7546_v48  ;;  %v7634_v47 = vld [vmem:[%s11187_s1 + $0x540] ss:$16 sps:$4 sm:$0xff]   ;;  %v7637_v48 = vld [vmem:[%s11187_s1 + $0x548] ss:$16 sps:$4 sm:$0xff]  }
  0x6f   :  { %4968 = vmatpush1.bf16.msra.mxu0 %v7541_v49  ;;  %5527 = vmatpush1.bf16.msra.mxu1 %v7544_v50  ;;  %v7642_v49 = vld [vmem:[%s11187_s1 + $0x564] ss:$16 sps:$4 sm:$0xff]   ;;  %v7645_v50 = vld [vmem:[%s11187_s1 + $0x56c] ss:$16 sps:$4 sm:$0xff]  }
  0x70   :  { %4969 = vmatprep.subr.bf16.mxu0 %v7549_v51  ;;  %5528 = vmatprep.subr.bf16.mxu1 %v7552_v52  ;;  %v7640_v51 = vld [vmem:[%s11187_s1 + $0x560] ss:$16 sps:$4 sm:$0xff]   ;;  %v7643_v52 = vld [vmem:[%s11187_s1 + $0x568] ss:$16 sps:$4 sm:$0xff]  }
  0x73   :  { %4970 = vmatpush1.bf16.msra.mxu0 %v7547_v53  ;;  %5529 = vmatpush1.bf16.msra.mxu1 %v7550_v54  ;;  %v7648_v53 = vld [vmem:[%s11187_s1 + $0x584] ss:$16 sps:$4 sm:$0xff]   ;;  %v7651_v54 = vld [vmem:[%s11187_s1 + $0x58c] ss:$16 sps:$4 sm:$0xff]  }
  0x74   :  { %4971 = vmatprep.subr.bf16.mxu0 %v7555_v55  ;;  %5530 = vmatprep.subr.bf16.mxu1 %v7558_v56  ;;  %v7646_v55 = vld [vmem:[%s11187_s1 + $0x580] ss:$16 sps:$4 sm:$0xff]   ;;  %v7649_v56 = vld [vmem:[%s11187_s1 + $0x588] ss:$16 sps:$4 sm:$0xff]  }
  0x77   :  { %4972 = vmatpush1.bf16.msra.mxu0 %v7553_v57  ;;  %5531 = vmatpush1.bf16.msra.mxu1 %v7556_v58  ;;  %v7654_v57 = vld [vmem:[%s11187_s1 + $0x5a4] ss:$16 sps:$4 sm:$0xff]   ;;  %v7657_v58 = vld [vmem:[%s11187_s1 + $0x5ac] ss:$16 sps:$4 sm:$0xff]  }
  0x78   :  { %4973 = vmatprep.subr.bf16.mxu0 %v7561_v59  ;;  %5532 = vmatprep.subr.bf16.mxu1 %v7564_v60  ;;  %v7652_v59 = vld [vmem:[%s11187_s1 + $0x5a0] ss:$16 sps:$4 sm:$0xff]   ;;  %v7655_v60 = vld [vmem:[%s11187_s1 + $0x5a8] ss:$16 sps:$4 sm:$0xff]  }
  0x7b   :  { %4974 = vmatpush1.bf16.msra.mxu0 %v7559_v61  ;;  %5533 = vmatpush1.bf16.msra.mxu1 %v7562_v62  ;;  %v7660_v61 = vld [vmem:[%s11187_s1 + $0x5c4] ss:$16 sps:$4 sm:$0xff]   ;;  %v7663_v62 = vld [vmem:[%s11187_s1 + $0x5cc] ss:$16 sps:$4 sm:$0xff]  }
  0x7c   :  { %4975 = vmatprep.subr.bf16.mxu0 %v7567_v63  ;;  %5534 = vmatprep.subr.bf16.mxu1 %v7570_v0  ;;  %v7658_v63 = vld [vmem:[%s11187_s1 + $0x5c0] ss:$16 sps:$4 sm:$0xff]   ;;  %v7661_v0 = vld [vmem:[%s11187_s1 + $0x5c8] ss:$16 sps:$4 sm:$0xff]  }
  0x7f   :  { %4976 = vmatpush1.bf16.msra.mxu0 %v7565_v1  ;;  %5535 = vmatpush1.bf16.msra.mxu1 %v7568_v2  ;;  %v7666_v1 = vld [vmem:[%s11187_s1 + $0x5e4] ss:$16 sps:$4 sm:$0xff]   ;;  %v7669_v2 = vld [vmem:[%s11187_s1 + $0x5ec] ss:$16 sps:$4 sm:$0xff]  }
  0x80   :  { %4988 = vmatprep.subr.bf16.mxu0 %v7576_v3  ;;  %5547 = vmatprep.subr.bf16.mxu1 %v7579_v4  ;;  %v7664_v3 = vld [vmem:[%s11187_s1 + $0x5e0] ss:$16 sps:$4 sm:$0xff]   ;;  %v7667_v4 = vld [vmem:[%s11187_s1 + $0x5e8] ss:$16 sps:$4 sm:$0xff]  }
  0x82   :  { %4978 = vmatmul.mubr.bf16.vlgmr.msra.gmra.mrb[0].mxu0 %v7571_v5  ;;  %5537 = vmatmul.mubr.bf16.vlgmr.msra.gmra.mrb[0].mxu1 %v7571_v5  ;;  %v7675_v5 = vld [vmem:[%s11187_s1 + $0x604] ss:$16 sps:$4 sm:$0xff]  }
  0x83   :  { %4989 = vmatpush1.bf16.msra.mxu0 %v7574_v6  ;;  %5548 = vmatpush1.bf16.msra.mxu1 %v7577_v7  ;;  %v7678_v6 = vld [vmem:[%s11187_s1 + $0x60c] ss:$16 sps:$4 sm:$0xff]   ;;  %v7670_v7 = vld [vmem:[%s11188_s0 + $0x10] ss:$100 sps:$4 sm:$0xff]  }
  0x84   :  { %4990 = vmatprep.subr.bf16.mxu0 %v7582_v8  ;;  %5549 = vmatprep.subr.bf16.mxu1 %v7585_v9  ;;  %v7673_v8 = vld [vmem:[%s11187_s1 + $0x600] ss:$16 sps:$4 sm:$0xff]   ;;  %v7676_v9 = vld [vmem:[%s11187_s1 + $0x608] ss:$16 sps:$4 sm:$0xff]  }
  0x85   :  { %5020 = vmatprep.mubr.bf16.mxu0 %v7672_v12  ;;  %5579 = vmatprep.mubr.bf16.mxu1 %v7672_v12  ;;  %v7771_v12 = vld [vmem:[%s11188_s0 + $0x1c] ss:$100 sps:$4 sm:$0xff]  }
  0x87   :  { %4991 = vmatpush1.bf16.msra.mxu0 %v7580_v10  ;;  %5550 = vmatpush1.bf16.msra.mxu1 %v7583_v11  ;;  %v7681_v10 = vld [vmem:[%s11187_s1 + $0x624] ss:$16 sps:$4 sm:$0xff]   ;;  %v7684_v11 = vld [vmem:[%s11187_s1 + $0x62c] ss:$16 sps:$4 sm:$0xff]  }
  0x88   :  { %4992 = vmatprep.subr.bf16.mxu0 %v7588_v13  ;;  %5551 = vmatprep.subr.bf16.mxu1 %v7591_v14  ;;  %v7679_v13 = vld [vmem:[%s11187_s1 + $0x620] ss:$16 sps:$4 sm:$0xff]   ;;  %v7682_v14 = vld [vmem:[%s11187_s1 + $0x628] ss:$16 sps:$4 sm:$0xff]  }
  0x8b   :  { %4993 = vmatpush1.bf16.msra.mxu0 %v7586_v15  ;;  %5552 = vmatpush1.bf16.msra.mxu1 %v7589_v16  ;;  %v7687_v15 = vld [vmem:[%s11187_s1 + $0x644] ss:$16 sps:$4 sm:$0xff]   ;;  %v7690_v16 = vld [vmem:[%s11187_s1 + $0x64c] ss:$16 sps:$4 sm:$0xff]  }
  0x8c   :  { %4994 = vmatprep.subr.bf16.mxu0 %v7594_v17  ;;  %5553 = vmatprep.subr.bf16.mxu1 %v7597_v18  ;;  %v7685_v17 = vld [vmem:[%s11187_s1 + $0x640] ss:$16 sps:$4 sm:$0xff]   ;;  %v7688_v18 = vld [vmem:[%s11187_s1 + $0x648] ss:$16 sps:$4 sm:$0xff]  }
  0x8f   :  { %4995 = vmatpush1.bf16.msra.mxu0 %v7592_v19  ;;  %5554 = vmatpush1.bf16.msra.mxu1 %v7595_v20  ;;  %v7693_v19 = vld [vmem:[%s11187_s1 + $0x664] ss:$16 sps:$4 sm:$0xff]   ;;  %v7696_v20 = vld [vmem:[%s11187_s1 + $0x66c] ss:$16 sps:$4 sm:$0xff]  }
  0x90   :  { %4996 = vmatprep.subr.bf16.mxu0 %v7600_v21  ;;  %5555 = vmatprep.subr.bf16.mxu1 %v7603_v22  ;;  %v7691_v21 = vld [vmem:[%s11187_s1 + $0x660] ss:$16 sps:$4 sm:$0xff]   ;;  %v7694_v22 = vld [vmem:[%s11187_s1 + $0x668] ss:$16 sps:$4 sm:$0xff]  }
  0x93   :  { %4997 = vmatpush1.bf16.msra.mxu0 %v7598_v23  ;;  %5556 = vmatpush1.bf16.msra.mxu1 %v7601_v24  ;;  %v7699_v23 = vld [vmem:[%s11187_s1 + $0x684] ss:$16 sps:$4 sm:$0xff]   ;;  %v7702_v24 = vld [vmem:[%s11187_s1 + $0x68c] ss:$16 sps:$4 sm:$0xff]  }
  0x94   :  { %4998 = vmatprep.subr.bf16.mxu0 %v7606_v25  ;;  %5557 = vmatprep.subr.bf16.mxu1 %v7609_v26  ;;  %v7697_v25 = vld [vmem:[%s11187_s1 + $0x680] ss:$16 sps:$4 sm:$0xff]   ;;  %v7700_v26 = vld [vmem:[%s11187_s1 + $0x688] ss:$16 sps:$4 sm:$0xff]  }
  0x97   :  { %4999 = vmatpush1.bf16.msra.mxu0 %v7604_v27  ;;  %5558 = vmatpush1.bf16.msra.mxu1 %v7607_v28  ;;  %v7705_v27 = vld [vmem:[%s11187_s1 + $0x6a4] ss:$16 sps:$4 sm:$0xff]   ;;  %v7708_v28 = vld [vmem:[%s11187_s1 + $0x6ac] ss:$16 sps:$4 sm:$0xff]  }
  0x98   :  { %5000 = vmatprep.subr.bf16.mxu0 %v7612_v29  ;;  %5559 = vmatprep.subr.bf16.mxu1 %v7615_v30  ;;  %v7703_v29 = vld [vmem:[%s11187_s1 + $0x6a0] ss:$16 sps:$4 sm:$0xff]   ;;  %v7706_v30 = vld [vmem:[%s11187_s1 + $0x6a8] ss:$16 sps:$4 sm:$0xff]  }
  0x9b   :  { %5001 = vmatpush1.bf16.msra.mxu0 %v7610_v31  ;;  %5560 = vmatpush1.bf16.msra.mxu1 %v7613_v32  ;;  %v7711_v31 = vld [vmem:[%s11187_s1 + $0x6c4] ss:$16 sps:$4 sm:$0xff]   ;;  %v7714_v32 = vld [vmem:[%s11187_s1 + $0x6cc] ss:$16 sps:$4 sm:$0xff]  }
  0x9c   :  { %5002 = vmatprep.subr.bf16.mxu0 %v7618_v33  ;;  %5561 = vmatprep.subr.bf16.mxu1 %v7621_v34  ;;  %v7709_v33 = vld [vmem:[%s11187_s1 + $0x6c0] ss:$16 sps:$4 sm:$0xff]   ;;  %v7712_v34 = vld [vmem:[%s11187_s1 + $0x6c8] ss:$16 sps:$4 sm:$0xff]  }
  0x9f   :  { %5003 = vmatpush1.bf16.msra.mxu0 %v7616_v35  ;;  %5562 = vmatpush1.bf16.msra.mxu1 %v7619_v36  ;;  %v7717_v35 = vld [vmem:[%s11187_s1 + $0x6e4] ss:$16 sps:$4 sm:$0xff]   ;;  %v7720_v36 = vld [vmem:[%s11187_s1 + $0x6ec] ss:$16 sps:$4 sm:$0xff]  }
  0xa0   :  { %5004 = vmatprep.subr.bf16.mxu0 %v7624_v37  ;;  %5563 = vmatprep.subr.bf16.mxu1 %v7627_v38  ;;  %v7715_v37 = vld [vmem:[%s11187_s1 + $0x6e0] ss:$16 sps:$4 sm:$0xff]   ;;  %v7718_v38 = vld [vmem:[%s11187_s1 + $0x6e8] ss:$16 sps:$4 sm:$0xff]  }
  0xa3   :  { %5005 = vmatpush1.bf16.msra.mxu0 %v7622_v39  ;;  %5564 = vmatpush1.bf16.msra.mxu1 %v7625_v40  ;;  %v7723_v39 = vld [vmem:[%s11187_s1 + $0x704] ss:$16 sps:$4 sm:$0xff]   ;;  %v7726_v40 = vld [vmem:[%s11187_s1 + $0x70c] ss:$16 sps:$4 sm:$0xff]  }
  0xa4   :  { %5006 = vmatprep.subr.bf16.mxu0 %v7630_v41  ;;  %5565 = vmatprep.subr.bf16.mxu1 %v7633_v42  ;;  %v7721_v41 = vld [vmem:[%s11187_s1 + $0x700] ss:$16 sps:$4 sm:$0xff]   ;;  %v7724_v42 = vld [vmem:[%s11187_s1 + $0x708] ss:$16 sps:$4 sm:$0xff]  }
  0xa7   :  { %5007 = vmatpush1.bf16.msra.mxu0 %v7628_v43  ;;  %5566 = vmatpush1.bf16.msra.mxu1 %v7631_v44  ;;  %v7729_v43 = vld [vmem:[%s11187_s1 + $0x724] ss:$16 sps:$4 sm:$0xff]   ;;  %v7732_v44 = vld [vmem:[%s11187_s1 + $0x72c] ss:$16 sps:$4 sm:$0xff]  }
  0xa8   :  { %5008 = vmatprep.subr.bf16.mxu0 %v7636_v45  ;;  %5567 = vmatprep.subr.bf16.mxu1 %v7639_v46  ;;  %v7727_v45 = vld [vmem:[%s11187_s1 + $0x720] ss:$16 sps:$4 sm:$0xff]   ;;  %v7730_v46 = vld [vmem:[%s11187_s1 + $0x728] ss:$16 sps:$4 sm:$0xff]  }
  0xab   :  { %5009 = vmatpush1.bf16.msra.mxu0 %v7634_v47  ;;  %5568 = vmatpush1.bf16.msra.mxu1 %v7637_v48  ;;  %v7735_v47 = vld [vmem:[%s11187_s1 + $0x744] ss:$16 sps:$4 sm:$0xff]   ;;  %v7738_v48 = vld [vmem:[%s11187_s1 + $0x74c] ss:$16 sps:$4 sm:$0xff]  }
  0xac   :  { %5010 = vmatprep.subr.bf16.mxu0 %v7642_v49  ;;  %5569 = vmatprep.subr.bf16.mxu1 %v7645_v50  ;;  %v7733_v49 = vld [vmem:[%s11187_s1 + $0x740] ss:$16 sps:$4 sm:$0xff]   ;;  %v7736_v50 = vld [vmem:[%s11187_s1 + $0x748] ss:$16 sps:$4 sm:$0xff]  }
  0xaf   :  { %5011 = vmatpush1.bf16.msra.mxu0 %v7640_v51  ;;  %5570 = vmatpush1.bf16.msra.mxu1 %v7643_v52  ;;  %v7741_v51 = vld [vmem:[%s11187_s1 + $0x764] ss:$16 sps:$4 sm:$0xff]   ;;  %v7744_v52 = vld [vmem:[%s11187_s1 + $0x76c] ss:$16 sps:$4 sm:$0xff]  }
  0xb0   :  { %5012 = vmatprep.subr.bf16.mxu0 %v7648_v53  ;;  %5571 = vmatprep.subr.bf16.mxu1 %v7651_v54  ;;  %v7739_v53 = vld [vmem:[%s11187_s1 + $0x760] ss:$16 sps:$4 sm:$0xff]   ;;  %v7742_v54 = vld [vmem:[%s11187_s1 + $0x768] ss:$16 sps:$4 sm:$0xff]  }
  0xb3   :  { %5013 = vmatpush1.bf16.msra.mxu0 %v7646_v55  ;;  %5572 = vmatpush1.bf16.msra.mxu1 %v7649_v56  ;;  %v7747_v55 = vld [vmem:[%s11187_s1 + $0x784] ss:$16 sps:$4 sm:$0xff]   ;;  %v7750_v56 = vld [vmem:[%s11187_s1 + $0x78c] ss:$16 sps:$4 sm:$0xff]  }
  0xb4   :  { %5014 = vmatprep.subr.bf16.mxu0 %v7654_v57  ;;  %5573 = vmatprep.subr.bf16.mxu1 %v7657_v58  ;;  %v7745_v57 = vld [vmem:[%s11187_s1 + $0x780] ss:$16 sps:$4 sm:$0xff]   ;;  %v7748_v58 = vld [vmem:[%s11187_s1 + $0x788] ss:$16 sps:$4 sm:$0xff]  }
  0xb7   :  { %5015 = vmatpush1.bf16.msra.mxu0 %v7652_v59  ;;  %5574 = vmatpush1.bf16.msra.mxu1 %v7655_v60  ;;  %v7753_v59 = vld [vmem:[%s11187_s1 + $0x7a4] ss:$16 sps:$4 sm:$0xff]   ;;  %v7756_v60 = vld [vmem:[%s11187_s1 + $0x7ac] ss:$16 sps:$4 sm:$0xff]  }
  0xb8   :  { %5016 = vmatprep.subr.bf16.mxu0 %v7660_v61  ;;  %5575 = vmatprep.subr.bf16.mxu1 %v7663_v62  ;;  %v7751_v61 = vld [vmem:[%s11187_s1 + $0x7a0] ss:$16 sps:$4 sm:$0xff]   ;;  %v7754_v62 = vld [vmem:[%s11187_s1 + $0x7a8] ss:$16 sps:$4 sm:$0xff]  }
  0xbb   :  { %5017 = vmatpush1.bf16.msra.mxu0 %v7658_v63  ;;  %5576 = vmatpush1.bf16.msra.mxu1 %v7661_v0  ;;  %v7759_v63 = vld [vmem:[%s11187_s1 + $0x7c4] ss:$16 sps:$4 sm:$0xff]   ;;  %v7762_v0 = vld [vmem:[%s11187_s1 + $0x7cc] ss:$16 sps:$4 sm:$0xff]  }
  0xbc   :  { %5018 = vmatprep.subr.bf16.mxu0 %v7666_v1  ;;  %5577 = vmatprep.subr.bf16.mxu1 %v7669_v2  ;;  %v7757_v1 = vld [vmem:[%s11187_s1 + $0x7c0] ss:$16 sps:$4 sm:$0xff]   ;;  %v7760_v2 = vld [vmem:[%s11187_s1 + $0x7c8] ss:$16 sps:$4 sm:$0xff]  }
  0xbf   :  { %5019 = vmatpush1.bf16.msra.mxu0 %v7664_v3  ;;  %5578 = vmatpush1.bf16.msra.mxu1 %v7667_v4  ;;  %v7765_v3 = vld [vmem:[%s11187_s1 + $0x7e4] ss:$16 sps:$4 sm:$0xff]   ;;  %v7768_v4 = vld [vmem:[%s11187_s1 + $0x7ec] ss:$16 sps:$4 sm:$0xff]  }
  0xc0   :  { %5031 = vmatprep.subr.bf16.mxu0 %v7675_v5  ;;  %5590 = vmatprep.subr.bf16.mxu1 %v7678_v6  ;;  %v7763_v5 = vld [vmem:[%s11187_s1 + $0x7e0] ss:$16 sps:$4 sm:$0xff]   ;;  %v7766_v6 = vld [vmem:[%s11187_s1 + $0x7e8] ss:$16 sps:$4 sm:$0xff]  }
  0xc2   :  { %5021 = vmatmul.mubr.bf16.vlgmr.msra.gmra.mrb[0].mxu0 %v7670_v7  ;;  %5580 = vmatmul.mubr.bf16.vlgmr.msra.gmra.mrb[0].mxu1 %v7670_v7  ;;  %v7774_v7 = vld [vmem:[%s11187_s1 + $0x804] ss:$16 sps:$4 sm:$0xff]  }
  0xc3   :  { %5032 = vmatpush1.bf16.msra.mxu0 %v7673_v8  ;;  %5591 = vmatpush1.bf16.msra.mxu1 %v7676_v9  ;;  %v7777_v8 = vld [vmem:[%s11187_s1 + $0x80c] ss:$16 sps:$4 sm:$0xff]  }
  0xc4   :  { %5033 = vmatprep.subr.bf16.mxu0 %v7681_v10  ;;  %5592 = vmatprep.subr.bf16.mxu1 %v7684_v11  ;;  %v7769_v9 = vld [vmem:[%s11188_s0 + $0x18] ss:$100 sps:$4 sm:$0xff]   ;;  %v7772_v10 = vld [vmem:[%s11187_s1 + $0x800] ss:$16 sps:$4 sm:$0xff]  }
  0xc5   :  { %5063 = vmatprep.mubr.bf16.mxu0 %v7771_v12  ;;  %5622 = vmatprep.mubr.bf16.mxu1 %v7771_v12  ;;  %v7775_v11 = vld [vmem:[%s11187_s1 + $0x808] ss:$16 sps:$4 sm:$0xff]   ;;  %v7780_v12 = vld [vmem:[%s11187_s1 + $0x824] ss:$16 sps:$4 sm:$0xff]  }
  0xc7   :  { %5034 = vmatpush1.bf16.msra.mxu0 %v7679_v13  ;;  %5593 = vmatpush1.bf16.msra.mxu1 %v7682_v14  ;;  %v7783_v13 = vld [vmem:[%s11187_s1 + $0x82c] ss:$16 sps:$4 sm:$0xff]   ;;  %v7870_v14 = vld [vmem:[%s11188_s0 + $0x24] ss:$100 sps:$4 sm:$0xff]  }
  0xc8   :  { %5035 = vmatprep.subr.bf16.mxu0 %v7687_v15  ;;  %5594 = vmatprep.subr.bf16.mxu1 %v7690_v16  ;;  %v7778_v15 = vld [vmem:[%s11187_s1 + $0x820] ss:$16 sps:$4 sm:$0xff]   ;;  %v7781_v16 = vld [vmem:[%s11187_s1 + $0x828] ss:$16 sps:$4 sm:$0xff]  }
  0xcb   :  { %5036 = vmatpush1.bf16.msra.mxu0 %v7685_v17  ;;  %5595 = vmatpush1.bf16.msra.mxu1 %v7688_v18  ;;  %v7786_v17 = vld [vmem:[%s11187_s1 + $0x844] ss:$16 sps:$4 sm:$0xff]   ;;  %v7789_v18 = vld [vmem:[%s11187_s1 + $0x84c] ss:$16 sps:$4 sm:$0xff]  }
  0xcc   :  { %5037 = vmatprep.subr.bf16.mxu0 %v7693_v19  ;;  %5596 = vmatprep.subr.bf16.mxu1 %v7696_v20  ;;  %v7784_v19 = vld [vmem:[%s11187_s1 + $0x840] ss:$16 sps:$4 sm:$0xff]   ;;  %v7787_v20 = vld [vmem:[%s11187_s1 + $0x848] ss:$16 sps:$4 sm:$0xff]  }
  0xcf   :  { %5038 = vmatpush1.bf16.msra.mxu0 %v7691_v21  ;;  %5597 = vmatpush1.bf16.msra.mxu1 %v7694_v22  ;;  %v7792_v21 = vld [vmem:[%s11187_s1 + $0x864] ss:$16 sps:$4 sm:$0xff]   ;;  %v7795_v22 = vld [vmem:[%s11187_s1 + $0x86c] ss:$16 sps:$4 sm:$0xff]  }
  0xd0   :  { %5039 = vmatprep.subr.bf16.mxu0 %v7699_v23  ;;  %5598 = vmatprep.subr.bf16.mxu1 %v7702_v24  ;;  %v7790_v23 = vld [vmem:[%s11187_s1 + $0x860] ss:$16 sps:$4 sm:$0xff]   ;;  %v7793_v24 = vld [vmem:[%s11187_s1 + $0x868] ss:$16 sps:$4 sm:$0xff]  }
  0xd3   :  { %5040 = vmatpush1.bf16.msra.mxu0 %v7697_v25  ;;  %5599 = vmatpush1.bf16.msra.mxu1 %v7700_v26  ;;  %v7798_v25 = vld [vmem:[%s11187_s1 + $0x884] ss:$16 sps:$4 sm:$0xff]   ;;  %v7801_v26 = vld [vmem:[%s11187_s1 + $0x88c] ss:$16 sps:$4 sm:$0xff]  }
  0xd4   :  { %5041 = vmatprep.subr.bf16.mxu0 %v7705_v27  ;;  %5600 = vmatprep.subr.bf16.mxu1 %v7708_v28  ;;  %v7796_v27 = vld [vmem:[%s11187_s1 + $0x880] ss:$16 sps:$4 sm:$0xff]   ;;  %v7799_v28 = vld [vmem:[%s11187_s1 + $0x888] ss:$16 sps:$4 sm:$0xff]  }
  0xd7   :  { %5042 = vmatpush1.bf16.msra.mxu0 %v7703_v29  ;;  %5601 = vmatpush1.bf16.msra.mxu1 %v7706_v30  ;;  %v7804_v29 = vld [vmem:[%s11187_s1 + $0x8a4] ss:$16 sps:$4 sm:$0xff]   ;;  %v7807_v30 = vld [vmem:[%s11187_s1 + $0x8ac] ss:$16 sps:$4 sm:$0xff]  }
  0xd8   :  { %5043 = vmatprep.subr.bf16.mxu0 %v7711_v31  ;;  %5602 = vmatprep.subr.bf16.mxu1 %v7714_v32  ;;  %v7802_v31 = vld [vmem:[%s11187_s1 + $0x8a0] ss:$16 sps:$4 sm:$0xff]   ;;  %v7805_v32 = vld [vmem:[%s11187_s1 + $0x8a8] ss:$16 sps:$4 sm:$0xff]  }
  0xdb   :  { %5044 = vmatpush1.bf16.msra.mxu0 %v7709_v33  ;;  %5603 = vmatpush1.bf16.msra.mxu1 %v7712_v34  ;;  %v7810_v33 = vld [vmem:[%s11187_s1 + $0x8c4] ss:$16 sps:$4 sm:$0xff]   ;;  %v7813_v34 = vld [vmem:[%s11187_s1 + $0x8cc] ss:$16 sps:$4 sm:$0xff]  }
  0xdc   :  { %5045 = vmatprep.subr.bf16.mxu0 %v7717_v35  ;;  %5604 = vmatprep.subr.bf16.mxu1 %v7720_v36  ;;  %v7808_v35 = vld [vmem:[%s11187_s1 + $0x8c0] ss:$16 sps:$4 sm:$0xff]   ;;  %v7811_v36 = vld [vmem:[%s11187_s1 + $0x8c8] ss:$16 sps:$4 sm:$0xff]  }
  0xdf   :  { %5046 = vmatpush1.bf16.msra.mxu0 %v7715_v37  ;;  %5605 = vmatpush1.bf16.msra.mxu1 %v7718_v38  ;;  %v7816_v37 = vld [vmem:[%s11187_s1 + $0x8e4] ss:$16 sps:$4 sm:$0xff]   ;;  %v7819_v38 = vld [vmem:[%s11187_s1 + $0x8ec] ss:$16 sps:$4 sm:$0xff]  }
  0xe0   :  { %5047 = vmatprep.subr.bf16.mxu0 %v7723_v39  ;;  %5606 = vmatprep.subr.bf16.mxu1 %v7726_v40  ;;  %v7814_v39 = vld [vmem:[%s11187_s1 + $0x8e0] ss:$16 sps:$4 sm:$0xff]   ;;  %v7817_v40 = vld [vmem:[%s11187_s1 + $0x8e8] ss:$16 sps:$4 sm:$0xff]  }
  0xe3   :  { %5048 = vmatpush1.bf16.msra.mxu0 %v7721_v41  ;;  %5607 = vmatpush1.bf16.msra.mxu1 %v7724_v42  ;;  %v7822_v41 = vld [vmem:[%s11187_s1 + $0x904] ss:$16 sps:$4 sm:$0xff]   ;;  %v7825_v42 = vld [vmem:[%s11187_s1 + $0x90c] ss:$16 sps:$4 sm:$0xff]  }
  0xe4   :  { %5049 = vmatprep.subr.bf16.mxu0 %v7729_v43  ;;  %5608 = vmatprep.subr.bf16.mxu1 %v7732_v44  ;;  %v7820_v43 = vld [vmem:[%s11187_s1 + $0x900] ss:$16 sps:$4 sm:$0xff]   ;;  %v7823_v44 = vld [vmem:[%s11187_s1 + $0x908] ss:$16 sps:$4 sm:$0xff]  }
  0xe7   :  { %5050 = vmatpush1.bf16.msra.mxu0 %v7727_v45  ;;  %5609 = vmatpush1.bf16.msra.mxu1 %v7730_v46  ;;  %v7828_v45 = vld [vmem:[%s11187_s1 + $0x924] ss:$16 sps:$4 sm:$0xff]   ;;  %v7831_v46 = vld [vmem:[%s11187_s1 + $0x92c] ss:$16 sps:$4 sm:$0xff]  }
  0xe8   :  { %5051 = vmatprep.subr.bf16.mxu0 %v7735_v47  ;;  %5610 = vmatprep.subr.bf16.mxu1 %v7738_v48  ;;  %v7826_v47 = vld [vmem:[%s11187_s1 + $0x920] ss:$16 sps:$4 sm:$0xff]   ;;  %v7829_v48 = vld [vmem:[%s11187_s1 + $0x928] ss:$16 sps:$4 sm:$0xff]  }
  0xeb   :  { %5052 = vmatpush1.bf16.msra.mxu0 %v7733_v49  ;;  %5611 = vmatpush1.bf16.msra.mxu1 %v7736_v50  ;;  %v7834_v49 = vld [vmem:[%s11187_s1 + $0x944] ss:$16 sps:$4 sm:$0xff]   ;;  %v7837_v50 = vld [vmem:[%s11187_s1 + $0x94c] ss:$16 sps:$4 sm:$0xff]  }
  0xec   :  { %5053 = vmatprep.subr.bf16.mxu0 %v7741_v51  ;;  %5612 = vmatprep.subr.bf16.mxu1 %v7744_v52  ;;  %v7832_v51 = vld [vmem:[%s11187_s1 + $0x940] ss:$16 sps:$4 sm:$0xff]   ;;  %v7835_v52 = vld [vmem:[%s11187_s1 + $0x948] ss:$16 sps:$4 sm:$0xff]  }
  0xef   :  { %5054 = vmatpush1.bf16.msra.mxu0 %v7739_v53  ;;  %5613 = vmatpush1.bf16.msra.mxu1 %v7742_v54  ;;  %v7840_v53 = vld [vmem:[%s11187_s1 + $0x964] ss:$16 sps:$4 sm:$0xff]   ;;  %v7843_v54 = vld [vmem:[%s11187_s1 + $0x96c] ss:$16 sps:$4 sm:$0xff]  }
  0xf0   :  { %5055 = vmatprep.subr.bf16.mxu0 %v7747_v55  ;;  %5614 = vmatprep.subr.bf16.mxu1 %v7750_v56  ;;  %v7838_v55 = vld [vmem:[%s11187_s1 + $0x960] ss:$16 sps:$4 sm:$0xff]   ;;  %v7841_v56 = vld [vmem:[%s11187_s1 + $0x968] ss:$16 sps:$4 sm:$0xff]  }
  0xf3   :  { %5056 = vmatpush1.bf16.msra.mxu0 %v7745_v57  ;;  %5615 = vmatpush1.bf16.msra.mxu1 %v7748_v58  ;;  %v7846_v57 = vld [vmem:[%s11187_s1 + $0x984] ss:$16 sps:$4 sm:$0xff]   ;;  %v7849_v58 = vld [vmem:[%s11187_s1 + $0x98c] ss:$16 sps:$4 sm:$0xff]  }
  0xf4   :  { %5057 = vmatprep.subr.bf16.mxu0 %v7753_v59  ;;  %5616 = vmatprep.subr.bf16.mxu1 %v7756_v60  ;;  %v7844_v59 = vld [vmem:[%s11187_s1 + $0x980] ss:$16 sps:$4 sm:$0xff]   ;;  %v7847_v60 = vld [vmem:[%s11187_s1 + $0x988] ss:$16 sps:$4 sm:$0xff]  }
  0xf7   :  { %5058 = vmatpush1.bf16.msra.mxu0 %v7751_v61  ;;  %5617 = vmatpush1.bf16.msra.mxu1 %v7754_v62  ;;  %v7852_v61 = vld [vmem:[%s11187_s1 + $0x9a4] ss:$16 sps:$4 sm:$0xff]   ;;  %v7855_v62 = vld [vmem:[%s11187_s1 + $0x9ac] ss:$16 sps:$4 sm:$0xff]  }
  0xf8   :  { %5059 = vmatprep.subr.bf16.mxu0 %v7759_v63  ;;  %5618 = vmatprep.subr.bf16.mxu1 %v7762_v0  ;;  %v7850_v63 = vld [vmem:[%s11187_s1 + $0x9a0] ss:$16 sps:$4 sm:$0xff]   ;;  %v7853_v0 = vld [vmem:[%s11187_s1 + $0x9a8] ss:$16 sps:$4 sm:$0xff]  }
  0xfb   :  { %5060 = vmatpush1.bf16.msra.mxu0 %v7757_v1  ;;  %5619 = vmatpush1.bf16.msra.mxu1 %v7760_v2  ;;  %v7858_v1 = vld [vmem:[%s11187_s1 + $0x9c4] ss:$16 sps:$4 sm:$0xff]   ;;  %v7861_v2 = vld [vmem:[%s11187_s1 + $0x9cc] ss:$16 sps:$4 sm:$0xff]  }
  0xfc   :  { %5061 = vmatprep.subr.bf16.mxu0 %v7765_v3  ;;  %5620 = vmatprep.subr.bf16.mxu1 %v7768_v4  ;;  %v7856_v3 = vld [vmem:[%s11187_s1 + $0x9c0] ss:$16 sps:$4 sm:$0xff]   ;;  %v7859_v4 = vld [vmem:[%s11187_s1 + $0x9c8] ss:$16 sps:$4 sm:$0xff]  }
  0xff   :  { %5062 = vmatpush1.bf16.msra.mxu0 %v7763_v5  ;;  %5621 = vmatpush1.bf16.msra.mxu1 %v7766_v6  ;;  %v7864_v5 = vld [vmem:[%s11187_s1 + $0x9e4] ss:$16 sps:$4 sm:$0xff]   ;;  %v7867_v6 = vld [vmem:[%s11187_s1 + $0x9ec] ss:$16 sps:$4 sm:$0xff]  }
 0x100   :  { %5074 = vmatprep.subr.bf16.mxu0 %v7774_v7  ;;  %5633 = vmatprep.subr.bf16.mxu1 %v7777_v8  ;;  %v7862_v7 = vld [vmem:[%s11187_s1 + $0x9e0] ss:$16 sps:$4 sm:$0xff]   ;;  %v7865_v8 = vld [vmem:[%s11187_s1 + $0x9e8] ss:$16 sps:$4 sm:$0xff]  }
 0x102   :  { %5064 = vmatmul.mubr.bf16.vlgmr.msra.gmra.mrb[0].mxu0 %v7769_v9  ;;  %5623 = vmatmul.mubr.bf16.vlgmr.msra.gmra.mrb[0].mxu1 %v7769_v9  ;;  %v7868_v9 = vld [vmem:[%s11188_s0 + $0x20] ss:$100 sps:$4 sm:$0xff]  }
 0x103   :  { %5075 = vmatpush1.bf16.msra.mxu0 %v7772_v10  ;;  %5634 = vmatpush1.bf16.msra.mxu1 %v7775_v11  ;;  %v7873_v10 = vld [vmem:[%s11187_s1 + $0xa04] ss:$16 sps:$4 sm:$0xff]   ;;  %v7876_v11 = vld [vmem:[%s11187_s1 + $0xa0c] ss:$16 sps:$4 sm:$0xff]  }
 0x104   :  { %5076 = vmatprep.subr.bf16.mxu0 %v7780_v12  ;;  %5635 = vmatprep.subr.bf16.mxu1 %v7783_v13  ;;  %v7871_v12 = vld [vmem:[%s11187_s1 + $0xa00] ss:$16 sps:$4 sm:$0xff]   ;;  %v7874_v13 = vld [vmem:[%s11187_s1 + $0xa08] ss:$16 sps:$4 sm:$0xff]  }
 0x105   :  { %5106 = vmatprep.mubr.bf16.mxu0 %v7870_v14  ;;  %5665 = vmatprep.mubr.bf16.mxu1 %v7870_v14  ;;  %v7879_v14 = vld [vmem:[%s11187_s1 + $0xa24] ss:$16 sps:$4 sm:$0xff]  }
 0x107   :  { %5077 = vmatpush1.bf16.msra.mxu0 %v7778_v15  ;;  %5636 = vmatpush1.bf16.msra.mxu1 %v7781_v16  ;;  %v7882_v15 = vld [vmem:[%s11187_s1 + $0xa2c] ss:$16 sps:$4 sm:$0xff]  }
 0x108   :  { %5078 = vmatprep.subr.bf16.mxu0 %v7786_v17  ;;  %5637 = vmatprep.subr.bf16.mxu1 %v7789_v18  ;;  %v7969_v16 = vld [vmem:[%s11188_s0 + $0x2c] ss:$100 sps:$4 sm:$0xff]   ;;  %v7880_v18 = vld [vmem:[%s11187_s1 + $0xa28] ss:$16 sps:$4 sm:$0xff]  }
 0x109   :  { %v7877_v17 = vld [vmem:[%s11187_s1 + $0xa20] ss:$16 sps:$4 sm:$0xff]  }
 0x10b   :  { %5079 = vmatpush1.bf16.msra.mxu0 %v7784_v19  ;;  %5638 = vmatpush1.bf16.msra.mxu1 %v7787_v20  ;;  %v7885_v19 = vld [vmem:[%s11187_s1 + $0xa44] ss:$16 sps:$4 sm:$0xff]   ;;  %v7888_v20 = vld [vmem:[%s11187_s1 + $0xa4c] ss:$16 sps:$4 sm:$0xff]  }
 0x10c   :  { %5080 = vmatprep.subr.bf16.mxu0 %v7792_v21  ;;  %5639 = vmatprep.subr.bf16.mxu1 %v7795_v22  ;;  %v7883_v21 = vld [vmem:[%s11187_s1 + $0xa40] ss:$16 sps:$4 sm:$0xff]   ;;  %v7886_v22 = vld [vmem:[%s11187_s1 + $0xa48] ss:$16 sps:$4 sm:$0xff]  }
 0x10f   :  { %5081 = vmatpush1.bf16.msra.mxu0 %v7790_v23  ;;  %5640 = vmatpush1.bf16.msra.mxu1 %v7793_v24  ;;  %v7891_v23 = vld [vmem:[%s11187_s1 + $0xa64] ss:$16 sps:$4 sm:$0xff]   ;;  %v7894_v24 = vld [vmem:[%s11187_s1 + $0xa6c] ss:$16 sps:$4 sm:$0xff]  }
 0x110   :  { %5082 = vmatprep.subr.bf16.mxu0 %v7798_v25  ;;  %5641 = vmatprep.subr.bf16.mxu1 %v7801_v26  ;;  %v7889_v25 = vld [vmem:[%s11187_s1 + $0xa60] ss:$16 sps:$4 sm:$0xff]   ;;  %v7892_v26 = vld [vmem:[%s11187_s1 + $0xa68] ss:$16 sps:$4 sm:$0xff]  }
 0x113   :  { %5083 = vmatpush1.bf16.msra.mxu0 %v7796_v27  ;;  %5642 = vmatpush1.bf16.msra.mxu1 %v7799_v28  ;;  %v7897_v27 = vld [vmem:[%s11187_s1 + $0xa84] ss:$16 sps:$4 sm:$0xff]   ;;  %v7900_v28 = vld [vmem:[%s11187_s1 + $0xa8c] ss:$16 sps:$4 sm:$0xff]  }
 0x114   :  { %5084 = vmatprep.subr.bf16.mxu0 %v7804_v29  ;;  %5643 = vmatprep.subr.bf16.mxu1 %v7807_v30  ;;  %v7895_v29 = vld [vmem:[%s11187_s1 + $0xa80] ss:$16 sps:$4 sm:$0xff]   ;;  %v7898_v30 = vld [vmem:[%s11187_s1 + $0xa88] ss:$16 sps:$4 sm:$0xff]  }
 0x117   :  { %5085 = vmatpush1.bf16.msra.mxu0 %v7802_v31  ;;  %5644 = vmatpush1.bf16.msra.mxu1 %v7805_v32  ;;  %v7903_v31 = vld [vmem:[%s11187_s1 + $0xaa4] ss:$16 sps:$4 sm:$0xff]   ;;  %v7906_v32 = vld [vmem:[%s11187_s1 + $0xaac] ss:$16 sps:$4 sm:$0xff]  }
 0x118   :  { %5086 = vmatprep.subr.bf16.mxu0 %v7810_v33  ;;  %5645 = vmatprep.subr.bf16.mxu1 %v7813_v34  ;;  %v7901_v33 = vld [vmem:[%s11187_s1 + $0xaa0] ss:$16 sps:$4 sm:$0xff]   ;;  %v7904_v34 = vld [vmem:[%s11187_s1 + $0xaa8] ss:$16 sps:$4 sm:$0xff]  }
 0x11b   :  { %5087 = vmatpush1.bf16.msra.mxu0 %v7808_v35  ;;  %5646 = vmatpush1.bf16.msra.mxu1 %v7811_v36  ;;  %v7909_v35 = vld [vmem:[%s11187_s1 + $0xac4] ss:$16 sps:$4 sm:$0xff]   ;;  %v7912_v36 = vld [vmem:[%s11187_s1 + $0xacc] ss:$16 sps:$4 sm:$0xff]  }
 0x11c   :  { %5088 = vmatprep.subr.bf16.mxu0 %v7816_v37  ;;  %5647 = vmatprep.subr.bf16.mxu1 %v7819_v38  ;;  %v7907_v37 = vld [vmem:[%s11187_s1 + $0xac0] ss:$16 sps:$4 sm:$0xff]   ;;  %v7910_v38 = vld [vmem:[%s11187_s1 + $0xac8] ss:$16 sps:$4 sm:$0xff]  }
 0x11f   :  { %5089 = vmatpush1.bf16.msra.mxu0 %v7814_v39  ;;  %5648 = vmatpush1.bf16.msra.mxu1 %v7817_v40  ;;  %v7915_v39 = vld [vmem:[%s11187_s1 + $0xae4] ss:$16 sps:$4 sm:$0xff]   ;;  %v7918_v40 = vld [vmem:[%s11187_s1 + $0xaec] ss:$16 sps:$4 sm:$0xff]  }
 0x120   :  { %5090 = vmatprep.subr.bf16.mxu0 %v7822_v41  ;;  %5649 = vmatprep.subr.bf16.mxu1 %v7825_v42  ;;  %v7913_v41 = vld [vmem:[%s11187_s1 + $0xae0] ss:$16 sps:$4 sm:$0xff]   ;;  %v7916_v42 = vld [vmem:[%s11187_s1 + $0xae8] ss:$16 sps:$4 sm:$0xff]  }
 0x123   :  { %5091 = vmatpush1.bf16.msra.mxu0 %v7820_v43  ;;  %5650 = vmatpush1.bf16.msra.mxu1 %v7823_v44  ;;  %v7921_v43 = vld [vmem:[%s11187_s1 + $0xb04] ss:$16 sps:$4 sm:$0xff]   ;;  %v7924_v44 = vld [vmem:[%s11187_s1 + $0xb0c] ss:$16 sps:$4 sm:$0xff]  }
 0x124   :  { %5092 = vmatprep.subr.bf16.mxu0 %v7828_v45  ;;  %5651 = vmatprep.subr.bf16.mxu1 %v7831_v46  ;;  %v7919_v45 = vld [vmem:[%s11187_s1 + $0xb00] ss:$16 sps:$4 sm:$0xff]   ;;  %v7922_v46 = vld [vmem:[%s11187_s1 + $0xb08] ss:$16 sps:$4 sm:$0xff]  }
 0x127   :  { %5093 = vmatpush1.bf16.msra.mxu0 %v7826_v47  ;;  %5652 = vmatpush1.bf16.msra.mxu1 %v7829_v48  ;;  %v7927_v47 = vld [vmem:[%s11187_s1 + $0xb24] ss:$16 sps:$4 sm:$0xff]   ;;  %v7930_v48 = vld [vmem:[%s11187_s1 + $0xb2c] ss:$16 sps:$4 sm:$0xff]  }
 0x128   :  { %5094 = vmatprep.subr.bf16.mxu0 %v7834_v49  ;;  %5653 = vmatprep.subr.bf16.mxu1 %v7837_v50  ;;  %v7925_v49 = vld [vmem:[%s11187_s1 + $0xb20] ss:$16 sps:$4 sm:$0xff]   ;;  %v7928_v50 = vld [vmem:[%s11187_s1 + $0xb28] ss:$16 sps:$4 sm:$0xff]  }
 0x12b   :  { %5095 = vmatpush1.bf16.msra.mxu0 %v7832_v51  ;;  %5654 = vmatpush1.bf16.msra.mxu1 %v7835_v52  ;;  %v7933_v51 = vld [vmem:[%s11187_s1 + $0xb44] ss:$16 sps:$4 sm:$0xff]   ;;  %v7936_v52 = vld [vmem:[%s11187_s1 + $0xb4c] ss:$16 sps:$4 sm:$0xff]  }
 0x12c   :  { %5096 = vmatprep.subr.bf16.mxu0 %v7840_v53  ;;  %5655 = vmatprep.subr.bf16.mxu1 %v7843_v54  ;;  %v7931_v53 = vld [vmem:[%s11187_s1 + $0xb40] ss:$16 sps:$4 sm:$0xff]   ;;  %v7934_v54 = vld [vmem:[%s11187_s1 + $0xb48] ss:$16 sps:$4 sm:$0xff]  }
 0x12f   :  { %5097 = vmatpush1.bf16.msra.mxu0 %v7838_v55  ;;  %5656 = vmatpush1.bf16.msra.mxu1 %v7841_v56  ;;  %v7939_v55 = vld [vmem:[%s11187_s1 + $0xb64] ss:$16 sps:$4 sm:$0xff]   ;;  %v7942_v56 = vld [vmem:[%s11187_s1 + $0xb6c] ss:$16 sps:$4 sm:$0xff]  }
 0x130   :  { %5098 = vmatprep.subr.bf16.mxu0 %v7846_v57  ;;  %5657 = vmatprep.subr.bf16.mxu1 %v7849_v58  ;;  %v7937_v57 = vld [vmem:[%s11187_s1 + $0xb60] ss:$16 sps:$4 sm:$0xff]   ;;  %v7940_v58 = vld [vmem:[%s11187_s1 + $0xb68] ss:$16 sps:$4 sm:$0xff]  }
 0x133   :  { %5099 = vmatpush1.bf16.msra.mxu0 %v7844_v59  ;;  %5658 = vmatpush1.bf16.msra.mxu1 %v7847_v60  ;;  %v7945_v59 = vld [vmem:[%s11187_s1 + $0xb84] ss:$16 sps:$4 sm:$0xff]   ;;  %v7948_v60 = vld [vmem:[%s11187_s1 + $0xb8c] ss:$16 sps:$4 sm:$0xff]  }
 0x134   :  { %5100 = vmatprep.subr.bf16.mxu0 %v7852_v61  ;;  %5659 = vmatprep.subr.bf16.mxu1 %v7855_v62  ;;  %v7943_v61 = vld [vmem:[%s11187_s1 + $0xb80] ss:$16 sps:$4 sm:$0xff]   ;;  %v7946_v62 = vld [vmem:[%s11187_s1 + $0xb88] ss:$16 sps:$4 sm:$0xff]  }
 0x137   :  { %5101 = vmatpush1.bf16.msra.mxu0 %v7850_v63  ;;  %5660 = vmatpush1.bf16.msra.mxu1 %v7853_v0  ;;  %v7951_v63 = vld [vmem:[%s11187_s1 + $0xba4] ss:$16 sps:$4 sm:$0xff]   ;;  %v7954_v0 = vld [vmem:[%s11187_s1 + $0xbac] ss:$16 sps:$4 sm:$0xff]  }
 0x138   :  { %5102 = vmatprep.subr.bf16.mxu0 %v7858_v1  ;;  %5661 = vmatprep.subr.bf16.mxu1 %v7861_v2  ;;  %v7949_v1 = vld [vmem:[%s11187_s1 + $0xba0] ss:$16 sps:$4 sm:$0xff]   ;;  %v7952_v2 = vld [vmem:[%s11187_s1 + $0xba8] ss:$16 sps:$4 sm:$0xff]  }
 0x13b   :  { %5103 = vmatpush1.bf16.msra.mxu0 %v7856_v3  ;;  %5662 = vmatpush1.bf16.msra.mxu1 %v7859_v4  ;;  %v7957_v3 = vld [vmem:[%s11187_s1 + $0xbc4] ss:$16 sps:$4 sm:$0xff]   ;;  %v7960_v4 = vld [vmem:[%s11187_s1 + $0xbcc] ss:$16 sps:$4 sm:$0xff]  }
 0x13c   :  { %5104 = vmatprep.subr.bf16.mxu0 %v7864_v5  ;;  %5663 = vmatprep.subr.bf16.mxu1 %v7867_v6  ;;  %v7955_v5 = vld [vmem:[%s11187_s1 + $0xbc0] ss:$16 sps:$4 sm:$0xff]   ;;  %v7958_v6 = vld [vmem:[%s11187_s1 + $0xbc8] ss:$16 sps:$4 sm:$0xff]  }
 0x13f   :  { %5105 = vmatpush1.bf16.msra.mxu0 %v7862_v7  ;;  %5664 = vmatpush1.bf16.msra.mxu1 %v7865_v8  ;;  %v7963_v7 = vld [vmem:[%s11187_s1 + $0xbe4] ss:$16 sps:$4 sm:$0xff]   ;;  %v7966_v8 = vld [vmem:[%s11187_s1 + $0xbec] ss:$16 sps:$4 sm:$0xff]  }
 0x140   :  { %5117 = vmatprep.subr.bf16.mxu0 %v7873_v10  ;;  %5676 = vmatprep.subr.bf16.mxu1 %v7876_v11  ;;  %v7964_v10 = vld [vmem:[%s11187_s1 + $0xbe8] ss:$16 sps:$4 sm:$0xff]  }
 0x141   :  { %v7967_v11 = vld [vmem:[%s11188_s0 + $0x28] ss:$100 sps:$4 sm:$0xff]  }
 0x142   :  { %5107 = vmatmul.mubr.bf16.vlgmr.msra.gmra.mrb[0].mxu0 %v7868_v9  ;;  %5666 = vmatmul.mubr.bf16.vlgmr.msra.gmra.mrb[0].mxu1 %v7868_v9  ;;  %v7961_v9 = vld [vmem:[%s11187_s1 + $0xbe0] ss:$16 sps:$4 sm:$0xff]  }
 0x143   :  { %5118 = vmatpush1.bf16.msra.mxu0 %v7871_v12  ;;  %5677 = vmatpush1.bf16.msra.mxu1 %v7874_v13  ;;  %v7972_v12 = vld [vmem:[%s11187_s1 + $0xc04] ss:$16 sps:$4 sm:$0xff]   ;;  %v7975_v13 = vld [vmem:[%s11187_s1 + $0xc0c] ss:$16 sps:$4 sm:$0xff]  }
 0x144   :  { %5119 = vmatprep.subr.bf16.mxu0 %v7879_v14  ;;  %5678 = vmatprep.subr.bf16.mxu1 %v7882_v15  ;;  %v7970_v14 = vld [vmem:[%s11187_s1 + $0xc00] ss:$16 sps:$4 sm:$0xff]   ;;  %v7973_v15 = vld [vmem:[%s11187_s1 + $0xc08] ss:$16 sps:$4 sm:$0xff]  }
 0x145   :  { %5149 = vmatprep.mubr.bf16.mxu0 %v7969_v16  ;;  %5708 = vmatprep.mubr.bf16.mxu1 %v7969_v16  ;;  %v7978_v16 = vld [vmem:[%s11187_s1 + $0xc24] ss:$16 sps:$4 sm:$0xff]  }
 0x147   :  { %5120 = vmatpush1.bf16.msra.mxu0 %v7877_v17  ;;  %5679 = vmatpush1.bf16.msra.mxu1 %v7880_v18  ;;  %v7981_v17 = vld [vmem:[%s11187_s1 + $0xc2c] ss:$16 sps:$4 sm:$0xff]   ;;  %v8068_v18 = vld [vmem:[%s11188_s0 + $0x34] ss:$100 sps:$4 sm:$0xff]  }
 0x148   :  { %5121 = vmatprep.subr.bf16.mxu0 %v7885_v19  ;;  %5680 = vmatprep.subr.bf16.mxu1 %v7888_v20  ;;  %v7976_v19 = vld [vmem:[%s11187_s1 + $0xc20] ss:$16 sps:$4 sm:$0xff]   ;;  %v7979_v20 = vld [vmem:[%s11187_s1 + $0xc28] ss:$16 sps:$4 sm:$0xff]  }
 0x14b   :  { %5122 = vmatpush1.bf16.msra.mxu0 %v7883_v21  ;;  %5681 = vmatpush1.bf16.msra.mxu1 %v7886_v22  ;;  %v7984_v21 = vld [vmem:[%s11187_s1 + $0xc44] ss:$16 sps:$4 sm:$0xff]   ;;  %v7987_v22 = vld [vmem:[%s11187_s1 + $0xc4c] ss:$16 sps:$4 sm:$0xff]  }
 0x14c   :  { %5123 = vmatprep.subr.bf16.mxu0 %v7891_v23  ;;  %5682 = vmatprep.subr.bf16.mxu1 %v7894_v24  ;;  %v7982_v23 = vld [vmem:[%s11187_s1 + $0xc40] ss:$16 sps:$4 sm:$0xff]   ;;  %v7985_v24 = vld [vmem:[%s11187_s1 + $0xc48] ss:$16 sps:$4 sm:$0xff]  }
 0x14f   :  { %5124 = vmatpush1.bf16.msra.mxu0 %v7889_v25  ;;  %5683 = vmatpush1.bf16.msra.mxu1 %v7892_v26  ;;  %v7990_v25 = vld [vmem:[%s11187_s1 + $0xc64] ss:$16 sps:$4 sm:$0xff]   ;;  %v7993_v26 = vld [vmem:[%s11187_s1 + $0xc6c] ss:$16 sps:$4 sm:$0xff]  }
 0x150   :  { %5125 = vmatprep.subr.bf16.mxu0 %v7897_v27  ;;  %5684 = vmatprep.subr.bf16.mxu1 %v7900_v28  ;;  %v7988_v27 = vld [vmem:[%s11187_s1 + $0xc60] ss:$16 sps:$4 sm:$0xff]   ;;  %v7991_v28 = vld [vmem:[%s11187_s1 + $0xc68] ss:$16 sps:$4 sm:$0xff]  }
 0x153   :  { %5126 = vmatpush1.bf16.msra.mxu0 %v7895_v29  ;;  %5685 = vmatpush1.bf16.msra.mxu1 %v7898_v30  ;;  %v7996_v29 = vld [vmem:[%s11187_s1 + $0xc84] ss:$16 sps:$4 sm:$0xff]   ;;  %v7999_v30 = vld [vmem:[%s11187_s1 + $0xc8c] ss:$16 sps:$4 sm:$0xff]  }
 0x154   :  { %5127 = vmatprep.subr.bf16.mxu0 %v7903_v31  ;;  %5686 = vmatprep.subr.bf16.mxu1 %v7906_v32  ;;  %v7994_v31 = vld [vmem:[%s11187_s1 + $0xc80] ss:$16 sps:$4 sm:$0xff]   ;;  %v7997_v32 = vld [vmem:[%s11187_s1 + $0xc88] ss:$16 sps:$4 sm:$0xff]  }
 0x157   :  { %5128 = vmatpush1.bf16.msra.mxu0 %v7901_v33  ;;  %5687 = vmatpush1.bf16.msra.mxu1 %v7904_v34  ;;  %v8002_v33 = vld [vmem:[%s11187_s1 + $0xca4] ss:$16 sps:$4 sm:$0xff]   ;;  %v8005_v34 = vld [vmem:[%s11187_s1 + $0xcac] ss:$16 sps:$4 sm:$0xff]  }
 0x158   :  { %5129 = vmatprep.subr.bf16.mxu0 %v7909_v35  ;;  %5688 = vmatprep.subr.bf16.mxu1 %v7912_v36  ;;  %v8000_v35 = vld [vmem:[%s11187_s1 + $0xca0] ss:$16 sps:$4 sm:$0xff]   ;;  %v8003_v36 = vld [vmem:[%s11187_s1 + $0xca8] ss:$16 sps:$4 sm:$0xff]  }
 0x15b   :  { %5130 = vmatpush1.bf16.msra.mxu0 %v7907_v37  ;;  %5689 = vmatpush1.bf16.msra.mxu1 %v7910_v38  ;;  %v8008_v37 = vld [vmem:[%s11187_s1 + $0xcc4] ss:$16 sps:$4 sm:$0xff]   ;;  %v8011_v38 = vld [vmem:[%s11187_s1 + $0xccc] ss:$16 sps:$4 sm:$0xff]  }
 0x15c   :  { %5131 = vmatprep.subr.bf16.mxu0 %v7915_v39  ;;  %5690 = vmatprep.subr.bf16.mxu1 %v7918_v40  ;;  %v8006_v39 = vld [vmem:[%s11187_s1 + $0xcc0] ss:$16 sps:$4 sm:$0xff]   ;;  %v8009_v40 = vld [vmem:[%s11187_s1 + $0xcc8] ss:$16 sps:$4 sm:$0xff]  }
 0x15f   :  { %5132 = vmatpush1.bf16.msra.mxu0 %v7913_v41  ;;  %5691 = vmatpush1.bf16.msra.mxu1 %v7916_v42  ;;  %v8014_v41 = vld [vmem:[%s11187_s1 + $0xce4] ss:$16 sps:$4 sm:$0xff]   ;;  %v8017_v42 = vld [vmem:[%s11187_s1 + $0xcec] ss:$16 sps:$4 sm:$0xff]  }
 0x160   :  { %5133 = vmatprep.subr.bf16.mxu0 %v7921_v43  ;;  %5692 = vmatprep.subr.bf16.mxu1 %v7924_v44  ;;  %v8012_v43 = vld [vmem:[%s11187_s1 + $0xce0] ss:$16 sps:$4 sm:$0xff]   ;;  %v8015_v44 = vld [vmem:[%s11187_s1 + $0xce8] ss:$16 sps:$4 sm:$0xff]  }
 0x163   :  { %5134 = vmatpush1.bf16.msra.mxu0 %v7919_v45  ;;  %5693 = vmatpush1.bf16.msra.mxu1 %v7922_v46  ;;  %v8020_v45 = vld [vmem:[%s11187_s1 + $0xd04] ss:$16 sps:$4 sm:$0xff]   ;;  %v8023_v46 = vld [vmem:[%s11187_s1 + $0xd0c] ss:$16 sps:$4 sm:$0xff]  }
 0x164   :  { %5135 = vmatprep.subr.bf16.mxu0 %v7927_v47  ;;  %5694 = vmatprep.subr.bf16.mxu1 %v7930_v48  ;;  %v8018_v47 = vld [vmem:[%s11187_s1 + $0xd00] ss:$16 sps:$4 sm:$0xff]   ;;  %v8021_v48 = vld [vmem:[%s11187_s1 + $0xd08] ss:$16 sps:$4 sm:$0xff]  }
 0x167   :  { %5136 = vmatpush1.bf16.msra.mxu0 %v7925_v49  ;;  %5695 = vmatpush1.bf16.msra.mxu1 %v7928_v50  ;;  %v8026_v49 = vld [vmem:[%s11187_s1 + $0xd24] ss:$16 sps:$4 sm:$0xff]   ;;  %v8029_v50 = vld [vmem:[%s11187_s1 + $0xd2c] ss:$16 sps:$4 sm:$0xff]  }
 0x168   :  { %5137 = vmatprep.subr.bf16.mxu0 %v7933_v51  ;;  %5696 = vmatprep.subr.bf16.mxu1 %v7936_v52  ;;  %v8024_v51 = vld [vmem:[%s11187_s1 + $0xd20] ss:$16 sps:$4 sm:$0xff]   ;;  %v8027_v52 = vld [vmem:[%s11187_s1 + $0xd28] ss:$16 sps:$4 sm:$0xff]  }
 0x16b   :  { %5138 = vmatpush1.bf16.msra.mxu0 %v7931_v53  ;;  %5697 = vmatpush1.bf16.msra.mxu1 %v7934_v54  ;;  %v8032_v53 = vld [vmem:[%s11187_s1 + $0xd44] ss:$16 sps:$4 sm:$0xff]   ;;  %v8035_v54 = vld [vmem:[%s11187_s1 + $0xd4c] ss:$16 sps:$4 sm:$0xff]  }
 0x16c   :  { %5139 = vmatprep.subr.bf16.mxu0 %v7939_v55  ;;  %5698 = vmatprep.subr.bf16.mxu1 %v7942_v56  ;;  %v8030_v55 = vld [vmem:[%s11187_s1 + $0xd40] ss:$16 sps:$4 sm:$0xff]   ;;  %v8033_v56 = vld [vmem:[%s11187_s1 + $0xd48] ss:$16 sps:$4 sm:$0xff]  }
 0x16f   :  { %5140 = vmatpush1.bf16.msra.mxu0 %v7937_v57  ;;  %5699 = vmatpush1.bf16.msra.mxu1 %v7940_v58  ;;  %v8038_v57 = vld [vmem:[%s11187_s1 + $0xd64] ss:$16 sps:$4 sm:$0xff]   ;;  %v8041_v58 = vld [vmem:[%s11187_s1 + $0xd6c] ss:$16 sps:$4 sm:$0xff]  }
 0x170   :  { %5141 = vmatprep.subr.bf16.mxu0 %v7945_v59  ;;  %5700 = vmatprep.subr.bf16.mxu1 %v7948_v60  ;;  %v8036_v59 = vld [vmem:[%s11187_s1 + $0xd60] ss:$16 sps:$4 sm:$0xff]   ;;  %v8039_v60 = vld [vmem:[%s11187_s1 + $0xd68] ss:$16 sps:$4 sm:$0xff]  }
 0x173   :  { %5142 = vmatpush1.bf16.msra.mxu0 %v7943_v61  ;;  %5701 = vmatpush1.bf16.msra.mxu1 %v7946_v62  ;;  %v8044_v61 = vld [vmem:[%s11187_s1 + $0xd84] ss:$16 sps:$4 sm:$0xff]   ;;  %v8047_v62 = vld [vmem:[%s11187_s1 + $0xd8c] ss:$16 sps:$4 sm:$0xff]  }
 0x174   :  { %5143 = vmatprep.subr.bf16.mxu0 %v7951_v63  ;;  %5702 = vmatprep.subr.bf16.mxu1 %v7954_v0  ;;  %v8042_v63 = vld [vmem:[%s11187_s1 + $0xd80] ss:$16 sps:$4 sm:$0xff]   ;;  %v8045_v0 = vld [vmem:[%s11187_s1 + $0xd88] ss:$16 sps:$4 sm:$0xff]  }
 0x177   :  { %5144 = vmatpush1.bf16.msra.mxu0 %v7949_v1  ;;  %5703 = vmatpush1.bf16.msra.mxu1 %v7952_v2  ;;  %v8050_v1 = vld [vmem:[%s11187_s1 + $0xda4] ss:$16 sps:$4 sm:$0xff]   ;;  %v8053_v2 = vld [vmem:[%s11187_s1 + $0xdac] ss:$16 sps:$4 sm:$0xff]  }
 0x178   :  { %5145 = vmatprep.subr.bf16.mxu0 %v7957_v3  ;;  %5704 = vmatprep.subr.bf16.mxu1 %v7960_v4  ;;  %v8048_v3 = vld [vmem:[%s11187_s1 + $0xda0] ss:$16 sps:$4 sm:$0xff]   ;;  %v8051_v4 = vld [vmem:[%s11187_s1 + $0xda8] ss:$16 sps:$4 sm:$0xff]  }
 0x17b   :  { %5146 = vmatpush1.bf16.msra.mxu0 %v7955_v5  ;;  %5705 = vmatpush1.bf16.msra.mxu1 %v7958_v6  ;;  %v8056_v5 = vld [vmem:[%s11187_s1 + $0xdc4] ss:$16 sps:$4 sm:$0xff]   ;;  %v8059_v6 = vld [vmem:[%s11187_s1 + $0xdcc] ss:$16 sps:$4 sm:$0xff]  }
 0x17c   :  { %5147 = vmatprep.subr.bf16.mxu0 %v7963_v7  ;;  %5706 = vmatprep.subr.bf16.mxu1 %v7966_v8  ;;  %v8054_v7 = vld [vmem:[%s11187_s1 + $0xdc0] ss:$16 sps:$4 sm:$0xff]   ;;  %v8057_v8 = vld [vmem:[%s11187_s1 + $0xdc8] ss:$16 sps:$4 sm:$0xff]  }
 0x17f   :  { %5148 = vmatpush1.bf16.msra.mxu0 %v7961_v9  ;;  %5707 = vmatpush1.bf16.msra.mxu1 %v7964_v10  ;;  %v8062_v9 = vld [vmem:[%s11187_s1 + $0xde4] ss:$16 sps:$4 sm:$0xff]   ;;  %v8065_v10 = vld [vmem:[%s11187_s1 + $0xdec] ss:$16 sps:$4 sm:$0xff]  }
 0x180   :  { %5160 = vmatprep.subr.bf16.mxu0 %v7972_v12  ;;  %5719 = vmatprep.subr.bf16.mxu1 %v7975_v13  ;;  %v8063_v12 = vld [vmem:[%s11187_s1 + $0xde8] ss:$16 sps:$4 sm:$0xff]   ;;  %v8066_v13 = vld [vmem:[%s11188_s0 + $0x30] ss:$100 sps:$4 sm:$0xff]  }
 0x182   :  { %5150 = vmatmul.mubr.bf16.vlgmr.msra.gmra.mrb[0].mxu0 %v7967_v11  ;;  %5709 = vmatmul.mubr.bf16.vlgmr.msra.gmra.mrb[0].mxu1 %v7967_v11  ;;  %v8060_v11 = vld [vmem:[%s11187_s1 + $0xde0] ss:$16 sps:$4 sm:$0xff]  }
 0x183   :  { %5161 = vmatpush1.bf16.msra.mxu0 %v7970_v14  ;;  %5720 = vmatpush1.bf16.msra.mxu1 %v7973_v15  ;;  %v8071_v14 = vld [vmem:[%s11187_s1 + $0xe04] ss:$16 sps:$4 sm:$0xff]   ;;  %v8074_v15 = vld [vmem:[%s11187_s1 + $0xe0c] ss:$16 sps:$4 sm:$0xff]  }
 0x184   :  { %5162 = vmatprep.subr.bf16.mxu0 %v7978_v16  ;;  %5721 = vmatprep.subr.bf16.mxu1 %v7981_v17  ;;  %v8069_v16 = vld [vmem:[%s11187_s1 + $0xe00] ss:$16 sps:$4 sm:$0xff]   ;;  %v8072_v17 = vld [vmem:[%s11187_s1 + $0xe08] ss:$16 sps:$4 sm:$0xff]  }
 0x185   :  { %5192 = vmatprep.mubr.bf16.mxu0 %v8068_v18  ;;  %5751 = vmatprep.mubr.bf16.mxu1 %v8068_v18  ;;  %v8077_v18 = vld [vmem:[%s11187_s1 + $0xe24] ss:$16 sps:$4 sm:$0xff]  }
 0x187   :  { %5163 = vmatpush1.bf16.msra.mxu0 %v7976_v19  ;;  %5722 = vmatpush1.bf16.msra.mxu1 %v7979_v20  ;;  %v8080_v19 = vld [vmem:[%s11187_s1 + $0xe2c] ss:$16 sps:$4 sm:$0xff]  }
 0x188   :  { %5164 = vmatprep.subr.bf16.mxu0 %v7984_v21  ;;  %5723 = vmatprep.subr.bf16.mxu1 %v7987_v22  ;;  %v8167_v20 = vld [vmem:[%s11188_s0 + $0x3c] ss:$100 sps:$4 sm:$0xff]   ;;  %v8078_v22 = vld [vmem:[%s11187_s1 + $0xe28] ss:$16 sps:$4 sm:$0xff]  }
 0x189   :  { %v8075_v21 = vld [vmem:[%s11187_s1 + $0xe20] ss:$16 sps:$4 sm:$0xff]  }
 0x18b   :  { %5165 = vmatpush1.bf16.msra.mxu0 %v7982_v23  ;;  %5724 = vmatpush1.bf16.msra.mxu1 %v7985_v24  ;;  %v8083_v23 = vld [vmem:[%s11187_s1 + $0xe44] ss:$16 sps:$4 sm:$0xff]   ;;  %v8086_v24 = vld [vmem:[%s11187_s1 + $0xe4c] ss:$16 sps:$4 sm:$0xff]  }
 0x18c   :  { %5166 = vmatprep.subr.bf16.mxu0 %v7990_v25  ;;  %5725 = vmatprep.subr.bf16.mxu1 %v7993_v26  ;;  %v8081_v25 = vld [vmem:[%s11187_s1 + $0xe40] ss:$16 sps:$4 sm:$0xff]   ;;  %v8084_v26 = vld [vmem:[%s11187_s1 + $0xe48] ss:$16 sps:$4 sm:$0xff]  }
 0x18f   :  { %5167 = vmatpush1.bf16.msra.mxu0 %v7988_v27  ;;  %5726 = vmatpush1.bf16.msra.mxu1 %v7991_v28  ;;  %v8089_v27 = vld [vmem:[%s11187_s1 + $0xe64] ss:$16 sps:$4 sm:$0xff]   ;;  %v8092_v28 = vld [vmem:[%s11187_s1 + $0xe6c] ss:$16 sps:$4 sm:$0xff]  }
 0x190   :  { %5168 = vmatprep.subr.bf16.mxu0 %v7996_v29  ;;  %5727 = vmatprep.subr.bf16.mxu1 %v7999_v30  ;;  %v8087_v29 = vld [vmem:[%s11187_s1 + $0xe60] ss:$16 sps:$4 sm:$0xff]   ;;  %v8090_v30 = vld [vmem:[%s11187_s1 + $0xe68] ss:$16 sps:$4 sm:$0xff]  }
 0x193   :  { %5169 = vmatpush1.bf16.msra.mxu0 %v7994_v31  ;;  %5728 = vmatpush1.bf16.msra.mxu1 %v7997_v32  ;;  %v8095_v31 = vld [vmem:[%s11187_s1 + $0xe84] ss:$16 sps:$4 sm:$0xff]   ;;  %v8098_v32 = vld [vmem:[%s11187_s1 + $0xe8c] ss:$16 sps:$4 sm:$0xff]  }
 0x194   :  { %5170 = vmatprep.subr.bf16.mxu0 %v8002_v33  ;;  %5729 = vmatprep.subr.bf16.mxu1 %v8005_v34  ;;  %v8093_v33 = vld [vmem:[%s11187_s1 + $0xe80] ss:$16 sps:$4 sm:$0xff]   ;;  %v8096_v34 = vld [vmem:[%s11187_s1 + $0xe88] ss:$16 sps:$4 sm:$0xff]  }
 0x197   :  { %5171 = vmatpush1.bf16.msra.mxu0 %v8000_v35  ;;  %5730 = vmatpush1.bf16.msra.mxu1 %v8003_v36  ;;  %v8101_v35 = vld [vmem:[%s11187_s1 + $0xea4] ss:$16 sps:$4 sm:$0xff]   ;;  %v8104_v36 = vld [vmem:[%s11187_s1 + $0xeac] ss:$16 sps:$4 sm:$0xff]  }
 0x198   :  { %5172 = vmatprep.subr.bf16.mxu0 %v8008_v37  ;;  %5731 = vmatprep.subr.bf16.mxu1 %v8011_v38  ;;  %v8099_v37 = vld [vmem:[%s11187_s1 + $0xea0] ss:$16 sps:$4 sm:$0xff]   ;;  %v8102_v38 = vld [vmem:[%s11187_s1 + $0xea8] ss:$16 sps:$4 sm:$0xff]  }
 0x19b   :  { %5173 = vmatpush1.bf16.msra.mxu0 %v8006_v39  ;;  %5732 = vmatpush1.bf16.msra.mxu1 %v8009_v40  ;;  %v8107_v39 = vld [vmem:[%s11187_s1 + $0xec4] ss:$16 sps:$4 sm:$0xff]   ;;  %v8110_v40 = vld [vmem:[%s11187_s1 + $0xecc] ss:$16 sps:$4 sm:$0xff]  }
 0x19c   :  { %5174 = vmatprep.subr.bf16.mxu0 %v8014_v41  ;;  %5733 = vmatprep.subr.bf16.mxu1 %v8017_v42  ;;  %v8105_v41 = vld [vmem:[%s11187_s1 + $0xec0] ss:$16 sps:$4 sm:$0xff]   ;;  %v8108_v42 = vld [vmem:[%s11187_s1 + $0xec8] ss:$16 sps:$4 sm:$0xff]  }
 0x19f   :  { %5175 = vmatpush1.bf16.msra.mxu0 %v8012_v43  ;;  %5734 = vmatpush1.bf16.msra.mxu1 %v8015_v44  ;;  %v8113_v43 = vld [vmem:[%s11187_s1 + $0xee4] ss:$16 sps:$4 sm:$0xff]   ;;  %v8116_v44 = vld [vmem:[%s11187_s1 + $0xeec] ss:$16 sps:$4 sm:$0xff]  }
 0x1a0   :  { %5176 = vmatprep.subr.bf16.mxu0 %v8020_v45  ;;  %5735 = vmatprep.subr.bf16.mxu1 %v8023_v46  ;;  %v8111_v45 = vld [vmem:[%s11187_s1 + $0xee0] ss:$16 sps:$4 sm:$0xff]   ;;  %v8114_v46 = vld [vmem:[%s11187_s1 + $0xee8] ss:$16 sps:$4 sm:$0xff]  }
 0x1a3   :  { %5177 = vmatpush1.bf16.msra.mxu0 %v8018_v47  ;;  %5736 = vmatpush1.bf16.msra.mxu1 %v8021_v48  ;;  %v8119_v47 = vld [vmem:[%s11187_s1 + $0xf04] ss:$16 sps:$4 sm:$0xff]   ;;  %v8122_v48 = vld [vmem:[%s11187_s1 + $0xf0c] ss:$16 sps:$4 sm:$0xff]  }
 0x1a4   :  { %5178 = vmatprep.subr.bf16.mxu0 %v8026_v49  ;;  %5737 = vmatprep.subr.bf16.mxu1 %v8029_v50  ;;  %v8117_v49 = vld [vmem:[%s11187_s1 + $0xf00] ss:$16 sps:$4 sm:$0xff]   ;;  %v8120_v50 = vld [vmem:[%s11187_s1 + $0xf08] ss:$16 sps:$4 sm:$0xff]  }
 0x1a7   :  { %5179 = vmatpush1.bf16.msra.mxu0 %v8024_v51  ;;  %5738 = vmatpush1.bf16.msra.mxu1 %v8027_v52  ;;  %v8125_v51 = vld [vmem:[%s11187_s1 + $0xf24] ss:$16 sps:$4 sm:$0xff]   ;;  %v8128_v52 = vld [vmem:[%s11187_s1 + $0xf2c] ss:$16 sps:$4 sm:$0xff]  }
 0x1a8   :  { %5180 = vmatprep.subr.bf16.mxu0 %v8032_v53  ;;  %5739 = vmatprep.subr.bf16.mxu1 %v8035_v54  ;;  %v8123_v53 = vld [vmem:[%s11187_s1 + $0xf20] ss:$16 sps:$4 sm:$0xff]   ;;  %v8126_v54 = vld [vmem:[%s11187_s1 + $0xf28] ss:$16 sps:$4 sm:$0xff]  }
 0x1ab   :  { %5181 = vmatpush1.bf16.msra.mxu0 %v8030_v55  ;;  %5740 = vmatpush1.bf16.msra.mxu1 %v8033_v56  ;;  %v8131_v55 = vld [vmem:[%s11187_s1 + $0xf44] ss:$16 sps:$4 sm:$0xff]   ;;  %v8134_v56 = vld [vmem:[%s11187_s1 + $0xf4c] ss:$16 sps:$4 sm:$0xff]  }
 0x1ac   :  { %5182 = vmatprep.subr.bf16.mxu0 %v8038_v57  ;;  %5741 = vmatprep.subr.bf16.mxu1 %v8041_v58  ;;  %v8129_v57 = vld [vmem:[%s11187_s1 + $0xf40] ss:$16 sps:$4 sm:$0xff]   ;;  %v8132_v58 = vld [vmem:[%s11187_s1 + $0xf48] ss:$16 sps:$4 sm:$0xff]  }
 0x1af   :  { %5183 = vmatpush1.bf16.msra.mxu0 %v8036_v59  ;;  %5742 = vmatpush1.bf16.msra.mxu1 %v8039_v60  ;;  %v8137_v59 = vld [vmem:[%s11187_s1 + $0xf64] ss:$16 sps:$4 sm:$0xff]   ;;  %v8140_v60 = vld [vmem:[%s11187_s1 + $0xf6c] ss:$16 sps:$4 sm:$0xff]  }
 0x1b0   :  { %5184 = vmatprep.subr.bf16.mxu0 %v8044_v61  ;;  %5743 = vmatprep.subr.bf16.mxu1 %v8047_v62  ;;  %v8135_v61 = vld [vmem:[%s11187_s1 + $0xf60] ss:$16 sps:$4 sm:$0xff]   ;;  %v8138_v62 = vld [vmem:[%s11187_s1 + $0xf68] ss:$16 sps:$4 sm:$0xff]  }
 0x1b3   :  { %5185 = vmatpush1.bf16.msra.mxu0 %v8042_v63  ;;  %5744 = vmatpush1.bf16.msra.mxu1 %v8045_v0  ;;  %v8143_v63 = vld [vmem:[%s11187_s1 + $0xf84] ss:$16 sps:$4 sm:$0xff]   ;;  %v8146_v0 = vld [vmem:[%s11187_s1 + $0xf8c] ss:$16 sps:$4 sm:$0xff]  }
 0x1b4   :  { %5186 = vmatprep.subr.bf16.mxu0 %v8050_v1  ;;  %5745 = vmatprep.subr.bf16.mxu1 %v8053_v2  ;;  %v8141_v1 = vld [vmem:[%s11187_s1 + $0xf80] ss:$16 sps:$4 sm:$0xff]   ;;  %v8144_v2 = vld [vmem:[%s11187_s1 + $0xf88] ss:$16 sps:$4 sm:$0xff]  }
 0x1b7   :  { %5187 = vmatpush1.bf16.msra.mxu0 %v8048_v3  ;;  %5746 = vmatpush1.bf16.msra.mxu1 %v8051_v4  ;;  %v8149_v3 = vld [vmem:[%s11187_s1 + $0xfa4] ss:$16 sps:$4 sm:$0xff]   ;;  %v8152_v4 = vld [vmem:[%s11187_s1 + $0xfac] ss:$16 sps:$4 sm:$0xff]  }
 0x1b8   :  { %5188 = vmatprep.subr.bf16.mxu0 %v8056_v5  ;;  %5747 = vmatprep.subr.bf16.mxu1 %v8059_v6  ;;  %v8147_v5 = vld [vmem:[%s11187_s1 + $0xfa0] ss:$16 sps:$4 sm:$0xff]   ;;  %v8150_v6 = vld [vmem:[%s11187_s1 + $0xfa8] ss:$16 sps:$4 sm:$0xff]  }
 0x1bb   :  { %5189 = vmatpush1.bf16.msra.mxu0 %v8054_v7  ;;  %5748 = vmatpush1.bf16.msra.mxu1 %v8057_v8  ;;  %v8155_v7 = vld [vmem:[%s11187_s1 + $0xfc4] ss:$16 sps:$4 sm:$0xff]   ;;  %v8158_v8 = vld [vmem:[%s11187_s1 + $0xfcc] ss:$16 sps:$4 sm:$0xff]  }
 0x1bc   :  { %5190 = vmatprep.subr.bf16.mxu0 %v8062_v9  ;;  %5749 = vmatprep.subr.bf16.mxu1 %v8065_v10  ;;  %v8153_v9 = vld [vmem:[%s11187_s1 + $0xfc0] ss:$16 sps:$4 sm:$0xff]   ;;  %v8156_v10 = vld [vmem:[%s11187_s1 + $0xfc8] ss:$16 sps:$4 sm:$0xff]  }
 0x1bf   :  { %5191 = vmatpush1.bf16.msra.mxu0 %v8060_v11  ;;  %5750 = vmatpush1.bf16.msra.mxu1 %v8063_v12  ;;  %v8161_v11 = vld [vmem:[%s11187_s1 + $0xfe4] ss:$16 sps:$4 sm:$0xff]   ;;  %v8164_v12 = vld [vmem:[%s11187_s1 + $0xfec] ss:$16 sps:$4 sm:$0xff]  }
 0x1c0   :  { %5203 = vmatprep.subr.bf16.mxu0 %v8071_v14  ;;  %5762 = vmatprep.subr.bf16.mxu1 %v8074_v15  ;;  %v8162_v14 = vld [vmem:[%s11187_s1 + $0xfe8] ss:$16 sps:$4 sm:$0xff]   ;;  %v8170_v15 = vld [vmem:[%s11187_s1 + $0x1004] ss:$16 sps:$4 sm:$0xff]  }
 0x1c2   :  { %5193 = vmatmul.mubr.bf16.vlgmr.msra.gmra.mrb[0].mxu0 %v8066_v13  ;;  %5752 = vmatmul.mubr.bf16.vlgmr.msra.gmra.mrb[0].mxu1 %v8066_v13  ;;  %v8159_v13 = vld [vmem:[%s11187_s1 + $0xfe0] ss:$16 sps:$4 sm:$0xff]  }
 0x1c3   :  { %5204 = vmatpush1.bf16.msra.mxu0 %v8069_v16  ;;  %5763 = vmatpush1.bf16.msra.mxu1 %v8072_v17  ;;  %v8173_v16 = vld [vmem:[%s11187_s1 + $0x100c] ss:$16 sps:$4 sm:$0xff]  }
 0x1c4   :  { %5205 = vmatprep.subr.bf16.mxu0 %v8077_v18  ;;  %5764 = vmatprep.subr.bf16.mxu1 %v8080_v19  ;;  %v8165_v17 = vld [vmem:[%s11188_s0 + $0x38] ss:$100 sps:$4 sm:$0xff]   ;;  %v8168_v18 = vld [vmem:[%s11187_s1 + $0x1000] ss:$16 sps:$4 sm:$0xff]  }
 0x1c5   :  { %5235 = vmatprep.mubr.bf16.mxu0 %v8167_v20  ;;  %5794 = vmatprep.mubr.bf16.mxu1 %v8167_v20  ;;  %v8171_v19 = vld [vmem:[%s11187_s1 + $0x1008] ss:$16 sps:$4 sm:$0xff]   ;;  %v8176_v20 = vld [vmem:[%s11187_s1 + $0x1024] ss:$16 sps:$4 sm:$0xff]  }
 0x1c7   :  { %5206 = vmatpush1.bf16.msra.mxu0 %v8075_v21  ;;  %5765 = vmatpush1.bf16.msra.mxu1 %v8078_v22  ;;  %v8179_v21 = vld [vmem:[%s11187_s1 + $0x102c] ss:$16 sps:$4 sm:$0xff]   ;;  %v8266_v22 = vld [vmem:[%s11188_s0 + $0x44] ss:$100 sps:$4 sm:$0xff]  }
 0x1c8   :  { %5207 = vmatprep.subr.bf16.mxu0 %v8083_v23  ;;  %5766 = vmatprep.subr.bf16.mxu1 %v8086_v24  ;;  %v8174_v23 = vld [vmem:[%s11187_s1 + $0x1020] ss:$16 sps:$4 sm:$0xff]   ;;  %v8177_v24 = vld [vmem:[%s11187_s1 + $0x1028] ss:$16 sps:$4 sm:$0xff]  }
 0x1cb   :  { %5208 = vmatpush1.bf16.msra.mxu0 %v8081_v25  ;;  %5767 = vmatpush1.bf16.msra.mxu1 %v8084_v26  ;;  %v8182_v25 = vld [vmem:[%s11187_s1 + $0x1044] ss:$16 sps:$4 sm:$0xff]   ;;  %v8185_v26 = vld [vmem:[%s11187_s1 + $0x104c] ss:$16 sps:$4 sm:$0xff]  }
 0x1cc   :  { %5209 = vmatprep.subr.bf16.mxu0 %v8089_v27  ;;  %5768 = vmatprep.subr.bf16.mxu1 %v8092_v28  ;;  %v8180_v27 = vld [vmem:[%s11187_s1 + $0x1040] ss:$16 sps:$4 sm:$0xff]   ;;  %v8183_v28 = vld [vmem:[%s11187_s1 + $0x1048] ss:$16 sps:$4 sm:$0xff]  }
 0x1cf   :  { %5210 = vmatpush1.bf16.msra.mxu0 %v8087_v29  ;;  %5769 = vmatpush1.bf16.msra.mxu1 %v8090_v30  ;;  %v8188_v29 = vld [vmem:[%s11187_s1 + $0x1064] ss:$16 sps:$4 sm:$0xff]   ;;  %v8191_v30 = vld [vmem:[%s11187_s1 + $0x106c] ss:$16 sps:$4 sm:$0xff]  }
 0x1d0   :  { %5211 = vmatprep.subr.bf16.mxu0 %v8095_v31  ;;  %5770 = vmatprep.subr.bf16.mxu1 %v8098_v32  ;;  %v8186_v31 = vld [vmem:[%s11187_s1 + $0x1060] ss:$16 sps:$4 sm:$0xff]   ;;  %v8189_v32 = vld [vmem:[%s11187_s1 + $0x1068] ss:$16 sps:$4 sm:$0xff]  }
 0x1d3   :  { %5212 = vmatpush1.bf16.msra.mxu0 %v8093_v33  ;;  %5771 = vmatpush1.bf16.msra.mxu1 %v8096_v34  ;;  %v8194_v33 = vld [vmem:[%s11187_s1 + $0x1084] ss:$16 sps:$4 sm:$0xff]   ;;  %v8197_v34 = vld [vmem:[%s11187_s1 + $0x108c] ss:$16 sps:$4 sm:$0xff]  }
 0x1d4   :  { %5213 = vmatprep.subr.bf16.mxu0 %v8101_v35  ;;  %5772 = vmatprep.subr.bf16.mxu1 %v8104_v36  ;;  %v8192_v35 = vld [vmem:[%s11187_s1 + $0x1080] ss:$16 sps:$4 sm:$0xff]   ;;  %v8195_v36 = vld [vmem:[%s11187_s1 + $0x1088] ss:$16 sps:$4 sm:$0xff]  }
 0x1d7   :  { %5214 = vmatpush1.bf16.msra.mxu0 %v8099_v37  ;;  %5773 = vmatpush1.bf16.msra.mxu1 %v8102_v38  ;;  %v8200_v37 = vld [vmem:[%s11187_s1 + $0x10a4] ss:$16 sps:$4 sm:$0xff]   ;;  %v8203_v38 = vld [vmem:[%s11187_s1 + $0x10ac] ss:$16 sps:$4 sm:$0xff]  }
 0x1d8   :  { %5215 = vmatprep.subr.bf16.mxu0 %v8107_v39  ;;  %5774 = vmatprep.subr.bf16.mxu1 %v8110_v40  ;;  %v8198_v39 = vld [vmem:[%s11187_s1 + $0x10a0] ss:$16 sps:$4 sm:$0xff]   ;;  %v8201_v40 = vld [vmem:[%s11187_s1 + $0x10a8] ss:$16 sps:$4 sm:$0xff]  }
 0x1db   :  { %5216 = vmatpush1.bf16.msra.mxu0 %v8105_v41  ;;  %5775 = vmatpush1.bf16.msra.mxu1 %v8108_v42  ;;  %v8206_v41 = vld [vmem:[%s11187_s1 + $0x10c4] ss:$16 sps:$4 sm:$0xff]   ;;  %v8209_v42 = vld [vmem:[%s11187_s1 + $0x10cc] ss:$16 sps:$4 sm:$0xff]  }
 0x1dc   :  { %5217 = vmatprep.subr.bf16.mxu0 %v8113_v43  ;;  %5776 = vmatprep.subr.bf16.mxu1 %v8116_v44  ;;  %v8204_v43 = vld [vmem:[%s11187_s1 + $0x10c0] ss:$16 sps:$4 sm:$0xff]   ;;  %v8207_v44 = vld [vmem:[%s11187_s1 + $0x10c8] ss:$16 sps:$4 sm:$0xff]  }
 0x1df   :  { %5218 = vmatpush1.bf16.msra.mxu0 %v8111_v45  ;;  %5777 = vmatpush1.bf16.msra.mxu1 %v8114_v46  ;;  %v8212_v45 = vld [vmem:[%s11187_s1 + $0x10e4] ss:$16 sps:$4 sm:$0xff]   ;;  %v8215_v46 = vld [vmem:[%s11187_s1 + $0x10ec] ss:$16 sps:$4 sm:$0xff]  }
 0x1e0   :  { %5219 = vmatprep.subr.bf16.mxu0 %v8119_v47  ;;  %5778 = vmatprep.subr.bf16.mxu1 %v8122_v48  ;;  %v8210_v47 = vld [vmem:[%s11187_s1 + $0x10e0] ss:$16 sps:$4 sm:$0xff]   ;;  %v8213_v48 = vld [vmem:[%s11187_s1 + $0x10e8] ss:$16 sps:$4 sm:$0xff]  }
 0x1e3   :  { %5220 = vmatpush1.bf16.msra.mxu0 %v8117_v49  ;;  %5779 = vmatpush1.bf16.msra.mxu1 %v8120_v50  ;;  %v8218_v49 = vld [vmem:[%s11187_s1 + $0x1104] ss:$16 sps:$4 sm:$0xff]   ;;  %v8221_v50 = vld [vmem:[%s11187_s1 + $0x110c] ss:$16 sps:$4 sm:$0xff]  }
 0x1e4   :  { %5221 = vmatprep.subr.bf16.mxu0 %v8125_v51  ;;  %5780 = vmatprep.subr.bf16.mxu1 %v8128_v52  ;;  %v8216_v51 = vld [vmem:[%s11187_s1 + $0x1100] ss:$16 sps:$4 sm:$0xff]   ;;  %v8219_v52 = vld [vmem:[%s11187_s1 + $0x1108] ss:$16 sps:$4 sm:$0xff]  }
 0x1e7   :  { %5222 = vmatpush1.bf16.msra.mxu0 %v8123_v53  ;;  %5781 = vmatpush1.bf16.msra.mxu1 %v8126_v54  ;;  %v8224_v53 = vld [vmem:[%s11187_s1 + $0x1124] ss:$16 sps:$4 sm:$0xff]   ;;  %v8227_v54 = vld [vmem:[%s11187_s1 + $0x112c] ss:$16 sps:$4 sm:$0xff]  }
 0x1e8   :  { %5223 = vmatprep.subr.bf16.mxu0 %v8131_v55  ;;  %5782 = vmatprep.subr.bf16.mxu1 %v8134_v56  ;;  %v8222_v55 = vld [vmem:[%s11187_s1 + $0x1120] ss:$16 sps:$4 sm:$0xff]   ;;  %v8225_v56 = vld [vmem:[%s11187_s1 + $0x1128] ss:$16 sps:$4 sm:$0xff]  }
 0x1eb   :  { %5224 = vmatpush1.bf16.msra.mxu0 %v8129_v57  ;;  %5783 = vmatpush1.bf16.msra.mxu1 %v8132_v58  ;;  %v8230_v57 = vld [vmem:[%s11187_s1 + $0x1144] ss:$16 sps:$4 sm:$0xff]   ;;  %v8233_v58 = vld [vmem:[%s11187_s1 + $0x114c] ss:$16 sps:$4 sm:$0xff]  }
 0x1ec   :  { %5225 = vmatprep.subr.bf16.mxu0 %v8137_v59  ;;  %5784 = vmatprep.subr.bf16.mxu1 %v8140_v60  ;;  %v8228_v59 = vld [vmem:[%s11187_s1 + $0x1140] ss:$16 sps:$4 sm:$0xff]   ;;  %v8231_v60 = vld [vmem:[%s11187_s1 + $0x1148] ss:$16 sps:$4 sm:$0xff]  }
 0x1ef   :  { %5226 = vmatpush1.bf16.msra.mxu0 %v8135_v61  ;;  %5785 = vmatpush1.bf16.msra.mxu1 %v8138_v62  ;;  %v8236_v61 = vld [vmem:[%s11187_s1 + $0x1164] ss:$16 sps:$4 sm:$0xff]   ;;  %v8239_v62 = vld [vmem:[%s11187_s1 + $0x116c] ss:$16 sps:$4 sm:$0xff]  }
 0x1f0   :  { %5227 = vmatprep.subr.bf16.mxu0 %v8143_v63  ;;  %5786 = vmatprep.subr.bf16.mxu1 %v8146_v0  ;;  %v8234_v63 = vld [vmem:[%s11187_s1 + $0x1160] ss:$16 sps:$4 sm:$0xff]   ;;  %v8237_v0 = vld [vmem:[%s11187_s1 + $0x1168] ss:$16 sps:$4 sm:$0xff]  }
 0x1f3   :  { %5228 = vmatpush1.bf16.msra.mxu0 %v8141_v1  ;;  %5787 = vmatpush1.bf16.msra.mxu1 %v8144_v2  ;;  %v8242_v1 = vld [vmem:[%s11187_s1 + $0x1184] ss:$16 sps:$4 sm:$0xff]   ;;  %v8245_v2 = vld [vmem:[%s11187_s1 + $0x118c] ss:$16 sps:$4 sm:$0xff]  }
 0x1f4   :  { %5229 = vmatprep.subr.bf16.mxu0 %v8149_v3  ;;  %5788 = vmatprep.subr.bf16.mxu1 %v8152_v4  ;;  %v8240_v3 = vld [vmem:[%s11187_s1 + $0x1180] ss:$16 sps:$4 sm:$0xff]   ;;  %v8243_v4 = vld [vmem:[%s11187_s1 + $0x1188] ss:$16 sps:$4 sm:$0xff]  }
 0x1f7   :  { %5230 = vmatpush1.bf16.msra.mxu0 %v8147_v5  ;;  %5789 = vmatpush1.bf16.msra.mxu1 %v8150_v6  ;;  %v8248_v5 = vld [vmem:[%s11187_s1 + $0x11a4] ss:$16 sps:$4 sm:$0xff]   ;;  %v8251_v6 = vld [vmem:[%s11187_s1 + $0x11ac] ss:$16 sps:$4 sm:$0xff]  }
 0x1f8   :  { %5231 = vmatprep.subr.bf16.mxu0 %v8155_v7  ;;  %5790 = vmatprep.subr.bf16.mxu1 %v8158_v8  ;;  %v8246_v7 = vld [vmem:[%s11187_s1 + $0x11a0] ss:$16 sps:$4 sm:$0xff]   ;;  %v8249_v8 = vld [vmem:[%s11187_s1 + $0x11a8] ss:$16 sps:$4 sm:$0xff]  }
 0x1fb   :  { %5232 = vmatpush1.bf16.msra.mxu0 %v8153_v9  ;;  %5791 = vmatpush1.bf16.msra.mxu1 %v8156_v10  ;;  %v8254_v9 = vld [vmem:[%s11187_s1 + $0x11c4] ss:$16 sps:$4 sm:$0xff]   ;;  %v8257_v10 = vld [vmem:[%s11187_s1 + $0x11cc] ss:$16 sps:$4 sm:$0xff]  }
 0x1fc   :  { %5233 = vmatprep.subr.bf16.mxu0 %v8161_v11  ;;  %5792 = vmatprep.subr.bf16.mxu1 %v8164_v12  ;;  %v8252_v11 = vld [vmem:[%s11187_s1 + $0x11c0] ss:$16 sps:$4 sm:$0xff]   ;;  %v8255_v12 = vld [vmem:[%s11187_s1 + $0x11c8] ss:$16 sps:$4 sm:$0xff]  }
 0x1ff   :  { %5234 = vmatpush1.bf16.msra.mxu0 %v8159_v13  ;;  %5793 = vmatpush1.bf16.msra.mxu1 %v8162_v14  ;;  %v8260_v13 = vld [vmem:[%s11187_s1 + $0x11e4] ss:$16 sps:$4 sm:$0xff]   ;;  %v8263_v14 = vld [vmem:[%s11187_s1 + $0x11ec] ss:$16 sps:$4 sm:$0xff]  }
 0x200   :  { %5246 = vmatprep.subr.bf16.mxu0 %v8170_v15  ;;  %5805 = vmatprep.subr.bf16.mxu1 %v8173_v16  ;;  %v8258_v15 = vld [vmem:[%s11187_s1 + $0x11e0] ss:$16 sps:$4 sm:$0xff]   ;;  %v8261_v16 = vld [vmem:[%s11187_s1 + $0x11e8] ss:$16 sps:$4 sm:$0xff]  }
 0x202   :  { %5236 = vmatmul.mubr.bf16.vlgmr.msra.gmra.mrb[0].mxu0 %v8165_v17  ;;  %5795 = vmatmul.mubr.bf16.vlgmr.msra.gmra.mrb[0].mxu1 %v8165_v17  ;;  %v8269_v17 = vld [vmem:[%s11187_s1 + $0x1204] ss:$16 sps:$4 sm:$0xff]  }
 0x203   :  { %5247 = vmatpush1.bf16.msra.mxu0 %v8168_v18  ;;  %5806 = vmatpush1.bf16.msra.mxu1 %v8171_v19  ;;  %v8272_v18 = vld [vmem:[%s11187_s1 + $0x120c] ss:$16 sps:$4 sm:$0xff]   ;;  %v8264_v19 = vld [vmem:[%s11188_s0 + $0x40] ss:$100 sps:$4 sm:$0xff]  }
 0x204   :  { %5248 = vmatprep.subr.bf16.mxu0 %v8176_v20  ;;  %5807 = vmatprep.subr.bf16.mxu1 %v8179_v21  ;;  %v8267_v20 = vld [vmem:[%s11187_s1 + $0x1200] ss:$16 sps:$4 sm:$0xff]   ;;  %v8270_v21 = vld [vmem:[%s11187_s1 + $0x1208] ss:$16 sps:$4 sm:$0xff]  }
 0x205   :  { %5278 = vmatprep.mubr.bf16.mxu0 %v8266_v22  ;;  %5837 = vmatprep.mubr.bf16.mxu1 %v8266_v22  ;;  %v8275_v22 = vld [vmem:[%s11187_s1 + $0x1224] ss:$16 sps:$4 sm:$0xff]  }
 0x207   :  { %5249 = vmatpush1.bf16.msra.mxu0 %v8174_v23  ;;  %5808 = vmatpush1.bf16.msra.mxu1 %v8177_v24  ;;  %v8278_v23 = vld [vmem:[%s11187_s1 + $0x122c] ss:$16 sps:$4 sm:$0xff]  }
 0x208   :  { %5250 = vmatprep.subr.bf16.mxu0 %v8182_v25  ;;  %5809 = vmatprep.subr.bf16.mxu1 %v8185_v26  ;;  %v8365_v24 = vld [vmem:[%s11188_s0 + $0x4c] ss:$100 sps:$4 sm:$0xff]   ;;  %v8276_v26 = vld [vmem:[%s11187_s1 + $0x1228] ss:$16 sps:$4 sm:$0xff]  }
 0x209   :  { %v8273_v25 = vld [vmem:[%s11187_s1 + $0x1220] ss:$16 sps:$4 sm:$0xff]  }
 0x20b   :  { %5251 = vmatpush1.bf16.msra.mxu0 %v8180_v27  ;;  %5810 = vmatpush1.bf16.msra.mxu1 %v8183_v28  ;;  %v8281_v27 = vld [vmem:[%s11187_s1 + $0x1244] ss:$16 sps:$4 sm:$0xff]   ;;  %v8284_v28 = vld [vmem:[%s11187_s1 + $0x124c] ss:$16 sps:$4 sm:$0xff]  }
 0x20c   :  { %5252 = vmatprep.subr.bf16.mxu0 %v8188_v29  ;;  %5811 = vmatprep.subr.bf16.mxu1 %v8191_v30  ;;  %v8279_v29 = vld [vmem:[%s11187_s1 + $0x1240] ss:$16 sps:$4 sm:$0xff]   ;;  %v8282_v30 = vld [vmem:[%s11187_s1 + $0x1248] ss:$16 sps:$4 sm:$0xff]  }
 0x20f   :  { %5253 = vmatpush1.bf16.msra.mxu0 %v8186_v31  ;;  %5812 = vmatpush1.bf16.msra.mxu1 %v8189_v32  ;;  %v8287_v31 = vld [vmem:[%s11187_s1 + $0x1264] ss:$16 sps:$4 sm:$0xff]   ;;  %v8290_v32 = vld [vmem:[%s11187_s1 + $0x126c] ss:$16 sps:$4 sm:$0xff]  }
 0x210   :  { %5254 = vmatprep.subr.bf16.mxu0 %v8194_v33  ;;  %5813 = vmatprep.subr.bf16.mxu1 %v8197_v34  ;;  %v8285_v33 = vld [vmem:[%s11187_s1 + $0x1260] ss:$16 sps:$4 sm:$0xff]   ;;  %v8288_v34 = vld [vmem:[%s11187_s1 + $0x1268] ss:$16 sps:$4 sm:$0xff]  }
 0x213   :  { %5255 = vmatpush1.bf16.msra.mxu0 %v8192_v35  ;;  %5814 = vmatpush1.bf16.msra.mxu1 %v8195_v36  ;;  %v8293_v35 = vld [vmem:[%s11187_s1 + $0x1284] ss:$16 sps:$4 sm:$0xff]   ;;  %v8296_v36 = vld [vmem:[%s11187_s1 + $0x128c] ss:$16 sps:$4 sm:$0xff]  }
 0x214   :  { %5256 = vmatprep.subr.bf16.mxu0 %v8200_v37  ;;  %5815 = vmatprep.subr.bf16.mxu1 %v8203_v38  ;;  %v8291_v37 = vld [vmem:[%s11187_s1 + $0x1280] ss:$16 sps:$4 sm:$0xff]   ;;  %v8294_v38 = vld [vmem:[%s11187_s1 + $0x1288] ss:$16 sps:$4 sm:$0xff]  }
 0x217   :  { %5257 = vmatpush1.bf16.msra.mxu0 %v8198_v39  ;;  %5816 = vmatpush1.bf16.msra.mxu1 %v8201_v40  ;;  %v8299_v39 = vld [vmem:[%s11187_s1 + $0x12a4] ss:$16 sps:$4 sm:$0xff]   ;;  %v8302_v40 = vld [vmem:[%s11187_s1 + $0x12ac] ss:$16 sps:$4 sm:$0xff]  }
 0x218   :  { %5258 = vmatprep.subr.bf16.mxu0 %v8206_v41  ;;  %5817 = vmatprep.subr.bf16.mxu1 %v8209_v42  ;;  %v8297_v41 = vld [vmem:[%s11187_s1 + $0x12a0] ss:$16 sps:$4 sm:$0xff]   ;;  %v8300_v42 = vld [vmem:[%s11187_s1 + $0x12a8] ss:$16 sps:$4 sm:$0xff]  }
 0x21b   :  { %5259 = vmatpush1.bf16.msra.mxu0 %v8204_v43  ;;  %5818 = vmatpush1.bf16.msra.mxu1 %v8207_v44  ;;  %v8305_v43 = vld [vmem:[%s11187_s1 + $0x12c4] ss:$16 sps:$4 sm:$0xff]   ;;  %v8308_v44 = vld [vmem:[%s11187_s1 + $0x12cc] ss:$16 sps:$4 sm:$0xff]  }
 0x21c   :  { %5260 = vmatprep.subr.bf16.mxu0 %v8212_v45  ;;  %5819 = vmatprep.subr.bf16.mxu1 %v8215_v46  ;;  %v8303_v45 = vld [vmem:[%s11187_s1 + $0x12c0] ss:$16 sps:$4 sm:$0xff]   ;;  %v8306_v46 = vld [vmem:[%s11187_s1 + $0x12c8] ss:$16 sps:$4 sm:$0xff]  }
 0x21f   :  { %5261 = vmatpush1.bf16.msra.mxu0 %v8210_v47  ;;  %5820 = vmatpush1.bf16.msra.mxu1 %v8213_v48  ;;  %v8311_v47 = vld [vmem:[%s11187_s1 + $0x12e4] ss:$16 sps:$4 sm:$0xff]   ;;  %v8314_v48 = vld [vmem:[%s11187_s1 + $0x12ec] ss:$16 sps:$4 sm:$0xff]  }
 0x220   :  { %5262 = vmatprep.subr.bf16.mxu0 %v8218_v49  ;;  %5821 = vmatprep.subr.bf16.mxu1 %v8221_v50  ;;  %v8309_v49 = vld [vmem:[%s11187_s1 + $0x12e0] ss:$16 sps:$4 sm:$0xff]   ;;  %v8312_v50 = vld [vmem:[%s11187_s1 + $0x12e8] ss:$16 sps:$4 sm:$0xff]  }
 0x223   :  { %5263 = vmatpush1.bf16.msra.mxu0 %v8216_v51  ;;  %5822 = vmatpush1.bf16.msra.mxu1 %v8219_v52  ;;  %v8317_v51 = vld [vmem:[%s11187_s1 + $0x1304] ss:$16 sps:$4 sm:$0xff]   ;;  %v8320_v52 = vld [vmem:[%s11187_s1 + $0x130c] ss:$16 sps:$4 sm:$0xff]  }
 0x224   :  { %5264 = vmatprep.subr.bf16.mxu0 %v8224_v53  ;;  %5823 = vmatprep.subr.bf16.mxu1 %v8227_v54  ;;  %v8315_v53 = vld [vmem:[%s11187_s1 + $0x1300] ss:$16 sps:$4 sm:$0xff]   ;;  %v8318_v54 = vld [vmem:[%s11187_s1 + $0x1308] ss:$16 sps:$4 sm:$0xff]  }
 0x227   :  { %5265 = vmatpush1.bf16.msra.mxu0 %v8222_v55  ;;  %5824 = vmatpush1.bf16.msra.mxu1 %v8225_v56  ;;  %v8323_v55 = vld [vmem:[%s11187_s1 + $0x1324] ss:$16 sps:$4 sm:$0xff]   ;;  %v8326_v56 = vld [vmem:[%s11187_s1 + $0x132c] ss:$16 sps:$4 sm:$0xff]  }
 0x228   :  { %5266 = vmatprep.subr.bf16.mxu0 %v8230_v57  ;;  %5825 = vmatprep.subr.bf16.mxu1 %v8233_v58  ;;  %v8321_v57 = vld [vmem:[%s11187_s1 + $0x1320] ss:$16 sps:$4 sm:$0xff]   ;;  %v8324_v58 = vld [vmem:[%s11187_s1 + $0x1328] ss:$16 sps:$4 sm:$0xff]  }
 0x22b   :  { %5267 = vmatpush1.bf16.msra.mxu0 %v8228_v59  ;;  %5826 = vmatpush1.bf16.msra.mxu1 %v8231_v60  ;;  %v8329_v59 = vld [vmem:[%s11187_s1 + $0x1344] ss:$16 sps:$4 sm:$0xff]   ;;  %v8332_v60 = vld [vmem:[%s11187_s1 + $0x134c] ss:$16 sps:$4 sm:$0xff]  }
 0x22c   :  { %5268 = vmatprep.subr.bf16.mxu0 %v8236_v61  ;;  %5827 = vmatprep.subr.bf16.mxu1 %v8239_v62  ;;  %v8327_v61 = vld [vmem:[%s11187_s1 + $0x1340] ss:$16 sps:$4 sm:$0xff]   ;;  %v8330_v62 = vld [vmem:[%s11187_s1 + $0x1348] ss:$16 sps:$4 sm:$0xff]  }
 0x22f   :  { %5269 = vmatpush1.bf16.msra.mxu0 %v8234_v63  ;;  %5828 = vmatpush1.bf16.msra.mxu1 %v8237_v0  ;;  %v8335_v63 = vld [vmem:[%s11187_s1 + $0x1364] ss:$16 sps:$4 sm:$0xff]   ;;  %v8338_v0 = vld [vmem:[%s11187_s1 + $0x136c] ss:$16 sps:$4 sm:$0xff]  }
 0x230   :  { %5270 = vmatprep.subr.bf16.mxu0 %v8242_v1  ;;  %5829 = vmatprep.subr.bf16.mxu1 %v8245_v2  ;;  %v8333_v1 = vld [vmem:[%s11187_s1 + $0x1360] ss:$16 sps:$4 sm:$0xff]   ;;  %v8336_v2 = vld [vmem:[%s11187_s1 + $0x1368] ss:$16 sps:$4 sm:$0xff]  }
 0x233   :  { %5271 = vmatpush1.bf16.msra.mxu0 %v8240_v3  ;;  %5830 = vmatpush1.bf16.msra.mxu1 %v8243_v4  ;;  %v8341_v3 = vld [vmem:[%s11187_s1 + $0x1384] ss:$16 sps:$4 sm:$0xff]   ;;  %v8344_v4 = vld [vmem:[%s11187_s1 + $0x138c] ss:$16 sps:$4 sm:$0xff]  }
 0x234   :  { %5272 = vmatprep.subr.bf16.mxu0 %v8248_v5  ;;  %5831 = vmatprep.subr.bf16.mxu1 %v8251_v6  ;;  %v8339_v5 = vld [vmem:[%s11187_s1 + $0x1380] ss:$16 sps:$4 sm:$0xff]   ;;  %v8342_v6 = vld [vmem:[%s11187_s1 + $0x1388] ss:$16 sps:$4 sm:$0xff]  }
 0x237   :  { %5273 = vmatpush1.bf16.msra.mxu0 %v8246_v7  ;;  %5832 = vmatpush1.bf16.msra.mxu1 %v8249_v8  ;;  %v8347_v7 = vld [vmem:[%s11187_s1 + $0x13a4] ss:$16 sps:$4 sm:$0xff]   ;;  %v8350_v8 = vld [vmem:[%s11187_s1 + $0x13ac] ss:$16 sps:$4 sm:$0xff]  }
 0x238   :  { %5274 = vmatprep.subr.bf16.mxu0 %v8254_v9  ;;  %5833 = vmatprep.subr.bf16.mxu1 %v8257_v10  ;;  %v8345_v9 = vld [vmem:[%s11187_s1 + $0x13a0] ss:$16 sps:$4 sm:$0xff]   ;;  %v8348_v10 = vld [vmem:[%s11187_s1 + $0x13a8] ss:$16 sps:$4 sm:$0xff]  }
 0x23b   :  { %5275 = vmatpush1.bf16.msra.mxu0 %v8252_v11  ;;  %5834 = vmatpush1.bf16.msra.mxu1 %v8255_v12  ;;  %v8353_v11 = vld [vmem:[%s11187_s1 + $0x13c4] ss:$16 sps:$4 sm:$0xff]   ;;  %v8356_v12 = vld [vmem:[%s11187_s1 + $0x13cc] ss:$16 sps:$4 sm:$0xff]  }
 0x23c   :  { %5276 = vmatprep.subr.bf16.mxu0 %v8260_v13  ;;  %5835 = vmatprep.subr.bf16.mxu1 %v8263_v14  ;;  %v8351_v13 = vld [vmem:[%s11187_s1 + $0x13c0] ss:$16 sps:$4 sm:$0xff]   ;;  %v8354_v14 = vld [vmem:[%s11187_s1 + $0x13c8] ss:$16 sps:$4 sm:$0xff]  }
 0x23f   :  { %5277 = vmatpush1.bf16.msra.mxu0 %v8258_v15  ;;  %5836 = vmatpush1.bf16.msra.mxu1 %v8261_v16  ;;  %v8359_v15 = vld [vmem:[%s11187_s1 + $0x13e4] ss:$16 sps:$4 sm:$0xff]   ;;  %v8362_v16 = vld [vmem:[%s11187_s1 + $0x13ec] ss:$16 sps:$4 sm:$0xff]  }
 0x240   :  { %5289 = vmatprep.subr.bf16.mxu0 %v8269_v17  ;;  %5848 = vmatprep.subr.bf16.mxu1 %v8272_v18  ;;  %v8357_v17 = vld [vmem:[%s11187_s1 + $0x13e0] ss:$16 sps:$4 sm:$0xff]   ;;  %v8360_v18 = vld [vmem:[%s11187_s1 + $0x13e8] ss:$16 sps:$4 sm:$0xff]  }
 0x242   :  { %5279 = vmatmul.mubr.bf16.vlgmr.msra.gmra.mrb[0].mxu0 %v8264_v19  ;;  %5838 = vmatmul.mubr.bf16.vlgmr.msra.gmra.mrb[0].mxu1 %v8264_v19  ;;  %v8368_v19 = vld [vmem:[%s11187_s1 + $0x1404] ss:$16 sps:$4 sm:$0xff]  }
 0x243   :  { %5290 = vmatpush1.bf16.msra.mxu0 %v8267_v20  ;;  %5849 = vmatpush1.bf16.msra.mxu1 %v8270_v21  ;;  %v8371_v20 = vld [vmem:[%s11187_s1 + $0x140c] ss:$16 sps:$4 sm:$0xff]  }
 0x244   :  { %5291 = vmatprep.subr.bf16.mxu0 %v8275_v22  ;;  %5850 = vmatprep.subr.bf16.mxu1 %v8278_v23  ;;  %v8363_v21 = vld [vmem:[%s11188_s0 + $0x48] ss:$100 sps:$4 sm:$0xff]   ;;  %v8366_v22 = vld [vmem:[%s11187_s1 + $0x1400] ss:$16 sps:$4 sm:$0xff]  }
 0x245   :  { %5321 = vmatprep.mubr.bf16.mxu0 %v8365_v24  ;;  %5880 = vmatprep.mubr.bf16.mxu1 %v8365_v24  ;;  %v8369_v23 = vld [vmem:[%s11187_s1 + $0x1408] ss:$16 sps:$4 sm:$0xff]   ;;  %v8374_v24 = vld [vmem:[%s11187_s1 + $0x1424] ss:$16 sps:$4 sm:$0xff]  }
 0x247   :  { %5292 = vmatpush1.bf16.msra.mxu0 %v8273_v25  ;;  %5851 = vmatpush1.bf16.msra.mxu1 %v8276_v26  ;;  %v8377_v25 = vld [vmem:[%s11187_s1 + $0x142c] ss:$16 sps:$4 sm:$0xff]   ;;  %v8464_v26 = vld [vmem:[%s11188_s0 + $0x54] ss:$100 sps:$4 sm:$0xff]  }
 0x248   :  { %5293 = vmatprep.subr.bf16.mxu0 %v8281_v27  ;;  %5852 = vmatprep.subr.bf16.mxu1 %v8284_v28  ;;  %v8372_v27 = vld [vmem:[%s11187_s1 + $0x1420] ss:$16 sps:$4 sm:$0xff]   ;;  %v8375_v28 = vld [vmem:[%s11187_s1 + $0x1428] ss:$16 sps:$4 sm:$0xff]  }
 0x24b   :  { %5294 = vmatpush1.bf16.msra.mxu0 %v8279_v29  ;;  %5853 = vmatpush1.bf16.msra.mxu1 %v8282_v30  ;;  %v8380_v29 = vld [vmem:[%s11187_s1 + $0x1444] ss:$16 sps:$4 sm:$0xff]   ;;  %v8383_v30 = vld [vmem:[%s11187_s1 + $0x144c] ss:$16 sps:$4 sm:$0xff]  }
 0x24c   :  { %5295 = vmatprep.subr.bf16.mxu0 %v8287_v31  ;;  %5854 = vmatprep.subr.bf16.mxu1 %v8290_v32  ;;  %v8378_v31 = vld [vmem:[%s11187_s1 + $0x1440] ss:$16 sps:$4 sm:$0xff]   ;;  %v8381_v32 = vld [vmem:[%s11187_s1 + $0x1448] ss:$16 sps:$4 sm:$0xff]  }
 0x24f   :  { %5296 = vmatpush1.bf16.msra.mxu0 %v8285_v33  ;;  %5855 = vmatpush1.bf16.msra.mxu1 %v8288_v34  ;;  %v8386_v33 = vld [vmem:[%s11187_s1 + $0x1464] ss:$16 sps:$4 sm:$0xff]   ;;  %v8389_v34 = vld [vmem:[%s11187_s1 + $0x146c] ss:$16 sps:$4 sm:$0xff]  }
 0x250   :  { %5297 = vmatprep.subr.bf16.mxu0 %v8293_v35  ;;  %5856 = vmatprep.subr.bf16.mxu1 %v8296_v36  ;;  %v8384_v35 = vld [vmem:[%s11187_s1 + $0x1460] ss:$16 sps:$4 sm:$0xff]   ;;  %v8387_v36 = vld [vmem:[%s11187_s1 + $0x1468] ss:$16 sps:$4 sm:$0xff]  }
 0x253   :  { %5298 = vmatpush1.bf16.msra.mxu0 %v8291_v37  ;;  %5857 = vmatpush1.bf16.msra.mxu1 %v8294_v38  ;;  %v8392_v37 = vld [vmem:[%s11187_s1 + $0x1484] ss:$16 sps:$4 sm:$0xff]   ;;  %v8395_v38 = vld [vmem:[%s11187_s1 + $0x148c] ss:$16 sps:$4 sm:$0xff]  }
 0x254   :  { %5299 = vmatprep.subr.bf16.mxu0 %v8299_v39  ;;  %5858 = vmatprep.subr.bf16.mxu1 %v8302_v40  ;;  %v8390_v39 = vld [vmem:[%s11187_s1 + $0x1480] ss:$16 sps:$4 sm:$0xff]   ;;  %v8393_v40 = vld [vmem:[%s11187_s1 + $0x1488] ss:$16 sps:$4 sm:$0xff]  }
 0x257   :  { %5300 = vmatpush1.bf16.msra.mxu0 %v8297_v41  ;;  %5859 = vmatpush1.bf16.msra.mxu1 %v8300_v42  ;;  %v8398_v41 = vld [vmem:[%s11187_s1 + $0x14a4] ss:$16 sps:$4 sm:$0xff]   ;;  %v8401_v42 = vld [vmem:[%s11187_s1 + $0x14ac] ss:$16 sps:$4 sm:$0xff]  }
 0x258   :  { %5301 = vmatprep.subr.bf16.mxu0 %v8305_v43  ;;  %5860 = vmatprep.subr.bf16.mxu1 %v8308_v44  ;;  %v8396_v43 = vld [vmem:[%s11187_s1 + $0x14a0] ss:$16 sps:$4 sm:$0xff]   ;;  %v8399_v44 = vld [vmem:[%s11187_s1 + $0x14a8] ss:$16 sps:$4 sm:$0xff]  }
 0x25b   :  { %5302 = vmatpush1.bf16.msra.mxu0 %v8303_v45  ;;  %5861 = vmatpush1.bf16.msra.mxu1 %v8306_v46  ;;  %v8404_v45 = vld [vmem:[%s11187_s1 + $0x14c4] ss:$16 sps:$4 sm:$0xff]   ;;  %v8407_v46 = vld [vmem:[%s11187_s1 + $0x14cc] ss:$16 sps:$4 sm:$0xff]  }
 0x25c   :  { %5303 = vmatprep.subr.bf16.mxu0 %v8311_v47  ;;  %5862 = vmatprep.subr.bf16.mxu1 %v8314_v48  ;;  %v8402_v47 = vld [vmem:[%s11187_s1 + $0x14c0] ss:$16 sps:$4 sm:$0xff]   ;;  %v8405_v48 = vld [vmem:[%s11187_s1 + $0x14c8] ss:$16 sps:$4 sm:$0xff]  }
 0x25f   :  { %5304 = vmatpush1.bf16.msra.mxu0 %v8309_v49  ;;  %5863 = vmatpush1.bf16.msra.mxu1 %v8312_v50  ;;  %v8410_v49 = vld [vmem:[%s11187_s1 + $0x14e4] ss:$16 sps:$4 sm:$0xff]   ;;  %v8413_v50 = vld [vmem:[%s11187_s1 + $0x14ec] ss:$16 sps:$4 sm:$0xff]  }
 0x260   :  { %5305 = vmatprep.subr.bf16.mxu0 %v8317_v51  ;;  %5864 = vmatprep.subr.bf16.mxu1 %v8320_v52  ;;  %v8408_v51 = vld [vmem:[%s11187_s1 + $0x14e0] ss:$16 sps:$4 sm:$0xff]   ;;  %v8411_v52 = vld [vmem:[%s11187_s1 + $0x14e8] ss:$16 sps:$4 sm:$0xff]  }
 0x263   :  { %5306 = vmatpush1.bf16.msra.mxu0 %v8315_v53  ;;  %5865 = vmatpush1.bf16.msra.mxu1 %v8318_v54  ;;  %v8416_v53 = vld [vmem:[%s11187_s1 + $0x1504] ss:$16 sps:$4 sm:$0xff]   ;;  %v8419_v54 = vld [vmem:[%s11187_s1 + $0x150c] ss:$16 sps:$4 sm:$0xff]  }
 0x264   :  { %5307 = vmatprep.subr.bf16.mxu0 %v8323_v55  ;;  %5866 = vmatprep.subr.bf16.mxu1 %v8326_v56  ;;  %v8414_v55 = vld [vmem:[%s11187_s1 + $0x1500] ss:$16 sps:$4 sm:$0xff]   ;;  %v8417_v56 = vld [vmem:[%s11187_s1 + $0x1508] ss:$16 sps:$4 sm:$0xff]  }
 0x267   :  { %5308 = vmatpush1.bf16.msra.mxu0 %v8321_v57  ;;  %5867 = vmatpush1.bf16.msra.mxu1 %v8324_v58  ;;  %v8422_v57 = vld [vmem:[%s11187_s1 + $0x1524] ss:$16 sps:$4 sm:$0xff]   ;;  %v8425_v58 = vld [vmem:[%s11187_s1 + $0x152c] ss:$16 sps:$4 sm:$0xff]  }
 0x268   :  { %5309 = vmatprep.subr.bf16.mxu0 %v8329_v59  ;;  %5868 = vmatprep.subr.bf16.mxu1 %v8332_v60  ;;  %v8420_v59 = vld [vmem:[%s11187_s1 + $0x1520] ss:$16 sps:$4 sm:$0xff]   ;;  %v8423_v60 = vld [vmem:[%s11187_s1 + $0x1528] ss:$16 sps:$4 sm:$0xff]  }
 0x26b   :  { %5310 = vmatpush1.bf16.msra.mxu0 %v8327_v61  ;;  %5869 = vmatpush1.bf16.msra.mxu1 %v8330_v62  ;;  %v8428_v61 = vld [vmem:[%s11187_s1 + $0x1544] ss:$16 sps:$4 sm:$0xff]   ;;  %v8431_v62 = vld [vmem:[%s11187_s1 + $0x154c] ss:$16 sps:$4 sm:$0xff]  }
 0x26c   :  { %5311 = vmatprep.subr.bf16.mxu0 %v8335_v63  ;;  %5870 = vmatprep.subr.bf16.mxu1 %v8338_v0  ;;  %v8426_v63 = vld [vmem:[%s11187_s1 + $0x1540] ss:$16 sps:$4 sm:$0xff]   ;;  %v8429_v0 = vld [vmem:[%s11187_s1 + $0x1548] ss:$16 sps:$4 sm:$0xff]  }
 0x26f   :  { %5312 = vmatpush1.bf16.msra.mxu0 %v8333_v1  ;;  %5871 = vmatpush1.bf16.msra.mxu1 %v8336_v2  ;;  %v8434_v1 = vld [vmem:[%s11187_s1 + $0x1564] ss:$16 sps:$4 sm:$0xff]   ;;  %v8437_v2 = vld [vmem:[%s11187_s1 + $0x156c] ss:$16 sps:$4 sm:$0xff]  }
 0x270   :  { %5313 = vmatprep.subr.bf16.mxu0 %v8341_v3  ;;  %5872 = vmatprep.subr.bf16.mxu1 %v8344_v4  ;;  %v8432_v3 = vld [vmem:[%s11187_s1 + $0x1560] ss:$16 sps:$4 sm:$0xff]   ;;  %v8435_v4 = vld [vmem:[%s11187_s1 + $0x1568] ss:$16 sps:$4 sm:$0xff]  }
 0x273   :  { %5314 = vmatpush1.bf16.msra.mxu0 %v8339_v5  ;;  %5873 = vmatpush1.bf16.msra.mxu1 %v8342_v6  ;;  %v8440_v5 = vld [vmem:[%s11187_s1 + $0x1584] ss:$16 sps:$4 sm:$0xff]   ;;  %v8443_v6 = vld [vmem:[%s11187_s1 + $0x158c] ss:$16 sps:$4 sm:$0xff]  }
 0x274   :  { %5315 = vmatprep.subr.bf16.mxu0 %v8347_v7  ;;  %5874 = vmatprep.subr.bf16.mxu1 %v8350_v8  ;;  %v8438_v7 = vld [vmem:[%s11187_s1 + $0x1580] ss:$16 sps:$4 sm:$0xff]   ;;  %v8441_v8 = vld [vmem:[%s11187_s1 + $0x1588] ss:$16 sps:$4 sm:$0xff]  }
 0x277   :  { %5316 = vmatpush1.bf16.msra.mxu0 %v8345_v9  ;;  %5875 = vmatpush1.bf16.msra.mxu1 %v8348_v10  ;;  %v8446_v9 = vld [vmem:[%s11187_s1 + $0x15a4] ss:$16 sps:$4 sm:$0xff]   ;;  %v8449_v10 = vld [vmem:[%s11187_s1 + $0x15ac] ss:$16 sps:$4 sm:$0xff]  }
 0x278   :  { %5317 = vmatprep.subr.bf16.mxu0 %v8353_v11  ;;  %5876 = vmatprep.subr.bf16.mxu1 %v8356_v12  ;;  %v8444_v11 = vld [vmem:[%s11187_s1 + $0x15a0] ss:$16 sps:$4 sm:$0xff]   ;;  %v8447_v12 = vld [vmem:[%s11187_s1 + $0x15a8] ss:$16 sps:$4 sm:$0xff]  }
 0x27b   :  { %5318 = vmatpush1.bf16.msra.mxu0 %v8351_v13  ;;  %5877 = vmatpush1.bf16.msra.mxu1 %v8354_v14  ;;  %v8452_v13 = vld [vmem:[%s11187_s1 + $0x15c4] ss:$16 sps:$4 sm:$0xff]   ;;  %v8455_v14 = vld [vmem:[%s11187_s1 + $0x15cc] ss:$16 sps:$4 sm:$0xff]  }
 0x27c   :  { %5319 = vmatprep.subr.bf16.mxu0 %v8359_v15  ;;  %5878 = vmatprep.subr.bf16.mxu1 %v8362_v16  ;;  %v8450_v15 = vld [vmem:[%s11187_s1 + $0x15c0] ss:$16 sps:$4 sm:$0xff]   ;;  %v8453_v16 = vld [vmem:[%s11187_s1 + $0x15c8] ss:$16 sps:$4 sm:$0xff]  }
 0x27f   :  { %5320 = vmatpush1.bf16.msra.mxu0 %v8357_v17  ;;  %5879 = vmatpush1.bf16.msra.mxu1 %v8360_v18  ;;  %v8458_v17 = vld [vmem:[%s11187_s1 + $0x15e4] ss:$16 sps:$4 sm:$0xff]   ;;  %v8461_v18 = vld [vmem:[%s11187_s1 + $0x15ec] ss:$16 sps:$4 sm:$0xff]  }
 0x280   :  { %5332 = vmatprep.subr.bf16.mxu0 %v8368_v19  ;;  %5891 = vmatprep.subr.bf16.mxu1 %v8371_v20  ;;  %v8456_v19 = vld [vmem:[%s11187_s1 + $0x15e0] ss:$16 sps:$4 sm:$0xff]   ;;  %v8459_v20 = vld [vmem:[%s11187_s1 + $0x15e8] ss:$16 sps:$4 sm:$0xff]  }
 0x282   :  { %5322 = vmatmul.mubr.bf16.vlgmr.msra.gmra.mrb[0].mxu0 %v8363_v21  ;;  %5881 = vmatmul.mubr.bf16.vlgmr.msra.gmra.mrb[0].mxu1 %v8363_v21  ;;  %v8467_v21 = vld [vmem:[%s11187_s1 + $0x1604] ss:$16 sps:$4 sm:$0xff]  }
 0x283   :  { %5333 = vmatpush1.bf16.msra.mxu0 %v8366_v22  ;;  %5892 = vmatpush1.bf16.msra.mxu1 %v8369_v23  ;;  %v8470_v22 = vld [vmem:[%s11187_s1 + $0x160c] ss:$16 sps:$4 sm:$0xff]   ;;  %v8462_v23 = vld [vmem:[%s11188_s0 + $0x50] ss:$100 sps:$4 sm:$0xff]  }
 0x284   :  { %5334 = vmatprep.subr.bf16.mxu0 %v8374_v24  ;;  %5893 = vmatprep.subr.bf16.mxu1 %v8377_v25  ;;  %v8465_v24 = vld [vmem:[%s11187_s1 + $0x1600] ss:$16 sps:$4 sm:$0xff]   ;;  %v8468_v25 = vld [vmem:[%s11187_s1 + $0x1608] ss:$16 sps:$4 sm:$0xff]  }
 0x285   :  { %5364 = vmatprep.mubr.bf16.mxu0 %v8464_v26  ;;  %5923 = vmatprep.mubr.bf16.mxu1 %v8464_v26  ;;  %v8473_v26 = vld [vmem:[%s11187_s1 + $0x1624] ss:$16 sps:$4 sm:$0xff]  }
 0x287   :  { %5335 = vmatpush1.bf16.msra.mxu0 %v8372_v27  ;;  %5894 = vmatpush1.bf16.msra.mxu1 %v8375_v28  ;;  %v8476_v27 = vld [vmem:[%s11187_s1 + $0x162c] ss:$16 sps:$4 sm:$0xff]  }
 0x288   :  { %5336 = vmatprep.subr.bf16.mxu0 %v8380_v29  ;;  %5895 = vmatprep.subr.bf16.mxu1 %v8383_v30  ;;  %v8563_v28 = vld [vmem:[%s11188_s0 + $0x5c] ss:$100 sps:$4 sm:$0xff]   ;;  %v8474_v30 = vld [vmem:[%s11187_s1 + $0x1628] ss:$16 sps:$4 sm:$0xff]  }
 0x289   :  { %v8471_v29 = vld [vmem:[%s11187_s1 + $0x1620] ss:$16 sps:$4 sm:$0xff]  }
 0x28b   :  { %5337 = vmatpush1.bf16.msra.mxu0 %v8378_v31  ;;  %5896 = vmatpush1.bf16.msra.mxu1 %v8381_v32  ;;  %v8479_v31 = vld [vmem:[%s11187_s1 + $0x1644] ss:$16 sps:$4 sm:$0xff]   ;;  %v8482_v32 = vld [vmem:[%s11187_s1 + $0x164c] ss:$16 sps:$4 sm:$0xff]  }
 0x28c   :  { %5338 = vmatprep.subr.bf16.mxu0 %v8386_v33  ;;  %5897 = vmatprep.subr.bf16.mxu1 %v8389_v34  ;;  %v8477_v33 = vld [vmem:[%s11187_s1 + $0x1640] ss:$16 sps:$4 sm:$0xff]   ;;  %v8480_v34 = vld [vmem:[%s11187_s1 + $0x1648] ss:$16 sps:$4 sm:$0xff]  }
 0x28f   :  { %5339 = vmatpush1.bf16.msra.mxu0 %v8384_v35  ;;  %5898 = vmatpush1.bf16.msra.mxu1 %v8387_v36  ;;  %v8485_v35 = vld [vmem:[%s11187_s1 + $0x1664] ss:$16 sps:$4 sm:$0xff]   ;;  %v8488_v36 = vld [vmem:[%s11187_s1 + $0x166c] ss:$16 sps:$4 sm:$0xff]  }
 0x290   :  { %5340 = vmatprep.subr.bf16.mxu0 %v8392_v37  ;;  %5899 = vmatprep.subr.bf16.mxu1 %v8395_v38  ;;  %v8483_v37 = vld [vmem:[%s11187_s1 + $0x1660] ss:$16 sps:$4 sm:$0xff]   ;;  %v8486_v38 = vld [vmem:[%s11187_s1 + $0x1668] ss:$16 sps:$4 sm:$0xff]  }
 0x293   :  { %5341 = vmatpush1.bf16.msra.mxu0 %v8390_v39  ;;  %5900 = vmatpush1.bf16.msra.mxu1 %v8393_v40  ;;  %v8491_v39 = vld [vmem:[%s11187_s1 + $0x1684] ss:$16 sps:$4 sm:$0xff]   ;;  %v8494_v40 = vld [vmem:[%s11187_s1 + $0x168c] ss:$16 sps:$4 sm:$0xff]  }
 0x294   :  { %5342 = vmatprep.subr.bf16.mxu0 %v8398_v41  ;;  %5901 = vmatprep.subr.bf16.mxu1 %v8401_v42  ;;  %v8489_v41 = vld [vmem:[%s11187_s1 + $0x1680] ss:$16 sps:$4 sm:$0xff]   ;;  %v8492_v42 = vld [vmem:[%s11187_s1 + $0x1688] ss:$16 sps:$4 sm:$0xff]  }
 0x297   :  { %5343 = vmatpush1.bf16.msra.mxu0 %v8396_v43  ;;  %5902 = vmatpush1.bf16.msra.mxu1 %v8399_v44  ;;  %v8497_v43 = vld [vmem:[%s11187_s1 + $0x16a4] ss:$16 sps:$4 sm:$0xff]   ;;  %v8500_v44 = vld [vmem:[%s11187_s1 + $0x16ac] ss:$16 sps:$4 sm:$0xff]  }
 0x298   :  { %5344 = vmatprep.subr.bf16.mxu0 %v8404_v45  ;;  %5903 = vmatprep.subr.bf16.mxu1 %v8407_v46  ;;  %v8495_v45 = vld [vmem:[%s11187_s1 + $0x16a0] ss:$16 sps:$4 sm:$0xff]   ;;  %v8498_v46 = vld [vmem:[%s11187_s1 + $0x16a8] ss:$16 sps:$4 sm:$0xff]  }
 0x29b   :  { %5345 = vmatpush1.bf16.msra.mxu0 %v8402_v47  ;;  %5904 = vmatpush1.bf16.msra.mxu1 %v8405_v48  ;;  %v8503_v47 = vld [vmem:[%s11187_s1 + $0x16c4] ss:$16 sps:$4 sm:$0xff]   ;;  %v8506_v48 = vld [vmem:[%s11187_s1 + $0x16cc] ss:$16 sps:$4 sm:$0xff]  }
 0x29c   :  { %5346 = vmatprep.subr.bf16.mxu0 %v8410_v49  ;;  %5905 = vmatprep.subr.bf16.mxu1 %v8413_v50  ;;  %v8501_v49 = vld [vmem:[%s11187_s1 + $0x16c0] ss:$16 sps:$4 sm:$0xff]   ;;  %v8504_v50 = vld [vmem:[%s11187_s1 + $0x16c8] ss:$16 sps:$4 sm:$0xff]  }
 0x29f   :  { %5347 = vmatpush1.bf16.msra.mxu0 %v8408_v51  ;;  %5906 = vmatpush1.bf16.msra.mxu1 %v8411_v52  ;;  %v8509_v51 = vld [vmem:[%s11187_s1 + $0x16e4] ss:$16 sps:$4 sm:$0xff]   ;;  %v8512_v52 = vld [vmem:[%s11187_s1 + $0x16ec] ss:$16 sps:$4 sm:$0xff]  }
 0x2a0   :  { %5348 = vmatprep.subr.bf16.mxu0 %v8416_v53  ;;  %5907 = vmatprep.subr.bf16.mxu1 %v8419_v54  ;;  %v8507_v53 = vld [vmem:[%s11187_s1 + $0x16e0] ss:$16 sps:$4 sm:$0xff]   ;;  %v8510_v54 = vld [vmem:[%s11187_s1 + $0x16e8] ss:$16 sps:$4 sm:$0xff]  }
 0x2a3   :  { %5349 = vmatpush1.bf16.msra.mxu0 %v8414_v55  ;;  %5908 = vmatpush1.bf16.msra.mxu1 %v8417_v56  ;;  %v8515_v55 = vld [vmem:[%s11187_s1 + $0x1704] ss:$16 sps:$4 sm:$0xff]   ;;  %v8518_v56 = vld [vmem:[%s11187_s1 + $0x170c] ss:$16 sps:$4 sm:$0xff]  }
 0x2a4   :  { %5350 = vmatprep.subr.bf16.mxu0 %v8422_v57  ;;  %5909 = vmatprep.subr.bf16.mxu1 %v8425_v58  ;;  %v8513_v57 = vld [vmem:[%s11187_s1 + $0x1700] ss:$16 sps:$4 sm:$0xff]   ;;  %v8516_v58 = vld [vmem:[%s11187_s1 + $0x1708] ss:$16 sps:$4 sm:$0xff]  }
 0x2a7   :  { %5351 = vmatpush1.bf16.msra.mxu0 %v8420_v59  ;;  %5910 = vmatpush1.bf16.msra.mxu1 %v8423_v60  ;;  %v8521_v59 = vld [vmem:[%s11187_s1 + $0x1724] ss:$16 sps:$4 sm:$0xff]   ;;  %v8524_v60 = vld [vmem:[%s11187_s1 + $0x172c] ss:$16 sps:$4 sm:$0xff]  }
 0x2a8   :  { %5352 = vmatprep.subr.bf16.mxu0 %v8428_v61  ;;  %5911 = vmatprep.subr.bf16.mxu1 %v8431_v62  ;;  %v8519_v61 = vld [vmem:[%s11187_s1 + $0x1720] ss:$16 sps:$4 sm:$0xff]   ;;  %v8522_v62 = vld [vmem:[%s11187_s1 + $0x1728] ss:$16 sps:$4 sm:$0xff]  }
 0x2ab   :  { %5353 = vmatpush1.bf16.msra.mxu0 %v8426_v63  ;;  %5912 = vmatpush1.bf16.msra.mxu1 %v8429_v0  ;;  %v8527_v63 = vld [vmem:[%s11187_s1 + $0x1744] ss:$16 sps:$4 sm:$0xff]   ;;  %v8530_v0 = vld [vmem:[%s11187_s1 + $0x174c] ss:$16 sps:$4 sm:$0xff]  }
 0x2ac   :  { %5354 = vmatprep.subr.bf16.mxu0 %v8434_v1  ;;  %5913 = vmatprep.subr.bf16.mxu1 %v8437_v2  ;;  %v8525_v1 = vld [vmem:[%s11187_s1 + $0x1740] ss:$16 sps:$4 sm:$0xff]   ;;  %v8528_v2 = vld [vmem:[%s11187_s1 + $0x1748] ss:$16 sps:$4 sm:$0xff]  }
 0x2af   :  { %5355 = vmatpush1.bf16.msra.mxu0 %v8432_v3  ;;  %5914 = vmatpush1.bf16.msra.mxu1 %v8435_v4  ;;  %v8533_v3 = vld [vmem:[%s11187_s1 + $0x1764] ss:$16 sps:$4 sm:$0xff]   ;;  %v8536_v4 = vld [vmem:[%s11187_s1 + $0x176c] ss:$16 sps:$4 sm:$0xff]  }
 0x2b0   :  { %5356 = vmatprep.subr.bf16.mxu0 %v8440_v5  ;;  %5915 = vmatprep.subr.bf16.mxu1 %v8443_v6  ;;  %v8531_v5 = vld [vmem:[%s11187_s1 + $0x1760] ss:$16 sps:$4 sm:$0xff]   ;;  %v8534_v6 = vld [vmem:[%s11187_s1 + $0x1768] ss:$16 sps:$4 sm:$0xff]  }
 0x2b3   :  { %5357 = vmatpush1.bf16.msra.mxu0 %v8438_v7  ;;  %5916 = vmatpush1.bf16.msra.mxu1 %v8441_v8  ;;  %v8539_v7 = vld [vmem:[%s11187_s1 + $0x1784] ss:$16 sps:$4 sm:$0xff]   ;;  %v8542_v8 = vld [vmem:[%s11187_s1 + $0x178c] ss:$16 sps:$4 sm:$0xff]  }
 0x2b4   :  { %5358 = vmatprep.subr.bf16.mxu0 %v8446_v9  ;;  %5917 = vmatprep.subr.bf16.mxu1 %v8449_v10  ;;  %v8537_v9 = vld [vmem:[%s11187_s1 + $0x1780] ss:$16 sps:$4 sm:$0xff]   ;;  %v8540_v10 = vld [vmem:[%s11187_s1 + $0x1788] ss:$16 sps:$4 sm:$0xff]  }
 0x2b7   :  { %5359 = vmatpush1.bf16.msra.mxu0 %v8444_v11  ;;  %5918 = vmatpush1.bf16.msra.mxu1 %v8447_v12  ;;  %v8545_v11 = vld [vmem:[%s11187_s1 + $0x17a4] ss:$16 sps:$4 sm:$0xff]   ;;  %v8548_v12 = vld [vmem:[%s11187_s1 + $0x17ac] ss:$16 sps:$4 sm:$0xff]  }
 0x2b8   :  { %5360 = vmatprep.subr.bf16.mxu0 %v8452_v13  ;;  %5919 = vmatprep.subr.bf16.mxu1 %v8455_v14  ;;  %v8543_v13 = vld [vmem:[%s11187_s1 + $0x17a0] ss:$16 sps:$4 sm:$0xff]   ;;  %v8546_v14 = vld [vmem:[%s11187_s1 + $0x17a8] ss:$16 sps:$4 sm:$0xff]  }
 0x2bb   :  { %5361 = vmatpush1.bf16.msra.mxu0 %v8450_v15  ;;  %5920 = vmatpush1.bf16.msra.mxu1 %v8453_v16  ;;  %v8551_v15 = vld [vmem:[%s11187_s1 + $0x17c4] ss:$16 sps:$4 sm:$0xff]   ;;  %v8554_v16 = vld [vmem:[%s11187_s1 + $0x17cc] ss:$16 sps:$4 sm:$0xff]  }
 0x2bc   :  { %5362 = vmatprep.subr.bf16.mxu0 %v8458_v17  ;;  %5921 = vmatprep.subr.bf16.mxu1 %v8461_v18  ;;  %v8549_v17 = vld [vmem:[%s11187_s1 + $0x17c0] ss:$16 sps:$4 sm:$0xff]   ;;  %v8552_v18 = vld [vmem:[%s11187_s1 + $0x17c8] ss:$16 sps:$4 sm:$0xff]  }
 0x2bf   :  { %5363 = vmatpush1.bf16.msra.mxu0 %v8456_v19  ;;  %5922 = vmatpush1.bf16.msra.mxu1 %v8459_v20  ;;  %v8557_v19 = vld [vmem:[%s11187_s1 + $0x17e4] ss:$16 sps:$4 sm:$0xff]   ;;  %v8560_v20 = vld [vmem:[%s11187_s1 + $0x17ec] ss:$16 sps:$4 sm:$0xff]  }
 0x2c0   :  { %5375 = vmatprep.subr.bf16.mxu0 %v8467_v21  ;;  %5934 = vmatprep.subr.bf16.mxu1 %v8470_v22  ;;  %v8555_v21 = vld [vmem:[%s11187_s1 + $0x17e0] ss:$16 sps:$4 sm:$0xff]   ;;  %v8558_v22 = vld [vmem:[%s11187_s1 + $0x17e8] ss:$16 sps:$4 sm:$0xff]  }
 0x2c2   :  { %5365 = vmatmul.mubr.bf16.vlgmr.msra.gmra.mrb[0].mxu0 %v8462_v23  ;;  %5924 = vmatmul.mubr.bf16.vlgmr.msra.gmra.mrb[0].mxu1 %v8462_v23  ;;  %v8566_v23 = vld [vmem:[%s11187_s1 + $0x1804] ss:$16 sps:$4 sm:$0xff]  }
 0x2c3   :  { %5376 = vmatpush1.bf16.msra.mxu0 %v8465_v24  ;;  %5935 = vmatpush1.bf16.msra.mxu1 %v8468_v25  ;;  %v8569_v24 = vld [vmem:[%s11187_s1 + $0x180c] ss:$16 sps:$4 sm:$0xff]  }
 0x2c4   :  { %5377 = vmatprep.subr.bf16.mxu0 %v8473_v26  ;;  %5936 = vmatprep.subr.bf16.mxu1 %v8476_v27  ;;  %v8561_v25 = vld [vmem:[%s11188_s0 + $0x58] ss:$100 sps:$4 sm:$0xff]   ;;  %v8564_v26 = vld [vmem:[%s11187_s1 + $0x1800] ss:$16 sps:$4 sm:$0xff]  }
 0x2c5   :  { %5407 = vmatprep.mubr.bf16.mxu0 %v8563_v28  ;;  %5966 = vmatprep.mubr.bf16.mxu1 %v8563_v28  ;;  %v8567_v27 = vld [vmem:[%s11187_s1 + $0x1808] ss:$16 sps:$4 sm:$0xff]   ;;  %v8572_v28 = vld [vmem:[%s11187_s1 + $0x1824] ss:$16 sps:$4 sm:$0xff]  }
 0x2c7   :  { %5378 = vmatpush1.bf16.msra.mxu0 %v8471_v29  ;;  %5937 = vmatpush1.bf16.msra.mxu1 %v8474_v30  ;;  %v8575_v29 = vld [vmem:[%s11187_s1 + $0x182c] ss:$16 sps:$4 sm:$0xff]   ;;  %v8570_v30 = vld [vmem:[%s11187_s1 + $0x1820] ss:$16 sps:$4 sm:$0xff]  }
 0x2c8   :  { %5379 = vmatprep.subr.bf16.mxu0 %v8479_v31  ;;  %5938 = vmatprep.subr.bf16.mxu1 %v8482_v32  ;;  %v8573_v31 = vld [vmem:[%s11187_s1 + $0x1828] ss:$16 sps:$4 sm:$0xff]   ;;  %v8578_v32 = vld [vmem:[%s11187_s1 + $0x1844] ss:$16 sps:$4 sm:$0xff]  }
 0x2cb   :  { %5380 = vmatpush1.bf16.msra.mxu0 %v8477_v33  ;;  %5939 = vmatpush1.bf16.msra.mxu1 %v8480_v34  ;;  %v8581_v33 = vld [vmem:[%s11187_s1 + $0x184c] ss:$16 sps:$4 sm:$0xff]   ;;  %v8621_v34 = vmov 0  }
 0x2cc   :  { %5381 = vmatprep.subr.bf16.mxu0 %v8485_v35  ;;  %5940 = vmatprep.subr.bf16.mxu1 %v8488_v36  ;;  %v8576_v35 = vld [vmem:[%s11187_s1 + $0x1840] ss:$16 sps:$4 sm:$0xff]   ;;  %v8579_v36 = vld [vmem:[%s11187_s1 + $0x1848] ss:$16 sps:$4 sm:$0xff]  }
 0x2cf   :  { %5382 = vmatpush1.bf16.msra.mxu0 %v8483_v37  ;;  %5941 = vmatpush1.bf16.msra.mxu1 %v8486_v38  ;;  %v8584_v37 = vld [vmem:[%s11187_s1 + $0x1864] ss:$16 sps:$4 sm:$0xff]   ;;  %v8587_v38 = vld [vmem:[%s11187_s1 + $0x186c] ss:$16 sps:$4 sm:$0xff]  }
 0x2d0   :  { %5383 = vmatprep.subr.bf16.mxu0 %v8491_v39  ;;  %5942 = vmatprep.subr.bf16.mxu1 %v8494_v40  ;;  %v8582_v39 = vld [vmem:[%s11187_s1 + $0x1860] ss:$16 sps:$4 sm:$0xff]   ;;  %v8585_v40 = vld [vmem:[%s11187_s1 + $0x1868] ss:$16 sps:$4 sm:$0xff]  }
 0x2d3   :  { %5384 = vmatpush1.bf16.msra.mxu0 %v8489_v41  ;;  %5943 = vmatpush1.bf16.msra.mxu1 %v8492_v42  ;;  %v8589_v41 = vld [vmem:[%s11189_s3 + $0x40] sm:$0xff]  }
 0x2d4   :  { %5385 = vmatprep.subr.bf16.mxu0 %v8497_v43  ;;  %5944 = vmatprep.subr.bf16.mxu1 %v8500_v44  ;;  %v8590_v42 = vld [vmem:[%s11189_s3 + $0xc0] sm:$0xff]  }
 0x2d5   :  { %v8588_v43 = vld [vmem:[%s11188_s0 + $0x60] ss:$100 sps:$4 sm:$0xff]  }
 0x2d6   :  { %v8591_v44 = vld [vmem:[%s11189_s3] sm:$0xff]  }
 0x2d7   :  { %5386 = vmatpush1.bf16.msra.mxu0 %v8495_v45  ;;  %5945 = vmatpush1.bf16.msra.mxu1 %v8498_v46  ;;  %v8592_v45 = vld [vmem:[%s11189_s3 + $0x80] sm:$0xff]   ;;  %v8593_v46 = vld [vmem:[%s11189_s3 + $0x48] sm:$0xff]  }
 0x2d8   :  { %5387 = vmatprep.subr.bf16.mxu0 %v8503_v47  ;;  %5946 = vmatprep.subr.bf16.mxu1 %v8506_v48  ;;  %v8594_v47 = vld [vmem:[%s11189_s3 + $0xc8] sm:$0xff]  }
 0x2d9   :  { %v8595_v48 = vld [vmem:[%s11189_s3 + $0x8] sm:$0xff]  }
 0x2db   :  { %5388 = vmatpush1.bf16.msra.mxu0 %v8501_v49  ;;  %5947 = vmatpush1.bf16.msra.mxu1 %v8504_v50  ;;  %v8596_v49 = vld [vmem:[%s11189_s3 + $0x88] sm:$0xff]   ;;  %v8597_v50 = vld [vmem:[%s11189_s3 + $0x50] sm:$0xff]  }
 0x2dc   :  { %5389 = vmatprep.subr.bf16.mxu0 %v8509_v51  ;;  %5948 = vmatprep.subr.bf16.mxu1 %v8512_v52  ;;  %v8598_v51 = vld [vmem:[%s11189_s3 + $0xd0] sm:$0xff]  }
 0x2dd   :  { %v8599_v52 = vld [vmem:[%s11189_s3 + $0x10] sm:$0xff]  }
 0x2df   :  { %5390 = vmatpush1.bf16.msra.mxu0 %v8507_v53  ;;  %5949 = vmatpush1.bf16.msra.mxu1 %v8510_v54  ;;  %v8600_v53 = vld [vmem:[%s11189_s3 + $0x90] sm:$0xff]   ;;  %v8601_v54 = vld [vmem:[%s11189_s3 + $0x58] sm:$0xff]  }
 0x2e0   :  { %5391 = vmatprep.subr.bf16.mxu0 %v8515_v55  ;;  %5950 = vmatprep.subr.bf16.mxu1 %v8518_v56  ;;  %v8602_v55 = vld [vmem:[%s11189_s3 + $0xd8] sm:$0xff]  }
 0x2e1   :  { %v8603_v56 = vld [vmem:[%s11189_s3 + $0x18] sm:$0xff]  }
 0x2e3   :  { %5392 = vmatpush1.bf16.msra.mxu0 %v8513_v57  ;;  %5951 = vmatpush1.bf16.msra.mxu1 %v8516_v58  ;;  %v8604_v57 = vld [vmem:[%s11189_s3 + $0x98] sm:$0xff]   ;;  %v8605_v58 = vld [vmem:[%s11189_s3 + $0x60] sm:$0xff]  }
 0x2e4   :  { %5393 = vmatprep.subr.bf16.mxu0 %v8521_v59  ;;  %5952 = vmatprep.subr.bf16.mxu1 %v8524_v60  ;;  %v8606_v59 = vld [vmem:[%s11189_s3 + $0xe0] sm:$0xff]  }
 0x2e5   :  { %v8607_v60 = vld [vmem:[%s11189_s3 + $0x20] sm:$0xff]  }
 0x2e7   :  { %5394 = vmatpush1.bf16.msra.mxu0 %v8519_v61  ;;  %5953 = vmatpush1.bf16.msra.mxu1 %v8522_v62  ;;  %v8608_v61 = vld [vmem:[%s11189_s3 + $0xa0] sm:$0xff]   ;;  %v8609_v62 = vld [vmem:[%s11189_s3 + $0x68] sm:$0xff]  }
 0x2e8   :  { %5395 = vmatprep.subr.bf16.mxu0 %v8527_v63  ;;  %5954 = vmatprep.subr.bf16.mxu1 %v8530_v0  ;;  %v8610_v63 = vld [vmem:[%s11189_s3 + $0xe8] sm:$0xff]  }
 0x2e9   :  { %v8611_v0 = vld [vmem:[%s11189_s3 + $0x28] sm:$0xff]  }
 0x2eb   :  { %5396 = vmatpush1.bf16.msra.mxu0 %v8525_v1  ;;  %5955 = vmatpush1.bf16.msra.mxu1 %v8528_v2  ;;  %v8612_v1 = vld [vmem:[%s11189_s3 + $0xa8] sm:$0xff]   ;;  %v8613_v2 = vld [vmem:[%s11189_s3 + $0x70] sm:$0xff]  }
 0x2ec   :  { %5397 = vmatprep.subr.bf16.mxu0 %v8533_v3  ;;  %5956 = vmatprep.subr.bf16.mxu1 %v8536_v4  ;;  %v8614_v3 = vld [vmem:[%s11189_s3 + $0xf0] sm:$0xff]  }
 0x2ed   :  { %v8615_v4 = vld [vmem:[%s11189_s3 + $0x30] sm:$0xff]  }
 0x2ef   :  { %5398 = vmatpush1.bf16.msra.mxu0 %v8531_v5  ;;  %5957 = vmatpush1.bf16.msra.mxu1 %v8534_v6  ;;  %v8616_v5 = vld [vmem:[%s11189_s3 + $0xb0] sm:$0xff]   ;;  %v8617_v6 = vld [vmem:[%s11189_s3 + $0x78] sm:$0xff]  }
 0x2f0   :  { %5399 = vmatprep.subr.bf16.mxu0 %v8539_v7  ;;  %5958 = vmatprep.subr.bf16.mxu1 %v8542_v8  ;;  %v8618_v7 = vld [vmem:[%s11189_s3 + $0xf8] sm:$0xff]  }
 0x2f1   :  { %v8619_v8 = vld [vmem:[%s11189_s3 + $0x38] sm:$0xff]  }
 0x2f3   :  { %5400 = vmatpush1.bf16.msra.mxu0 %v8537_v9  ;;  %5959 = vmatpush1.bf16.msra.mxu1 %v8540_v10  ;;  %v8620_v9 = vld [vmem:[%s11189_s3 + $0xb8] sm:$0xff]   ;;  %v833_v10 = vlaneseq }
 0x2f4   :  { %5401 = vmatprep.subr.bf16.mxu0 %v8545_v11  ;;  %5960 = vmatprep.subr.bf16.mxu1 %v8548_v12 }
 0x2f5   :  { %v834_v11 = vshrl.u32 %v833_v10, 7 }
 0x2f7   :  { %5402 = vmatpush1.bf16.msra.mxu0 %v8543_v13  ;;  %5961 = vmatpush1.bf16.msra.mxu1 %v8546_v14  ;;  %v835_v12 = vsub.s32 0, %v834_v11  ;;  %v843_v13 = vsub.s32 2, %v834_v11  ;;  %v831_v14 = vld [vmem:[%s11190_s2] sm:$0xf] }
 0x2f8   :  { %5403 = vmatprep.subr.bf16.mxu0 %v8551_v15  ;;  %5962 = vmatprep.subr.bf16.mxu1 %v8554_v16  ;;  %v839_v15 = vsub.s32 1, %v834_v11  ;;  %v847_v16 = vsub.s32 3, %v834_v11 }
 0x2fb   :  { %5404 = vmatpush1.bf16.msra.mxu0 %v8549_v17  ;;  %5963 = vmatpush1.bf16.msra.mxu1 %v8552_v18  ;;  %v836_v17 = vrot.slane %v831_v14, %v835_v12  ;;  %v844_v18 = vrot.slane %v831_v14, %v843_v13 }
 0x2fc   :  { %5405 = vmatprep.subr.bf16.mxu0 %v8557_v19  ;;  %5964 = vmatprep.subr.bf16.mxu1 %v8560_v20  ;;  %v840_v19 = vrot.slane %v831_v14, %v839_v15  ;;  %v848_v20 = vrot.slane %v831_v14, %v847_v16 }
 0x2ff   :  { %5406 = vmatpush1.bf16.msra.mxu0 %v8555_v21  ;;  %5965 = vmatpush1.bf16.msra.mxu1 %v8558_v22 }
 0x300   :  { %5418 = vmatprep.subr.bf16.mxu0 %v8566_v23  ;;  %5977 = vmatprep.subr.bf16.mxu1 %v8569_v24 }
 0x302   :  { %5408 = vmatmul.mubr.bf16.vlgmr.msra.gmra.mrb[0].mxu0 %v8561_v25  ;;  %5967 = vmatmul.mubr.bf16.vlgmr.msra.gmra.mrb[0].mxu1 %v8561_v25 }
 0x303   :  { %5419 = vmatpush1.bf16.msra.mxu0 %v8564_v26  ;;  %5978 = vmatpush1.bf16.msra.mxu1 %v8567_v27 }
 0x304   :  { %5420 = vmatprep.subr.bf16.mxu0 %v8572_v28  ;;  %5979 = vmatprep.subr.bf16.mxu1 %v8575_v29 }
 0x305   :  { %5450 = vmatprep.mubr.bf16.mxu0 %v8621_v34  ;;  %6009 = vmatprep.mubr.bf16.mxu1 %v8621_v34 }
 0x307   :  { %5421 = vmatpush1.bf16.msra.mxu0 %v8570_v30  ;;  %5980 = vmatpush1.bf16.msra.mxu1 %v8573_v31 }
 0x308   :  { %5422 = vmatprep.subr.bf16.mxu0 %v8578_v32  ;;  %5981 = vmatprep.subr.bf16.mxu1 %v8581_v33 }
 0x30b   :  { %5423 = vmatpush1.bf16.msra.mxu0 %v8576_v35  ;;  %5982 = vmatpush1.bf16.msra.mxu1 %v8579_v36 }
 0x30c   :  { %5424 = vmatprep.subr.bf16.mxu0 %v8584_v37  ;;  %5983 = vmatprep.subr.bf16.mxu1 %v8587_v38 }
 0x30f   :  { %5425 = vmatpush1.bf16.msra.mxu0 %v8582_v39  ;;  %5984 = vmatpush1.bf16.msra.mxu1 %v8585_v40 }
 0x310   :  { %7227 = vmatprep.subr.bf16.mxu0 %v8589_v41  ;;  %7249 = vmatprep.subr.bf16.mxu1 %v8590_v42 }
 0x312   :  { %7192 = vmatmul.mubr.msk.bf16.vlgmr.msra.gmra.mrb[0].mxu0 %vm4898_vm0, %v8588_v43  ;;  %7193 = vmatmul.mubr.msk.bf16.vlgmr.msra.gmra.mrb[0].mxu1 %vm4898_vm0, %v8588_v43 }
 0x313   :  { %7228 = vmatpush3.bf16.msra.mxu0 %v8591_v44  ;;  %7250 = vmatpush3.bf16.msra.mxu1 %v8592_v45 }
 0x314   :  { %7229 = vmatprep.subr.bf16.mxu0 %v8593_v46  ;;  %7251 = vmatprep.subr.bf16.mxu1 %v8594_v47 }
 0x317   :  { %7230 = vmatpush3.bf16.msra.mxu0 %v8595_v48  ;;  %7252 = vmatpush3.bf16.msra.mxu1 %v8596_v49 }
 0x318   :  { %7231 = vmatprep.subr.bf16.mxu0 %v8597_v50  ;;  %7253 = vmatprep.subr.bf16.mxu1 %v8598_v51  ;;  %v7194_v51 = vld [vmem:[%s11191_s4] ss:$0 sm:$0xff] }
 0x31b   :  { %7232 = vmatpush3.bf16.msra.mxu0 %v8599_v52  ;;  %7254 = vmatpush3.bf16.msra.mxu1 %v8600_v53 }
 0x31c   :  { %7233 = vmatprep.subr.bf16.mxu0 %v8601_v54  ;;  %7255 = vmatprep.subr.bf16.mxu1 %v8602_v55 }
 0x31f   :  { %7234 = vmatpush3.bf16.msra.mxu0 %v8603_v56  ;;  %7256 = vmatpush3.bf16.msra.mxu1 %v8604_v57 }
 0x320   :  { %7235 = vmatprep.subr.bf16.mxu0 %v8605_v58  ;;  %7257 = vmatprep.subr.bf16.mxu1 %v8606_v59 }
 0x323   :  { %7236 = vmatpush3.bf16.msra.mxu0 %v8607_v60  ;;  %7258 = vmatpush3.bf16.msra.mxu1 %v8608_v61 }
 0x324   :  { %7237 = vmatprep.subr.bf16.mxu0 %v8609_v62  ;;  %7259 = vmatprep.subr.bf16.mxu1 %v8610_v63 }
 0x327   :  { %7238 = vmatpush3.bf16.msra.mxu0 %v8611_v0  ;;  %7260 = vmatpush3.bf16.msra.mxu1 %v8612_v1 }
 0x328   :  { %7239 = vmatprep.subr.bf16.mxu0 %v8613_v2  ;;  %7261 = vmatprep.subr.bf16.mxu1 %v8614_v3 }
 0x32b   :  { %7240 = vmatpush3.bf16.msra.mxu0 %v8615_v4  ;;  %7262 = vmatpush3.bf16.msra.mxu1 %v8616_v5 }
 0x32c   :  { %7241 = vmatprep.subr.bf16.mxu0 %v8617_v6  ;;  %7263 = vmatprep.subr.bf16.mxu1 %v8618_v7 }
 0x32f   :  { %7242 = vmatpush3.bf16.msra.mxu0 %v8619_v8  ;;  %7264 = vmatpush3.bf16.msra.mxu1 %v8620_v9 }
 0x3e5   :  { %v5452_v21 = vpop.f32.mrb[0].mxu0  ;;  %v6011_v22 = vpop.f32.mrb[0].mxu1 }
 0x3e6   :  { %v7271_v23 = vadd.f32 %v5452_v21, %v836_v17  ;;  %v7275_v24 = vadd.f32 %v6011_v22, %v844_v18  ;;  %v5454_v25 = vpop.f32.mrb[1].mxu0  ;;  %v6013_v26 = vpop.f32.mrb[1].mxu1 }
 0x3e7   :  { %v7272_v27 = vadd.f32 %v5454_v25, %v840_v19  ;;  %v7276_v28 = vadd.f32 %v6013_v26, %v848_v20  ;;  %v5456_v29 = vpop.f32.mrb[2].mxu0  ;;  %v6015_v30 = vpop.f32.mrb[2].mxu1 }
 0x3e8   :  { %v7273_v31 = vadd.f32 %v5456_v29, %v836_v17  ;;  %v7277_v32 = vadd.f32 %v6015_v30, %v844_v18  ;;  %v5458_v33 = vpop.f32.mrb[3].mxu0  ;;  %v6017_v34 = vpop.f32.mrb[3].mxu1  ;;  %v6020_v37 = vmax.f32 %v7271_v23, 0.0  ;;  %v6022_v38 = vmax.f32 %v7275_v24, 0.0 }
 0x3e9   :  { %v7274_v35 = vadd.f32 %v5458_v33, %v840_v19  ;;  %v7278_v36 = vadd.f32 %v6017_v34, %v848_v20  ;;  %v6021_v41 = vmax.f32 %v7272_v27, 0.0  ;;  %v6023_v42 = vmax.f32 %v7276_v28, 0.0 }
 0x3ea   :  { %v6024_v39 = vmax.f32 %v7273_v31, 0.0  ;;  %v6026_v40 = vmax.f32 %v7277_v32, 0.0 }
 0x3eb   :  { %v6025_v43 = vmax.f32 %v7274_v35, 0.0  ;;  %v6027_v44 = vmax.f32 %v7278_v36, 0.0 }
 0x3ec   :  { %v6028_v45 = vpack.c.bf16 %v6024_v39, %v6020_v37  ;;  %v6030_v46 = vpack.c.bf16 %v6026_v40, %v6022_v38 }
 0x3ed   :  { %v6029_v47 = vpack.c.bf16 %v6025_v43, %v6021_v41  ;;  %v6031_v48 = vpack.c.bf16 %v6027_v44, %v6023_v42 }
 0x3ef   :  { %6327 = vmatprep.mubr.bf16.mxu0 %v6029_v47  ;;  %6368 = vmatprep.mubr.bf16.mxu1 %v6031_v48 }
 0x3f0   :  { %6328 = vmatmul.mubr.bf16.vlgmr.msra.gmra.mrb[4].mxu0 %v6028_v45  ;;  %6369 = vmatmul.mubr.bf16.vlgmr.msra.gmra.mrb[4].mxu1 %v6030_v46 }
 0x4c3   :  { %v7243_v49 = vpop.f32.mrb[4].mxu0  ;;  %v7265_v50 = vpop.f32.mrb[4].mxu1 }
 0x4c4   :  { %v7244_v52 = vpop.f32.mrb[5].mxu0  ;;  %v7266_v53 = vpop.f32.mrb[5].mxu1 }
 0x4c5   :  { %v7245_v54 = vadd.f32 %v7244_v52, %v7243_v49  ;;  %v7267_v55 = vadd.f32 %v7266_v53, %v7265_v50  ;;  %v7246_v56 = vpop.f32.mrb[6].mxu0  ;;  %v7268_v57 = vpop.f32.mrb[6].mxu1 }
 0x4c6   :  { %v7247_v58 = vpop.f32.mrb[7].mxu0  ;;  %v7269_v59 = vpop.f32.mrb[7].mxu1 }
 0x4c7   :  { %v6330_v60 = vadd.f32 %v7245_v54, %v7194_v51  ;;  %v7248_v61 = vadd.f32 %v7247_v58, %v7246_v56  ;;  %v7270_v62 = vadd.f32 %v7269_v59, %v7268_v57 }
 0x4c9   :  { %v6371_v63 = vadd.f32 %v7267_v55, %v6330_v60  ;;  %v6333_v0 = vadd.f32 %v7248_v61, %v7194_v51 }
 0x4cb   :  { %6377 = vst [vmem:[%s11192_s5] sm:$0xff] %v6371_v63  ;;  %v6374_v1 = vadd.f32 %v7270_v62, %v6333_v0 }
 0x4cd   :  { %6378 = vst [vmem:[%s11192_s5 + $0x8] sm:$0xff] %v6374_v1 }

// kernel: ddqnet_forward.2
= control target key start
LH: loop header
LB: loop body
LE: loop exit
PB: predicated region body
PF: predicated region fallthrough
CT: control target
= control target key end

     0   :  { %s8989_s24 = smov 0   ;;  %s11103_s0 = inlined_call_operand.vmem [shape: bf16[8,110,256], index: 0, kind: input, shape index: {}]   ;;  %s11104_s1 = inlined_call_operand.vmem [shape: bf16[256,32], index: 1, kind: input, shape index: {}]   ;;  %s11105_s2 = inlined_call_operand.vmem [shape: f32[1,32], index: 2, kind: input, shape index: {}]   ;;  %s11106_s3 = inlined_call_operand.vmem [shape: bf16[512,64], index: 3, kind: input, shape index: {}]   ;;  %s11107_s4 = inlined_call_operand.vmem [shape: f32[1,64], index: 4, kind: input, shape index: {}]   ;;  %s11108_s5 = inlined_call_operand.vmem [shape: bf16[576,64], index: 5, kind: input, shape index: {}]   ;;  %s11109_s6 = inlined_call_operand.vmem [shape: f32[1,64], index: 6, kind: input, shape index: {}]   ;;  %s11110_s7 = inlined_call_operand.vmem [shape: bf16[2,49,64], index: 7, kind: output, shape index: {}]  }
   0x1 LB: > { %s8995_s25 = sadd.s32 4294967295, %s8945_s24   ;;  %p6755_p0 = scmp.ge.s32.totalorder %s8945_s24, 1  ;;  %s8945_s24 = sphi %s8989_s24, %s17_s24  }
   0x2   : > { %p239_p1 = scmp.lt.s32.totalorder %s8945_s24, 3 }
   0x4   : > { %p240_p2 = pnand %p6755_p0, %p239_p1 }
   0x5   : > { %v8638_v0 = vld [vmem:[%s11104_s1 + $0x40] sm:$0xff] (!%p240_p2)   ;;  %v8640_v2 = vld [vmem:[%s11104_s1 + $0x48] sm:$0xff] (!%p240_p2)   ;;  %s6756_s9 = sshll.u32 (!%p240_p2), %s8995_s25, 2  ;;  %v8642_v4 = vld [vmem:[%s11104_s1 + $0x50] sm:$0xff] (!%p240_p2)   ;;  %vm8948_vm0 = vmmov (!%p240_p2), 0   ;;  %vm663_vm1 = vcmask (!%p240_p2), 257024  }
   0x6   : > { %243 = sbr.rel (%p240_p2) target bundleno = 1387 (0x56b), region = 48  ;;  %v8639_v1 = vld [vmem:[%s11104_s1] sm:$0xff] (!%p240_p2)   ;;  %7459 = vmatprep.subr.bf16.mxu1 (!%p240_p2), %v8638_v0  ;;  %v8641_v3 = vld [vmem:[%s11104_s1 + $0x8] sm:$0xff] (!%p240_p2)   ;;  %p273_p3 = scmp.lt.s32.totalorder (!%p240_p2), %s6756_s9, 7  ;;  %v8643_v5 = vld [vmem:[%s11104_s1 + $0x10] sm:$0xff] (!%p240_p2)   ;;  %vm1940_vm2 = vcmask (!%p240_p2), 261120  }
   0x7   : > { %7460 = vmatpush3.bf16.msra.mxu1 (!%p240_p2), %v8639_v1  ;;  %v8644_v6 = vld [vmem:[%s11104_s1 + $0x58] sm:$0xff] (!%p240_p2)   ;;  %v8646_v8 = vld [vmem:[%s11104_s1 + $0x60] sm:$0xff] (!%p240_p2)   ;;  %v8648_v12 = vld [vmem:[%s11104_s1 + $0x68] sm:$0xff] (!%p240_p2)   ;;  %vm2208_vm3 = vsmask.f32 (!%p240_p2), 7424  ;;  %vm677_vm4 = vcmask (!%p240_p2), 256000  }
   0x8   : > { %7461 = vmatprep.subr.bf16.mxu1 (!%p240_p2), %v8640_v2  ;;  %v8645_v7 = vld [vmem:[%s11104_s1 + $0x18] sm:$0xff] (!%p240_p2)   ;;  %v8647_v9 = vld [vmem:[%s11104_s1 + $0x20] sm:$0xff] (!%p240_p2)   ;;  %v8649_v13 = vld [vmem:[%s11104_s1 + $0x28] sm:$0xff] (!%p240_p2)   ;;  %vm3363_vm5 = vsmask.f32 (!%p240_p2), 6400  ;;  %vm3818_vm6 = vcmask (!%p240_p2), 1045504  }
   0x9   : > { %v8652_v10 = vld [vmem:[%s11104_s1 + $0x40] sm:$0xff] (!%p240_p2)   ;;  %v8656_v14 = vld [vmem:[%s11104_s1 + $0x48] sm:$0xff] (!%p240_p2)   ;;  %v8650_v15 = vld [vmem:[%s11104_s1 + $0x70] sm:$0xff] (!%p240_p2)   ;;  %vm5021_vm7 = vcmask (!%p240_p2), 519168   ;;  %vm5154_vm8 = vcmask (!%p240_p2), 523264   ;;  %vm5034_vm9 = vcmask (!%p240_p2), 516096  }
   0xa   : > { %v8653_v11 = vld [vmem:[%s11104_s1] sm:$0xff] (!%p240_p2)   ;;  %7401 = vmatprep.subr.bf16.mxu0 (!%p240_p2), %v8652_v10  ;;  %v8651_v17 = vld [vmem:[%s11104_s1 + $0x30] sm:$0xff] (!%p240_p2)   ;;  %v8660_v18 = vld [vmem:[%s11104_s1 + $0x8] sm:$0xff] (!%p240_p2)   ;;  %vm5035_vm10 = vsmask.f32 (!%p240_p2), 256  ;;  %vm5366_vm12 = vcmask (!%p240_p2), 1046528  }
   0xb   : > { %7462 = vmatpush3.bf16.msra.mxu1 (!%p240_p2), %v8641_v3  ;;  %7402 = vmatpush3.bf16.msra.mxu0 (!%p240_p2), %v8653_v11  ;;  %v8654_v19 = vld [vmem:[%s11104_s1 + $0x78] sm:$0xff] (!%p240_p2)   ;;  %v8661_v20 = vld [vmem:[%s11104_s1 + $0x50] sm:$0xff] (!%p240_p2)   ;;  %v8668_v25 = vld [vmem:[%s11104_s1 + $0x60] sm:$0xff] (!%p240_p2)   ;;  %vm5862_vm13 = vsmask.f32 (!%p240_p2), 5376  ;;  %vm6057_vm15 = vcmask (!%p240_p2), 1044480  }
   0xc   : > { %7463 = vmatprep.subr.bf16.mxu1 (!%p240_p2), %v8642_v4  ;;  %7403 = vmatprep.subr.bf16.mxu0 (!%p240_p2), %v8656_v14  ;;  %v8662_v21 = vld [vmem:[%s11104_s1 + $0x10] sm:$0xff] (!%p240_p2)   ;;  %v8663_v22 = vld [vmem:[%s11104_s1 + $0x58] sm:$0xff] (!%p240_p2)   ;;  %v8669_v28 = vld [vmem:[%s11104_s1 + $0x20] sm:$0xff] (!%p240_p2)   ;;  %vm6197_vm14 = vsmask.f32 (!%p240_p2), 4352  ;;  %p279_p4 = scmp.lt.s32.totalorder (!%p240_p2), %s8995_s25, 1 }
   0xd   : > { %s11122_s9 = smov (!%p273_p3, %s6756_s9), 7  ;;  %v8655_v23 = vld [vmem:[%s11104_s1 + $0x38] sm:$0xff]   ;;  %v8670_v29 = vld [vmem:[%s11104_s1 + $0x68] sm:$0xff]   ;;  %v8675_v31 = vld [vmem:[%s11104_s1 + $0x70] sm:$0xff]  }
   0xe   : > { %s8626_s26 = smul.u32 112, %s11122_s9  ;;  %v8666_v24 = vld [vmem:[%s11104_s1 + $0x18] sm:$0xff]   ;;  %v8673_v30 = vld [vmem:[%s11104_s1 + $0x28] sm:$0xff]   ;;  %v8676_v35 = vld [vmem:[%s11104_s1 + $0x30] sm:$0xff]   ;;  %s11124_s25 = smov (!%p279_p4, %s8995_s25), 1 }
   0xf   : > { %7464 = vmatpush3.bf16.msra.mxu1 %v8643_v5  ;;  %7404 = vmatpush3.bf16.msra.mxu0 %v8660_v18  ;;  %v8677_v36 = vld [vmem:[%s11104_s1 + $0x78] sm:$0xff]   ;;  %v8706_v42 = vld [vmem:[%s11104_s1 + $0x40] sm:$0xff]   ;;  %v8711_v45 = vld [vmem:[%s11104_s1 + $0x48] sm:$0xff]   ;;  %s8627_s13 = smul.u32 28, %s11124_s25 }
  0x10   : > { %7465 = vmatprep.subr.bf16.mxu1 %v8644_v6  ;;  %s9045_s14 = scalar_lea.vmem %s11103_s0, %s8626_s26  ;;  %7405 = vmatprep.subr.bf16.mxu0 %v8661_v20  ;;  %v8680_v37 = vld [vmem:[%s11104_s1 + $0x38] sm:$0xff]   ;;  %v8707_v43 = vld [vmem:[%s11104_s1] sm:$0xff]   ;;  %v8712_v47 = vld [vmem:[%s11104_s1 + $0x8] sm:$0xff]  }
  0x11   : > { %v8659_v16 = vld [vmem:[%s9045_s14 + $0x74] ss:$8 sps:$4 sm:$0xff]   ;;  %v8657_v26 = vld [vmem:[%s9045_s14 + $0x70] ss:$8 sps:$4 sm:$0xff]   ;;  %v8664_v27 = vld [vmem:[%s9045_s14 + $0x84] ss:$8 sps:$4 sm:$0xff]   ;;  %s11017_s17 = scalar_lea.vmem %s11110_s7, %s8627_s13 }
  0x12   : > { %931 = vmatprep.mubr.bf16.mxu1 %v8659_v16  ;;  %v8667_v32 = vld [vmem:[%s9045_s14 + $0x80] ss:$8 sps:$4 sm:$0xff]   ;;  %v8684_v33 = vld [vmem:[%s9045_s14 + $0x4] ss:$8 sps:$4 sm:$0xff]   ;;  %v8671_v34 = vld [vmem:[%s9045_s14 + $0x94] ss:$8 sps:$4 sm:$0xff]  }
  0x13   : > { %7466 = vmatpush3.bf16.msra.mxu1 %v8645_v7  ;;  %7406 = vmatpush3.bf16.msra.mxu0 %v8662_v21  ;;  %v8674_v38 = vld [vmem:[%s9045_s14 + $0x90] ss:$8 sps:$4 sm:$0xff]   ;;  %v8682_v39 = vld [vmem:[%s9045_s14] ss:$8 sps:$4 sm:$0xff]   ;;  %v8678_v40 = vld [vmem:[%s9045_s14 + $0xa4] ss:$8 sps:$4 sm:$0xff]  }
  0x14   : > { %7467 = vmatprep.subr.bf16.mxu1 %v8646_v8  ;;  %7407 = vmatprep.subr.bf16.mxu0 %v8663_v22  ;;  %v8688_v41 = vld [vmem:[%s9045_s14 + $0x14] ss:$8 sps:$4 sm:$0xff]   ;;  %v8681_v44 = vld [vmem:[%s9045_s14 + $0xa0] ss:$8 sps:$4 sm:$0xff]   ;;  %v8690_v48 = vld [vmem:[%s9045_s14 + $0x10] ss:$8 sps:$4 sm:$0xff]  }
  0x15   : > { %536 = vmatprep.mubr.bf16.mxu0 %v8684_v33  ;;  %v8685_v46 = vld [vmem:[%s9045_s14 + $0xb4] ss:$8 sps:$4 sm:$0xff]   ;;  %v8694_v49 = vld [vmem:[%s9045_s14 + $0x24] ss:$8 sps:$4 sm:$0xff]   ;;  %v8687_v53 = vld [vmem:[%s9045_s14 + $0xb0] ss:$8 sps:$4 sm:$0xff]  }
  0x16   : > { %v8713_v50 = vld [vmem:[%s11104_s1 + $0x50] sm:$0xff]   ;;  %v8717_v52 = vld [vmem:[%s11104_s1 + $0x58] sm:$0xff]   ;;  %v8691_v54 = vld [vmem:[%s9045_s14 + $0xc4] ss:$8 sps:$4 sm:$0xff]  }
  0x17   : > { %7468 = vmatpush3.bf16.msra.mxu1 %v8647_v9  ;;  %7408 = vmatpush3.bf16.msra.mxu0 %v8666_v24  ;;  %v8714_v51 = vld [vmem:[%s11104_s1 + $0x10] sm:$0xff]   ;;  %v8719_v55 = vld [vmem:[%s11104_s1 + $0x18] sm:$0xff]   ;;  %v8696_v56 = vld [vmem:[%s9045_s14 + $0x20] ss:$8 sps:$4 sm:$0xff]  }
  0x18   : > { %7469 = vmatprep.subr.bf16.mxu1 %v8648_v12  ;;  %7409 = vmatprep.subr.bf16.mxu0 %v8668_v25  ;;  %v8700_v57 = vld [vmem:[%s9045_s14 + $0x34] ss:$8 sps:$4 sm:$0xff]   ;;  %v8720_v58 = vld [vmem:[%s11104_s1 + $0x60] sm:$0xff]   ;;  %v8722_v60 = vld [vmem:[%s11104_s1 + $0x68] sm:$0xff]  }
  0x19   : > { %v8721_v59 = vld [vmem:[%s11104_s1 + $0x20] sm:$0xff]   ;;  %v8702_v62 = vld [vmem:[%s9045_s14 + $0x30] ss:$8 sps:$4 sm:$0xff]   ;;  %v8697_v63 = vld [vmem:[%s9045_s14 + $0xd4] ss:$8 sps:$4 sm:$0x7f]  }
  0x1a   : > { %v8693_v61 = vld [vmem:[%s9045_s14 + $0xc0] ss:$8 sps:$4 sm:$0xff]   ;;  %v8703_v0 = vld [vmem:[%s9045_s14 + $0x44] ss:$8 sps:$4 sm:$0xff]   ;;  %v8724_v2 = vld [vmem:[%s11104_s1 + $0x70] sm:$0xff]  }
  0x1b   : > { %7470 = vmatpush3.bf16.msra.mxu1 %v8649_v13  ;;  %7410 = vmatpush3.bf16.msra.mxu0 %v8669_v28  ;;  %v8723_v1 = vld [vmem:[%s11104_s1 + $0x28] sm:$0xff]   ;;  %v8725_v3 = vld [vmem:[%s11104_s1 + $0x30] sm:$0xff]   ;;  %v8736_v4 = vld [vmem:[%s11104_s1 + $0x40] sm:$0xff]  }
  0x1c   : > { %7471 = vmatprep.subr.bf16.mxu1 %v8650_v15  ;;  %7411 = vmatprep.subr.bf16.mxu0 %v8670_v29  ;;  %v8738_v5 = vld [vmem:[%s11104_s1] sm:$0xff]   ;;  %v8739_v6 = vld [vmem:[%s11104_s1 + $0x48] sm:$0xff]   ;;  %v8726_v7 = vld [vmem:[%s11104_s1 + $0x78] sm:$0xff]  }
  0x1d   : > { %v8727_v8 = vld [vmem:[%s11104_s1 + $0x38] sm:$0xff]   ;;  %v8742_v10 = vld [vmem:[%s11104_s1 + $0x8] sm:$0xff]   ;;  %v8744_v11 = vld [vmem:[%s11104_s1 + $0x50] sm:$0xff]  }
  0x1e   : > { %v8699_v9 = vld [vmem:[%s9045_s14 + $0xd0] ss:$8 sps:$4 sm:$0x7f]   ;;  %v8705_v12 = vld [vmem:[%s9045_s14 + $0x40] ss:$8 sps:$4 sm:$0xff]   ;;  %vm10722_vm11 = vmand %vm5034_vm9, %vm5035_vm10 }
  0x1f   : > { %7472 = vmatpush3.bf16.msra.mxu1 %v8651_v17  ;;  %7412 = vmatpush3.bf16.msra.mxu0 %v8673_v30  ;;  %v8708_v13 = vld [vmem:[%s9045_s14 + $0x54] ss:$8 sps:$4 sm:$0xff]   ;;  %v8715_v17 = vld [vmem:[%s9045_s14 + $0x64] ss:$8 sps:$4 sm:$0x7f]  }
  0x20   : > { %7473 = vmatprep.subr.bf16.mxu1 %v8654_v19  ;;  %7413 = vmatprep.subr.bf16.mxu0 %v8675_v31  ;;  %v8745_v14 = vld [vmem:[%s11104_s1 + $0x10] sm:$0xff]   ;;  %v8749_v15 = vld [vmem:[%s11104_s1 + $0x58] sm:$0xff]   ;;  %v8753_v18 = vld [vmem:[%s11104_s1 + $0x60] sm:$0xff]  }
  0x21   : > { %v8750_v16 = vld [vmem:[%s11104_s1 + $0x18] sm:$0xff]   ;;  %v8755_v20 = vld [vmem:[%s11104_s1 + $0x20] sm:$0xff]   ;;  %v8756_v21 = vld [vmem:[%s11104_s1 + $0x68] sm:$0xff]  }
  0x22   : > { %v8710_v19 = vld [vmem:[%s9045_s14 + $0x50] ss:$8 sps:$4 sm:$0xff]   ;;  %v8757_v22 = vld [vmem:[%s11104_s1 + $0x28] sm:$0xff]   ;;  %v8767_v24 = vld [vmem:[%s9045_s14 + $0x154] ss:$8 sps:$4 sm:$0xff]  }
  0x23   : > { %7474 = vmatpush3.bf16.msra.mxu1 %v8655_v23  ;;  %7414 = vmatpush3.bf16.msra.mxu0 %v8676_v35  ;;  %v8758_v23 = vld [vmem:[%s11104_s1 + $0x70] sm:$0xff]   ;;  %v8718_v25 = vld [vmem:[%s9045_s14 + $0x60] ss:$8 sps:$4 sm:$0x7f]   ;;  %v8763_v28 = vld [vmem:[%s11104_s1 + $0x78] sm:$0xff]  }
  0x24   : > { %7415 = vmatprep.subr.bf16.mxu0 %v8677_v36  ;;  %7575 = vmatprep.subr.bf16.mxu1 %v8736_v4  ;;  %v8728_v29 = vld [vmem:[%s9045_s14 + $0xe0] ss:$8 sps:$4 sm:$0xff]   ;;  %v8764_v30 = vld [vmem:[%s11104_s1 + $0x38] sm:$0xff]   ;;  %v8768_v33 = vld [vmem:[%s9045_s14 + $0x164] ss:$8 sps:$4 sm:$0xff]  }
  0x25   : > { %v8731_v31 = vld [vmem:[%s9045_s14 + $0xf4] ss:$8 sps:$4 sm:$0xff]   ;;  %v8734_v35 = vld [vmem:[%s9045_s14 + $0x104] ss:$8 sps:$4 sm:$0xff]   ;;  %v8770_v36 = vld [vmem:[%s9045_s14 + $0x160] ss:$8 sps:$4 sm:$0xff]  }
  0x26   : > { %932 = vmatmul.mubr.bf16.vlgmr.msra.gmra.mrb[0].mxu1 %v8657_v26  ;;  %v8730_v26 = vld [vmem:[%s9045_s14 + $0xe4] ss:$8 sps:$4 sm:$0xff]  }
  0x27   : > { %939 = vmatprep.mubr.bf16.mxu1 %v8664_v27  ;;  %7416 = vmatpush3.bf16.msra.mxu0 %v8680_v37  ;;  %v8759_v27 = vld [vmem:[%s11104_s1 + $0x30] sm:$0xff]  }
  0x28   : > { %7517 = vmatprep.subr.bf16.mxu0 %v8706_v42  ;;  %7576 = vmatpush3.bf16.msra.mxu1 %v8738_v5  ;;  %v8771_v37 = vld [vmem:[%s9045_s14 + $0x174] ss:$8 sps:$4 sm:$0xff]   ;;  %v8743_v42 = vld [vmem:[%s9045_s14 + $0x110] ss:$8 sps:$4 sm:$0xff]  }
  0x29   : > { %7577 = vmatprep.subr.bf16.mxu1 %v8739_v6 }
  0x2a   : > { %537 = vmatmul.mubr.bf16.vlgmr.msra.gmra.mrb[0].mxu0 %v8682_v39  ;;  %v8740_v39 = vld [vmem:[%s9045_s14 + $0x114] ss:$8 sps:$4 sm:$0xff]  }
  0x2b   : > { %544 = vmatprep.mubr.bf16.mxu0 %v8688_v41  ;;  %7518 = vmatpush3.bf16.msra.mxu0 %v8707_v43  ;;  %v8774_v41 = vld [vmem:[%s9045_s14 + $0x184] ss:$8 sps:$4 sm:$0xff]  }
  0x2c   : > { %7519 = vmatprep.subr.bf16.mxu0 %v8711_v45  ;;  %7578 = vmatpush3.bf16.msra.mxu1 %v8742_v10  ;;  %v8746_v43 = vld [vmem:[%s9045_s14 + $0x124] ss:$8 sps:$4 sm:$0xff]   ;;  %v8777_v45 = vld [vmem:[%s9045_s14 + $0x194] ss:$8 sps:$4 sm:$0xff]  }
  0x2d   : > { %7579 = vmatprep.subr.bf16.mxu1 %v8744_v11 }
  0x2e   : > { %940 = vmatmul.mubr.bf16.gmra.mrb[4].mxu1 %v8667_v32  ;;  %v8765_v32 = vld [vmem:[%s9045_s14 + $0x150] ss:$8 sps:$4 sm:$0xff]  }
  0x2f   : > { %947 = vmatprep.mubr.bf16.mxu1 %v8671_v34  ;;  %7520 = vmatpush3.bf16.msra.mxu0 %v8712_v47  ;;  %v8733_v34 = vld [vmem:[%s9045_s14 + $0xf0] ss:$8 sps:$4 sm:$0xff]   ;;  %v8947_v47 = vmov 0.0  }
  0x30   : > { %7521 = vmatprep.subr.bf16.mxu0 %v8713_v50  ;;  %7580 = vmatpush3.bf16.msra.mxu1 %v8745_v14  ;;  %v8779_v50 = vld [vmem:[%s9045_s14 + $0x190] ss:$8 sps:$4 sm:$0xff]  }
  0x31   : > { %7581 = vmatprep.subr.bf16.mxu1 %v8749_v15 }
  0x32   : > { %545 = vmatmul.mubr.bf16.gmra.mrb[4].mxu0 %v8690_v48  ;;  %v8748_v48 = vld [vmem:[%s9045_s14 + $0x120] ss:$8 sps:$4 sm:$0xff]  }
  0x33   : > { %552 = vmatprep.mubr.bf16.mxu0 %v8694_v49  ;;  %7522 = vmatpush3.bf16.msra.mxu0 %v8714_v51  ;;  %v8751_v49 = vld [vmem:[%s9045_s14 + $0x134] ss:$8 sps:$4 sm:$0xff]  }
  0x34   : > { %7523 = vmatprep.subr.bf16.mxu0 %v8717_v52  ;;  %7582 = vmatpush3.bf16.msra.mxu1 %v8750_v16  ;;  %v8787_v51 = vld [vmem:[%s11106_s3 + $0x18] sm:$0xff]   ;;  %v8780_v52 = vld [vmem:[%s9045_s14 + $0x1a4] ss:$8 sps:$4 sm:$0xff]  }
  0x35   : > { %7583 = vmatprep.subr.bf16.mxu1 %v8753_v18 }
  0x36   : > { %948 = vmatmul.mubr.bf16.gmra.mrb[8].mxu1 %v8674_v38  ;;  %v8737_v38 = vld [vmem:[%s9045_s14 + $0x100] ss:$8 sps:$4 sm:$0xff]  }
  0x37   : > { %955 = vmatprep.mubr.bf16.mxu1 %v8678_v40  ;;  %7524 = vmatpush3.bf16.msra.mxu0 %v8719_v55  ;;  %v8773_v40 = vld [vmem:[%s9045_s14 + $0x170] ss:$8 sps:$4 sm:$0xff]   ;;  %v8782_v55 = vld [vmem:[%s9045_s14 + $0x1a0] ss:$8 sps:$4 sm:$0xff]  }
  0x38   : > { %7525 = vmatprep.subr.bf16.mxu0 %v8720_v58  ;;  %7584 = vmatpush3.bf16.msra.mxu1 %v8755_v20  ;;  %v8785_v58 = vld [vmem:[%s9045_s14 + $0x1b0] ss:$8 sps:$4 sm:$0x7f]  }
  0x39   : > { %7585 = vmatprep.subr.bf16.mxu1 %v8756_v21 }
  0x3a   : > { %553 = vmatmul.mubr.bf16.gmra.mrb[8].mxu0 %v8696_v56  ;;  %v8783_v56 = vld [vmem:[%s9045_s14 + $0x1b4] ss:$8 sps:$4 sm:$0x7f]  }
  0x3b   : > { %560 = vmatprep.mubr.bf16.mxu0 %v8700_v57  ;;  %7526 = vmatpush3.bf16.msra.mxu0 %v8721_v59  ;;  %v8762_v57 = vld [vmem:[%s9045_s14 + $0x140] ss:$8 sps:$4 sm:$0x7f]  }
  0x3c   : > { %7527 = vmatprep.subr.bf16.mxu0 %v8722_v60  ;;  %7586 = vmatpush3.bf16.msra.mxu1 %v8757_v22  ;;  %v9272_v60 = vld [vmem:[%s11105_s2] ss:$0 sm:$0xff] }
  0x3d   : > { %7587 = vmatprep.subr.bf16.mxu1 %v8758_v23 }
  0x3e   : > { %956 = vmatmul.mubr.bf16.gmra.mrb[12].mxu1 %v8681_v44  ;;  %v8776_v44 = vld [vmem:[%s9045_s14 + $0x180] ss:$8 sps:$4 sm:$0xff]  }
  0x3f   : > { %963 = vmatprep.mubr.bf16.mxu1 %v8685_v46  ;;  %7528 = vmatpush3.bf16.msra.mxu0 %v8723_v1  ;;  %v8786_v46 = vld [vmem:[%s11106_s3 + $0x10] sm:$0xff]  }
  0x40   : > { %7529 = vmatprep.subr.bf16.mxu0 %v8724_v2  ;;  %7588 = vmatpush3.bf16.msra.mxu1 %v8759_v27 }
  0x41   : > { %7589 = vmatprep.subr.bf16.mxu1 %v8763_v28  ;;  %v8793_v28 = vld [vmem:[%s11106_s3 + $0x20] sm:$0xff]  }
  0x42   : > { %561 = vmatmul.mubr.bf16.gmra.mrb[12].mxu0 %v8702_v62 }
  0x43   : > { %568 = vmatprep.mubr.bf16.mxu0 %v8703_v0  ;;  %7530 = vmatpush3.bf16.msra.mxu0 %v8725_v3 }
  0x44   : > { %7531 = vmatprep.subr.bf16.mxu0 %v8726_v7  ;;  %7590 = vmatpush3.bf16.msra.mxu1 %v8764_v30 }
  0x45   : > { %8622 = vmatprep.subr.bf16.mxu1 %v8947_v47 }
  0x46   : > { %964 = vmatmul.mubr.bf16.gmra.mrb[16].mxu1 %v8687_v53  ;;  %v8754_v53 = vld [vmem:[%s9045_s14 + $0x130] ss:$8 sps:$4 sm:$0xff]  }
  0x47   : > { %971 = vmatprep.mubr.bf16.mxu1 %v8691_v54  ;;  %7532 = vmatpush3.bf16.msra.mxu0 %v8727_v8  ;;  %v8760_v54 = vld [vmem:[%s9045_s14 + $0x144] ss:$8 sps:$4 sm:$0x7f]  }
  0x48   : > { %7858 = vmatprep.subr.bf16.mxu0 %v8947_v47 }
  0x4a   : > { %569 = vmatmul.mubr.bf16.gmra.mrb[16].mxu0 %v8705_v12 }
  0x4b   : > { %576 = vmatprep.mubr.bf16.mxu0 %v8708_v13 }
  0x4e   : > { %972 = vmatmul.mubr.bf16.gmra.mrb[20].mxu1 %v8693_v61 }
  0x4f   : > { %979 = vmatprep.mubr.bf16.mxu1 %v8697_v63 }
  0x52   : > { %577 = vmatmul.mubr.bf16.gmra.mrb[20].mxu0 %v8710_v19 }
  0x53   : > { %584 = vmatprep.mubr.bf16.mxu0 %v8715_v17 }
  0x56   : > { %980 = vmatmul.mubr.bf16.gmra.mrb[24].mxu1 %v8699_v9 }
  0x57   : > { %1719 = vmatprep.mubr.bf16.mxu1 %v8767_v24 }
  0x5a   : > { %585 = vmatmul.mubr.bf16.gmra.mrb[24].mxu0 %v8718_v25 }
  0x5b   : > { %1325 = vmatprep.mubr.bf16.mxu0 %v8730_v26 }
  0x5e   : > { %1720 = vmatmul.mubr.bf16.vlgmr.msra.gmra.mrb[28].mxu1 %v8765_v32 }
  0x5f   : > { %1727 = vmatprep.mubr.bf16.mxu1 %v8768_v33  ;;  %8624 = vmatpush3.bf16.msra.mxu1 %v8786_v46 }
  0x60   : > { %8623 = vmatprep.subr.bf16.mxu1 %v8947_v47 }
  0x62   : > { %1326 = vmatmul.mubr.bf16.vlgmr.msra.gmra.mrb[28].mxu0 %v8728_v29 }
  0x63   : > { %1333 = vmatprep.mubr.bf16.mxu0 %v8731_v31  ;;  %7859 = vmatpush3.bf16.msra.mxu0 %v8786_v46 }
  0x64   : > { %7860 = vmatprep.subr.bf16.mxu0 %v8947_v47  ;;  %8625 = vmatpush3.bf16.msra.mxu1 %v8787_v51 }
  0x65   : > { %7890 = vmatprep.subr.bf16.mxu1 %v8947_v47 }
  0x66   : > { %1728 = vmatmul.mubr.bf16.gmra.mrb[32].mxu1 %v8770_v36 }
  0x67   : > { %1735 = vmatprep.mubr.bf16.mxu1 %v8771_v37  ;;  %7861 = vmatpush3.bf16.msra.mxu0 %v8787_v51 }
  0x68   : > { %7922 = vmatprep.subr.bf16.mxu0 %v8947_v47 }
  0x6a   : > { %1334 = vmatmul.mubr.bf16.gmra.mrb[32].mxu0 %v8733_v34 }
  0x6b   : > { %1341 = vmatprep.mubr.bf16.mxu0 %v8734_v35 }
  0x6e   : > { %1736 = vmatmul.mubr.bf16.gmra.mrb[36].mxu1 %v8773_v40  ;;  %v8794_v40 = vld [vmem:[%s11106_s3 + $0x28] sm:$0xff]  }
  0x6f   : > { %1743 = vmatprep.mubr.bf16.mxu1 %v8774_v41 }
  0x72   : > { %1342 = vmatmul.mubr.bf16.gmra.mrb[36].mxu0 %v8737_v38 }
  0x73   : > { %1349 = vmatprep.mubr.bf16.mxu0 %v8740_v39 }
  0x76   : > { %1744 = vmatmul.mubr.bf16.gmra.mrb[40].mxu1 %v8776_v44 }
  0x77   : > { %1751 = vmatprep.mubr.bf16.mxu1 %v8777_v45 }
  0x7a   : > { %1350 = vmatmul.mubr.bf16.gmra.mrb[40].mxu0 %v8743_v42 }
  0x7b   : > { %1357 = vmatprep.mubr.bf16.mxu0 %v8746_v43 }
  0x7e   : > { %1752 = vmatmul.mubr.bf16.gmra.mrb[44].mxu1 %v8779_v50 }
  0x7f   : > { %1759 = vmatprep.mubr.bf16.mxu1 %v8780_v52 }
  0x82   : > { %1358 = vmatmul.mubr.bf16.gmra.mrb[44].mxu0 %v8748_v48 }
  0x83   : > { %1365 = vmatprep.mubr.bf16.mxu0 %v8751_v49 }
  0x86   : > { %1760 = vmatmul.mubr.bf16.gmra.mrb[48].mxu1 %v8782_v55 }
  0x87   : > { %1767 = vmatprep.mubr.bf16.mxu1 %v8783_v56 }
  0x8a   : > { %1366 = vmatmul.mubr.bf16.gmra.mrb[48].mxu0 %v8754_v53 }
  0x8b   : > { %1373 = vmatprep.mubr.bf16.mxu0 %v8760_v54 }
  0x8e   : > { %1768 = vmatmul.mubr.bf16.gmra.mrb[52].mxu1 %v8785_v58 }
  0x8f   : > { %7882 = vmatprep.mubr.msk.bf16.mxu1 %vm8948_vm0, %v8947_v47 }
  0x92   : > { %1374 = vmatmul.mubr.bf16.gmra.mrb[52].mxu0 %v8762_v57 }
  0x93   : > { %7862 = vmatprep.mubr.msk.bf16.mxu0 %vm8948_vm0, %v8947_v47 }
  0xf9   : > { %v7475_v59 = vpop.f32.mrb[0].mxu1 }
  0xfa   : > { %v7476_v61 = vpop.f32.mrb[1].mxu1 }
  0xfb   : > { %v7477_v62 = vadd.f32 %v7476_v61, %v7475_v59  ;;  %v7478_v63 = vpop.f32.mrb[2].mxu1 }
  0xfc   : > { %v7479_v0 = vpop.f32.mrb[3].mxu1 }
  0xfd   : > { %v934_v1 = vadd.f32 %v7477_v62, %v9272_v60  ;;  %v7480_v2 = vadd.f32 %v7479_v0, %v7478_v63  ;;  %v7417_v20 = vpop.f32.mrb[0].mxu0 }
  0xfe   : > { %v7418_v22 = vpop.f32.mrb[1].mxu0 }
  0xff   : > { %v988_v3 = vmax.f32 %v934_v1, 0.0  ;;  %v937_v4 = vadd.f32 %v7480_v2, %v9272_v60  ;;  %v7419_v26 = vadd.f32 %v7418_v22, %v7417_v20  ;;  %v7420_v27 = vpop.f32.mrb[2].mxu0 }
 0x100   : > { %v7421_v31 = vpop.f32.mrb[3].mxu0 }
 0x101   : > { %v7336_v5 = vpack.c.bf16 %v988_v3, %v988_v3  ;;  %v989_v6 = vmax.f32 %v937_v4, 0.0  ;;  %v7481_v7 = vpop.f32.mrb[4].mxu1  ;;  %v539_v34 = vadd.f32 %v7419_v26, %v9272_v60  ;;  %v7422_v35 = vadd.f32 %v7421_v31, %v7420_v27 }
 0x102   : > { %v7482_v8 = vpop.f32.mrb[5].mxu1 }
 0x103   : > { %1059 = vst.msk [vmem:[#allocation2 + $0x38] sm:$0xf] %vm663_vm1, %v7336_v5  ;;  %v7337_v9 = vpack.c.bf16 %v989_v6, %v989_v6  ;;  %v7483_v10 = vadd.f32 %v7482_v8, %v7481_v7  ;;  %v7484_v11 = vpop.f32.mrb[6].mxu1  ;;  %v593_v38 = vmax.f32 %v539_v34, 0.0  ;;  %v542_v39 = vadd.f32 %v7422_v35, %v9272_v60 }
 0x104   : > { %v7485_v12 = vpop.f32.mrb[7].mxu1 }
 0x105   : > { %1060 = vst.msk [vmem:[#allocation2 + $0x3c] sm:$0xf] %vm663_vm1, %v7337_v9  ;;  %v942_v13 = vadd.f32 %v7483_v10, %v9272_v60  ;;  %v7486_v14 = vadd.f32 %v7485_v12, %v7484_v11  ;;  %v7322_v45 = vpack.c.bf16 %v593_v38, %v593_v38  ;;  %v594_v46 = vmax.f32 %v542_v39, 0.0  ;;  %v7423_v48 = vpop.f32.mrb[4].mxu0 }
 0x106   : > { %v7424_v50 = vpop.f32.mrb[5].mxu0 }
 0x107   : > { %v990_v15 = vmax.f32 %v942_v13, 0.0  ;;  %v945_v16 = vadd.f32 %v7486_v14, %v9272_v60  ;;  %664 = vst.msk [vmem:[#allocation2] sm:$0xf] %vm663_vm1, %v7322_v45  ;;  %v7323_v54 = vpack.c.bf16 %v594_v46, %v594_v46  ;;  %v7425_v55 = vadd.f32 %v7424_v50, %v7423_v48  ;;  %v7426_v56 = vpop.f32.mrb[6].mxu0 }
 0x108   : > { %v7427_v59 = vpop.f32.mrb[7].mxu0 }
 0x109   : > { %v7338_v17 = vpack.c.bf16 %v990_v15, %v990_v15  ;;  %v991_v18 = vmax.f32 %v945_v16, 0.0  ;;  %v7487_v19 = vpop.f32.mrb[8].mxu1  ;;  %665 = vst.msk [vmem:[#allocation2 + $0x4] sm:$0xf] %vm663_vm1, %v7323_v54  ;;  %v547_v0 = vadd.f32 %v7425_v55, %v9272_v60  ;;  %v7428_v1 = vadd.f32 %v7427_v59, %v7426_v56 }
 0x10a   : > { %v7488_v21 = vpop.f32.mrb[9].mxu1 }
 0x10b   : > { %1061 = vst.msk [vmem:[#allocation2 + $0x40] sm:$0xf] %vm663_vm1, %v7338_v17  ;;  %v7339_v23 = vpack.c.bf16 %v991_v18, %v991_v18  ;;  %v7489_v24 = vadd.f32 %v7488_v21, %v7487_v19  ;;  %v7490_v25 = vpop.f32.mrb[10].mxu1  ;;  %v595_v6 = vmax.f32 %v547_v0, 0.0  ;;  %v550_v7 = vadd.f32 %v7428_v1, %v9272_v60 }
 0x10c   : > { %v7491_v29 = vpop.f32.mrb[11].mxu1  ;;  %v8788_v30 = vld [vmem:[#allocation2 + $0x38] sm:$0xff]  }
 0x10d   : > { %1062 = vst.msk [vmem:[#allocation2 + $0x44] sm:$0xf] %vm663_vm1, %v7339_v23  ;;  %v950_v32 = vadd.f32 %v7489_v24, %v9272_v60  ;;  %v7492_v33 = vadd.f32 %v7491_v29, %v7490_v25  ;;  %7863 = vmatmul.mubr.msk.bf16.vlgmr.msra.gmra.mrb[56].mxu0 %vm1940_vm2, %v8788_v30  ;;  %v2396_v41 = vshll.u32 %v8788_v30, 16  ;;  %v2394_v3 = vshrl.u32 %v8788_v30, 16  ;;  %v7429_v15 = vpop.f32.mrb[8].mxu0 }
 0x10e   : > { %7866 = vmatprep.mubr.msk.bf16.mxu0 %vm8948_vm0, %v8947_v47  ;;  %7923 = vmatpush3.bf16.msra.mxu0 %v8793_v28  ;;  %v7324_v13 = vpack.c.bf16 %v595_v6, %v595_v6  ;;  %v596_v14 = vmax.f32 %v550_v7, 0.0  ;;  %v7430_v17 = vpop.f32.mrb[9].mxu0 }
 0x10f   : > { %v992_v36 = vmax.f32 %v950_v32, 0.0  ;;  %v953_v37 = vadd.f32 %v7492_v33, %v9272_v60  ;;  %7924 = vmatprep.subr.bf16.mxu0 %v8947_v47  ;;  %v2398_v61 = vrot.slane %v2396_v41, 1  ;;  %v7431_v23 = vadd.f32 %v7430_v17, %v7429_v15  ;;  %v7432_v24 = vpop.f32.mrb[10].mxu0 }
 0x110   : > { %666 = vst.msk [vmem:[#allocation2 + $0x8] sm:$0xf] %vm663_vm1, %v7324_v13  ;;  %v7325_v22 = vpack.c.bf16 %v596_v14, %v596_v14  ;;  %v7433_v27 = vpop.f32.mrb[11].mxu0  ;;  %v9313_v28 = vld [vmem:[#allocation2] sm:$0xff]  }
 0x111   : > { %v7340_v42 = vpack.c.bf16 %v992_v36, %v992_v36  ;;  %v993_v43 = vmax.f32 %v953_v37, 0.0  ;;  %v7493_v44 = vpop.f32.mrb[12].mxu1  ;;  %v2399_v9 = vor.u32 %v2398_v61, %v2394_v3  ;;  %v555_v31 = vadd.f32 %v7431_v23, %v9272_v60 }
 0x112   : > { %v7494_v49 = vpop.f32.mrb[13].mxu1  ;;  %7925 = vmatpush3.bf16.msra.mxu0 %v8794_v40  ;;  %667 = vst.msk [vmem:[#allocation2 + $0xc] sm:$0xf] %vm663_vm1, %v7325_v22  ;;  %v7434_v32 = vadd.f32 %v7433_v27, %v7432_v24  ;;  %v2211_v39 = vshll.u32 %v9313_v28, 16  ;;  %v2209_v3 = vshrl.u32 %v9313_v28, 16 }
 0x113   : > { %1063 = vst.msk [vmem:[#allocation2 + $0x48] sm:$0xf] %vm663_vm1, %v7340_v42  ;;  %v7341_v51 = vpack.c.bf16 %v993_v43, %v993_v43  ;;  %v7495_v52 = vadd.f32 %v7494_v49, %v7493_v44  ;;  %v7496_v53 = vpop.f32.mrb[14].mxu1  ;;  %7986 = vmatprep.subr.bf16.mxu0 %v8947_v47  ;;  %v597_v37 = vmax.f32 %v555_v31, 0.0 }
 0x114   : > { %v7497_v57 = vpop.f32.mrb[15].mxu1  ;;  %v8789_v58 = vld [vmem:[#allocation2 + $0x40] sm:$0xff]   ;;  %v558_v38 = vadd.f32 %v7434_v32, %v9272_v60 }
 0x115   : > { %1064 = vst.msk [vmem:[#allocation2 + $0x4c] sm:$0xf] %vm663_vm1, %v7341_v51  ;;  %v958_v62 = vadd.f32 %v7495_v52, %v9272_v60  ;;  %v7498_v63 = vadd.f32 %v7497_v57, %v7496_v53  ;;  %7867 = vmatmul.mubr.msk.bf16.gmra.mrb[60].mxu0 %vm1940_vm2, %v8789_v58  ;;  %v2400_v2 = vshll.u32 %v8789_v58, 16  ;;  %v2404_v33 = vshrl.u32 %v8789_v58, 16  ;;  %v7435_v48 = vpop.f32.mrb[12].mxu0 }
 0x116   : > { %7870 = vmatprep.mubr.msk.bf16.mxu0 %vm8948_vm0, %v8947_v47  ;;  %v7326_v45 = vpack.c.bf16 %v597_v37, %v597_v37  ;;  %v598_v46 = vmax.f32 %v558_v38, 0.0  ;;  %v7436_v50 = vpop.f32.mrb[13].mxu0 }
 0x117   : > { %v994_v4 = vmax.f32 %v958_v62, 0.0  ;;  %v961_v5 = vadd.f32 %v7498_v63, %v9272_v60  ;;  %v2402_v8 = vrot.slane %v2400_v2, 1  ;;  %v7437_v56 = vadd.f32 %v7436_v50, %v7435_v48  ;;  %v7438_v57 = vpop.f32.mrb[14].mxu0 }
 0x118   : > { %668 = vst.msk [vmem:[#allocation2 + $0x10] sm:$0xf] %vm663_vm1, %v7326_v45  ;;  %v7327_v55 = vpack.c.bf16 %v598_v46, %v598_v46  ;;  %v7439_v61 = vpop.f32.mrb[15].mxu0 }
 0x119   : > { %v7342_v10 = vpack.c.bf16 %v994_v4, %v994_v4  ;;  %v995_v11 = vmax.f32 %v961_v5, 0.0  ;;  %v7499_v12 = vpop.f32.mrb[16].mxu1  ;;  %v9309_v18 = vsel %vm2208_vm3, %v2399_v9, %v2402_v8  ;;  %v2406_v40 = vor.u32 %v2404_v33, %v2402_v8  ;;  %v9330_v62 = vld [vmem:[#allocation2 + $0x8] sm:$0xff]  }
 0x11a   : > { %v7500_v16 = vpop.f32.mrb[17].mxu1  ;;  %669 = vst.msk [vmem:[#allocation2 + $0x14] sm:$0xf] %vm663_vm1, %v7327_v55  ;;  %v563_v1 = vadd.f32 %v7437_v56, %v9272_v60  ;;  %v7440_v2 = vadd.f32 %v7439_v61, %v7438_v57  ;;  %v8796_v55 = vld [vmem:[%s11106_s3] sm:$0xff]  }
 0x11b   : > { %1065 = vst.msk [vmem:[#allocation2 + $0x50] sm:$0xf] %vm663_vm1, %v7342_v10  ;;  %v7343_v19 = vpack.c.bf16 %v995_v11, %v995_v11  ;;  %v7501_v20 = vadd.f32 %v7500_v16, %v7499_v12  ;;  %v7502_v21 = vpop.f32.mrb[18].mxu1  ;;  %v2213_v10 = vrot.slane %v2211_v39, 1  ;;  %v2215_v11 = vshll.u32 %v9330_v62, 16 }
 0x11c   : > { %v7503_v25 = vpop.f32.mrb[19].mxu1  ;;  %v8790_v26 = vld [vmem:[#allocation2 + $0x48] sm:$0xff]   ;;  %v599_v8 = vmax.f32 %v563_v1, 0.0  ;;  %v566_v9 = vadd.f32 %v7440_v2, %v9272_v60 }
 0x11d   : > { %1066 = vst.msk [vmem:[#allocation2 + $0x54] sm:$0xf] %vm663_vm1, %v7343_v19  ;;  %v966_v29 = vadd.f32 %v7501_v20, %v9272_v60  ;;  %v7504_v30 = vadd.f32 %v7503_v25, %v7502_v21  ;;  %7871 = vmatmul.mubr.msk.bf16.gmra.mrb[64].mxu0 %vm1940_vm2, %v8790_v26  ;;  %v2407_v34 = vshll.u32 %v8790_v26, 16  ;;  %v2411_v4 = vshrl.u32 %v8790_v26, 16  ;;  %v7441_v20 = vpop.f32.mrb[16].mxu0 }
 0x11e   : > { %7874 = vmatprep.mubr.msk.bf16.mxu0 %vm8948_vm0, %v8947_v47  ;;  %v7328_v17 = vpack.c.bf16 %v599_v8, %v599_v8  ;;  %v600_v19 = vmax.f32 %v566_v9, 0.0  ;;  %v7442_v22 = vpop.f32.mrb[17].mxu0  ;;  %v2214_v38 = vor.u32 %v2213_v10, %v2209_v3  ;;  %v2217_v39 = vrot.slane %v2215_v11, 1  ;;  %v8808_v8 = vld [vmem:[%s11106_s3 + $0x40] sm:$0xff]  }
 0x11f   : > { %v996_v35 = vmax.f32 %v966_v29, 0.0  ;;  %v969_v36 = vadd.f32 %v7504_v30, %v9272_v60  ;;  %v2409_v41 = vrot.slane %v2407_v34, 1  ;;  %v7443_v29 = vadd.f32 %v7442_v22, %v7441_v20  ;;  %v7444_v30 = vpop.f32.mrb[18].mxu0 }
 0x120   : > { %670 = vst.msk [vmem:[#allocation2 + $0x18] sm:$0xf] %vm663_vm1, %v7328_v17  ;;  %v7329_v27 = vpack.c.bf16 %v600_v19, %v600_v19  ;;  %v7445_v33 = vpop.f32.mrb[19].mxu0  ;;  %v2218_v57 = vsel %vm2208_vm3, %v2214_v38, %v2217_v39 }
 0x121   : > { %v7344_v42 = vpack.c.bf16 %v996_v35, %v996_v35  ;;  %v997_v43 = vmax.f32 %v969_v36, 0.0  ;;  %v7505_v44 = vpop.f32.mrb[20].mxu1  ;;  %v9326_v51 = vsel %vm2208_vm3, %v2406_v40, %v2409_v41  ;;  %v2413_v12 = vor.u32 %v2411_v4, %v2409_v41  ;;  %v9357_v46 = vld [vmem:[#allocation2 + $0x10] sm:$0xff]  }
 0x122   : > { %v7506_v49 = vpop.f32.mrb[21].mxu1  ;;  %671 = vst.msk [vmem:[#allocation2 + $0x1c] sm:$0xf] %vm663_vm1, %v7329_v27  ;;  %v571_v36 = vadd.f32 %v7443_v29, %v9272_v60  ;;  %v7446_v37 = vadd.f32 %v7445_v33, %v7444_v30  ;;  %v2222_v3 = vshll.u32 %v9357_v46, 16 }
 0x123   : > { %1067 = vst.msk [vmem:[#allocation2 + $0x58] sm:$0xf] %vm663_vm1, %v7344_v42  ;;  %v7345_v52 = vpack.c.bf16 %v997_v43, %v997_v43  ;;  %v7507_v53 = vadd.f32 %v7506_v49, %v7505_v44  ;;  %v7508_v54 = vpop.f32.mrb[22].mxu1 }
 0x124   : > { %v7509_v58 = vpop.f32.mrb[23].mxu1  ;;  %v8791_v59 = vld [vmem:[#allocation2 + $0x50] sm:$0xff]   ;;  %v601_v44 = vmax.f32 %v571_v36, 0.0  ;;  %v574_v45 = vadd.f32 %v7446_v37, %v9272_v60 }
 0x125   : > { %1068 = vst.msk [vmem:[#allocation2 + $0x5c] sm:$0xf] %vm663_vm1, %v7345_v52  ;;  %v974_v63 = vadd.f32 %v7507_v53, %v9272_v60  ;;  %v7510_v0 = vadd.f32 %v7509_v58, %v7508_v54  ;;  %7875 = vmatmul.mubr.msk.bf16.gmra.mrb[68].mxu0 %vm1940_vm2, %v8791_v59  ;;  %v2414_v5 = vshll.u32 %v8791_v59, 16  ;;  %v2418_v40 = vshrl.u32 %v8791_v59, 16  ;;  %v7447_v56 = vpop.f32.mrb[20].mxu0 }
 0x126   : > { %7878 = vmatprep.mubr.msk.bf16.mxu0 %vm8948_vm0, %v8947_v47  ;;  %v7330_v53 = vpack.c.bf16 %v601_v44, %v601_v44  ;;  %v602_v54 = vmax.f32 %v574_v45, 0.0  ;;  %v7448_v58 = vpop.f32.mrb[21].mxu0  ;;  %v2219_v59 = vshrl.u32 %v9330_v62, 16 }
 0x127   : > { %v998_v6 = vmax.f32 %v974_v63, 0.0  ;;  %v977_v7 = vadd.f32 %v7510_v0, %v9272_v60  ;;  %v2416_v13 = vrot.slane %v2414_v5, 1  ;;  %v7449_v1 = vadd.f32 %v7448_v58, %v7447_v56  ;;  %v7450_v2 = vpop.f32.mrb[22].mxu0  ;;  %v8803_v58 = vld [vmem:[%s11106_s3 + $0x30] sm:$0xff]  }
 0x128   : > { %672 = vst.msk [vmem:[#allocation2 + $0x20] sm:$0xf] %vm663_vm1, %v7330_v53  ;;  %v7331_v0 = vpack.c.bf16 %v602_v54, %v602_v54  ;;  %v7451_v5 = vpop.f32.mrb[23].mxu0 }
 0x129   : > { %v7346_v14 = vpack.c.bf16 %v998_v6, %v998_v6  ;;  %v999_v15 = vmax.f32 %v977_v7, 0.0  ;;  %v7511_v16 = vpop.f32.mrb[24].mxu1  ;;  %v9344_v23 = vsel %vm2208_vm3, %v2413_v12, %v2416_v13  ;;  %v2420_v48 = vor.u32 %v2418_v40, %v2416_v13  ;;  %v8800_v13 = vld [vmem:[%s11106_s3 + $0x8] sm:$0xff]  }
 0x12a   : > { %v7512_v21 = vpop.f32.mrb[25].mxu1  ;;  %673 = vst.msk [vmem:[#allocation2 + $0x24] sm:$0xf] %vm663_vm1, %v7331_v0  ;;  %v579_v6 = vadd.f32 %v7449_v1, %v9272_v60  ;;  %v7452_v7 = vadd.f32 %v7451_v5, %v7450_v2  ;;  %v9430_v2 = vld [vmem:[%s11105_s2] ss:$0 sm:$0xff] }
 0x12b   : > { %1069 = vst.msk [vmem:[#allocation2 + $0x60] sm:$0xf] %vm663_vm1, %v7346_v14  ;;  %v7347_v24 = vpack.c.bf16 %v999_v15, %v999_v15  ;;  %v7513_v25 = vadd.f32 %v7512_v21, %v7511_v16  ;;  %v7514_v26 = vpop.f32.mrb[26].mxu1  ;;  %v2221_v14 = vor.u32 %v2219_v59, %v2217_v39  ;;  %v2224_v15 = vrot.slane %v2222_v3, 1  ;;  %v9384_v16 = vld [vmem:[#allocation2 + $0x18] sm:$0xff]  }
 0x12c   : > { %v7515_v31 = vpop.f32.mrb[27].mxu1  ;;  %v8792_v32 = vld [vmem:[#allocation2 + $0x58] sm:$0xff]   ;;  %v603_v11 = vmax.f32 %v579_v6, 0.0  ;;  %v582_v12 = vadd.f32 %v7452_v7, %v9272_v60  ;;  %v2229_v33 = vshll.u32 %v9384_v16, 16 }
 0x12d   : > { %1070 = vst.msk [vmem:[#allocation2 + $0x64] sm:$0xf] %vm663_vm1, %v7347_v24  ;;  %v982_v34 = vadd.f32 %v7513_v25, %v9272_v60  ;;  %v7516_v35 = vadd.f32 %v7515_v31, %v7514_v26  ;;  %7879 = vmatmul.mubr.msk.bf16.gmra.mrb[72].mxu0 %vm1940_vm2, %v8792_v32  ;;  %v2421_v41 = vshll.u32 %v8792_v32, 16  ;;  %v2425_v9 = vshrl.u32 %v8792_v32, 16  ;;  %v7453_v22 = vpop.f32.mrb[24].mxu0  ;;  %v8809_v25 = vld [vmem:[%s11106_s3 + $0x48] sm:$0xff]  }
 0x12e   : > { %7926 = vmatprep.mubr.msk.bf16.mxu0 %vm8948_vm0, %v8947_v47  ;;  %v7332_v20 = vpack.c.bf16 %v603_v11, %v603_v11  ;;  %v604_v21 = vmax.f32 %v582_v12, 0.0  ;;  %v2226_v24 = vshrl.u32 %v9357_v46, 16  ;;  %v7454_v27 = vpop.f32.mrb[25].mxu0  ;;  %v2225_v31 = vsel %vm2208_vm3, %v2221_v14, %v2224_v15 }
 0x12f   : > { %v1000_v42 = vmax.f32 %v982_v34, 0.0  ;;  %v985_v43 = vadd.f32 %v7516_v35, %v9272_v60  ;;  %v2423_v49 = vrot.slane %v2421_v41, 1  ;;  %v7455_v32 = vadd.f32 %v7454_v27, %v7453_v22  ;;  %v7456_v34 = vpop.f32.mrb[26].mxu0 }
 0x130   : > { %674 = vst.msk [vmem:[#allocation2 + $0x28] sm:$0xf] %vm663_vm1, %v7332_v20  ;;  %v7333_v30 = vpack.c.bf16 %v604_v21, %v604_v21  ;;  %v7457_v35 = vpop.f32.mrb[27].mxu0  ;;  %v2231_v44 = vrot.slane %v2229_v33, 1 }
 0x131   : > { %v7348_v50 = vpack.c.bf16 %v1000_v42, %v1000_v42  ;;  %v1001_v52 = vmax.f32 %v985_v43, 0.0  ;;  %v9365_v61 = vsel %vm2208_vm3, %v2420_v48, %v2423_v49  ;;  %v2427_v17 = vor.u32 %v2425_v9, %v2423_v49  ;;  %v9413_v45 = vld [vmem:[#allocation2 + $0x20] sm:$0xff]   ;;  %v7591_v56 = vpop.f32.mrb[28].mxu1 }
 0x132   : > { %675 = vst.msk [vmem:[#allocation2 + $0x2c] sm:$0xf] %vm663_vm1, %v7333_v30  ;;  %v587_v38 = vadd.f32 %v7455_v32, %v9272_v60  ;;  %v7458_v39 = vadd.f32 %v7457_v35, %v7456_v34  ;;  %v2228_v43 = vor.u32 %v2226_v24, %v2224_v15  ;;  %v2236_v59 = vshll.u32 %v9413_v45, 16  ;;  %v7592_v3 = vpop.f32.mrb[29].mxu1 }
 0x133   : > { %1071 = vst.msk [vmem:[#allocation2 + $0x68] sm:$0xf] %vm663_vm1, %v7348_v50  ;;  %v7349_v63 = vpack.c.bf16 %v1001_v52, %v1001_v52  ;;  %v2233_v52 = vshrl.u32 %v9384_v16, 16  ;;  %v7593_v5 = vadd.f32 %v7592_v3, %v7591_v56  ;;  %v7594_v6 = vpop.f32.mrb[30].mxu1 }
 0x134   : > { %v8795_v4 = vld [vmem:[#allocation2 + $0x60] sm:$0xff]   ;;  %v605_v42 = vmax.f32 %v587_v38, 0.0  ;;  %v590_v48 = vadd.f32 %v7458_v39, %v9272_v60  ;;  %v7595_v9 = vpop.f32.mrb[31].mxu1  ;;  %v2238_v14 = vrot.slane %v2236_v59, 1 }
 0x135   : > { %1072 = vst.msk [vmem:[#allocation2 + $0x6c] sm:$0x7] %vm677_vm4, %v7349_v63  ;;  %7883 = vmatmul.mubr.msk.bf16.vlgmr.msra.gmra.mrb[56].mxu1 %vm1940_vm2, %v8795_v4  ;;  %7927 = vmatmul.mubr.msk.bf16.vlgmr.msra.gmra.mrb[76].mxu0 %vm1940_vm2, %v2218_v57  ;;  %v2428_v10 = vshll.u32 %v8795_v4, 16  ;;  %v2432_v36 = vshrl.u32 %v8795_v4, 16  ;;  %v7533_v54 = vpop.f32.mrb[28].mxu0  ;;  %v2232_v57 = vsel %vm2208_vm3, %v2228_v43, %v2231_v44  ;;  %v1722_v11 = vadd.f32 %v7593_v5, %v9430_v2 }
 0x136   : > { %7891 = vmatpush3.bf16.msra.mxu1 %v8796_v55  ;;  %7886 = vmatprep.mubr.msk.bf16.mxu1 %vm8948_vm0, %v8947_v47  ;;  %v7334_v50 = vpack.c.bf16 %v605_v42, %v605_v42  ;;  %v606_v53 = vmax.f32 %v590_v48, 0.0  ;;  %v7534_v55 = vpop.f32.mrb[29].mxu0  ;;  %v7596_v12 = vadd.f32 %v7595_v9, %v7594_v6 }
 0x137   : > { %7892 = vmatprep.subr.bf16.mxu1 %v8947_v47  ;;  %7930 = vmatprep.mubr.msk.bf16.mxu0 %vm8948_vm0, %v8947_v47  ;;  %v2430_v19 = vrot.slane %v2428_v10, 1  ;;  %v7535_v0 = vadd.f32 %v7534_v55, %v7533_v54  ;;  %v7536_v1 = vpop.f32.mrb[30].mxu0 }
 0x138   : > { %7987 = vmatpush3.bf16.msra.mxu0 %v8808_v8  ;;  %676 = vst.msk [vmem:[#allocation2 + $0x30] sm:$0xf] %vm663_vm1, %v7334_v50  ;;  %v7335_v63 = vpack.c.bf16 %v606_v53, %v606_v53  ;;  %v7537_v4 = vpop.f32.mrb[31].mxu0  ;;  %v1725_v20 = vadd.f32 %v7596_v12, %v9430_v2 }
 0x139   : > { %7988 = vmatprep.subr.bf16.mxu0 %v8947_v47  ;;  %v9397_v29 = vsel %vm2208_vm3, %v2427_v17, %v2430_v19  ;;  %v2434_v40 = vor.u32 %v2432_v36, %v2430_v19  ;;  %v1328_v7 = vadd.f32 %v7535_v0, %v9272_v60  ;;  %v7538_v8 = vadd.f32 %v7537_v4, %v7536_v1  ;;  %v9437_v10 = vld [vmem:[#allocation2 + $0x28] sm:$0xff]  }
 0x13a   : > { %v9393_v26 = vld [vmem:[#allocation2 + $0x68] ss:$0 sps:$4 sm:$0x11]   ;;  %7893 = vmatpush3.bf16.msra.mxu1 %v8800_v13  ;;  %678 = vst.msk [vmem:[#allocation2 + $0x34] sm:$0x7] %vm677_vm4, %v7335_v63  ;;  %v2235_v13 = vor.u32 %v2233_v52, %v2231_v44  ;;  %v1776_v19 = vmax.f32 %v1722_v11, 0.0 }
 0x13b   : > { %7954 = vmatprep.subr.bf16.mxu1 %v8947_v47  ;;  %v2435_v37 = vshll.u32 %v9393_v26, 16  ;;  %v1382_v15 = vmax.f32 %v1328_v7, 0.0  ;;  %v1331_v17 = vadd.f32 %v7538_v8, %v9272_v60  ;;  %v2243_v27 = vshll.u32 %v9437_v10, 16 }
 0x13c   : > { %7989 = vmatpush3.bf16.msra.mxu0 %v8809_v25  ;;  %v2240_v25 = vshrl.u32 %v9413_v45, 16  ;;  %v2239_v32 = vsel %vm2208_vm3, %v2235_v13, %v2238_v14  ;;  %v1777_v36 = vmax.f32 %v1725_v20, 0.0  ;;  %v2247_v3 = vshrl.u32 %v9437_v10, 16 }
 0x13d   : > { %7887 = vmatmul.mubr.msk.bf16.gmra.mrb[60].mxu1 %vm1940_vm2, %v9393_v26  ;;  %7931 = vmatmul.mubr.msk.bf16.gmra.mrb[80].mxu0 %vm1940_vm2, %v2225_v31  ;;  %v2437_v41 = vrot.slane %v2435_v37, 1  ;;  %v7350_v21 = vpack.c.bf16 %v1382_v15, %v1382_v15  ;;  %v1383_v22 = vmax.f32 %v1331_v17, 0.0  ;;  %v7539_v24 = vpop.f32.mrb[32].mxu0  ;;  %v7364_v31 = vpack.c.bf16 %v1776_v19, %v1776_v19  ;;  %v7597_v37 = vpop.f32.mrb[32].mxu1 }
 0x13e   : > { %7894 = vmatprep.mubr.msk.bf16.mxu1 %vm8948_vm0, %v8947_v47  ;;  %7934 = vmatprep.mubr.msk.bf16.mxu0 %vm8948_vm0, %v8947_v47  ;;  %v7540_v30 = vpop.f32.mrb[33].mxu0  ;;  %v7598_v39 = vpop.f32.mrb[33].mxu1  ;;  %v7365_v42 = vpack.c.bf16 %v1777_v36, %v1777_v36  ;;  %v2242_v48 = vor.u32 %v2240_v25, %v2238_v14  ;;  %v2245_v50 = vrot.slane %v2243_v27, 1 }
 0x13f   : > { %8050 = vmatprep.subr.bf16.mxu0 %v8947_v47  ;;  %v9418_v49 = vsel %vm2208_vm3, %v2434_v40, %v2437_v41  ;;  %1453 = vst.msk [vmem:[#allocation2 + $0x70] sm:$0xf] %vm663_vm1, %v7350_v21  ;;  %v7351_v33 = vpack.c.bf16 %v1383_v22, %v1383_v22  ;;  %v7541_v34 = vadd.f32 %v7540_v30, %v7539_v24  ;;  %v7542_v35 = vpop.f32.mrb[34].mxu0  ;;  %1847 = vst.msk [vmem:[#allocation2 + $0xa8] sm:$0xf] %vm663_vm1, %v7364_v31  ;;  %v7600_v44 = vpop.f32.mrb[34].mxu1 }
 0x140   : > { %v7543_v38 = vpop.f32.mrb[35].mxu0  ;;  %v7599_v43 = vadd.f32 %v7598_v39, %v7597_v37  ;;  %v9461_v52 = vld [vmem:[#allocation2 + $0x30] ss:$0 sps:$4 sm:$0x11]   ;;  %v7601_v53 = vpop.f32.mrb[35].mxu1  ;;  %v2246_v1 = vsel %vm2208_vm3, %v2242_v48, %v2245_v50  ;;  %v2249_v25 = vor.u32 %v2247_v3, %v2245_v50 }
 0x141   : > { %1454 = vst.msk [vmem:[#allocation2 + $0x74] sm:$0xf] %vm663_vm1, %v7351_v33  ;;  %v1336_v40 = vadd.f32 %v7541_v34, %v9272_v60  ;;  %v7544_v41 = vadd.f32 %v7543_v38, %v7542_v35  ;;  %1848 = vst.msk [vmem:[#allocation2 + $0xac] sm:$0xf] %vm663_vm1, %v7365_v42  ;;  %v7602_v56 = vadd.f32 %v7601_v53, %v7600_v44  ;;  %v2250_v4 = vshll.u32 %v9461_v52, 16  ;;  %v7603_v6 = vpop.f32.mrb[36].mxu1 }
 0x142   : > { %v7604_v13 = vpop.f32.mrb[37].mxu1 }
 0x143   : > { %v1384_v54 = vmax.f32 %v1336_v40, 0.0  ;;  %v1339_v55 = vadd.f32 %v7544_v41, %v9272_v60  ;;  %v1733_v0 = vadd.f32 %v7602_v56, %v9430_v2  ;;  %v7605_v15 = vadd.f32 %v7604_v13, %v7603_v6  ;;  %v7606_v17 = vpop.f32.mrb[38].mxu1 }
 0x144   : > { %v7607_v21 = vpop.f32.mrb[39].mxu1  ;;  %v2252_v27 = vrot.slane %v2250_v4, 1 }
 0x145   : > { %7895 = vmatmul.mubr.msk.bf16.vlgmr.msra.gmra.mrb[64].mxu1 %vm1940_vm2, %v9313_v28  ;;  %7935 = vmatmul.mubr.msk.bf16.gmra.mrb[84].mxu0 %vm1940_vm2, %v2232_v57  ;;  %v8807_v28 = vld [vmem:[%s11106_s3 + $0x38] sm:$0xff]   ;;  %v7352_v57 = vpack.c.bf16 %v1384_v54, %v1384_v54  ;;  %v7545_v59 = vpop.f32.mrb[36].mxu0  ;;  %v1779_v12 = vmax.f32 %v1733_v0, 0.0  ;;  %v1738_v22 = vadd.f32 %v7605_v15, %v9430_v2  ;;  %v7608_v24 = vadd.f32 %v7607_v21, %v7606_v17 }
 0x146   : > { %7955 = vmatpush3.bf16.msra.mxu1 %v8803_v58  ;;  %7898 = vmatprep.mubr.msk.bf16.mxu1 %vm8948_vm0, %v8947_v47  ;;  %v1385_v58 = vmax.f32 %v1339_v55, 0.0  ;;  %v7546_v5 = vpop.f32.mrb[37].mxu0  ;;  %v2253_v40 = vsel %vm2208_vm3, %v2249_v25, %v2252_v27 }
 0x147   : > { %7938 = vmatprep.mubr.msk.bf16.mxu0 %vm8948_vm0, %v8947_v47  ;;  %7956 = vmatprep.subr.bf16.mxu1 %v8947_v47  ;;  %1455 = vst.msk [vmem:[#allocation2 + $0x78] sm:$0xf] %vm663_vm1, %v7352_v57  ;;  %v7547_v8 = vadd.f32 %v7546_v5, %v7545_v59  ;;  %v7548_v9 = vpop.f32.mrb[38].mxu0  ;;  %v7367_v20 = vpack.c.bf16 %v1779_v12, %v1779_v12  ;;  %v2254_v5 = vshrl.u32 %v9461_v52, 16 }
 0x148   : > { %v7353_v7 = vpack.c.bf16 %v1385_v58, %v1385_v58  ;;  %v7549_v14 = vpop.f32.mrb[39].mxu0 }
 0x149   : > { %v7550_v19 = vadd.f32 %v7549_v14, %v7548_v9  ;;  %1850 = vst.msk [vmem:[#allocation2 + $0xb4] sm:$0xf] %vm663_vm1, %v7367_v20  ;;  %v7609_v39 = vpop.f32.mrb[40].mxu1 }
 0x14a   : > { %7957 = vmatpush3.bf16.msra.mxu1 %v8807_v28  ;;  %1456 = vst.msk [vmem:[#allocation2 + $0x7c] sm:$0xf] %vm663_vm1, %v7353_v7  ;;  %v1344_v28 = vadd.f32 %v7547_v8, %v9272_v60  ;;  %v7610_v44 = vpop.f32.mrb[41].mxu1 }
 0x14b   : > { %8018 = vmatprep.subr.bf16.mxu1 %v8947_v47  ;;  %v1347_v31 = vadd.f32 %v7550_v19, %v9272_v60  ;;  %v7611_v53 = vadd.f32 %v7610_v44, %v7609_v39  ;;  %v7612_v54 = vpop.f32.mrb[42].mxu1  ;;  %v9512_v19 = vld [vmem:[%s11105_s2] ss:$0 sm:$0xff] }
 0x14c   : > { %v1386_v30 = vmax.f32 %v1344_v28, 0.0  ;;  %v7613_v56 = vpop.f32.mrb[43].mxu1  ;;  %v8819_v44 = vld [vmem:[%s11106_s3 + $0x60] sm:$0xff]  }
 0x14d   : > { %7899 = vmatmul.mubr.msk.bf16.gmra.mrb[68].mxu1 %vm1940_vm2, %v9330_v62  ;;  %7939 = vmatmul.mubr.msk.bf16.gmra.mrb[88].mxu0 %vm1940_vm2, %v2239_v32  ;;  %v1730_v62 = vadd.f32 %v7599_v43, %v9430_v2  ;;  %v1780_v32 = vmax.f32 %v1738_v22, 0.0  ;;  %v1387_v34 = vmax.f32 %v1347_v31, 0.0  ;;  %v7551_v35 = vpop.f32.mrb[40].mxu0  ;;  %v1746_v57 = vadd.f32 %v7611_v53, %v9430_v2 }
 0x14e   : > { %7902 = vmatprep.mubr.msk.bf16.mxu1 %vm8948_vm0, %v8947_v47  ;;  %7942 = vmatprep.mubr.msk.bf16.mxu0 %vm8948_vm0, %v8947_v47  ;;  %v7354_v33 = vpack.c.bf16 %v1386_v30, %v1386_v30  ;;  %v7552_v36 = vpop.f32.mrb[41].mxu0  ;;  %v7614_v58 = vadd.f32 %v7613_v56, %v7612_v54 }
 0x14f   : > { %v1778_v63 = vmax.f32 %v1730_v62, 0.0  ;;  %v7368_v37 = vpack.c.bf16 %v1780_v32, %v1780_v32  ;;  %v7355_v41 = vpack.c.bf16 %v1387_v34, %v1387_v34  ;;  %v7553_v42 = vadd.f32 %v7552_v36, %v7551_v35  ;;  %v7554_v43 = vpop.f32.mrb[42].mxu0  ;;  %v9526_v34 = vld [vmem:[#allocation2 + $0x70] sm:$0xff]  }
 0x150   : > { %1457 = vst.msk [vmem:[#allocation2 + $0x80] sm:$0xf] %vm663_vm1, %v7354_v33  ;;  %v7555_v48 = vpop.f32.mrb[43].mxu0  ;;  %v1782_v0 = vmax.f32 %v1746_v57, 0.0 }
 0x151   : > { %v7366_v11 = vpack.c.bf16 %v1778_v63, %v1778_v63  ;;  %1851 = vst.msk [vmem:[#allocation2 + $0xb8] sm:$0xf] %vm663_vm1, %v7368_v37  ;;  %1458 = vst.msk [vmem:[#allocation2 + $0x84] sm:$0xf] %vm663_vm1, %v7355_v41  ;;  %v1352_v55 = vadd.f32 %v7553_v42, %v9272_v60  ;;  %v7556_v62 = vadd.f32 %v7555_v48, %v7554_v43  ;;  %v7615_v9 = vpop.f32.mrb[44].mxu1 }
 0x152   : > { %v7370_v7 = vpack.c.bf16 %v1782_v0, %v1782_v0  ;;  %v7616_v14 = vpop.f32.mrb[45].mxu1 }
 0x153   : > { %1849 = vst.msk [vmem:[#allocation2 + $0xb0] sm:$0xf] %vm663_vm1, %v7366_v11  ;;  %v1388_v59 = vmax.f32 %v1352_v55, 0.0  ;;  %v1355_v63 = vadd.f32 %v7556_v62, %v9272_v60  ;;  %v7617_v17 = vadd.f32 %v7616_v14, %v7615_v9  ;;  %v7618_v28 = vpop.f32.mrb[46].mxu1 }
 0x154   : > { %1853 = vst.msk [vmem:[#allocation2 + $0xc0] sm:$0xf] %vm663_vm1, %v7370_v7  ;;  %v7619_v22 = vpop.f32.mrb[47].mxu1 }
 0x155   : > { %7903 = vmatmul.mubr.msk.bf16.gmra.mrb[72].mxu1 %vm1940_vm2, %v9357_v46  ;;  %7943 = vmatmul.mubr.msk.bf16.gmra.mrb[92].mxu0 %vm1940_vm2, %v2246_v1  ;;  %v1741_v46 = vadd.f32 %v7608_v24, %v9430_v2  ;;  %v1749_v1 = vadd.f32 %v7614_v58, %v9430_v2  ;;  %v1389_v3 = vmax.f32 %v1355_v63, 0.0  ;;  %v7557_v4 = vpop.f32.mrb[44].mxu0  ;;  %v1754_v24 = vadd.f32 %v7617_v17, %v9430_v2 }
 0x156   : > { %7906 = vmatprep.mubr.msk.bf16.mxu1 %vm8948_vm0, %v8947_v47  ;;  %7946 = vmatprep.mubr.msk.bf16.mxu0 %vm8948_vm0, %v8947_v47  ;;  %v7558_v6 = vpop.f32.mrb[45].mxu0  ;;  %v7620_v25 = vadd.f32 %v7619_v22, %v7618_v28 }
 0x157   : > { %v1781_v38 = vmax.f32 %v1741_v46, 0.0  ;;  %v1783_v8 = vmax.f32 %v1749_v1, 0.0  ;;  %v7357_v11 = vpack.c.bf16 %v1389_v3, %v1389_v3  ;;  %v7559_v12 = vadd.f32 %v7558_v6, %v7557_v4  ;;  %v7560_v13 = vpop.f32.mrb[46].mxu0  ;;  %v9551_v4 = vld [vmem:[#allocation2 + $0x78] sm:$0xff]  }
 0x158   : > { %v7561_v15 = vpop.f32.mrb[47].mxu0  ;;  %v1784_v31 = vmax.f32 %v1754_v24, 0.0  ;;  %v1757_v32 = vadd.f32 %v7620_v25, %v9430_v2 }
 0x159   : > { %v7369_v50 = vpack.c.bf16 %v1781_v38, %v1781_v38  ;;  %v7371_v60 = vpack.c.bf16 %v1783_v8, %v1783_v8  ;;  %1460 = vst.msk [vmem:[#allocation2 + $0x8c] sm:$0xf] %vm663_vm1, %v7357_v11  ;;  %v1360_v20 = vadd.f32 %v9512_v19, %v7559_v12  ;;  %v7562_v21 = vadd.f32 %v7561_v15, %v7560_v13  ;;  %v7621_v38 = vpop.f32.mrb[48].mxu1 }
 0x15a   : > { %v7372_v36 = vpack.c.bf16 %v1784_v31, %v1784_v31  ;;  %v1785_v37 = vmax.f32 %v1757_v32, 0.0  ;;  %v7622_v42 = vpop.f32.mrb[49].mxu1 }
 0x15b   : > { %1852 = vst.msk [vmem:[#allocation2 + $0xbc] sm:$0xf] %vm663_vm1, %v7369_v50  ;;  %1854 = vst.msk [vmem:[#allocation2 + $0xc4] sm:$0xf] %vm663_vm1, %v7371_v60  ;;  %v1390_v27 = vmax.f32 %v1360_v20, 0.0  ;;  %v1363_v30 = vadd.f32 %v9512_v19, %v7562_v21  ;;  %v7623_v50 = vadd.f32 %v7622_v42, %v7621_v38  ;;  %v7624_v53 = vpop.f32.mrb[50].mxu1 }
 0x15c   : > { %1855 = vst.msk [vmem:[#allocation2 + $0xc8] sm:$0xf] %vm663_vm1, %v7372_v36  ;;  %v7373_v48 = vpack.c.bf16 %v1785_v37, %v1785_v37  ;;  %v7625_v62 = vpop.f32.mrb[51].mxu1 }
 0x15d   : > { %7907 = vmatmul.mubr.msk.bf16.gmra.mrb[76].mxu1 %vm1940_vm2, %v9384_v16  ;;  %7947 = vmatmul.mubr.msk.bf16.gmra.mrb[96].mxu0 %vm1940_vm2, %v2253_v40  ;;  %v7356_v16 = vpack.c.bf16 %v1388_v59, %v1388_v59  ;;  %v1391_v46 = vmax.f32 %v1363_v30, 0.0  ;;  %v7563_v33 = vpop.f32.mrb[48].mxu0  ;;  %v1762_v56 = vadd.f32 %v7623_v50, %v9430_v2  ;;  %v7626_v57 = vadd.f32 %v7625_v62, %v7624_v53  ;;  %v8829_v53 = vld [vmem:[%s11106_s3 + $0x88] sm:$0xff]  }
 0x15e   : > { %7910 = vmatprep.mubr.msk.bf16.mxu1 %vm8948_vm0, %v8947_v47  ;;  %7950 = vmatprep.mubr.msk.bf16.mxu0 %vm8948_vm0, %v8947_v47  ;;  %v7564_v35 = vpop.f32.mrb[49].mxu0  ;;  %1856 = vst.msk [vmem:[#allocation2 + $0xcc] sm:$0xf] %vm663_vm1, %v7373_v48  ;;  %v2439_v62 = vshrl.u32 %v9393_v26, 16  ;;  %v8822_v26 = vld [vmem:[%s11106_s3 + $0x70] sm:$0xff]  }
 0x15f   : > { %1459 = vst.msk [vmem:[#allocation2 + $0x88] sm:$0xf] %vm663_vm1, %v7356_v16  ;;  %v7359_v39 = vpack.c.bf16 %v1391_v46, %v1391_v46  ;;  %v7565_v40 = vadd.f32 %v7564_v35, %v7563_v33  ;;  %v7566_v41 = vpop.f32.mrb[50].mxu0  ;;  %v1786_v63 = vmax.f32 %v1762_v56, 0.0  ;;  %v1765_v0 = vadd.f32 %v7626_v57, %v9430_v2  ;;  %v8813_v35 = vld [vmem:[%s11106_s3 + $0x50] sm:$0xff]  }
 0x160   : > { %v7567_v43 = vpop.f32.mrb[51].mxu0 }
 0x161   : > { %1462 = vst.msk [vmem:[#allocation2 + $0x94] sm:$0xf] %vm663_vm1, %v7359_v39  ;;  %v1368_v54 = vadd.f32 %v9512_v19, %v7565_v40  ;;  %v7568_v55 = vadd.f32 %v7567_v43, %v7566_v41  ;;  %v7374_v6 = vpack.c.bf16 %v1786_v63, %v1786_v63  ;;  %v1787_v7 = vmax.f32 %v1765_v0, 0.0  ;;  %v7627_v8 = vpop.f32.mrb[52].mxu1  ;;  %v9669_v63 = vld [vmem:[#allocation2 + $0xa8] sm:$0xff]  }
 0x162   : > { %v7628_v12 = vpop.f32.mrb[53].mxu1  ;;  %v2953_v39 = vshll.u32 %v9551_v4, 16  ;;  %v2947_v40 = vshrl.u32 %v9526_v34, 16 }
 0x163   : > { %v1392_v58 = vmax.f32 %v1368_v54, 0.0  ;;  %v1371_v59 = vadd.f32 %v9512_v19, %v7568_v55  ;;  %1857 = vst.msk [vmem:[#allocation2 + $0xd0] sm:$0xf] %vm663_vm1, %v7374_v6  ;;  %v7375_v14 = vpack.c.bf16 %v1787_v7, %v1787_v7  ;;  %v7629_v15 = vadd.f32 %v7628_v12, %v7627_v8  ;;  %v7630_v17 = vpop.f32.mrb[54].mxu1  ;;  %v9685_v6 = vld [vmem:[#allocation2 + $0xb0] sm:$0xff]  }
 0x164   : > { %v7631_v21 = vpop.f32.mrb[55].mxu1 }
 0x165   : > { %7911 = vmatmul.mubr.msk.bf16.gmra.mrb[80].mxu1 %vm1940_vm2, %v9413_v45  ;;  %7951 = vmatmul.mubr.msk.bf16.gmra.mrb[100].mxu0 %vm1940_vm2, %v2254_v5  ;;  %v7358_v45 = vpack.c.bf16 %v1390_v27, %v1390_v27  ;;  %v7360_v1 = vpack.c.bf16 %v1392_v58, %v1392_v58  ;;  %v1393_v16 = vmax.f32 %v1371_v59, 0.0  ;;  %v7569_v3 = vpop.f32.mrb[52].mxu0  ;;  %1858 = vst.msk [vmem:[#allocation2 + $0xd4] sm:$0xf] %vm663_vm1, %v7375_v14 }
 0x166   : > { %7914 = vmatprep.mubr.msk.bf16.mxu1 %vm8948_vm0, %v8947_v47  ;;  %7990 = vmatprep.mubr.msk.bf16.mxu0 %vm8948_vm0, %v8947_v47  ;;  %v7570_v5 = vpop.f32.mrb[53].mxu0  ;;  %v1770_v22 = vadd.f32 %v7629_v15, %v9430_v2  ;;  %v7632_v24 = vadd.f32 %v7631_v21, %v7630_v17  ;;  %v9707_v17 = vld [vmem:[#allocation2 + $0x8] sm:$0xf] }
 0x167   : > { %1461 = vst.msk [vmem:[#allocation2 + $0x90] sm:$0xf] %vm663_vm1, %v7358_v45  ;;  %1463 = vst.msk [vmem:[#allocation2 + $0x98] sm:$0xf] %vm663_vm1, %v7360_v1  ;;  %v7361_v9 = vpack.c.bf16 %v1393_v16, %v1393_v16  ;;  %v7571_v11 = vadd.f32 %v7570_v5, %v7569_v3  ;;  %v7572_v13 = vpop.f32.mrb[54].mxu0  ;;  %v9570_v45 = vld [vmem:[#allocation2 + $0x80] sm:$0xff]  }
 0x168   : > { %v7573_v60 = vpop.f32.mrb[55].mxu0  ;;  %v1788_v30 = vmax.f32 %v1770_v22, 0.0  ;;  %v8826_v16 = vld [vmem:[%s11106_s3 + $0x78] sm:$0xff]   ;;  %v9713_v22 = vld [vmem:[#allocation2 + $0xc] sm:$0xff]  }
 0x169   : > { %1464 = vst.msk [vmem:[#allocation2 + $0x9c] sm:$0xf] %vm663_vm1, %v7361_v9  ;;  %v1376_v28 = vadd.f32 %v9512_v19, %v7571_v11  ;;  %v7574_v20 = vadd.f32 %v7573_v60, %v7572_v13  ;;  %v9698_v13 = vld [vmem:[#allocation2 + $0xb8] sm:$0xff]   ;;  %v3313_v60 = vld [vmem:[#allocation2 + $0x4] sm:$0xe] }
 0x16a   : > { %v7376_v46 = vpack.c.bf16 %v1788_v30, %v1788_v30  ;;  %v7081_v21 = vcombine.low %v3313_v60, %v9707_v17  ;;  %v3376_v30 = vshll.u32 %v9713_v22, 16  ;;  %v8840_v60 = vld [vmem:[%s11106_s3 + $0x98] sm:$0xff]  }
 0x16b   : > { %v1394_v25 = vmax.f32 %v1376_v28, 0.0  ;;  %v1379_v27 = vadd.f32 %v9512_v19, %v7574_v20  ;;  %v9591_v19 = vld [vmem:[#allocation2 + $0x88] sm:$0xff]   ;;  %v9710_v20 = vld [vmem:[#allocation2 + $0xc0] sm:$0xff]  }
 0x16c   : > { %1859 = vst.msk [vmem:[#allocation2 + $0xd8] sm:$0xf] %vm663_vm1, %v7376_v46  ;;  %v2967_v55 = vshll.u32 %v9591_v19, 16  ;;  %v2971_v59 = vshrl.u32 %v9591_v19, 16 }
 0x16d   : > { %7915 = vmatmul.mubr.msk.bf16.gmra.mrb[84].mxu1 %vm1940_vm2, %v9437_v10  ;;  %7991 = vmatmul.mubr.msk.bf16.vlgmr.msra.gmra.mrb[104].mxu0 %vm1940_vm2, %v9526_v34  ;;  %v8820_v10 = vld [vmem:[%s11106_s3 + $0x68] sm:$0xff]   ;;  %v7362_v31 = vpack.c.bf16 %v1394_v25, %v1394_v25  ;;  %v1395_v32 = vmax.f32 %v1379_v27, 0.0  ;;  %v3368_v25 = vshll.u32 %v7081_v21, 16  ;;  %v3373_v27 = vshrl.u32 %v9713_v22, 16 }
 0x16e   : > { %7918 = vmatprep.mubr.msk.bf16.mxu1 %vm8948_vm0, %v8947_v47  ;;  %7994 = vmatprep.mubr.msk.bf16.mxu0 %vm8948_vm0, %v8947_v47  ;;  %v2969_v57 = vrot.slane %v2967_v55, 1  ;;  %v9766_v55 = vld [vmem:[#allocation2 + $0x24] sm:$0xff]  }
 0x16f   : > { %8051 = vmatpush3.bf16.msra.mxu0 %v8819_v44  ;;  %1465 = vst.msk [vmem:[#allocation2 + $0xa0] sm:$0xf] %vm663_vm1, %v7362_v31  ;;  %v7363_v36 = vpack.c.bf16 %v1395_v32, %v1395_v32  ;;  %v2957_v44 = vshrl.u32 %v9551_v4, 16  ;;  %v9725_v31 = vld [vmem:[#allocation2 + $0xc8] sm:$0xff]   ;;  %v3375_v46 = vrot.slane %v3373_v27, 1 }
 0x170   : > { %8052 = vmatprep.subr.bf16.mxu0 %v8947_v47  ;;  %v2973_v0 = vor.u32 %v2971_v59, %v2969_v57  ;;  %v3400_v59 = vshrl.u32 %v9766_v55, 16 }
 0x171   : > { %1466 = vst.msk [vmem:[#allocation2 + $0xa4] sm:$0x7] %vm677_vm4, %v7363_v36 }
 0x173   : > { %8053 = vmatpush3.bf16.msra.mxu0 %v8820_v10 }
 0x174   : > { %8114 = vmatprep.subr.bf16.mxu0 %v8947_v47 }
 0x175   : > { %7919 = vmatmul.mubr.msk.bf16.gmra.mrb[88].mxu1 %vm1940_vm2, %v9461_v52  ;;  %7995 = vmatmul.mubr.msk.bf16.gmra.mrb[108].mxu0 %vm1940_vm2, %v9551_v4  ;;  %v1773_v52 = vadd.f32 %v7632_v24, %v9430_v2  ;;  %v8817_v2 = vld [vmem:[%s11106_s3 + $0x58] sm:$0xff]   ;;  %v3365_v24 = vshrl.u32 %v7081_v21, 16 }
 0x176   : > { %7958 = vmatprep.mubr.msk.bf16.mxu1 %vm8948_vm0, %v8947_v47  ;;  %7998 = vmatprep.mubr.msk.bf16.mxu0 %vm8948_vm0, %v8947_v47  ;;  %v9623_v38 = vld [vmem:[#allocation2 + $0xa0] ss:$0 sps:$4 sm:$0x11]  }
 0x177   : > { %v1789_v33 = vmax.f32 %v1773_v52, 0.0  ;;  %v2988_v12 = vshll.u32 %v9623_v38, 16  ;;  %v2992_v52 = vshrl.u32 %v9623_v38, 16  ;;  %v3367_v32 = vrot.slane %v3365_v24, 1 }
 0x179   : > { %v7377_v37 = vpack.c.bf16 %v1789_v33, %v1789_v33  ;;  %v2990_v15 = vrot.slane %v2988_v12, 1  ;;  %v3378_v33 = vrot.slane %v3376_v30, 2  ;;  %v3142_v12 = vshrl.u32 %v9685_v6, 16 }
 0x17b   : > { %1860 = vst.msk [vmem:[#allocation2 + $0xdc] sm:$0x7] %vm677_vm4, %v7377_v37  ;;  %v3379_v37 = vor.u32 %v3378_v33, %v3375_v46  ;;  %v8839_v33 = vld [vmem:[#allocation2 + $0x34] ss:$0 sps:$4 sm:$0x33]   ;;  %vm6628_vm4 = vcmask 519171  }
 0x17d   : > { %7959 = vmatmul.mubr.msk.bf16.vlgmr.msra.gmra.mrb[92].mxu1 %vm1940_vm2, %v9309_v18  ;;  %7999 = vmatmul.mubr.msk.bf16.gmra.mrb[112].mxu0 %vm1940_vm2, %v9570_v45  ;;  %v9602_v18 = vld [vmem:[#allocation2 + $0x90] sm:$0xff]  }
 0x17e   : > { %8019 = vmatpush3.bf16.msra.mxu1 %v8813_v35  ;;  %7962 = vmatprep.mubr.msk.bf16.mxu1 %vm8948_vm0, %v8947_v47  ;;  %v2974_v10 = vshll.u32 %v9602_v18, 16  ;;  %v2978_v4 = vshrl.u32 %v9602_v18, 16  ;;  %v9727_v35 = vld [vmem:[#allocation2 + $0x14] sm:$0xff]  }
 0x17f   : > { %8002 = vmatprep.mubr.msk.bf16.mxu0 %vm8948_vm0, %v8947_v47  ;;  %8020 = vmatprep.subr.bf16.mxu1 %v8947_v47 }
 0x180   : > { %v2976_v1 = vrot.slane %v2974_v10, 1 }
 0x182   : > { %8021 = vmatpush3.bf16.msra.mxu1 %v8817_v2  ;;  %v2977_v3 = vsel %vm2208_vm3, %v2973_v0, %v2976_v1  ;;  %v2980_v7 = vor.u32 %v2978_v4, %v2976_v1  ;;  %v3382_v2 = vshrl.u32 %v9727_v35, 16  ;;  %v3403_v1 = vshll.u32 %v9766_v55, 16  ;;  %v8836_v4 = vld [vmem:[%s11106_s3 + $0x90] sm:$0xff]  }
 0x183   : > { %8082 = vmatprep.subr.bf16.mxu1 %v8947_v47 }
 0x185   : > { %7963 = vmatmul.mubr.msk.bf16.gmra.mrb[96].mxu1 %vm1940_vm2, %v9326_v51  ;;  %8003 = vmatmul.mubr.msk.bf16.gmra.mrb[116].mxu0 %vm1940_vm2, %v9591_v19  ;;  %v9612_v51 = vld [vmem:[#allocation2 + $0x98] sm:$0xff]   ;;  %v3385_v19 = vshll.u32 %v9727_v35, 16 }
 0x186   : > { %7966 = vmatprep.mubr.msk.bf16.mxu1 %vm8948_vm0, %v8947_v47  ;;  %8006 = vmatprep.mubr.msk.bf16.mxu0 %vm8948_vm0, %v8947_v47  ;;  %v2981_v5 = vshll.u32 %v9612_v51, 16  ;;  %v2985_v11 = vshrl.u32 %v9612_v51, 16 }
 0x188   : > { %v2983_v8 = vrot.slane %v2981_v5, 1 }
 0x18a   : > { %v2984_v9 = vsel %vm2208_vm3, %v2980_v7, %v2983_v8  ;;  %v2987_v14 = vor.u32 %v2985_v11, %v2983_v8  ;;  %v3402_v8 = vrot.slane %v3400_v59, 1 }
 0x18c   : > { %v2991_v28 = vsel %vm2208_vm3, %v2987_v14, %v2990_v15  ;;  %v3145_v14 = vshll.u32 %v9698_v13, 16  ;;  %v3405_v15 = vrot.slane %v3403_v1, 2 }
 0x18d   : > { %7967 = vmatmul.mubr.msk.bf16.gmra.mrb[100].mxu1 %vm1940_vm2, %v9344_v23  ;;  %8007 = vmatmul.mubr.msk.bf16.gmra.mrb[120].mxu0 %vm1940_vm2, %v9602_v18  ;;  %v2949_v23 = vshll.u32 %v9526_v34, 16  ;;  %v2960_v34 = vshll.u32 %v9570_v45, 16  ;;  %v9738_v18 = vld [vmem:[#allocation2 + $0x1c] sm:$0xff]  }
 0x18e   : > { %7970 = vmatprep.mubr.msk.bf16.mxu1 %vm8948_vm0, %v8947_v47  ;;  %8010 = vmatprep.mubr.msk.bf16.mxu0 %vm8948_vm0, %v8947_v47  ;;  %v3406_v27 = vor.u32 %v3405_v15, %v3402_v8 }
 0x18f   : > { %v2951_v41 = vrot.slane %v2949_v23, 1  ;;  %v2962_v50 = vrot.slane %v2960_v34, 1  ;;  %v8841_v23 = vld [vmem:[%s11106_s3 + $0xa0] sm:$0xff]   ;;  %v3134_v34 = vshll.u32 %v9669_v63, 16 }
 0x191   : > { %v2952_v42 = vor.u32 %v2951_v41, %v2947_v40  ;;  %v3387_v40 = vrot.slane %v3385_v19, 2  ;;  %v3391_v41 = vshrl.u32 %v9738_v18, 16  ;;  %v3152_v19 = vshll.u32 %v9710_v20, 16 }
 0x195   : > { %7971 = vmatmul.mubr.msk.bf16.gmra.mrb[104].mxu1 %vm1940_vm2, %v9365_v61  ;;  %8011 = vmatmul.mubr.msk.bf16.gmra.mrb[124].mxu0 %vm1940_vm2, %v9612_v51  ;;  %v2955_v61 = vrot.slane %v2953_v39, 1  ;;  %v9740_v51 = vld [vmem:[#allocation2 + $0xd0] sm:$0xff]   ;;  %v3384_v39 = vrot.slane %v3382_v2, 1  ;;  %v3149_v2 = vshrl.u32 %v9698_v13, 16 }
 0x196   : > { %7974 = vmatprep.mubr.msk.bf16.mxu1 %vm8948_vm0, %v8947_v47  ;;  %8014 = vmatprep.mubr.msk.bf16.mxu0 %vm8948_vm0, %v8947_v47 }
 0x197   : > { %v2956_v43 = vsel %vm2208_vm3, %v2952_v42, %v2955_v61  ;;  %v2959_v48 = vor.u32 %v2957_v44, %v2955_v61  ;;  %v3394_v61 = vshll.u32 %v9738_v18, 16  ;;  %v8842_v42 = vld [vmem:[%s11106_s3 + $0xa8] sm:$0xff]   ;;  %v3388_v44 = vor.u32 %v3387_v40, %v3384_v39 }
 0x199   : > { %v2963_v54 = vsel %vm2208_vm3, %v2959_v48, %v2962_v50 }
 0x19d   : > { %7975 = vmatmul.mubr.msk.bf16.gmra.mrb[108].mxu1 %vm1940_vm2, %v9397_v29  ;;  %8015 = vmatmul.mubr.msk.bf16.gmra.mrb[128].mxu0 %vm1940_vm2, %v9623_v38  ;;  %v8828_v29 = vld [vmem:[%s11106_s3 + $0x80] sm:$0xff]  }
 0x19e   : > { %7978 = vmatprep.mubr.msk.bf16.mxu1 %vm8948_vm0, %v8947_v47  ;;  %8054 = vmatprep.mubr.msk.bf16.mxu0 %vm8948_vm0, %v8947_v47 }
 0x1a5   : > { %7979 = vmatmul.mubr.msk.bf16.gmra.mrb[112].mxu1 %vm1940_vm2, %v9418_v49  ;;  %8055 = vmatmul.mubr.msk.bf16.vlgmr.msra.gmra.mrb[132].mxu0 %vm1940_vm2, %v2956_v43  ;;  %v2964_v49 = vshrl.u32 %v9570_v45, 16  ;;  %v3370_v45 = vrot.slane %v3368_v25, 2  ;;  %v3147_v25 = vrot.slane %v3145_v14, 1  ;;  %v3806_v14 = vld [vmem:[#allocation2 + $0x4] sm:$0xc] }
 0x1a6   : > { %7982 = vmatprep.mubr.msk.bf16.mxu1 %vm8948_vm0, %v8947_v47  ;;  %8058 = vmatprep.mubr.msk.bf16.mxu0 %vm8948_vm0, %v8947_v47 }
 0x1a7   : > { %8115 = vmatpush3.bf16.msra.mxu0 %v8828_v29  ;;  %v2966_v56 = vor.u32 %v2964_v49, %v2962_v50  ;;  %v3371_v36 = vor.u32 %v3370_v45, %v3367_v32  ;;  %v3393_v50 = vrot.slane %v3391_v41, 1  ;;  %v3396_v49 = vrot.slane %v3394_v61, 2 }
 0x1a8   : > { %8116 = vmatprep.subr.bf16.mxu0 %v8947_v47  ;;  %v3151_v40 = vor.u32 %v3149_v2, %v3147_v25  ;;  %v3154_v41 = vrot.slane %v3152_v19, 1  ;;  %v3421_v61 = vshll.u32 %v8839_v33, 16 }
 0x1a9   : > { %v2970_v58 = vsel %vm2208_vm3, %v2966_v56, %v2969_v57  ;;  %v3380_v38 = vsel %vm3363_vm5, %v3371_v36, %v3379_v37  ;;  %v3389_v56 = vsel %vm3363_vm5, %v3379_v37, %v3388_v44  ;;  %v3132_v57 = vshrl.u32 %v9669_v63, 16 }
 0x1ab   : > { %8117 = vmatpush3.bf16.msra.mxu0 %v8829_v53 }
 0x1ac   : > { %8178 = vmatprep.subr.bf16.mxu0 %v8947_v47 }
 0x1ad   : > { %7983 = vmatmul.mubr.msk.bf16.gmra.mrb[116].mxu1 %vm1940_vm2, %v2439_v62  ;;  %8059 = vmatmul.mubr.msk.bf16.gmra.mrb[136].mxu0 %vm1940_vm2, %v2963_v54  ;;  %v9764_v54 = vld [vmem:[#allocation2 + $0xd8] ss:$0 sps:$4 sm:$0x11]   ;;  %v3138_v62 = vshll.u32 %v9685_v6, 16 }
 0x1ae   : > { %8022 = vmatprep.mubr.msk.bf16.mxu1 %vm8948_vm0, %v8947_v47  ;;  %8062 = vmatprep.mubr.msk.bf16.mxu0 %vm8948_vm0, %v8947_v47 }
 0x1af   : > { %v3140_v10 = vrot.slane %v3138_v62, 1  ;;  %v3423_v62 = vrot.slane %v3421_v61, 2 }
 0x1b1   : > { %v3144_v24 = vor.u32 %v3142_v12, %v3140_v10 }
 0x1b3   : > { %v3148_v36 = vsel %vm2208_vm3, %v3144_v24, %v3147_v25  ;;  %v3170_v25 = vshrl.u32 %v9740_v51, 16 }
 0x1b5   : > { %8023 = vmatmul.mubr.msk.bf16.vlgmr.msra.gmra.mrb[120].mxu1 %vm1940_vm2, %v9669_v63  ;;  %8063 = vmatmul.mubr.msk.bf16.gmra.mrb[140].mxu0 %vm1940_vm2, %v2970_v58  ;;  %v3136_v58 = vrot.slane %v3134_v34, 1 }
 0x1b6   : > { %8083 = vmatpush3.bf16.msra.mxu1 %v8822_v26  ;;  %8026 = vmatprep.mubr.msk.bf16.mxu1 %vm8948_vm0, %v8947_v47  ;;  %v3397_v26 = vor.u32 %v3396_v49, %v3393_v50  ;;  %v3155_v50 = vsel %vm2208_vm3, %v3151_v40, %v3154_v41  ;;  %v3159_v49 = vshll.u32 %v9725_v31, 16  ;;  %v9872_v40 = vld [vmem:[#allocation2 + $0x40] sm:$0xf] }
 0x1b7   : > { %8066 = vmatprep.mubr.msk.bf16.mxu0 %vm8948_vm0, %v8947_v47  ;;  %8084 = vmatprep.subr.bf16.mxu1 %v8947_v47  ;;  %v3137_v63 = vor.u32 %v3136_v58, %v3132_v57 }
 0x1b8   : > { %v3398_v7 = vsel %vm3363_vm5, %v3388_v44, %v3397_v26  ;;  %v3407_v37 = vsel %vm3363_vm5, %v3397_v26, %v3406_v27  ;;  %v3161_v58 = vrot.slane %v3159_v49, 1 }
 0x1b9   : > { %v3141_v11 = vsel %vm2208_vm3, %v3137_v63, %v3140_v10 }
 0x1ba   : > { %8085 = vmatpush3.bf16.msra.mxu1 %v8826_v16 }
 0x1bb   : > { %8146 = vmatprep.subr.bf16.mxu1 %v8947_v47 }
 0x1bd   : > { %8027 = vmatmul.mubr.msk.bf16.gmra.mrb[124].mxu1 %vm1940_vm2, %v9685_v6  ;;  %8067 = vmatmul.mubr.msk.bf16.gmra.mrb[144].mxu0 %vm1940_vm2, %v2977_v3 }
 0x1be   : > { %8030 = vmatprep.mubr.msk.bf16.mxu1 %vm8948_vm0, %v8947_v47  ;;  %8070 = vmatprep.mubr.msk.bf16.mxu0 %vm8948_vm0, %v8947_v47 }
 0x1c5   : > { %8031 = vmatmul.mubr.msk.bf16.gmra.mrb[128].mxu1 %vm1940_vm2, %v9698_v13  ;;  %8071 = vmatmul.mubr.msk.bf16.gmra.mrb[148].mxu0 %vm1940_vm2, %v2984_v9  ;;  %v9789_v9 = vld [vmem:[#allocation2 + $0x2c] sm:$0xff]  }
 0x1c6   : > { %8034 = vmatprep.mubr.msk.bf16.mxu1 %vm8948_vm0, %v8947_v47  ;;  %8074 = vmatprep.mubr.msk.bf16.mxu0 %vm8948_vm0, %v8947_v47  ;;  %v3409_v6 = vshrl.u32 %v9789_v9, 16 }
 0x1c8   : > { %v3411_v45 = vrot.slane %v3409_v6, 1 }
 0x1cd   : > { %8035 = vmatmul.mubr.msk.bf16.gmra.mrb[132].mxu1 %vm1940_vm2, %v9710_v20  ;;  %8075 = vmatmul.mubr.msk.bf16.gmra.mrb[152].mxu0 %vm1940_vm2, %v2991_v28  ;;  %v3412_v28 = vshll.u32 %v9789_v9, 16 }
 0x1ce   : > { %8038 = vmatprep.mubr.msk.bf16.mxu1 %vm8948_vm0, %v8947_v47  ;;  %8078 = vmatprep.mubr.msk.bf16.mxu0 %vm8948_vm0, %v8947_v47 }
 0x1cf   : > { %v3414_v46 = vrot.slane %v3412_v28, 2 }
 0x1d5   : > { %8039 = vmatmul.mubr.msk.bf16.gmra.mrb[136].mxu1 %vm1940_vm2, %v9725_v31  ;;  %8079 = vmatmul.mubr.msk.bf16.gmra.mrb[156].mxu0 %vm1940_vm2, %v2992_v52 }
 0x1d6   : > { %8042 = vmatprep.mubr.msk.bf16.mxu1 %vm8948_vm0, %v8947_v47  ;;  %8118 = vmatprep.mubr.msk.bf16.mxu0 %vm8948_vm0, %v8947_v47 }
 0x1dd   : > { %8043 = vmatmul.mubr.msk.bf16.gmra.mrb[140].mxu1 %vm1940_vm2, %v9740_v51  ;;  %8119 = vmatmul.mubr.msk.bf16.vlgmr.msra.gmra.mrb[160].mxu0 %vm1940_vm2, %v3380_v38  ;;  %v3418_v38 = vshrl.u32 %v8839_v33, 16 }
 0x1de   : > { %8046 = vmatprep.mubr.msk.bf16.mxu1 %vm8948_vm0, %v8947_v47  ;;  %8122 = vmatprep.mubr.msk.bf16.mxu0 %vm8948_vm0, %v8947_v47 }
 0x1df   : > { %8179 = vmatpush3.bf16.msra.mxu0 %v8841_v23  ;;  %v3415_v23 = vor.u32 %v3414_v46, %v3411_v45 }
 0x1e0   : > { %v9758_v43 = vpop.f32.mrb[56].mxu0  ;;  %8180 = vmatprep.subr.bf16.mxu0 %v8947_v47 }
 0x1e1   : > { %v7864_v29 = vpop.f32.mrb[57].mxu0  ;;  %v3416_v34 = vsel %vm3363_vm5, %v3406_v27, %v3415_v23  ;;  %v3173_v27 = vshll.u32 %v9764_v54, 16 }
 0x1e2   : > { %v9762_v48 = vpop.f32.mrb[58].mxu0  ;;  %v3420_v29 = vrot.slane %v3418_v38, 1 }
 0x1e3   : > { %v7865_v53 = vpop.f32.mrb[59].mxu0  ;;  %8181 = vmatpush3.bf16.msra.mxu0 %v8842_v42  ;;  %v3175_v46 = vrot.slane %v3173_v27, 1 }
 0x1e4   : > { %8242 = vmatprep.subr.bf16.mxu0 %v8947_v47  ;;  %v3156_v53 = vshrl.u32 %v9710_v20, 16  ;;  %v3424_v26 = vor.u32 %v3423_v62, %v3420_v29 }
 0x1e5   : > { %8047 = vmatmul.mubr.msk.bf16.gmra.mrb[144].mxu1 %vm1940_vm2, %v9764_v54  ;;  %8123 = vmatmul.mubr.msk.bf16.gmra.mrb[164].mxu0 %vm1940_vm2, %v3389_v56 }
 0x1e6   : > { %8086 = vmatprep.mubr.msk.bf16.mxu1 %vm8948_vm0, %v8947_v47  ;;  %8126 = vmatprep.mubr.msk.bf16.mxu0 %vm8948_vm0, %v8947_v47  ;;  %v3158_v57 = vor.u32 %v3156_v53, %v3154_v41  ;;  %v3425_v1 = vsel %vm3363_vm5, %v3415_v23, %v3424_v26  ;;  %v8853_v41 = vld [vmem:[%s11106_s3 + $0xc0] sm:$0xff]   ;;  %v3822_v53 = vrot.slane %v9727_v35, 2 }
 0x1e8   : > { %v9780_v0 = vpop.f32.mrb[60].mxu0  ;;  %v3162_v63 = vsel %vm2208_vm3, %v3158_v57, %v3161_v58 }
 0x1e9   : > { %v7868_v16 = vpop.f32.mrb[61].mxu0 }
 0x1ea   : > { %v9783_v3 = vpop.f32.mrb[62].mxu0  ;;  %v3163_v16 = vshrl.u32 %v9725_v31, 16 }
 0x1eb   : > { %v7869_v5 = vpop.f32.mrb[63].mxu0 }
 0x1ed   : > { %8087 = vmatmul.mubr.msk.bf16.vlgmr.msra.gmra.mrb[148].mxu1 %vm1940_vm2, %v3141_v11  ;;  %8127 = vmatmul.mubr.msk.bf16.gmra.mrb[168].mxu0 %vm1940_vm2, %v3398_v7  ;;  %v3165_v7 = vor.u32 %v3163_v16, %v3161_v58 }
 0x1ee   : > { %8147 = vmatpush3.bf16.msra.mxu1 %v8836_v4  ;;  %8090 = vmatprep.mubr.msk.bf16.mxu1 %vm8948_vm0, %v8947_v47  ;;  %v3166_v4 = vshll.u32 %v9740_v51, 16  ;;  %v3820_v51 = vrot.slane %v9713_v22, 2 }
 0x1ef   : > { %8130 = vmatprep.mubr.msk.bf16.mxu0 %vm8948_vm0, %v8947_v47  ;;  %8148 = vmatprep.subr.bf16.mxu1 %v8947_v47 }
 0x1f0   : > { %v9806_v21 = vpop.f32.mrb[64].mxu0  ;;  %v3168_v8 = vrot.slane %v3166_v4, 1 }
 0x1f1   : > { %v7872_v30 = vpop.f32.mrb[65].mxu0 }
 0x1f2   : > { %v9808_v52 = vpop.f32.mrb[66].mxu0  ;;  %8149 = vmatpush3.bf16.msra.mxu1 %v8840_v60  ;;  %v3169_v24 = vsel %vm2208_vm3, %v3165_v7, %v3168_v8  ;;  %v7113_v30 = vcombine.low %v3806_v14, %v9707_v17  ;;  %v3172_v45 = vor.u32 %v3170_v25, %v3168_v8  ;;  %v3177_v7 = vshrl.u32 %v9764_v54, 16 }
 0x1f3   : > { %v7873_v32 = vpop.f32.mrb[67].mxu0  ;;  %8210 = vmatprep.subr.bf16.mxu1 %v8947_v47  ;;  %v3823_v14 = vsel %vm3818_vm6, %v3820_v51, %v3822_v53  ;;  %v3824_v25 = vrot.slane %v9738_v18, 2 }
 0x1f4   : > { %v3819_v33 = vrot.slane %v7113_v30, 2  ;;  %v3176_v61 = vsel %vm2208_vm3, %v3172_v45, %v3175_v46 }
 0x1f5   : > { %8091 = vmatmul.mubr.msk.bf16.gmra.mrb[152].mxu1 %vm1940_vm2, %v3148_v36  ;;  %8131 = vmatmul.mubr.msk.bf16.gmra.mrb[172].mxu0 %vm1940_vm2, %v3407_v37 }
 0x1f6   : > { %8094 = vmatprep.mubr.msk.bf16.mxu1 %vm8948_vm0, %v8947_v47  ;;  %8134 = vmatprep.mubr.msk.bf16.mxu0 %vm8948_vm0, %v8947_v47  ;;  %v3821_v22 = vsel %vm3818_vm6, %v3819_v33, %v3820_v51 }
 0x1f8   : > { %v9821_v39 = vpop.f32.mrb[68].mxu0 }
 0x1f9   : > { %v7876_v13 = vpop.f32.mrb[69].mxu0 }
 0x1fa   : > { %v9823_v42 = vpop.f32.mrb[70].mxu0  ;;  %v9879_v13 = vld [vmem:[#allocation2 + $0x44] sm:$0xff]  }
 0x1fb   : > { %v7877_v44 = vpop.f32.mrb[71].mxu0  ;;  %v3619_v49 = vshrl.u32 %v9879_v13, 16  ;;  %v3622_v62 = vshll.u32 %v9879_v13, 16 }
 0x1fc   : > { %v3560_v44 = vld [vmem:[#allocation2 + $0x3c] sm:$0xe] }
 0x1fd   : > { %8095 = vmatmul.mubr.msk.bf16.gmra.mrb[156].mxu1 %vm1940_vm2, %v3155_v50  ;;  %8135 = vmatmul.mubr.msk.bf16.gmra.mrb[176].mxu0 %vm1940_vm2, %v3416_v34  ;;  %v7097_v34 = vcombine.low %v3560_v44, %v9872_v40 }
 0x1fe   : > { %8098 = vmatprep.mubr.msk.bf16.mxu1 %vm8948_vm0, %v8947_v47  ;;  %8138 = vmatprep.mubr.msk.bf16.mxu0 %vm8948_vm0, %v8947_v47 }
 0x200   : > { %v9835_v56 = vpop.f32.mrb[72].mxu0 }
 0x201   : > { %v7880_v59 = vpop.f32.mrb[73].mxu0 }
 0x202   : > { %v9837_v20 = vpop.f32.mrb[74].mxu0 }
 0x203   : > { %v7881_v10 = vpop.f32.mrb[75].mxu0 }
 0x205   : > { %8099 = vmatmul.mubr.msk.bf16.gmra.mrb[160].mxu1 %vm1940_vm2, %v3162_v63  ;;  %8139 = vmatmul.mubr.msk.bf16.gmra.mrb[180].mxu0 %vm1940_vm2, %v3425_v1  ;;  %v3611_v63 = vshrl.u32 %v7097_v34, 16  ;;  %v3614_v1 = vshll.u32 %v7097_v34, 16  ;;  %v9934_v34 = vld [vmem:[#allocation2 + $0x54] sm:$0xff]  }
 0x206   : > { %8102 = vmatprep.mubr.msk.bf16.mxu1 %vm8948_vm0, %v8947_v47  ;;  %8142 = vmatprep.mubr.msk.bf16.mxu0 %vm8948_vm0, %v8947_v47 }
 0x207   : > { %v3613_v54 = vrot.slane %v3611_v63, 1 }
 0x208   : > { %v9849_v5 = vpop.f32.mrb[56].mxu1  ;;  %v2323_v11 = vpop.f32.mrb[76].mxu0 }
 0x209   : > { %v7884_v12 = vpop.f32.mrb[57].mxu1  ;;  %v7928_v31 = vpop.f32.mrb[77].mxu0 }
 0x20a   : > { %v9851_v15 = vpop.f32.mrb[58].mxu1  ;;  %v9853_v60 = vpop.f32.mrb[78].mxu0  ;;  %v3621_v31 = vrot.slane %v3619_v49, 1  ;;  %v3640_v49 = vshll.u32 %v9934_v34, 16 }
 0x20b   : > { %v7885_v6 = vpop.f32.mrb[59].mxu1  ;;  %v7929_v28 = vpop.f32.mrb[79].mxu0 }
 0x20c   : > { %v9905_v6 = vld [vmem:[#allocation2 + $0x4c] sm:$0xff]  }
 0x20d   : > { %8103 = vmatmul.mubr.msk.bf16.gmra.mrb[164].mxu1 %vm1940_vm2, %v3169_v24  ;;  %8143 = vmatmul.mubr.msk.bf16.gmra.mrb[184].mxu0 %vm1940_vm2, %v3420_v29  ;;  %v8854_v29 = vld [vmem:[%s11106_s3 + $0xc8] sm:$0xff]   ;;  %v3628_v27 = vshrl.u32 %v9905_v6, 16  ;;  %v3631_v30 = vshll.u32 %v9905_v6, 16 }
 0x20e   : > { %8106 = vmatprep.mubr.msk.bf16.mxu1 %vm8948_vm0, %v8947_v47  ;;  %8182 = vmatprep.mubr.msk.bf16.mxu0 %vm8948_vm0, %v8947_v47 }
 0x20f   : > { %v3633_v44 = vrot.slane %v3631_v30, 2 }
 0x210   : > { %v9865_v32 = vpop.f32.mrb[60].mxu1  ;;  %v9868_v36 = vpop.f32.mrb[80].mxu0 }
 0x211   : > { %v7888_v17 = vpop.f32.mrb[61].mxu1  ;;  %v7932_v37 = vpop.f32.mrb[81].mxu0 }
 0x212   : > { %v2047_v2 = vpop.f32.mrb[62].mxu1  ;;  %v9870_v19 = vpop.f32.mrb[82].mxu0  ;;  %v8846_v37 = vld [vmem:[%s11106_s3 + $0xb0] sm:$0xff]  }
 0x213   : > { %v7889_v23 = vpop.f32.mrb[63].mxu1  ;;  %v7933_v38 = vpop.f32.mrb[83].mxu0 }
 0x215   : > { %8107 = vmatmul.mubr.msk.bf16.gmra.mrb[168].mxu1 %vm1940_vm2, %v3176_v61  ;;  %8183 = vmatmul.mubr.msk.bf16.vlgmr.msra.gmra.mrb[188].mxu0 %vm1940_vm2, %v3821_v22  ;;  %v3630_v22 = vrot.slane %v3628_v27, 1 }
 0x216   : > { %8110 = vmatprep.mubr.msk.bf16.mxu1 %vm8948_vm0, %v8947_v47  ;;  %8186 = vmatprep.mubr.msk.bf16.mxu0 %vm8948_vm0, %v8947_v47 }
 0x217   : > { %8243 = vmatpush3.bf16.msra.mxu0 %v8853_v41 }
 0x218   : > { %v2150_v50 = vpop.f32.mrb[64].mxu1  ;;  %v9894_v57 = vpop.f32.mrb[84].mxu0  ;;  %8244 = vmatprep.subr.bf16.mxu0 %v8947_v47 }
 0x219   : > { %v2151_v58 = vadd.f32 %v2150_v50, %v9758_v43  ;;  %v7896_v26 = vpop.f32.mrb[65].mxu1  ;;  %v7936_v59 = vpop.f32.mrb[85].mxu0  ;;  %v3624_v43 = vrot.slane %v3622_v62, 2  ;;  %v3634_v50 = vor.u32 %v3633_v44, %v3630_v22 }
 0x21a   : > { %v2153_v10 = vpop.f32.mrb[66].mxu1  ;;  %v9898_v16 = vpop.f32.mrb[86].mxu0 }
 0x21b   : > { %v2154_v4 = vadd.f32 %v2153_v10, %v9762_v48  ;;  %v7897_v35 = vpop.f32.mrb[67].mxu1  ;;  %v7937_v8 = vpop.f32.mrb[87].mxu0  ;;  %8245 = vmatpush3.bf16.msra.mxu0 %v8854_v29  ;;  %v9902_v12 = vadd.f32 %v2323_v11, %v2151_v58  ;;  %v3616_v11 = vrot.slane %v3614_v1, 2  ;;  %v3625_v24 = vor.u32 %v3624_v43, %v3621_v31  ;;  %v9964_v31 = vld [vmem:[#allocation2 + $0x5c] sm:$0xff]  }
 0x21c   : > { %8306 = vmatprep.subr.bf16.mxu0 %v8947_v47 }
 0x21d   : > { %8111 = vmatmul.mubr.msk.bf16.gmra.mrb[172].mxu1 %vm1940_vm2, %v3177_v7  ;;  %8187 = vmatmul.mubr.msk.bf16.gmra.mrb[192].mxu0 %vm1940_vm2, %v3823_v14  ;;  %v9911_v48 = vadd.f32 %v9853_v60, %v2154_v4  ;;  %v3617_v17 = vor.u32 %v3616_v11, %v3613_v54  ;;  %v3635_v7 = vsel %vm3363_vm5, %v3625_v24, %v3634_v50  ;;  %v3642_v14 = vrot.slane %v3640_v49, 2 }
 0x21e   : > { %8150 = vmatprep.mubr.msk.bf16.mxu1 %vm8948_vm0, %v8947_v47  ;;  %8190 = vmatprep.mubr.msk.bf16.mxu0 %vm8948_vm0, %v8947_v47  ;;  %v3828_v54 = vrot.slane %v9789_v9, 2  ;;  %v3646_v11 = vshrl.u32 %v9964_v31, 16 }
 0x21f   : > { %v3626_v61 = vsel %vm3363_vm5, %v3617_v17, %v3625_v24 }
 0x220   : > { %v2158_v28 = vpop.f32.mrb[68].mxu1  ;;  %v9920_v45 = vpop.f32.mrb[88].mxu0 }
 0x221   : > { %v2159_v60 = vadd.f32 %v2158_v28, %v9780_v0  ;;  %v7900_v46 = vpop.f32.mrb[69].mxu1  ;;  %v7940_v33 = vpop.f32.mrb[89].mxu0  ;;  %v3825_v0 = vsel %vm3818_vm6, %v3822_v53, %v3824_v25  ;;  %v3826_v53 = vrot.slane %v9766_v55, 2  ;;  %v3649_v28 = vshll.u32 %v9964_v31, 16 }
 0x222   : > { %v2161_v51 = vpop.f32.mrb[70].mxu1  ;;  %v9926_v2 = vpop.f32.mrb[90].mxu0 }
 0x223   : > { %v2162_v18 = vadd.f32 %v2161_v51, %v9783_v3  ;;  %v7901_v23 = vpop.f32.mrb[71].mxu1  ;;  %v7941_v38 = vpop.f32.mrb[91].mxu0  ;;  %v9930_v41 = vadd.f32 %v9868_v36, %v2159_v60  ;;  %v8851_v3 = vld [vmem:[%s11106_s3 + $0xb8] sm:$0xff]   ;;  %v3827_v8 = vsel %vm3818_vm6, %v3824_v25, %v3826_v53 }
 0x224   : > { %v3651_v23 = vrot.slane %v3649_v28, 2  ;;  %v9989_v38 = vld [vmem:[#allocation2 + $0x34] ss:$0 sps:$4 sm:$0x77]  }
 0x225   : > { %8151 = vmatmul.mubr.msk.bf16.vlgmr.msra.gmra.mrb[176].mxu1 %vm1940_vm2, %v3626_v61  ;;  %8191 = vmatmul.mubr.msk.bf16.gmra.mrb[196].mxu0 %vm1940_vm2, %v3825_v0  ;;  %v9939_v29 = vadd.f32 %v9870_v19, %v2162_v18  ;;  %v3637_v19 = vshrl.u32 %v9934_v34, 16  ;;  %v3648_v18 = vrot.slane %v3646_v11, 1  ;;  %v10002_v61 = vld [vmem:[#allocation2 + $0x78] sm:$0xf]  ;;  %v3830_v44 = vrot.slane %v9989_v38, 2 }
 0x226   : > { %8211 = vmatpush3.bf16.msra.mxu1 %v8846_v37  ;;  %8154 = vmatprep.mubr.msk.bf16.mxu1 %vm8948_vm0, %v8947_v47  ;;  %v3829_v37 = vsel %vm3818_vm6, %v3826_v53, %v3828_v54 }
 0x227   : > { %8194 = vmatprep.mubr.msk.bf16.mxu0 %vm8948_vm0, %v8947_v47  ;;  %8212 = vmatprep.subr.bf16.mxu1 %v8947_v47  ;;  %v3652_v22 = vor.u32 %v3651_v23, %v3648_v18 }
 0x228   : > { %v2166_v36 = vpop.f32.mrb[72].mxu1  ;;  %v9952_v62 = vpop.f32.mrb[92].mxu0 }
 0x229   : > { %v2167_v58 = vadd.f32 %v2166_v36, %v9806_v21  ;;  %v7904_v26 = vpop.f32.mrb[73].mxu1  ;;  %v7944_v59 = vpop.f32.mrb[93].mxu0  ;;  %v3639_v21 = vrot.slane %v3637_v19, 1 }
 0x22a   : > { %v2169_v10 = vpop.f32.mrb[74].mxu1  ;;  %v9955_v63 = vpop.f32.mrb[94].mxu0  ;;  %8213 = vmatpush3.bf16.msra.mxu1 %v8851_v3  ;;  %v8855_v26 = vld [vmem:[#allocation2 + $0x6c] ss:$0 sps:$4 sm:$0x33]  }
 0x22b   : > { %v2170_v1 = vadd.f32 %v2169_v10, %v9808_v52  ;;  %v7905_v4 = vpop.f32.mrb[75].mxu1  ;;  %v7945_v35 = vpop.f32.mrb[95].mxu0  ;;  %8274 = vmatprep.subr.bf16.mxu1 %v8947_v47  ;;  %v9960_v55 = vadd.f32 %v9894_v57, %v2167_v58  ;;  %v3643_v43 = vor.u32 %v3642_v14, %v3639_v21  ;;  %v10017_v14 = vld [vmem:[#allocation2 + $0x7c] sm:$0xff]  }
 0x22d   : > { %8155 = vmatmul.mubr.msk.bf16.gmra.mrb[180].mxu1 %vm1940_vm2, %v3635_v7  ;;  %8195 = vmatmul.mubr.msk.bf16.gmra.mrb[200].mxu0 %vm1940_vm2, %v3827_v8  ;;  %v9969_v52 = vadd.f32 %v9898_v16, %v2170_v1  ;;  %v3644_v9 = vsel %vm3363_vm5, %v3634_v50, %v3643_v43  ;;  %v3653_v7 = vsel %vm3363_vm5, %v3643_v43, %v3652_v22 }
 0x22e   : > { %8158 = vmatprep.mubr.msk.bf16.mxu1 %vm8948_vm0, %v8947_v47  ;;  %8198 = vmatprep.mubr.msk.bf16.mxu0 %vm8948_vm0, %v8947_v47  ;;  %v3831_v8 = vsel %vm3818_vm6, %v3828_v54, %v3830_v44 }
 0x230   : > { %v2174_v57 = vpop.f32.mrb[76].mxu1  ;;  %v9978_v24 = vpop.f32.mrb[96].mxu0 }
 0x231   : > { %v2175_v25 = vadd.f32 %v2174_v57, %v9821_v39  ;;  %v7908_v16 = vpop.f32.mrb[77].mxu1  ;;  %v7948_v27 = vpop.f32.mrb[97].mxu0  ;;  %v9991_v39 = vld [vmem:[#allocation2 + $0x64] sm:$0xff]   ;;  %v3667_v57 = vshll.u32 %v8855_v26, 16 }
 0x232   : > { %v2177_v30 = vpop.f32.mrb[78].mxu1  ;;  %v9981_v60 = vpop.f32.mrb[98].mxu0  ;;  %v3655_v3 = vshrl.u32 %v9991_v39, 16  ;;  %v3658_v36 = vshll.u32 %v9991_v39, 16  ;;  %v4187_v16 = vshll.u32 %v10017_v14, 16 }
 0x233   : > { %v2178_v46 = vadd.f32 %v2177_v30, %v9823_v42  ;;  %v7909_v33 = vpop.f32.mrb[79].mxu1  ;;  %v7949_v51 = vpop.f32.mrb[99].mxu0  ;;  %v9985_v17 = vadd.f32 %v9920_v45, %v2175_v25  ;;  %v4125_v45 = vld [vmem:[#allocation2 + $0x74] sm:$0xe]  ;;  %v4184_v25 = vshrl.u32 %v10017_v14, 16  ;;  %v3669_v23 = vrot.slane %v3667_v57, 2 }
 0x234   : > { %v7135_v4 = vcombine.low %v4125_v45, %v10002_v61  ;;  %v3657_v21 = vrot.slane %v3655_v3, 1 }
 0x235   : > { %8159 = vmatmul.mubr.msk.bf16.gmra.mrb[184].mxu1 %vm1940_vm2, %v3644_v9  ;;  %8199 = vmatmul.mubr.msk.bf16.gmra.mrb[204].mxu0 %vm1940_vm2, %v3829_v37  ;;  %v9996_v42 = vadd.f32 %v9926_v2, %v2178_v46 }
 0x236   : > { %8162 = vmatprep.mubr.msk.bf16.mxu1 %vm8948_vm0, %v8947_v47  ;;  %8202 = vmatprep.mubr.msk.bf16.mxu0 %vm8948_vm0, %v8947_v47  ;;  %v4176_v43 = vshrl.u32 %v7135_v4, 16  ;;  %v4179_v28 = vshll.u32 %v7135_v4, 16 }
 0x238   : > { %v2182_v0 = vpop.f32.mrb[80].mxu1  ;;  %v10007_v50 = vpop.f32.mrb[100].mxu0  ;;  %v4178_v38 = vrot.slane %v4176_v43, 1 }
 0x239   : > { %v2183_v2 = vadd.f32 %v2182_v0, %v9835_v56  ;;  %v7912_v53 = vpop.f32.mrb[81].mxu1  ;;  %v7952_v19 = vpop.f32.mrb[101].mxu0  ;;  %v3660_v56 = vrot.slane %v3658_v36, 2  ;;  %v4181_v36 = vrot.slane %v4179_v28, 2 }
 0x23a   : > { %v2185_v49 = vpop.f32.mrb[82].mxu1  ;;  %v2374_v58 = vpop.f32.mrb[102].mxu0  ;;  %v10042_v53 = vld [vmem:[#allocation2 + $0x84] sm:$0xff]  }
 0x23b   : > { %v2186_v59 = vadd.f32 %v2185_v49, %v9837_v20  ;;  %v7913_v10 = vpop.f32.mrb[83].mxu1  ;;  %v7953_v1 = vpop.f32.mrb[103].mxu0  ;;  %v10013_v35 = vadd.f32 %v9952_v62, %v2183_v2  ;;  %v3664_v62 = vshrl.u32 %v8855_v26, 16  ;;  %v3661_v11 = vor.u32 %v3660_v56, %v3657_v21  ;;  %v8866_v21 = vld [vmem:[%s11106_s3 + $0xe0] sm:$0xff]  }
 0x23c   : > { %v4189_v2 = vrot.slane %v4187_v16, 2  ;;  %v4182_v19 = vor.u32 %v4181_v36, %v4178_v38  ;;  %v4193_v58 = vshrl.u32 %v10042_v53, 16  ;;  %v4196_v26 = vshll.u32 %v10042_v53, 16 }
 0x23d   : > { %8163 = vmatmul.mubr.msk.bf16.gmra.mrb[188].mxu1 %vm1940_vm2, %v3653_v7  ;;  %8203 = vmatmul.mubr.msk.bf16.gmra.mrb[208].mxu0 %vm1940_vm2, %v3831_v8  ;;  %v10022_v20 = vadd.f32 %v9955_v63, %v2186_v59  ;;  %v10033_v51 = vrot.slane %v3664_v62, 1  ;;  %v3662_v3 = vsel %vm3363_vm5, %v3652_v22, %v3661_v11 }
 0x23e   : > { %8166 = vmatprep.mubr.msk.bf16.mxu1 %vm8948_vm0, %v8947_v47  ;;  %8206 = vmatprep.mubr.msk.bf16.mxu0 %vm8948_vm0, %v8947_v47  ;;  %v4195_v43 = vrot.slane %v4193_v58, 1 }
 0x240   : > { %v2190_v54 = vpop.f32.mrb[84].mxu1  ;;  %v10030_v27 = vpop.f32.mrb[104].mxu0 }
 0x241   : > { %v2191_v63 = vadd.f32 %v2190_v54, %v9849_v5  ;;  %v7916_v30 = vpop.f32.mrb[85].mxu1  ;;  %v7992_v46 = vpop.f32.mrb[105].mxu0  ;;  %v4186_v5 = vrot.slane %v4184_v25, 1  ;;  %v10069_v54 = vld [vmem:[#allocation2 + $0x8c] sm:$0xff]  }
 0x242   : > { %v2193_v33 = vpop.f32.mrb[86].mxu1  ;;  %v10035_v9 = vpop.f32.mrb[106].mxu0  ;;  %v4202_v25 = vshrl.u32 %v10069_v54, 16  ;;  %v4205_v16 = vshll.u32 %v10069_v54, 16 }
 0x243   : > { %v2194_v37 = vadd.f32 %v2193_v33, %v9851_v15  ;;  %v7917_v18 = vpop.f32.mrb[87].mxu1  ;;  %v7993_v45 = vpop.f32.mrb[107].mxu0  ;;  %v10039_v0 = vadd.f32 %v9978_v24, %v2191_v63  ;;  %v3670_v24 = vor.u32 %v3669_v23, %v10033_v51  ;;  %v4190_v49 = vor.u32 %v4189_v2, %v4186_v5 }
 0x244   : > { %v4204_v5 = vrot.slane %v4202_v25, 1  ;;  %v4207_v2 = vrot.slane %v4205_v16, 2 }
 0x245   : > { %8167 = vmatmul.mubr.msk.bf16.gmra.mrb[192].mxu1 %vm1940_vm2, %v3662_v3  ;;  %8207 = vmatmul.mubr.msk.bf16.gmra.mrb[212].mxu0 %vm1940_vm2, %v3830_v44  ;;  %v10047_v15 = vadd.f32 %v9981_v60, %v2194_v37  ;;  %v3671_v62 = vsel %vm3363_vm5, %v3661_v11, %v3670_v24  ;;  %v4191_v57 = vsel %vm3363_vm5, %v4182_v19, %v4190_v49  ;;  %v10093_v24 = vld [vmem:[#allocation2 + $0x94] sm:$0xff]   ;;  %v3979_v19 = vrot.slane %v9879_v13, 2 }
 0x246   : > { %8170 = vmatprep.mubr.msk.bf16.mxu1 %vm8948_vm0, %v8947_v47  ;;  %8246 = vmatprep.mubr.msk.bf16.mxu0 %vm8948_vm0, %v8947_v47  ;;  %v4214_v58 = vshll.u32 %v10093_v24, 16 }
 0x248   : > { %v2198_v22 = vpop.f32.mrb[88].mxu1  ;;  %v10056_v59 = vpop.f32.mrb[108].mxu0 }
 0x249   : > { %v2199_v60 = vadd.f32 %v2198_v22, %v9865_v32  ;;  %v7920_v44 = vpop.f32.mrb[89].mxu1  ;;  %v7996_v10 = vpop.f32.mrb[109].mxu0  ;;  %v4198_v32 = vrot.slane %v4196_v26, 2 }
 0x24a   : > { %v2201_v1 = vpop.f32.mrb[90].mxu1  ;;  %v10059_v4 = vpop.f32.mrb[110].mxu0 }
 0x24b   : > { %v7921_v7 = vpop.f32.mrb[91].mxu1  ;;  %v7997_v8 = vpop.f32.mrb[111].mxu0  ;;  %v10065_v56 = vadd.f32 %v10007_v50, %v2199_v60  ;;  %v8867_v50 = vld [vmem:[%s11106_s3 + $0xe8] sm:$0xff]   ;;  %v4199_v28 = vor.u32 %v4198_v32, %v4195_v43  ;;  %v4216_v32 = vrot.slane %v4214_v58, 2 }
 0x24d   : > { %8171 = vmatmul.mubr.msk.bf16.gmra.mrb[196].mxu1 %vm1940_vm2, %v3671_v62  ;;  %8247 = vmatmul.mubr.msk.bf16.vlgmr.msra.gmra.mrb[216].mxu0 %vm1940_vm2, %v4191_v57  ;;  %v4200_v36 = vsel %vm3363_vm5, %v4190_v49, %v4199_v28  ;;  %v4208_v49 = vor.u32 %v4207_v2, %v4204_v5 }
 0x24e   : > { %8174 = vmatprep.mubr.msk.bf16.mxu1 %vm8948_vm0, %v8947_v47  ;;  %8250 = vmatprep.mubr.msk.bf16.mxu0 %vm8948_vm0, %v8947_v47 }
 0x24f   : > { %8307 = vmatpush3.bf16.msra.mxu0 %v8866_v21 }
 0x250   : > { %v2508_v11 = vpop.f32.mrb[92].mxu1  ;;  %v10082_v63 = vpop.f32.mrb[112].mxu0  ;;  %8308 = vmatprep.subr.bf16.mxu0 %v8947_v47 }
 0x251   : > { %v2562_v30 = vadd.f32 %v2508_v11, %v9902_v12  ;;  %v7960_v46 = vpop.f32.mrb[93].mxu1  ;;  %v8000_v33 = vpop.f32.mrb[113].mxu0  ;;  %v3966_v12 = vld [vmem:[#allocation2 + $0x3c] sm:$0xc] }
 0x252   : > { %v2511_v37 = vpop.f32.mrb[94].mxu1  ;;  %v10086_v18 = vpop.f32.mrb[114].mxu0 }
 0x253   : > { %v2563_v23 = vadd.f32 %v2511_v37, %v9911_v48  ;;  %v7961_v38 = vpop.f32.mrb[95].mxu1  ;;  %v8001_v45 = vpop.f32.mrb[115].mxu0  ;;  %8309 = vmatpush3.bf16.msra.mxu0 %v8867_v50  ;;  %v10090_v3 = vadd.f32 %v10030_v27, %v2562_v30  ;;  %v7124_v27 = vcombine.low %v3966_v12, %v9872_v40  ;;  %v8861_v40 = vld [vmem:[%s11106_s3 + $0xd0] sm:$0xff]   ;;  %v10124_v50 = vld [vmem:[#allocation2 + $0x9c] sm:$0xff]  }
 0x254   : > { %8370 = vmatprep.subr.bf16.mxu0 %v8947_v47  ;;  %v4223_v16 = vshll.u32 %v10124_v50, 16 }
 0x255   : > { %8175 = vmatmul.mubr.msk.bf16.gmra.mrb[200].mxu1 %vm1940_vm2, %v10033_v51  ;;  %8251 = vmatmul.mubr.msk.bf16.gmra.mrb[220].mxu0 %vm1940_vm2, %v4200_v36  ;;  %v10100_v48 = vadd.f32 %v10035_v9, %v2563_v23  ;;  %v4211_v51 = vshrl.u32 %v10093_v24, 16  ;;  %v3978_v1 = vrot.slane %v7124_v27, 2 }
 0x256   : > { %8214 = vmatprep.mubr.msk.bf16.mxu1 %vm8948_vm0, %v8947_v47  ;;  %8254 = vmatprep.mubr.msk.bf16.mxu0 %vm8948_vm0, %v8947_v47 }
 0x257   : > { %v3980_v57 = vsel %vm3818_vm6, %v3978_v1, %v3979_v19  ;;  %v4213_v43 = vrot.slane %v4211_v51, 1 }
 0x258   : > { %v2516_v22 = vpop.f32.mrb[96].mxu1  ;;  %v10110_v26 = vpop.f32.mrb[116].mxu0 }
 0x259   : > { %v2564_v9 = vadd.f32 %v2516_v22, %v9930_v41  ;;  %v7964_v60 = vpop.f32.mrb[97].mxu1  ;;  %v8004_v44 = vpop.f32.mrb[117].mxu0  ;;  %v4209_v41 = vsel %vm3363_vm5, %v4199_v28, %v4208_v49  ;;  %v3981_v28 = vrot.slane %v9905_v6, 2  ;;  %v4217_v25 = vor.u32 %v4216_v32, %v4213_v43  ;;  %v8864_v22 = vld [vmem:[#allocation2 + $0xa4] ss:$0 sps:$4 sm:$0x33]  }
 0x25a   : > { %v2519_v10 = vpop.f32.mrb[98].mxu1  ;;  %v10116_v7 = vpop.f32.mrb[118].mxu0  ;;  %v4229_v51 = vshrl.u32 %v8864_v22, 16  ;;  %v4232_v58 = vshll.u32 %v8864_v22, 16 }
 0x25b   : > { %v2565_v13 = vadd.f32 %v2519_v10, %v9939_v29  ;;  %v7965_v8 = vpop.f32.mrb[99].mxu1  ;;  %v8005_v21 = vpop.f32.mrb[119].mxu0  ;;  %v10120_v62 = vadd.f32 %v10056_v59, %v2564_v9  ;;  %v8865_v29 = vld [vmem:[%s11106_s3 + $0xd8] sm:$0xff]   ;;  %v3982_v2 = vsel %vm3818_vm6, %v3979_v19, %v3981_v28  ;;  %v4218_v12 = vsel %vm3363_vm5, %v4208_v49, %v4217_v25 }
 0x25c   : > { %v3983_v19 = vrot.slane %v9934_v34, 2  ;;  %v4234_v43 = vrot.slane %v4232_v58, 2 }
 0x25d   : > { %8215 = vmatmul.mubr.msk.bf16.vlgmr.msra.gmra.mrb[204].mxu1 %vm1940_vm2, %v3980_v57  ;;  %8255 = vmatmul.mubr.msk.bf16.gmra.mrb[224].mxu0 %vm1940_vm2, %v4209_v41  ;;  %v10129_v11 = vadd.f32 %v10059_v4, %v2565_v13  ;;  %v4220_v4 = vshrl.u32 %v10124_v50, 16  ;;  %v4231_v41 = vrot.slane %v4229_v51, 1 }
 0x25e   : > { %8275 = vmatpush3.bf16.msra.mxu1 %v8861_v40  ;;  %8218 = vmatprep.mubr.msk.bf16.mxu1 %vm8948_vm0, %v8947_v47  ;;  %v3984_v57 = vsel %vm3818_vm6, %v3981_v28, %v3983_v19 }
 0x25f   : > { %8258 = vmatprep.mubr.msk.bf16.mxu0 %vm8948_vm0, %v8947_v47  ;;  %8276 = vmatprep.subr.bf16.mxu1 %v8947_v47  ;;  %v4222_v27 = vrot.slane %v4220_v4, 1 }
 0x260   : > { %v2524_v59 = vpop.f32.mrb[100].mxu1  ;;  %v2724_v30 = vpop.f32.mrb[120].mxu0 }
 0x261   : > { %v2566_v46 = vadd.f32 %v2524_v59, %v9960_v55  ;;  %v7968_v33 = vpop.f32.mrb[101].mxu1  ;;  %v8008_v37 = vpop.f32.mrb[121].mxu0  ;;  %v4225_v55 = vrot.slane %v4223_v16, 2 }
 0x262   : > { %v2527_v23 = vpop.f32.mrb[102].mxu1  ;;  %v2727_v38 = vpop.f32.mrb[122].mxu0  ;;  %8277 = vmatpush3.bf16.msra.mxu1 %v8865_v29 }
 0x263   : > { %v2567_v45 = vadd.f32 %v2527_v23, %v9969_v52  ;;  %v7969_v36 = vpop.f32.mrb[103].mxu1  ;;  %v8009_v5 = vpop.f32.mrb[123].mxu0  ;;  %8338 = vmatprep.subr.bf16.mxu1 %v8947_v47  ;;  %v10146_v6 = vadd.f32 %v10082_v63, %v2566_v46  ;;  %v4226_v49 = vor.u32 %v4225_v55, %v4222_v27 }
 0x265   : > { %8219 = vmatmul.mubr.msk.bf16.gmra.mrb[208].mxu1 %vm1940_vm2, %v3982_v2  ;;  %8259 = vmatmul.mubr.msk.bf16.gmra.mrb[228].mxu0 %vm1940_vm2, %v4218_v12  ;;  %v10153_v52 = vadd.f32 %v10086_v18, %v2567_v45  ;;  %v4227_v34 = vsel %vm3363_vm5, %v4217_v25, %v4226_v49  ;;  %v4617_v2 = vld [vmem:[#allocation2 + $0x74] sm:$0xc] }
 0x266   : > { %8222 = vmatprep.mubr.msk.bf16.mxu1 %vm8948_vm0, %v8947_v47  ;;  %8262 = vmatprep.mubr.msk.bf16.mxu0 %vm8948_vm0, %v8947_v47  ;;  %v7167_v58 = vcombine.low %v4617_v2, %v10002_v61  ;;  %v10207_v61 = vld [vmem:[#allocation2 + $0xb0] sm:$0xf] }
 0x268   : > { %v2532_v63 = vpop.f32.mrb[104].mxu1  ;;  %v2732_v9 = vpop.f32.mrb[124].mxu0 }
 0x269   : > { %v7972_v60 = vpop.f32.mrb[105].mxu1  ;;  %v2568_v44 = vadd.f32 %v2532_v63, %v9985_v17  ;;  %v8012_v10 = vpop.f32.mrb[125].mxu0 }
 0x26a   : > { %v2535_v1 = vpop.f32.mrb[106].mxu1  ;;  %v2735_v18 = vpop.f32.mrb[126].mxu0  ;;  %v4629_v60 = vrot.slane %v7167_v58, 2 }
 0x26b   : > { %v10162_v40 = vadd.f32 %v10110_v26, %v2568_v44  ;;  %v7973_v13 = vpop.f32.mrb[107].mxu1  ;;  %v2569_v8 = vadd.f32 %v2535_v1, %v9996_v42  ;;  %v8013_v21 = vpop.f32.mrb[127].mxu0  ;;  %v3985_v42 = vrot.slane %v9964_v31, 2  ;;  %v4235_v26 = vor.u32 %v4234_v43, %v4231_v41 }
 0x26c   : > { %v4630_v44 = vrot.slane %v10017_v14, 2 }
 0x26d   : > { %v10168_v32 = vadd.f32 %v10116_v7, %v2569_v8  ;;  %8223 = vmatmul.mubr.msk.bf16.gmra.mrb[212].mxu1 %vm1940_vm2, %v3984_v57  ;;  %8263 = vmatmul.mubr.msk.bf16.gmra.mrb[232].mxu0 %vm1940_vm2, %v4227_v34  ;;  %v3986_v23 = vsel %vm3818_vm6, %v3983_v19, %v3985_v42  ;;  %v4236_v45 = vsel %vm3363_vm5, %v4226_v49, %v4235_v26  ;;  %v8868_v19 = vld [vmem:[#allocation2 + $0x6c] ss:$0 sps:$4 sm:$0x77]  }
 0x26e   : > { %8226 = vmatprep.mubr.msk.bf16.mxu1 %vm8948_vm0, %v8947_v47  ;;  %8266 = vmatprep.mubr.msk.bf16.mxu0 %vm8948_vm0, %v8947_v47  ;;  %v4631_v14 = vsel %vm3818_vm6, %v4629_v60, %v4630_v44  ;;  %v8873_v60 = vld [vmem:[%s11106_s3 + $0xf0] sm:$0xff]  }
 0x270   : > { %v2540_v17 = vpop.f32.mrb[108].mxu1  ;;  %v2740_v29 = vpop.f32.mrb[128].mxu0 }
 0x271   : > { %v7976_v59 = vpop.f32.mrb[109].mxu1  ;;  %v2570_v28 = vadd.f32 %v2540_v17, %v10013_v35  ;;  %v8016_v7 = vpop.f32.mrb[129].mxu0  ;;  %v3987_v35 = vrot.slane %v9991_v39, 2 }
 0x272   : > { %v2543_v25 = vpop.f32.mrb[110].mxu1  ;;  %v2743_v4 = vpop.f32.mrb[130].mxu0  ;;  %v4632_v59 = vrot.slane %v10042_v53, 2 }
 0x273   : > { %v10178_v16 = vadd.f32 %v2724_v30, %v2570_v28  ;;  %v7977_v46 = vpop.f32.mrb[111].mxu1  ;;  %v2571_v33 = vadd.f32 %v2543_v25, %v10022_v20  ;;  %v8017_v37 = vpop.f32.mrb[131].mxu0  ;;  %v3988_v51 = vsel %vm3818_vm6, %v3985_v42, %v3987_v35  ;;  %v10217_v42 = vld [vmem:[#allocation2 + $0xb4] sm:$0xff]  }
 0x274   : > { %v4430_v7 = vshrl.u32 %v10217_v42, 16  ;;  %v4433_v25 = vshll.u32 %v10217_v42, 16  ;;  %v4633_v2 = vsel %vm3818_vm6, %v4630_v44, %v4632_v59 }
 0x275   : > { %v10183_v36 = vadd.f32 %v2727_v38, %v2571_v33  ;;  %8227 = vmatmul.mubr.msk.bf16.gmra.mrb[216].mxu1 %vm1940_vm2, %v3986_v23  ;;  %8267 = vmatmul.mubr.msk.bf16.gmra.mrb[236].mxu0 %vm1940_vm2, %v4236_v45 }
 0x276   : > { %8230 = vmatprep.mubr.msk.bf16.mxu1 %vm8948_vm0, %v8947_v47  ;;  %8270 = vmatprep.mubr.msk.bf16.mxu0 %vm8948_vm0, %v8947_v47 }
 0x278   : > { %v2548_v31 = vpop.f32.mrb[112].mxu1  ;;  %v3061_v20 = vpop.f32.mrb[132].mxu0 }
 0x279   : > { %v2572_v30 = vadd.f32 %v2548_v31, %v10039_v0  ;;  %v7980_v5 = vpop.f32.mrb[113].mxu1  ;;  %v8056_v38 = vpop.f32.mrb[133].mxu0  ;;  %v3989_v0 = vrot.slane %v8868_v19, 2  ;;  %v4634_v19 = vrot.slane %v10069_v54, 2 }
 0x27a   : > { %v2551_v12 = vpop.f32.mrb[114].mxu1  ;;  %v3064_v27 = vpop.f32.mrb[134].mxu0  ;;  %v4432_v38 = vrot.slane %v4430_v7, 1 }
 0x27b   : > { %v2573_v55 = vadd.f32 %v2551_v12, %v10047_v15  ;;  %v10194_v22 = vadd.f32 %v2732_v9, %v2572_v30  ;;  %v7981_v63 = vpop.f32.mrb[115].mxu1  ;;  %v8057_v49 = vpop.f32.mrb[135].mxu0  ;;  %v4371_v15 = vld [vmem:[#allocation2 + $0xac] sm:$0xe]  ;;  %v3990_v17 = vsel %vm3818_vm6, %v3987_v35, %v3989_v0  ;;  %v4435_v12 = vrot.slane %v4433_v25, 2 }
 0x27c   : > { %v7151_v43 = vcombine.low %v4371_v15, %v10207_v61 }
 0x27d   : > { %v10198_v39 = vadd.f32 %v2735_v18, %v2573_v55  ;;  %8231 = vmatmul.mubr.msk.bf16.gmra.mrb[220].mxu1 %vm1940_vm2, %v3988_v51  ;;  %8271 = vmatmul.mubr.msk.bf16.gmra.mrb[240].mxu0 %vm1940_vm2, %v4231_v41  ;;  %v10237_v55 = vld [vmem:[#allocation2 + $0xbc] sm:$0xff]   ;;  %v4436_v63 = vor.u32 %v4435_v12, %v4432_v38 }
 0x27e   : > { %8234 = vmatprep.mubr.msk.bf16.mxu1 %vm8948_vm0, %v8947_v47  ;;  %8310 = vmatprep.mubr.msk.bf16.mxu0 %vm8948_vm0, %v8947_v47  ;;  %v4425_v26 = vshll.u32 %v7151_v43, 16  ;;  %v4439_v51 = vshrl.u32 %v10237_v55, 16  ;;  %v4442_v58 = vshll.u32 %v10237_v55, 16 }
 0x280   : > { %v2556_v9 = vpop.f32.mrb[116].mxu1  ;;  %v3069_v10 = vpop.f32.mrb[136].mxu0  ;;  %v4427_v30 = vrot.slane %v4425_v26, 2 }
 0x281   : > { %v2574_v1 = vadd.f32 %v2556_v9, %v10065_v56  ;;  %v7984_v18 = vpop.f32.mrb[117].mxu1  ;;  %v8060_v13 = vpop.f32.mrb[137].mxu0  ;;  %v4422_v56 = vshrl.u32 %v7151_v43, 16  ;;  %v10263_v43 = vld [vmem:[#allocation2 + $0xc4] sm:$0xff]  }
 0x282   : > { %v2559_v8 = vpop.f32.mrb[118].mxu1  ;;  %v10210_v21 = vpop.f32.mrb[138].mxu0 }
 0x283   : > { %v10212_v57 = vadd.f32 %v2740_v29, %v2574_v1  ;;  %v7985_v34 = vpop.f32.mrb[119].mxu1  ;;  %v8061_v41 = vpop.f32.mrb[139].mxu0  ;;  %v4424_v35 = vrot.slane %v4422_v56, 1 }
 0x284   : > { %v4635_v34 = vsel %vm3818_vm6, %v4632_v59, %v4634_v19  ;;  %v4444_v41 = vrot.slane %v4442_v58, 2 }
 0x285   : > { %8235 = vmatmul.mubr.msk.bf16.gmra.mrb[224].mxu1 %vm1940_vm2, %v3990_v17  ;;  %8311 = vmatmul.mubr.msk.bf16.vlgmr.msra.gmra.mrb[244].mxu0 %vm1940_vm2, %v4631_v14 }
 0x286   : > { %8238 = vmatprep.mubr.msk.bf16.mxu1 %vm8948_vm0, %v8947_v47  ;;  %8314 = vmatprep.mubr.msk.bf16.mxu0 %vm8948_vm0, %v8947_v47 }
 0x288   : > { %v2876_v29 = vpop.f32.mrb[120].mxu1  ;;  %v10226_v28 = vpop.f32.mrb[140].mxu0 }
 0x289   : > { %v2930_v4 = vadd.f32 %v2876_v29, %v10090_v3  ;;  %v8024_v46 = vpop.f32.mrb[121].mxu1  ;;  %v8064_v33 = vpop.f32.mrb[141].mxu0  ;;  %v4451_v29 = vshll.u32 %v10263_v43, 16 }
 0x28a   : > { %v2879_v37 = vpop.f32.mrb[122].mxu1  ;;  %v10231_v23 = vpop.f32.mrb[142].mxu0 }
 0x28b   : > { %v2931_v45 = vadd.f32 %v2879_v37, %v10100_v48  ;;  %v8025_v31 = vpop.f32.mrb[123].mxu1  ;;  %v8065_v5 = vpop.f32.mrb[143].mxu0  ;;  %v10234_v53 = vadd.f32 %v3061_v20, %v2930_v4  ;;  %v4428_v48 = vor.u32 %v4427_v30, %v4424_v35  ;;  %v4453_v30 = vrot.slane %v4451_v29, 2 }
 0x28c   : > { %v10293_v5 = vld [vmem:[#allocation2 + $0xcc] sm:$0xff]  }
 0x28d   : > { %8239 = vmatmul.mubr.msk.bf16.gmra.mrb[228].mxu1 %vm1940_vm2, %v3989_v0  ;;  %8315 = vmatmul.mubr.msk.bf16.gmra.mrb[248].mxu0 %vm1940_vm2, %v4633_v2  ;;  %v10241_v3 = vadd.f32 %v3064_v27, %v2931_v45  ;;  %v4437_v8 = vsel %vm3363_vm5, %v4428_v48, %v4436_v63  ;;  %v4457_v48 = vshrl.u32 %v10293_v5, 16 }
 0x28e   : > { %8278 = vmatprep.mubr.msk.bf16.mxu1 %vm8948_vm0, %v8947_v47  ;;  %8318 = vmatprep.mubr.msk.bf16.mxu0 %vm8948_vm0, %v8947_v47 }
 0x290   : > { %v2884_v20 = vpop.f32.mrb[124].mxu1  ;;  %v10248_v49 = vpop.f32.mrb[144].mxu0 }
 0x291   : > { %v2932_v27 = vadd.f32 %v2884_v20, %v10120_v62  ;;  %v8028_v0 = vpop.f32.mrb[125].mxu1  ;;  %v8068_v15 = vpop.f32.mrb[145].mxu0  ;;  %v4441_v62 = vrot.slane %v4439_v51, 1  ;;  %v4460_v20 = vshll.u32 %v10293_v5, 16 }
 0x292   : > { %v2887_v9 = vpop.f32.mrb[126].mxu1  ;;  %v10256_v44 = vpop.f32.mrb[146].mxu0 }
 0x293   : > { %v2933_v1 = vadd.f32 %v2887_v9, %v10129_v11  ;;  %v8029_v54 = vpop.f32.mrb[127].mxu1  ;;  %v8069_v18 = vpop.f32.mrb[147].mxu0  ;;  %v10259_v13 = vadd.f32 %v3069_v10, %v2932_v27  ;;  %v8878_v11 = vld [vmem:[%s11106_s3 + $0xf8] sm:$0xff]   ;;  %v4636_v10 = vrot.slane %v10093_v24, 2  ;;  %v4445_v56 = vor.u32 %v4444_v41, %v4441_v62 }
 0x294   : > { %v4462_v54 = vrot.slane %v4460_v20, 2  ;;  %v8877_v18 = vld [vmem:[#allocation2 + $0xa4] ss:$0 sps:$4 sm:$0x77]  }
 0x295   : > { %8279 = vmatmul.mubr.msk.bf16.vlgmr.msra.gmra.mrb[232].mxu1 %vm1940_vm2, %v4437_v8  ;;  %8319 = vmatmul.mubr.msk.bf16.gmra.mrb[252].mxu0 %vm1940_vm2, %v4635_v34  ;;  %v10268_v17 = vadd.f32 %v10210_v21, %v2933_v1  ;;  %v4448_v21 = vshrl.u32 %v10263_v43, 16  ;;  %v4637_v31 = vsel %vm3818_vm6, %v4634_v19, %v4636_v10  ;;  %v4446_v35 = vsel %vm3363_vm5, %v4436_v63, %v4445_v56  ;;  %v10314_v8 = vld [vmem:[#allocation2 + $0xd4] sm:$0xff]  }
 0x296   : > { %8339 = vmatpush3.bf16.msra.mxu1 %v8873_v60  ;;  %8282 = vmatprep.mubr.msk.bf16.mxu1 %vm8948_vm0, %v8947_v47  ;;  %v4459_v1 = vrot.slane %v4457_v48, 1  ;;  %v4640_v62 = vrot.slane %v8877_v18, 2  ;;  %v4466_v41 = vshrl.u32 %v10314_v8, 16 }
 0x297   : > { %8322 = vmatprep.mubr.msk.bf16.mxu0 %vm8948_vm0, %v8947_v47  ;;  %8340 = vmatprep.subr.bf16.mxu1 %v8947_v47 }
 0x298   : > { %v2892_v14 = vpop.f32.mrb[128].mxu1  ;;  %v10279_v26 = vpop.f32.mrb[148].mxu0  ;;  %v4463_v34 = vor.u32 %v4462_v54, %v4459_v1 }
 0x299   : > { %v2934_v59 = vadd.f32 %v2892_v14, %v10146_v6  ;;  %v8032_v7 = vpop.f32.mrb[129].mxu1  ;;  %v8072_v25 = vpop.f32.mrb[149].mxu0  ;;  %v4450_v6 = vrot.slane %v4448_v21, 1 }
 0x29a   : > { %v2895_v4 = vpop.f32.mrb[130].mxu1  ;;  %v10284_v46 = vpop.f32.mrb[150].mxu0  ;;  %8341 = vmatpush3.bf16.msra.mxu1 %v8878_v11  ;;  %v4469_v11 = vshll.u32 %v10314_v8, 16 }
 0x29b   : > { %v2935_v33 = vadd.f32 %v2895_v4, %v10153_v52  ;;  %v8033_v37 = vpop.f32.mrb[131].mxu1  ;;  %v8073_v24 = vpop.f32.mrb[151].mxu0  ;;  %v10288_v45 = vadd.f32 %v10226_v28, %v2934_v59  ;;  %8398 = vmatprep.subr.bf16.mxu1 %v8947_v47  ;;  %v4638_v28 = vrot.slane %v10124_v50, 2  ;;  %v4454_v38 = vor.u32 %v4453_v30, %v4450_v6 }
 0x29c   : > { %v4468_v37 = vrot.slane %v4466_v41, 1  ;;  %v4471_v24 = vrot.slane %v4469_v11, 2 }
 0x29d   : > { %8283 = vmatmul.mubr.msk.bf16.gmra.mrb[236].mxu1 %vm1940_vm2, %v4446_v35  ;;  %8323 = vmatmul.mubr.msk.bf16.gmra.mrb[0].mxu0 %vm1940_vm2, %v4637_v31  ;;  %v10298_v52 = vadd.f32 %v10231_v23, %v2935_v33  ;;  %v4455_v50 = vsel %vm3363_vm5, %v4445_v56, %v4454_v38  ;;  %v4639_v60 = vsel %vm3818_vm6, %v4636_v10, %v4638_v28  ;;  %v8880_v31 = vld [vmem:[#allocation2 + $0xdc] ss:$0 sps:$4 sm:$0x33]  }
 0x29e   : > { %8286 = vmatprep.mubr.msk.bf16.mxu1 %vm8948_vm0, %v8947_v47  ;;  %8326 = vmatprep.mubr.msk.bf16.mxu0 %vm8948_vm0, %v8947_v47  ;;  %v4464_v4 = vsel %vm3363_vm5, %v4454_v38, %v4463_v34  ;;  %v4641_v33 = vsel %vm3818_vm6, %v4638_v28, %v4640_v62  ;;  %v4472_v35 = vor.u32 %v4471_v24, %v4468_v37  ;;  %v4475_v6 = vshrl.u32 %v8880_v31, 16 }
 0x29f   : > { %v4478_v30 = vshll.u32 %v8880_v31, 16  ;;  %v4789_v37 = vrot.slane %v10217_v42, 2  ;;  %v4791_v42 = vrot.slane %v10237_v55, 2  ;;  %v4793_v55 = vrot.slane %v10263_v43, 2 }
 0x2a0   : > { %v2900_v2 = vpop.f32.mrb[132].mxu1  ;;  %v3101_v12 = vpop.f32.mrb[152].mxu0  ;;  %v4795_v43 = vrot.slane %v10293_v5, 2  ;;  %v4797_v5 = vrot.slane %v10314_v8, 2 }
 0x2a1   : > { %v2936_v63 = vadd.f32 %v2900_v2, %v10162_v40  ;;  %v8036_v19 = vpop.f32.mrb[133].mxu1  ;;  %v8076_v23 = vpop.f32.mrb[153].mxu0 }
 0x2a2   : > { %v2903_v51 = vpop.f32.mrb[134].mxu1  ;;  %v3104_v58 = vpop.f32.mrb[154].mxu0 }
 0x2a3   : > { %v2937_v27 = vadd.f32 %v2903_v51, %v10168_v32  ;;  %v8037_v0 = vpop.f32.mrb[135].mxu1  ;;  %v8077_v15 = vpop.f32.mrb[155].mxu0  ;;  %v10310_v9 = vadd.f32 %v10248_v49, %v2936_v63  ;;  %v4473_v51 = vsel %vm3363_vm5, %v4463_v34, %v4472_v35 }
 0x2a4   : > { %v4480_v0 = vrot.slane %v4478_v30, 2 }
 0x2a5   : > { %8287 = vmatmul.mubr.msk.bf16.gmra.mrb[240].mxu1 %vm1940_vm2, %v4455_v50  ;;  %8327 = vmatmul.mubr.msk.bf16.gmra.mrb[4].mxu0 %vm1940_vm2, %v4639_v60  ;;  %v10319_v40 = vadd.f32 %v10256_v44, %v2937_v27  ;;  %v4477_v27 = vrot.slane %v4475_v6, 1 }
 0x2a6   : > { %8290 = vmatprep.mubr.msk.bf16.mxu1 %vm8948_vm0, %v8947_v47  ;;  %8330 = vmatprep.mubr.msk.bf16.mxu0 %vm8948_vm0, %v8947_v47 }
 0x2a8   : > { %v2908_v32 = vpop.f32.mrb[136].mxu1  ;;  %v3109_v49 = vpop.f32.mrb[156].mxu0 }
 0x2a9   : > { %v2938_v10 = vadd.f32 %v2908_v32, %v10178_v16  ;;  %v8040_v14 = vpop.f32.mrb[137].mxu1  ;;  %v8080_v56 = vpop.f32.mrb[157].mxu0 }
 0x2aa   : > { %v2911_v44 = vpop.f32.mrb[138].mxu1  ;;  %v3112_v21 = vpop.f32.mrb[158].mxu0 }
 0x2ab   : > { %v2939_v29 = vadd.f32 %v2911_v44, %v10183_v36  ;;  %v8041_v59 = vpop.f32.mrb[139].mxu1  ;;  %v8081_v7 = vpop.f32.mrb[159].mxu0  ;;  %v10330_v25 = vadd.f32 %v10279_v26, %v2938_v10  ;;  %v4776_v10 = vld [vmem:[#allocation2 + $0xac] sm:$0xc] }
 0x2ad   : > { %8291 = vmatmul.mubr.msk.bf16.gmra.mrb[244].mxu1 %vm1940_vm2, %v4464_v4  ;;  %8331 = vmatmul.mubr.msk.bf16.gmra.mrb[8].mxu0 %vm1940_vm2, %v4641_v33  ;;  %v10337_v16 = vadd.f32 %v10284_v46, %v2939_v29  ;;  %v7178_v4 = vcombine.low %v4776_v10, %v10207_v61  ;;  %v4794_v10 = vsel %vm3818_vm6, %v4791_v42, %v4793_v55 }
 0x2ae   : > { %8294 = vmatprep.mubr.msk.bf16.mxu1 %vm8948_vm0, %v8947_v47  ;;  %8334 = vmatprep.mubr.msk.bf16.mxu0 %vm8948_vm0, %v8947_v47 }
 0x2b0   : > { %v2916_v36 = vpop.f32.mrb[140].mxu1  ;;  %v3493_v26 = vpop.f32.mrb[160].mxu0 }
 0x2b1   : > { %v2940_v28 = vadd.f32 %v2916_v36, %v10194_v22  ;;  %v8044_v2 = vpop.f32.mrb[141].mxu1  ;;  %v8120_v38 = vpop.f32.mrb[161].mxu0 }
 0x2b2   : > { %v2919_v48 = vpop.f32.mrb[142].mxu1  ;;  %v3496_v20 = vpop.f32.mrb[162].mxu0 }
 0x2b3   : > { %v2941_v46 = vadd.f32 %v2919_v48, %v10198_v39  ;;  %v8045_v63 = vpop.f32.mrb[143].mxu1  ;;  %v8121_v19 = vpop.f32.mrb[163].mxu0  ;;  %v10345_v23 = vadd.f32 %v3101_v12, %v2940_v28  ;;  %v4481_v12 = vor.u32 %v4480_v0, %v4477_v27 }
 0x2b5   : > { %8295 = vmatmul.mubr.msk.bf16.gmra.mrb[248].mxu1 %vm1940_vm2, %v4473_v51  ;;  %8335 = vmatmul.mubr.msk.bf16.gmra.mrb[12].mxu0 %vm1940_vm2, %v4640_v62  ;;  %v10350_v15 = vadd.f32 %v3104_v58, %v2941_v46  ;;  %v4482_v58 = vsel %vm3363_vm5, %v4472_v35, %v4481_v12  ;;  %v4792_v12 = vsel %vm3818_vm6, %v4789_v37, %v4791_v42  ;;  %v8881_v42 = vld [vmem:[#allocation2 + $0xdc] ss:$0 sps:$4 sm:$0x77]  }
 0x2b6   : > { %8298 = vmatprep.mubr.msk.bf16.mxu1 %vm8948_vm0, %v8947_v47  ;;  %8378 = vmatprep.mubr.msk.bf16.mxu0 %vm8948_vm0, %v8947_v47 }
 0x2b8   : > { %v2924_v22 = vpop.f32.mrb[144].mxu1  ;;  %v3501_v39 = vpop.f32.mrb[164].mxu0 }
 0x2b9   : > { %v2942_v50 = vadd.f32 %v2924_v22, %v10212_v57  ;;  %v8048_v60 = vpop.f32.mrb[145].mxu1  ;;  %v8124_v1 = vpop.f32.mrb[165].mxu0 }
 0x2ba   : > { %v2927_v54 = vpop.f32.mrb[146].mxu1  ;;  %v3504_v18 = vpop.f32.mrb[166].mxu0 }
 0x2bb   : > { %v8049_v32 = vpop.f32.mrb[147].mxu1  ;;  %v8125_v34 = vpop.f32.mrb[167].mxu0  ;;  %v10357_v62 = vadd.f32 %v3109_v49, %v2942_v50 }
 0x2bd   : > { %8299 = vmatmul.mubr.msk.bf16.gmra.mrb[252].mxu1 %vm1940_vm2, %v4482_v58 }
 0x2be   : > { %8302 = vmatprep.mubr.msk.bf16.mxu1 %vm8948_vm0, %v8947_v47 }
 0x2c0   : > { %v3246_v41 = vpop.f32.mrb[148].mxu1  ;;  %v3509_v11 = vpop.f32.mrb[168].mxu0 }
 0x2c1   : > { %v3300_v57 = vadd.f32 %v3246_v41, %v10234_v53  ;;  %v8088_v14 = vpop.f32.mrb[149].mxu1  ;;  %v8128_v56 = vpop.f32.mrb[169].mxu0  ;;  %v4788_v53 = vrot.slane %v7178_v4, 2 }
 0x2c2   : > { %v3249_v44 = vpop.f32.mrb[150].mxu1  ;;  %v3512_v21 = vpop.f32.mrb[170].mxu0 }
 0x2c3   : > { %v3301_v29 = vadd.f32 %v3249_v44, %v10241_v3  ;;  %v8089_v49 = vpop.f32.mrb[151].mxu1  ;;  %v8129_v59 = vpop.f32.mrb[171].mxu0  ;;  %v10365_v7 = vadd.f32 %v3493_v26, %v3300_v57  ;;  %v4790_v38 = vsel %vm3818_vm6, %v4788_v53, %v4789_v37  ;;  %v4796_v37 = vsel %vm3818_vm6, %v4793_v55, %v4795_v43 }
 0x2c5   : > { %8303 = vmatmul.mubr.msk.bf16.gmra.mrb[0].mxu1 %vm1940_vm2, %v4477_v27  ;;  %v10369_v33 = vadd.f32 %v3496_v20, %v3301_v29 }
 0x2c6   : > { %8342 = vmatprep.mubr.msk.bf16.mxu1 %vm8948_vm0, %v8947_v47 }
 0x2c8   : > { %v3254_v24 = vpop.f32.mrb[152].mxu1  ;;  %v3517_v31 = vpop.f32.mrb[172].mxu0 }
 0x2c9   : > { %v3302_v3 = vadd.f32 %v3254_v24, %v10259_v13  ;;  %v8092_v36 = vpop.f32.mrb[153].mxu1  ;;  %v8132_v35 = vpop.f32.mrb[173].mxu0 }
 0x2ca   : > { %v3257_v26 = vpop.f32.mrb[154].mxu1  ;;  %v3520_v6 = vpop.f32.mrb[174].mxu0 }
 0x2cb   : > { %v3303_v61 = vadd.f32 %v3257_v26, %v10268_v17  ;;  %v8093_v30 = vpop.f32.mrb[155].mxu1  ;;  %v8133_v28 = vpop.f32.mrb[175].mxu0  ;;  %v10376_v2 = vadd.f32 %v3501_v39, %v3302_v3 }
 0x2cd   : > { %8343 = vmatmul.mubr.msk.bf16.vlgmr.msra.gmra.mrb[4].mxu1 %vm1940_vm2, %v4790_v38  ;;  %v10380_v48 = vadd.f32 %v3504_v18, %v3303_v61  ;;  %v4798_v38 = vsel %vm3818_vm6, %v4795_v43, %v4797_v5 }
 0x2ce   : > { %8346 = vmatprep.mubr.msk.bf16.mxu1 %vm8948_vm0, %v8947_v47 }
 0x2d0   : > { %v3262_v13 = vpop.f32.mrb[156].mxu1  ;;  %v3525_v20 = vpop.f32.mrb[176].mxu0 }
 0x2d1   : > { %v3304_v46 = vadd.f32 %v3262_v13, %v10288_v45  ;;  %v8096_v17 = vpop.f32.mrb[157].mxu1  ;;  %v8136_v63 = vpop.f32.mrb[177].mxu0 }
 0x2d2   : > { %v3265_v19 = vpop.f32.mrb[158].mxu1  ;;  %v3528_v51 = vpop.f32.mrb[178].mxu0 }
 0x2d3   : > { %v3305_v27 = vadd.f32 %v3265_v19, %v10298_v52  ;;  %v8097_v0 = vpop.f32.mrb[159].mxu1  ;;  %v8137_v22 = vpop.f32.mrb[179].mxu0  ;;  %v10387_v39 = vadd.f32 %v3509_v11, %v3304_v46 }
 0x2d5   : > { %8347 = vmatmul.mubr.msk.bf16.gmra.mrb[8].mxu1 %vm1940_vm2, %v4792_v12  ;;  %v10391_v50 = vadd.f32 %v3512_v21, %v3305_v27 }
 0x2d6   : > { %8350 = vmatprep.mubr.msk.bf16.mxu1 %vm8948_vm0, %v8947_v47 }
 0x2d8   : > { %v3270_v45 = vpop.f32.mrb[160].mxu1  ;;  %v3533_v60 = vpop.f32.mrb[180].mxu0 }
 0x2d9   : > { %v3306_v1 = vadd.f32 %v3270_v45, %v10310_v9  ;;  %v8100_v52 = vpop.f32.mrb[161].mxu1  ;;  %v8140_v54 = vpop.f32.mrb[181].mxu0 }
 0x2da   : > { %v3273_v18 = vpop.f32.mrb[162].mxu1  ;;  %v3536_v32 = vpop.f32.mrb[182].mxu0 }
 0x2db   : > { %v3307_v34 = vadd.f32 %v3273_v18, %v10319_v40  ;;  %v8101_v58 = vpop.f32.mrb[163].mxu1  ;;  %v8141_v41 = vpop.f32.mrb[183].mxu0  ;;  %v10398_v11 = vadd.f32 %v3517_v31, %v3306_v1 }
 0x2dd   : > { %8351 = vmatmul.mubr.msk.bf16.gmra.mrb[12].mxu1 %vm1940_vm2, %v4794_v10  ;;  %v10402_v57 = vadd.f32 %v3520_v6, %v3307_v34 }
 0x2de   : > { %8354 = vmatprep.mubr.msk.bf16.mxu1 %vm8948_vm0, %v8947_v47 }
 0x2e0   : > { %v3278_v9 = vpop.f32.mrb[164].mxu1  ;;  %v3541_v14 = vpop.f32.mrb[184].mxu0 }
 0x2e1   : > { %v3308_v56 = vadd.f32 %v3278_v9, %v10330_v25  ;;  %v8104_v40 = vpop.f32.mrb[165].mxu1  ;;  %v8144_v44 = vpop.f32.mrb[185].mxu0 }
 0x2e2   : > { %v3281_v21 = vpop.f32.mrb[166].mxu1  ;;  %v3544_v29 = vpop.f32.mrb[186].mxu0 }
 0x2e3   : > { %v3309_v49 = vadd.f32 %v3281_v21, %v10337_v16  ;;  %v8105_v59 = vpop.f32.mrb[167].mxu1  ;;  %v8145_v4 = vpop.f32.mrb[187].mxu0  ;;  %v10409_v53 = vadd.f32 %v3525_v20, %v3308_v56  ;;  %v4799_v20 = vrot.slane %v8881_v42, 2 }
 0x2e5   : > { %8355 = vmatmul.mubr.msk.bf16.gmra.mrb[16].mxu1 %vm1940_vm2, %v4796_v37  ;;  %v10413_v24 = vadd.f32 %v3528_v51, %v3309_v49  ;;  %v4800_v22 = vsel %vm3818_vm6, %v4797_v5, %v4799_v20 }
 0x2e6   : > { %8358 = vmatprep.mubr.msk.bf16.mxu1 %vm8948_vm0, %v8947_v47 }
 0x2e8   : > { %v3286_v25 = vpop.f32.mrb[168].mxu1  ;;  %v3899_v31 = vpop.f32.mrb[188].mxu0 }
 0x2e9   : > { %v3310_v3 = vadd.f32 %v3286_v25, %v10345_v23  ;;  %v8108_v16 = vpop.f32.mrb[169].mxu1  ;;  %v8184_v36 = vpop.f32.mrb[189].mxu0 }
 0x2ea   : > { %v3289_v35 = vpop.f32.mrb[170].mxu1  ;;  %v3902_v26 = vpop.f32.mrb[190].mxu0 }
 0x2eb   : > { %v3311_v6 = vadd.f32 %v3289_v35, %v10350_v15  ;;  %v8109_v61 = vpop.f32.mrb[171].mxu1  ;;  %v8185_v30 = vpop.f32.mrb[191].mxu0  ;;  %v10420_v28 = vadd.f32 %v3533_v60, %v3310_v3 }
 0x2ed   : > { %8359 = vmatmul.mubr.msk.bf16.gmra.mrb[20].mxu1 %vm1940_vm2, %v4798_v38  ;;  %v10424_v8 = vadd.f32 %v3536_v32, %v3311_v6 }
 0x2ee   : > { %8362 = vmatprep.mubr.msk.bf16.mxu1 %vm8948_vm0, %v8947_v47 }
 0x2f0   : > { %v3294_v23 = vpop.f32.mrb[172].mxu1  ;;  %v3907_v13 = vpop.f32.mrb[192].mxu0 }
 0x2f1   : > { %v3312_v46 = vadd.f32 %v3294_v23, %v10357_v62  ;;  %v8112_v15 = vpop.f32.mrb[173].mxu1  ;;  %v8188_v17 = vpop.f32.mrb[193].mxu0 }
 0x2f2   : > { %v3297_v63 = vpop.f32.mrb[174].mxu1  ;;  %v3910_v19 = vpop.f32.mrb[194].mxu0 }
 0x2f3   : > { %v8113_v51 = vpop.f32.mrb[175].mxu1  ;;  %v8189_v27 = vpop.f32.mrb[195].mxu0  ;;  %v10429_v0 = vadd.f32 %v3541_v14, %v3312_v46 }
 0x2f5   : > { %8363 = vmatmul.mubr.msk.bf16.gmra.mrb[24].mxu1 %vm1940_vm2, %v4800_v22 }
 0x2f6   : > { %8366 = vmatprep.mubr.msk.bf16.mxu1 %vm8948_vm0, %v8947_v47 }
 0x2f8   : > { %v3739_v12 = vpop.f32.mrb[176].mxu1  ;;  %v3915_v55 = vpop.f32.mrb[196].mxu0 }
 0x2f9   : > { %v3793_v45 = vadd.f32 %v3739_v12, %v10365_v7  ;;  %v8152_v62 = vpop.f32.mrb[177].mxu1  ;;  %v8192_v60 = vpop.f32.mrb[197].mxu0 }
 0x2fa   : > { %v3742_v1 = vpop.f32.mrb[178].mxu1  ;;  %v3918_v52 = vpop.f32.mrb[198].mxu0 }
 0x2fb   : > { %v3794_v54 = vadd.f32 %v3742_v1, %v10369_v33  ;;  %v8153_v18 = vpop.f32.mrb[179].mxu1  ;;  %v8193_v32 = vpop.f32.mrb[199].mxu0  ;;  %v10437_v34 = vadd.f32 %v3899_v31, %v3793_v45 }
 0x2fd   : > { %8367 = vmatmul.mubr.msk.bf16.gmra.mrb[28].mxu1 %vm1940_vm2, %v4799_v20  ;;  %v10440_v58 = vadd.f32 %v3902_v26, %v3794_v54  ;;  %vm6619_vm2 = vcmask 1041408  }
 0x2fe   : > { %8406 = vmatprep.mubr.msk.bf16.mxu1 %vm8948_vm0, %v8947_v47 }
 0x300   : > { %v3747_v41 = vpop.f32.mrb[180].mxu1  ;;  %v3923_v10 = vpop.f32.mrb[200].mxu0 }
 0x301   : > { %v3795_v7 = vadd.f32 %v3747_v41, %v10376_v2  ;;  %v8156_v43 = vpop.f32.mrb[181].mxu1  ;;  %v8196_v9 = vpop.f32.mrb[201].mxu0 }
 0x302   : > { %v3750_v14 = vpop.f32.mrb[182].mxu1  ;;  %v3926_v56 = vpop.f32.mrb[202].mxu0 }
 0x303   : > { %v3796_v33 = vadd.f32 %v3750_v14, %v10380_v48  ;;  %v8157_v40 = vpop.f32.mrb[183].mxu1  ;;  %v8197_v44 = vpop.f32.mrb[203].mxu0  ;;  %v10446_v21 = vadd.f32 %v3907_v13, %v3795_v7  ;;  %v8882_v48 = vld [vmem:[%s11108_s5 + $0x20] sm:$0xff]  }
 0x304   : > { %8371 = vmatpush3.bf16.msra.mxu0 %v8882_v48 }
 0x305   : > { %v10448_v29 = vadd.f32 %v3910_v19, %v3796_v33  ;;  %8372 = vmatprep.subr.bf16.mxu0 %v8947_v47 }
 0x308   : > { %v3755_v49 = vpop.f32.mrb[184].mxu1  ;;  %v3931_v59 = vpop.f32.mrb[204].mxu0 }
 0x309   : > { %v3797_v4 = vadd.f32 %v3755_v49, %v10387_v39  ;;  %v8160_v37 = vpop.f32.mrb[185].mxu1  ;;  %v8200_v5 = vpop.f32.mrb[205].mxu0 }
 0x30a   : > { %v3758_v25 = vpop.f32.mrb[186].mxu1  ;;  %v3934_v2 = vpop.f32.mrb[206].mxu0 }
 0x30b   : > { %v3798_v31 = vadd.f32 %v3758_v25, %v10391_v50  ;;  %v8161_v3 = vpop.f32.mrb[187].mxu1  ;;  %v8201_v16 = vpop.f32.mrb[207].mxu0  ;;  %v10452_v36 = vadd.f32 %v3915_v55, %v3797_v4 }
 0x30d   : > { %v10457_v35 = vadd.f32 %v3918_v52, %v3798_v31 }
 0x310   : > { %v3763_v39 = vpop.f32.mrb[188].mxu1  ;;  %v3939_v26 = vpop.f32.mrb[208].mxu0 }
 0x311   : > { %v3799_v6 = vadd.f32 %v3763_v39, %v10398_v11  ;;  %v8164_v61 = vpop.f32.mrb[189].mxu1  ;;  %v8204_v30 = vpop.f32.mrb[209].mxu0  ;;  %v8883_v11 = vld [vmem:[%s11108_s5 + $0x28] sm:$0xff]  }
 0x312   : > { %v3766_v50 = vpop.f32.mrb[190].mxu1  ;;  %v3942_v38 = vpop.f32.mrb[210].mxu0  ;;  %8373 = vmatpush3.bf16.msra.mxu0 %v8883_v11 }
 0x313   : > { %v3800_v42 = vadd.f32 %v3766_v50, %v10402_v57  ;;  %v8165_v23 = vpop.f32.mrb[191].mxu1  ;;  %v8205_v13 = vpop.f32.mrb[211].mxu0  ;;  %v10462_v20 = vadd.f32 %v3923_v10, %v3799_v6  ;;  %8374 = vmatprep.subr.bf16.mxu0 %v8947_v47  ;;  %v8885_v6 = vld [vmem:[%s11108_s5] sm:$0xff]  }
 0x314   : > { %8399 = vmatpush3.bf16.msra.mxu1 %v8885_v6  ;;  %v8886_v13 = vld [vmem:[%s11108_s5 + $0x8] sm:$0xff]  }
 0x315   : > { %v10464_v46 = vadd.f32 %v3926_v56, %v3800_v42  ;;  %8400 = vmatprep.subr.bf16.mxu1 %v8947_v47 }
 0x318   : > { %v3771_v15 = vpop.f32.mrb[192].mxu1  ;;  %v3947_v17 = vpop.f32.mrb[212].mxu0  ;;  %8401 = vmatpush3.bf16.msra.mxu1 %v8886_v13 }
 0x319   : > { %v3801_v63 = vadd.f32 %v3771_v15, %v10409_v53  ;;  %v8168_v19 = vpop.f32.mrb[193].mxu1  ;;  %v8208_v51 = vpop.f32.mrb[213].mxu0  ;;  %8402 = vmatprep.subr.bf16.mxu1 %v8947_v47 }
 0x31a   : > { %v3774_v27 = vpop.f32.mrb[194].mxu1  ;;  %v3950_v22 = vpop.f32.mrb[214].mxu0  ;;  %v8887_v51 = vld [vmem:[%s11108_s5 + $0x10] sm:$0xff]  }
 0x31b   : > { %v3802_v57 = vadd.f32 %v3774_v27, %v10413_v24  ;;  %v8169_v12 = vpop.f32.mrb[195].mxu1  ;;  %v8209_v55 = vpop.f32.mrb[215].mxu0  ;;  %v10471_v45 = vadd.f32 %v3931_v59, %v3801_v63 }
 0x31c   : > { %8403 = vmatpush3.bf16.msra.mxu1 %v8887_v51  ;;  %v8888_v12 = vld [vmem:[%s11108_s5 + $0x18] sm:$0xff]  }
 0x31d   : > { %v10474_v62 = vadd.f32 %v3934_v2, %v3802_v57  ;;  %8404 = vmatprep.subr.bf16.mxu1 %v8947_v47  ;;  %v8889_v55 = vld [vmem:[%s11108_s5 + $0x38] sm:$0xff]  }
 0x320   : > { %v3779_v53 = vpop.f32.mrb[196].mxu1  ;;  %v4304_v60 = vpop.f32.mrb[216].mxu0  ;;  %8405 = vmatpush3.bf16.msra.mxu1 %v8888_v12 }
 0x321   : > { %v3803_v1 = vadd.f32 %v3779_v53, %v10420_v28  ;;  %v8172_v52 = vpop.f32.mrb[197].mxu1  ;;  %v8248_v54 = vpop.f32.mrb[217].mxu0  ;;  %8454 = vmatprep.subr.bf16.mxu1 %v8947_v47 }
 0x322   : > { %v3782_v18 = vpop.f32.mrb[198].mxu1  ;;  %v4307_v32 = vpop.f32.mrb[218].mxu0 }
 0x323   : > { %v3804_v41 = vadd.f32 %v3782_v18, %v10424_v8  ;;  %v8173_v24 = vpop.f32.mrb[199].mxu1  ;;  %v8249_v10 = vpop.f32.mrb[219].mxu0  ;;  %v10478_v7 = vadd.f32 %v3939_v26, %v3803_v1  ;;  %v8884_v26 = vld [vmem:[%s11108_s5 + $0x30] sm:$0xff]  }
 0x324   : > { %8375 = vmatpush3.bf16.msra.mxu0 %v8884_v26 }
 0x325   : > { %v10480_v43 = vadd.f32 %v3942_v38, %v3804_v41  ;;  %8376 = vmatprep.subr.bf16.mxu0 %v8947_v47 }
 0x328   : > { %v3787_v9 = vpop.f32.mrb[200].mxu1  ;;  %v4312_v14 = vpop.f32.mrb[220].mxu0  ;;  %8377 = vmatpush3.bf16.msra.mxu0 %v8889_v55 }
 0x329   : > { %v3805_v56 = vadd.f32 %v3787_v9, %v10429_v0  ;;  %v8176_v33 = vpop.f32.mrb[201].mxu1  ;;  %v8252_v40 = vpop.f32.mrb[221].mxu0  ;;  %8426 = vmatprep.subr.bf16.mxu0 %v8947_v47 }
 0x32a   : > { %v3790_v44 = vpop.f32.mrb[202].mxu1  ;;  %v4315_v28 = vpop.f32.mrb[222].mxu0 }
 0x32b   : > { %v8177_v49 = vpop.f32.mrb[203].mxu1  ;;  %v8253_v59 = vpop.f32.mrb[223].mxu0  ;;  %v10483_v4 = vadd.f32 %v3947_v17, %v3805_v56 }
 0x330   : > { %v4058_v37 = vpop.f32.mrb[204].mxu1  ;;  %v4320_v8 = vpop.f32.mrb[224].mxu0 }
 0x331   : > { %v4112_v5 = vadd.f32 %v4058_v37, %v10437_v34  ;;  %v8216_v25 = vpop.f32.mrb[205].mxu1  ;;  %v8256_v2 = vpop.f32.mrb[225].mxu0 }
 0x332   : > { %v4061_v31 = vpop.f32.mrb[206].mxu1  ;;  %v4323_v3 = vpop.f32.mrb[226].mxu0 }
 0x333   : > { %v4113_v16 = vadd.f32 %v4061_v31, %v10440_v58  ;;  %v8217_v48 = vpop.f32.mrb[207].mxu1  ;;  %v8257_v0 = vpop.f32.mrb[227].mxu0  ;;  %v10487_v39 = vadd.f32 %v4304_v60, %v4112_v5 }
 0x335   : > { %v10495_v61 = vadd.f32 %v4307_v32, %v4113_v16 }
 0x338   : > { %v4066_v34 = vpop.f32.mrb[208].mxu1  ;;  %v4328_v58 = vpop.f32.mrb[228].mxu0 }
 0x339   : > { %v4114_v30 = vadd.f32 %v4066_v34, %v10446_v21  ;;  %v8220_v50 = vpop.f32.mrb[209].mxu1  ;;  %v8260_v38 = vpop.f32.mrb[229].mxu0 }
 0x33a   : > { %v4069_v42 = vpop.f32.mrb[210].mxu1  ;;  %v4331_v23 = vpop.f32.mrb[230].mxu0 }
 0x33b   : > { %v4115_v15 = vadd.f32 %v4069_v42, %v10448_v29  ;;  %v8221_v17 = vpop.f32.mrb[211].mxu1  ;;  %v8261_v63 = vpop.f32.mrb[231].mxu0  ;;  %v10504_v19 = vadd.f32 %v4312_v14, %v4114_v30 }
 0x33d   : > { %v10509_v21 = vadd.f32 %v4315_v28, %v4115_v15 }
 0x340   : > { %v4074_v11 = vpop.f32.mrb[212].mxu1  ;;  %v4336_v27 = vpop.f32.mrb[232].mxu0 }
 0x341   : > { %v4116_v22 = vadd.f32 %v4074_v11, %v10452_v36  ;;  %v8224_v57 = vpop.f32.mrb[213].mxu1  ;;  %v8264_v29 = vpop.f32.mrb[233].mxu0 }
 0x342   : > { %v4077_v53 = vpop.f32.mrb[214].mxu1  ;;  %v4339_v60 = vpop.f32.mrb[234].mxu0 }
 0x343   : > { %v4117_v1 = vadd.f32 %v4077_v53, %v10457_v35  ;;  %v8225_v52 = vpop.f32.mrb[215].mxu1  ;;  %v8265_v54 = vpop.f32.mrb[235].mxu0  ;;  %v10521_v18 = vadd.f32 %v4320_v8, %v4116_v22 }
 0x345   : > { %v10524_v36 = vadd.f32 %v4323_v3, %v4117_v1 }
 0x348   : > { %v4082_v32 = vpop.f32.mrb[216].mxu1  ;;  %v4344_v41 = vpop.f32.mrb[236].mxu0 }
 0x349   : > { %v4118_v24 = vadd.f32 %v4082_v32, %v10462_v20  ;;  %v8228_v10 = vpop.f32.mrb[217].mxu1  ;;  %v8268_v9 = vpop.f32.mrb[237].mxu0 }
 0x34a   : > { %v4085_v14 = vpop.f32.mrb[218].mxu1  ;;  %v4347_v35 = vpop.f32.mrb[238].mxu0 }
 0x34b   : > { %v4119_v56 = vadd.f32 %v4085_v14, %v10464_v46  ;;  %v8229_v33 = vpop.f32.mrb[219].mxu1  ;;  %v8269_v40 = vpop.f32.mrb[239].mxu0  ;;  %v10529_v44 = vadd.f32 %v4328_v58, %v4118_v24 }
 0x34d   : > { %v10531_v28 = vadd.f32 %v4331_v23, %v4119_v56 }
 0x350   : > { %v4090_v49 = vpop.f32.mrb[220].mxu1  ;;  %v4352_v59 = vpop.f32.mrb[240].mxu0 }
 0x351   : > { %v4120_v37 = vadd.f32 %v4090_v49, %v10471_v45  ;;  %v8232_v8 = vpop.f32.mrb[221].mxu1  ;;  %v8272_v5 = vpop.f32.mrb[241].mxu0 }
 0x352   : > { %v4093_v25 = vpop.f32.mrb[222].mxu1  ;;  %v4355_v20 = vpop.f32.mrb[242].mxu0 }
 0x353   : > { %v4121_v2 = vadd.f32 %v4093_v25, %v10474_v62  ;;  %v8233_v31 = vpop.f32.mrb[223].mxu1  ;;  %v8273_v3 = vpop.f32.mrb[243].mxu0  ;;  %v10535_v16 = vadd.f32 %v4336_v27, %v4120_v37 }
 0x355   : > { %v10537_v46 = vadd.f32 %v4339_v60, %v4121_v2 }
 0x358   : > { %v4098_v48 = vpop.f32.mrb[224].mxu1  ;;  %v4709_v0 = vpop.f32.mrb[244].mxu0 }
 0x359   : > { %v4122_v26 = vadd.f32 %v4098_v48, %v10478_v7  ;;  %v8236_v6 = vpop.f32.mrb[225].mxu1  ;;  %v8312_v34 = vpop.f32.mrb[245].mxu0 }
 0x35a   : > { %v4101_v58 = vpop.f32.mrb[226].mxu1  ;;  %v4712_v45 = vpop.f32.mrb[246].mxu0 }
 0x35b   : > { %v4123_v30 = vadd.f32 %v4101_v58, %v10480_v43  ;;  %v8237_v50 = vpop.f32.mrb[227].mxu1  ;;  %v8313_v38 = vpop.f32.mrb[247].mxu0  ;;  %v10541_v42 = vadd.f32 %v4344_v41, %v4122_v26 }
 0x35d   : > { %v10543_v62 = vadd.f32 %v4347_v35, %v4123_v30 }
 0x360   : > { %v4106_v23 = vpop.f32.mrb[228].mxu1  ;;  %v4717_v13 = vpop.f32.mrb[248].mxu0 }
 0x361   : > { %v4124_v15 = vadd.f32 %v4106_v23, %v10483_v4  ;;  %v8240_v17 = vpop.f32.mrb[229].mxu1  ;;  %v8316_v63 = vpop.f32.mrb[249].mxu0 }
 0x362   : > { %v4109_v51 = vpop.f32.mrb[230].mxu1  ;;  %v4720_v7 = vpop.f32.mrb[250].mxu0 }
 0x363   : > { %v8241_v11 = vpop.f32.mrb[231].mxu1  ;;  %v8317_v27 = vpop.f32.mrb[251].mxu0  ;;  %v10546_v22 = vadd.f32 %v4352_v59, %v4124_v15 }
 0x368   : > { %v4550_v57 = vpop.f32.mrb[232].mxu1  ;;  %v4725_v43 = vpop.f32.mrb[252].mxu0 }
 0x369   : > { %v4604_v29 = vadd.f32 %v4550_v57, %v10487_v39  ;;  %v8280_v12 = vpop.f32.mrb[233].mxu1  ;;  %v8320_v55 = vpop.f32.mrb[253].mxu0 }
 0x36a   : > { %v4553_v53 = vpop.f32.mrb[234].mxu1  ;;  %v4728_v60 = vpop.f32.mrb[254].mxu0 }
 0x36b   : > { %v4605_v1 = vadd.f32 %v4553_v53, %v10495_v61  ;;  %v8281_v52 = vpop.f32.mrb[235].mxu1  ;;  %v8321_v4 = vpop.f32.mrb[255].mxu0  ;;  %v10550_v54 = vadd.f32 %v4709_v0, %v4604_v29 }
 0x36d   : > { %v10552_v32 = vadd.f32 %v4712_v45, %v4605_v1 }
 0x370   : > { %v4558_v41 = vpop.f32.mrb[236].mxu1  ;;  %v4733_v24 = vpop.f32.mrb[0].mxu0 }
 0x371   : > { %v4606_v10 = vadd.f32 %v4558_v41, %v10504_v19  ;;  %v8284_v9 = vpop.f32.mrb[237].mxu1  ;;  %v8324_v14 = vpop.f32.mrb[1].mxu0 }
 0x372   : > { %v4561_v35 = vpop.f32.mrb[238].mxu1  ;;  %v4736_v39 = vpop.f32.mrb[2].mxu0 }
 0x373   : > { %v4607_v56 = vadd.f32 %v4561_v35, %v10509_v21  ;;  %v8285_v33 = vpop.f32.mrb[239].mxu1  ;;  %v8325_v40 = vpop.f32.mrb[3].mxu0  ;;  %v10556_v49 = vadd.f32 %v4717_v13, %v4606_v10 }
 0x375   : > { %v10558_v61 = vadd.f32 %v4720_v7, %v4607_v56 }
 0x378   : > { %v4566_v59 = vpop.f32.mrb[240].mxu1  ;;  %v4741_v37 = vpop.f32.mrb[4].mxu0 }
 0x379   : > { %v4608_v8 = vadd.f32 %v4566_v59, %v10521_v18  ;;  %v8288_v5 = vpop.f32.mrb[241].mxu1  ;;  %v8328_v25 = vpop.f32.mrb[5].mxu0 }
 0x37a   : > { %v4569_v20 = vpop.f32.mrb[242].mxu1  ;;  %v4744_v19 = vpop.f32.mrb[6].mxu0 }
 0x37b   : > { %v4609_v2 = vadd.f32 %v4569_v20, %v10524_v36  ;;  %v8289_v31 = vpop.f32.mrb[243].mxu1  ;;  %v8329_v3 = vpop.f32.mrb[7].mxu0  ;;  %v10562_v48 = vadd.f32 %v4725_v43, %v4608_v8 }
 0x37d   : > { %v10564_v21 = vadd.f32 %v4728_v60, %v4609_v2 }
 0x380   : > { %v4574_v0 = vpop.f32.mrb[244].mxu1  ;;  %v4749_v26 = vpop.f32.mrb[8].mxu0 }
 0x381   : > { %v4610_v6 = vadd.f32 %v4574_v0, %v10529_v44  ;;  %v8292_v34 = vpop.f32.mrb[245].mxu1  ;;  %v8332_v58 = vpop.f32.mrb[9].mxu0 }
 0x382   : > { %v4577_v45 = vpop.f32.mrb[246].mxu1  ;;  %v4752_v18 = vpop.f32.mrb[10].mxu0 }
 0x383   : > { %v4611_v30 = vadd.f32 %v4577_v45, %v10531_v28  ;;  %v8293_v50 = vpop.f32.mrb[247].mxu1  ;;  %v8333_v38 = vpop.f32.mrb[11].mxu0  ;;  %v10568_v23 = vadd.f32 %v4733_v24, %v4610_v6 }
 0x385   : > { %v10570_v36 = vadd.f32 %v4736_v39, %v4611_v30 }
 0x388   : > { %v4582_v13 = vpop.f32.mrb[248].mxu1  ;;  %v4757_v15 = vpop.f32.mrb[12].mxu0 }
 0x389   : > { %v4612_v17 = vadd.f32 %v4582_v13, %v10535_v16  ;;  %v8296_v63 = vpop.f32.mrb[249].mxu1  ;;  %v8336_v51 = vpop.f32.mrb[13].mxu0 }
 0x38a   : > { %v4585_v7 = vpop.f32.mrb[250].mxu1  ;;  %v4760_v44 = vpop.f32.mrb[14].mxu0 }
 0x38b   : > { %v4613_v11 = vadd.f32 %v4585_v7, %v10537_v46  ;;  %v8297_v27 = vpop.f32.mrb[251].mxu1  ;;  %v8337_v57 = vpop.f32.mrb[15].mxu0  ;;  %v10574_v43 = vadd.f32 %v4741_v37, %v4612_v17  ;;  %v8896_v7 = vld [vmem:[%s11108_s5 + $0x68] sm:$0xff]  }
 0x38d   : > { %v10576_v28 = vadd.f32 %v4744_v19, %v4613_v11 }
 0x390   : > { %v4590_v29 = vpop.f32.mrb[252].mxu1 }
 0x391   : > { %v4614_v12 = vadd.f32 %v4590_v29, %v10541_v42  ;;  %v8300_v55 = vpop.f32.mrb[253].mxu1  ;;  %v10590_v42 = vld [vmem:[%s11107_s4] ss:$0 sm:$0xff] }
 0x392   : > { %v4593_v53 = vpop.f32.mrb[254].mxu1 }
 0x393   : > { %v4615_v60 = vadd.f32 %v4593_v53, %v10543_v62  ;;  %v8301_v16 = vpop.f32.mrb[255].mxu1  ;;  %v10580_v1 = vadd.f32 %v4749_v26, %v4614_v12 }
 0x395   : > { %v10582_v52 = vadd.f32 %v4752_v18, %v4615_v60  ;;  %v8899_v60 = vld [vmem:[%s11108_s5 + $0x70] sm:$0xff]  }
 0x398   : > { %v4598_v4 = vpop.f32.mrb[0].mxu1 }
 0x399   : > { %v4616_v46 = vadd.f32 %v4598_v4, %v10546_v22  ;;  %v8304_v41 = vpop.f32.mrb[1].mxu1 }
 0x39a   : > { %v4601_v24 = vpop.f32.mrb[2].mxu1 }
 0x39b   : > { %v8305_v10 = vpop.f32.mrb[3].mxu1  ;;  %v10585_v9 = vadd.f32 %v4757_v15, %v4616_v46 }
 0x3a0   : > { %v4868_v14 = vpop.f32.mrb[4].mxu1 }
 0x3a1   : > { %v4922_v62 = vadd.f32 %v4868_v14, %v10550_v54  ;;  %v8344_v35 = vpop.f32.mrb[5].mxu1 }
 0x3a2   : > { %v4871_v39 = vpop.f32.mrb[6].mxu1  ;;  %v8891_v35 = vld [vmem:[%s11108_s5 + $0x40] sm:$0xff]  }
 0x3a3   : > { %v4942_v56 = vadd.f32 %v10590_v42, %v4922_v62  ;;  %v4923_v33 = vadd.f32 %v4871_v39, %v10552_v32  ;;  %v8345_v22 = vpop.f32.mrb[7].mxu1 }
 0x3a5   : > { %v4955_v40 = vmax.f32 %v4942_v56, 0.0  ;;  %v4943_v59 = vadd.f32 %v10590_v42, %v4923_v33  ;;  %v8900_v56 = vld [vmem:[%s11108_s5 + $0x78] sm:$0xff]  }
 0x3a7   : > { %v7378_v37 = vpack.c.bf16 %v4955_v40, %v4955_v40  ;;  %v4956_v8 = vmax.f32 %v4943_v59, 0.0 }
 0x3a8   : > { %v4876_v5 = vpop.f32.mrb[8].mxu1 }
 0x3a9   : > { %5022 = vst.msk [vmem:[#allocation3] sm:$0xf] %vm5021_vm7, %v7378_v37  ;;  %v7379_v25 = vpack.c.bf16 %v4956_v8, %v4956_v8  ;;  %v4924_v20 = vadd.f32 %v4876_v5, %v10556_v49  ;;  %v8348_v54 = vpop.f32.mrb[9].mxu1  ;;  %v8893_v8 = vld [vmem:[%s11108_s5 + $0x48] sm:$0xff]  }
 0x3aa   : > { %v4879_v19 = vpop.f32.mrb[10].mxu1 }
 0x3ab   : > { %5023 = vst.msk [vmem:[#allocation3 + $0x4] sm:$0xf] %vm5021_vm7, %v7379_v25  ;;  %v4944_v2 = vadd.f32 %v10590_v42, %v4924_v20  ;;  %v4925_v32 = vadd.f32 %v4879_v19, %v10558_v61  ;;  %v8349_v31 = vpop.f32.mrb[11].mxu1  ;;  %v8895_v61 = vld [vmem:[%s11108_s5 + $0x60] sm:$0xff]  }
 0x3ad   : > { %v4957_v3 = vmax.f32 %v4944_v2, 0.0  ;;  %v4945_v0 = vadd.f32 %v10590_v42, %v4925_v32 }
 0x3af   : > { %v7380_v26 = vpack.c.bf16 %v4957_v3, %v4957_v3  ;;  %v4958_v6 = vmax.f32 %v4945_v0, 0.0 }
 0x3b0   : > { %v4884_v34 = vpop.f32.mrb[12].mxu1  ;;  %v5040_v18 = vld [vmem:[#allocation3] sm:$0xf] }
 0x3b1   : > { %5024 = vst.msk [vmem:[#allocation3 + $0x8] sm:$0xf] %vm5021_vm7, %v7380_v26  ;;  %v7381_v58 = vpack.c.bf16 %v4958_v6, %v4958_v6  ;;  %v4926_v49 = vadd.f32 %v4884_v34, %v10562_v48  ;;  %v8352_v45 = vpop.f32.mrb[13].mxu1 }
 0x3b2   : > { %v10604_v30 = vld [vmem:[#allocation3 + $0x4] sm:$0xf]  ;;  %v4887_v50 = vpop.f32.mrb[14].mxu1 }
 0x3b3   : > { %v7203_v38 = vcombine.low %v5040_v18, %v10604_v30  ;;  %5025 = vst.msk [vmem:[#allocation3 + $0xc] sm:$0xf] %vm5021_vm7, %v7381_v58  ;;  %v4946_v13 = vadd.f32 %v10590_v42, %v4926_v49  ;;  %v4927_v15 = vadd.f32 %v4887_v50, %v10564_v21  ;;  %v8353_v17 = vpop.f32.mrb[15].mxu1 }
 0x3b5   : > { %v4959_v48 = vmax.f32 %v4946_v13, 0.0  ;;  %v4947_v63 = vadd.f32 %v10590_v42, %v4927_v15  ;;  %8407 = vmatmul.mubr.msk.bf16.vlgmr.msra.gmra.mrb[32].mxu1 %vm5154_vm8, %v7203_v38  ;;  %v5094_v51 = vshll.u32 %v7203_v38, 16 }
 0x3b6   : > { %8410 = vmatprep.mubr.msk.bf16.mxu1 %vm8948_vm0, %v8947_v47  ;;  %8455 = vmatpush3.bf16.msra.mxu1 %v8895_v61  ;;  %v8903_v61 = vld [vmem:[%s11108_s5 + $0x58] sm:$0xff]  }
 0x3b7   : > { %v7382_v44 = vpack.c.bf16 %v4959_v48, %v4959_v48  ;;  %v4960_v11 = vmax.f32 %v4947_v63, 0.0  ;;  %8456 = vmatprep.subr.bf16.mxu1 %v8947_v47  ;;  %v5096_v53 = vrot.slane %v5094_v51, 1 }
 0x3b8   : > { %v4892_v21 = vpop.f32.mrb[16].mxu1  ;;  %v10683_v15 = vld [vmem:[#allocation3 + $0x8] sm:$0xf] }
 0x3b9   : > { %5026 = vst.msk [vmem:[#allocation3 + $0x10] sm:$0xf] %vm5021_vm7, %v7382_v44  ;;  %v7383_v27 = vpack.c.bf16 %v4960_v11, %v4960_v11  ;;  %v4928_v57 = vadd.f32 %v4892_v21, %v10568_v23  ;;  %v8356_v29 = vpop.f32.mrb[17].mxu1  ;;  %v5092_v23 = vshrl.u32 %v7203_v38, 16  ;;  %v5498_v44 = vld [vmem:[#allocation3 + $0x4] sm:$0xe] }
 0x3ba   : > { %v4895_v12 = vpop.f32.mrb[18].mxu1  ;;  %v10623_v55 = vld [vmem:[#allocation3 + $0x8] sm:$0xff]   ;;  %8457 = vmatpush3.bf16.msra.mxu1 %v8896_v7 }
 0x3bb   : > { %5027 = vst.msk [vmem:[#allocation3 + $0x14] sm:$0xf] %vm5021_vm7, %v7383_v27  ;;  %v4948_v16 = vadd.f32 %v10590_v42, %v4928_v57  ;;  %v4929_v4 = vadd.f32 %v4895_v12, %v10570_v36  ;;  %v8357_v46 = vpop.f32.mrb[19].mxu1  ;;  %8458 = vmatprep.subr.bf16.mxu1 %v8947_v47  ;;  %v5099_v41 = vshll.u32 %v10623_v55, 16  ;;  %v5097_v14 = vor.u32 %v5096_v53, %v5092_v23  ;;  %v5500_v17 = vld [vmem:[#allocation3 + $0xc] sm:$0xf] }
 0x3bc   : > { %v5103_v19 = vshrl.u32 %v10623_v55, 16  ;;  %v7237_v57 = vcombine.low %v5498_v44, %v10683_v15 }
 0x3bd   : > { %v4961_v24 = vmax.f32 %v4948_v16, 0.0  ;;  %v4949_v10 = vadd.f32 %v10590_v42, %v4929_v4  ;;  %8411 = vmatmul.mubr.msk.bf16.gmra.mrb[36].mxu1 %vm5154_vm8, %v10623_v55  ;;  %v5101_v62 = vrot.slane %v5099_v41, 1 }
 0x3be   : > { %8414 = vmatprep.mubr.msk.bf16.mxu1 %vm8948_vm0, %v8947_v47  ;;  %8459 = vmatpush3.bf16.msra.mxu1 %v8899_v60 }
 0x3bf   : > { %v7384_v36 = vpack.c.bf16 %v4961_v24, %v4961_v24  ;;  %v4962_v39 = vmax.f32 %v4949_v10, 0.0  ;;  %8460 = vmatprep.subr.bf16.mxu1 %v8947_v47  ;;  %v5102_v22 = vsel %vm2208_vm3, %v5097_v14, %v5101_v62  ;;  %v5105_v3 = vor.u32 %v5103_v19, %v5101_v62 }
 0x3c0   : > { %v4900_v33 = vpop.f32.mrb[20].mxu1  ;;  %8379 = vmatmul.mubr.msk.bf16.vlgmr.msra.gmra.mrb[16].mxu0 %vm5154_vm8, %v5102_v22  ;;  %v5501_v26 = vld [vmem:[#allocation3 + $0x10] sm:$0xf]  ;;  %v5542_v10 = vshrl.u32 %v7237_v57, 16 }
 0x3c1   : > { %5028 = vst.msk [vmem:[#allocation3 + $0x18] sm:$0xf] %vm5021_vm7, %v7384_v36  ;;  %v7385_v40 = vpack.c.bf16 %v4962_v39, %v4962_v39  ;;  %v4930_v59 = vadd.f32 %v4900_v33, %v10574_v43  ;;  %v8360_v37 = vpop.f32.mrb[21].mxu1  ;;  %8427 = vmatpush3.bf16.msra.mxu0 %v8891_v35  ;;  %8382 = vmatprep.mubr.msk.bf16.mxu0 %vm8948_vm0, %v8947_v47  ;;  %v5545_v36 = vshll.u32 %v7237_v57, 16 }
 0x3c2   : > { %v4903_v5 = vpop.f32.mrb[22].mxu1  ;;  %v10652_v25 = vld [vmem:[#allocation3 + $0x10] sm:$0xff]   ;;  %8428 = vmatprep.subr.bf16.mxu0 %v8947_v47  ;;  %8461 = vmatpush3.bf16.msra.mxu1 %v8900_v56  ;;  %v10691_v11 = vcombine.low %v5500_v17, %v5501_v26 }
 0x3c3   : > { %5029 = vst.msk [vmem:[#allocation3 + $0x1c] sm:$0xf] %vm5021_vm7, %v7385_v40  ;;  %v4950_v20 = vadd.f32 %v10590_v42, %v4930_v59  ;;  %v4931_v43 = vadd.f32 %v4903_v5, %v10576_v28  ;;  %v8361_v54 = vpop.f32.mrb[23].mxu1  ;;  %v5107_v2 = vshll.u32 %v10652_v25, 16  ;;  %8510 = vmatprep.subr.bf16.mxu1 %v8947_v47  ;;  %v8898_v28 = vld [vmem:[%s11108_s5 + $0x50] sm:$0xff]   ;;  %v5111_v51 = vshrl.u32 %v10652_v25, 16 }
 0x3c4   : > { %v5550_v4 = vshrl.u32 %v10691_v11, 16  ;;  %v5553_v46 = vshll.u32 %v10691_v11, 16  ;;  %v5037_v37 = vld [vmem:[#allocation3 + $0x30] sm:$0x1] }
 0x3c5   : > { %v4963_v32 = vmax.f32 %v4950_v20, 0.0  ;;  %v4951_v31 = vadd.f32 %v10590_v42, %v4931_v43  ;;  %8415 = vmatmul.mubr.msk.bf16.gmra.mrb[40].mxu1 %vm5154_vm8, %v10652_v25  ;;  %v5109_v0 = vrot.slane %v5107_v2, 1  ;;  %8429 = vmatpush3.bf16.msra.mxu0 %v8893_v8  ;;  %v5544_v20 = vrot.slane %v5542_v10, 1 }
 0x3c6   : > { %8418 = vmatprep.mubr.msk.bf16.mxu1 %vm8948_vm0, %v8947_v47  ;;  %8430 = vmatprep.subr.bf16.mxu0 %v8947_v47  ;;  %v5552_v33 = vrot.slane %v5550_v4, 1  ;;  %v5555_v22 = vrot.slane %v5553_v46, 2  ;;  %v5547_v43 = vrot.slane %v5545_v36, 2  ;;  %v8912_v36 = vld [vmem:[%s11108_s5 + $0x90] sm:$0xff]  }
 0x3c7   : > { %v7386_v6 = vpack.c.bf16 %v4963_v32, %v4963_v32  ;;  %v4964_v34 = vmax.f32 %v4951_v31, 0.0  ;;  %v5110_v49 = vsel %vm2208_vm3, %v5105_v3, %v5109_v0  ;;  %v5113_v29 = vor.u32 %v5111_v51, %v5109_v0  ;;  %v8913_v51 = vld [vmem:[%s11108_s5 + $0xb0] sm:$0xff]  }
 0x3c8   : > { %v4908_v58 = vpop.f32.mrb[24].mxu1  ;;  %8383 = vmatmul.mubr.msk.bf16.gmra.mrb[20].mxu0 %vm5154_vm8, %v5110_v49  ;;  %v10717_v40 = vld [vmem:[#allocation3 + $0x14] sm:$0xff]   ;;  %v5556_v32 = vor.u32 %v5555_v22, %v5552_v33  ;;  %v5548_v26 = vor.u32 %v5547_v43, %v5544_v20  ;;  %v5707_v33 = vld [vmem:[#allocation3 + $0x4] sm:$0xc] }
 0x3c9   : > { %5030 = vst.msk [vmem:[#allocation3 + $0x20] sm:$0xf] %vm5021_vm7, %v7386_v6  ;;  %v7387_v45 = vpack.c.bf16 %v4964_v34, %v4964_v34  ;;  %v4932_v18 = vadd.f32 %v4908_v58, %v10580_v1  ;;  %v8364_v50 = vpop.f32.mrb[25].mxu1  ;;  %8386 = vmatprep.mubr.msk.bf16.mxu0 %vm8948_vm0, %v8947_v47  ;;  %8431 = vmatpush3.bf16.msra.mxu0 %v8898_v28  ;;  %v5559_v31 = vshrl.u32 %v10717_v40, 16  ;;  %v5562_v3 = vshll.u32 %v10717_v40, 16  ;;  %v8910_v6 = vld [vmem:[%s11108_s5 + $0xa0] sm:$0xff]  }
 0x3ca   : > { %v4911_v38 = vpop.f32.mrb[26].mxu1  ;;  %v10679_v13 = vld [vmem:[#allocation3 + $0x18] sm:$0xff]   ;;  %8432 = vmatprep.subr.bf16.mxu0 %v8947_v47  ;;  %v5557_v34 = vsel %vm3363_vm5, %v5548_v26, %v5556_v32  ;;  %v8911_v50 = vld [vmem:[%s11108_s5 + $0xa8] sm:$0xff]  }
 0x3cb   : > { %5031 = vst.msk [vmem:[#allocation3 + $0x24] sm:$0xf] %vm5021_vm7, %v7387_v45  ;;  %v4952_v1 = vadd.f32 %v10590_v42, %v4932_v18  ;;  %v4933_v48 = vadd.f32 %v4911_v38, %v10582_v52  ;;  %v8365_v63 = vpop.f32.mrb[27].mxu1  ;;  %v5115_v7 = vshll.u32 %v10679_v13, 16  ;;  %v5119_v8 = vshrl.u32 %v10679_v13, 16 }
 0x3cc   : > { %v5561_v58 = vrot.slane %v5559_v31, 1  ;;  %v5564_v49 = vrot.slane %v5562_v3, 2  ;;  %v5350_v63 = vld [vmem:[#allocation3] sm:$0xe]  ;;  %v5372_v22 = vrot.slane %v10679_v13, 1  ;;  %v5876_v26 = vrot.slane %v5562_v3, 3 }
 0x3cd   : > { %v4965_v21 = vmax.f32 %v4952_v1, 0.0  ;;  %v4953_v27 = vadd.f32 %v10590_v42, %v4933_v48  ;;  %8419 = vmatmul.mubr.msk.bf16.gmra.mrb[44].mxu1 %vm5154_vm8, %v10679_v13  ;;  %v5117_v52 = vrot.slane %v5115_v7, 1  ;;  %8433 = vmatpush3.bf16.msra.mxu0 %v8903_v61  ;;  %v7226_v7 = vcombine.low %v5350_v63, %v10604_v30  ;;  %v8915_v30 = vld [vmem:[%s11108_s5 + $0xb8] sm:$0xff]  }
 0x3ce   : > { %8422 = vmatprep.mubr.msk.bf16.mxu1 %vm8948_vm0, %v8947_v47  ;;  %8482 = vmatprep.subr.bf16.mxu0 %v8947_v47  ;;  %v5565_v38 = vor.u32 %v5564_v49, %v5561_v58  ;;  %v5871_v13 = vrot.slane %v5550_v4, 2  ;;  %v8919_v4 = vld [vmem:[%s11108_s5 + $0xe0] sm:$0xff]  }
 0x3cf   : > { %v7388_v12 = vpack.c.bf16 %v4965_v21, %v4965_v21  ;;  %v4966_v53 = vmax.f32 %v4953_v27, 0.0  ;;  %v5118_v16 = vsel %vm2208_vm3, %v5113_v29, %v5117_v52  ;;  %v5121_v19 = vor.u32 %v5119_v8, %v5117_v52 }
 0x3d0   : > { %v4916_v60 = vpop.f32.mrb[28].mxu1  ;;  %8387 = vmatmul.mubr.msk.bf16.gmra.mrb[24].mxu0 %vm5154_vm8, %v5118_v16  ;;  %v10706_v62 = vld [vmem:[#allocation3 + $0x20] sm:$0xf]  ;;  %v5566_v21 = vsel %vm3363_vm5, %v5556_v32, %v5565_v38  ;;  %v5368_v52 = vrot.slane %v10623_v55, 1 }
 0x3d1   : > { %5032 = vst.msk [vmem:[#allocation3 + $0x28] sm:$0xf] %vm5021_vm7, %v7388_v12  ;;  %v7389_v23 = vpack.c.bf16 %v4966_v53, %v4966_v53  ;;  %v4934_v41 = vadd.f32 %v4916_v60, %v10585_v9  ;;  %v8368_v24 = vpop.f32.mrb[29].mxu1  ;;  %8390 = vmatprep.mubr.msk.bf16.mxu0 %vm8948_vm0, %v8947_v47  ;;  %v10744_v45 = vld [vmem:[#allocation3 + $0x1c] sm:$0xff]   ;;  %v5367_v12 = vrot.slane %v7226_v7, 1  ;;  %v8918_v7 = vld [vmem:[%s11108_s5 + $0xc8] sm:$0xff]  }
 0x3d2   : > { %v4919_v14 = vpop.f32.mrb[30].mxu1  ;;  %v5049_v35 = vld [vmem:[#allocation3 + $0x24] sm:$0x1]  ;;  %v5568_v17 = vshrl.u32 %v10744_v45, 16  ;;  %v5571_v1 = vshll.u32 %v10744_v45, 16 }
 0x3d3   : > { %5033 = vst.msk [vmem:[#allocation3 + $0x2c] sm:$0xf] %vm5021_vm7, %v7389_v23  ;;  %v4954_v39 = vadd.f32 %v10590_v42, %v4934_v41  ;;  %v8369_v56 = vpop.f32.mrb[31].mxu1  ;;  %v7207_v9 = vcombine.low %v10706_v62, %v5049_v35  ;;  %v10762_v44 = vld [vmem:[#allocation3 + $0x24] sm:$0xf]  ;;  %v5369_v55 = vsel %vm5366_vm12, %v5367_v12, %v5368_v52  ;;  %v8907_v41 = vld [vmem:[%s11108_s5 + $0x88] sm:$0xff]  }
 0x3d4   : > { %v5570_v27 = vrot.slane %v5568_v17, 1  ;;  %v5573_v57 = vrot.slane %v5571_v1, 2  ;;  %v8905_v53 = vld [vmem:[%s11108_s5 + $0x80] sm:$0xff]   ;;  %v5370_v35 = vrot.slane %v10652_v25, 1  ;;  %v8916_v25 = vld [vmem:[%s11108_s5 + $0x98] sm:$0xff]  }
 0x3d5   : > { %v4967_v59 = vmax.f32 %v4954_v39, 0.0  ;;  %8423 = vmatmul.mubr.msk.bf16.gmra.mrb[48].mxu1 %vm5154_vm8, %v7207_v9  ;;  %v5123_v42 = vshll.u32 %v7207_v9, 16  ;;  %v5127_v18 = vshrl.u32 %v7207_v9, 16 }
 0x3d6   : > { %8462 = vmatprep.mubr.msk.bf16.mxu1 %vm8948_vm0, %v8947_v47  ;;  %v5574_v60 = vor.u32 %v5573_v57, %v5570_v27  ;;  %v5371_v56 = vsel %vm5366_vm12, %v5368_v52, %v5370_v35  ;;  %v5373_v8 = vsel %vm5366_vm12, %v5370_v35, %v5372_v22  ;;  %v5726_v57 = vrot.slane %v10717_v40, 2  ;;  %v8926_v40 = vld [vmem:[%s11108_s5 + $0xd8] sm:$0xff]  }
 0x3d7   : > { %v7390_v54 = vpack.c.bf16 %v4967_v59, %v4967_v59  ;;  %v5125_v2 = vrot.slane %v5123_v42, 1  ;;  %v7251_v59 = vcombine.low %v5707_v33, %v10683_v15  ;;  %v5872_v15 = vrot.slane %v5553_v46, 3  ;;  %v10913_v35 = vld [vmem:[#allocation3 + $0x18] sm:$0xff]  }
 0x3d8   : > { %v5507_v48 = vld [vmem:[#allocation3 + $0x28] sm:$0x3]  ;;  %v5575_v24 = vsel %vm3363_vm5, %v5565_v38, %v5574_v60  ;;  %v8923_v38 = vld [vmem:[%s11108_s5 + $0xf8] sm:$0xff]   ;;  %v6219_v33 = vshll.u32 %v10913_v35, 16 }
 0x3d9   : > { %v5038_v0 = vsel %vm10722_vm11, %v7390_v54, %v5037_v37  ;;  %v5126_v28 = vsel %vm2208_vm3, %v5121_v19, %v5125_v2  ;;  %v5129_v61 = vor.u32 %v5127_v18, %v5125_v2  ;;  %v7241_v29 = vcombine.low %v10762_v44, %v5507_v48  ;;  %v5351_v37 = vld [vmem:[#allocation3 + $0x24] sm:$0x3]  ;;  %v5708_v58 = vld [vmem:[#allocation3 + $0x28] sm:$0x7] }
 0x3da   : > { %5039 = vst [vmem:[#allocation3 + $0x30] sm:$0x1] %v5038_v0  ;;  %8391 = vmatmul.mubr.msk.bf16.gmra.mrb[28].mxu0 %vm5154_vm8, %v5126_v28  ;;  %v7227_v42 = vcombine.low %v10706_v62, %v5351_v37  ;;  %v5864_v20 = vshrl.u32 %v7251_v59, 16  ;;  %v5867_v43 = vshll.u32 %v7251_v59, 16  ;;  %v5873_v2 = vor.u32 %v5872_v15, %v5871_v13 }
 0x3db   : > { %8394 = vmatprep.mubr.msk.bf16.mxu0 %vm8948_vm0, %v8947_v47  ;;  %v5577_v16 = vshrl.u32 %v7241_v29, 16  ;;  %v5580_v23 = vshll.u32 %v7241_v29, 16  ;;  %v5875_v28 = vrot.slane %v5559_v31, 2  ;;  %v8922_v31 = vld [vmem:[%s11108_s5 + $0xf0] sm:$0xff]   ;;  %v10854_v3 = vcombine.low %v10762_v44, %v5708_v58 }
 0x3dc   : > { %v5374_v54 = vrot.slane %v7227_v42, 1  ;;  %v5866_v62 = vrot.slane %v5864_v20, 2  ;;  %v5869_v19 = vrot.slane %v5867_v43, 3  ;;  %v5879_v18 = vrot.slane %v5568_v17, 2  ;;  %v8917_v17 = vld [vmem:[%s11108_s5 + $0xc0] sm:$0xff]   ;;  %v8921_v29 = vld [vmem:[%s11108_s5 + $0xd0] sm:$0xff]  }
 0x3dd   : > { %8463 = vmatmul.mubr.msk.bf16.vlgmr.msra.gmra.mrb[52].mxu1 %vm5154_vm8, %v5557_v34  ;;  %v5579_v10 = vrot.slane %v5577_v16, 1  ;;  %v5582_v14 = vrot.slane %v5580_v23, 2  ;;  %v5877_v34 = vor.u32 %v5876_v26, %v5875_v28  ;;  %v5723_v48 = vrot.slane %v7251_v59, 2  ;;  %v8924_v16 = vld [vmem:[#allocation3 + $0x8] sm:$0xf8]   ;;  %v8929_v20 = vld [vmem:[#allocation3 + $0x20] sm:$0xff]  }
 0x3de   : > { %8466 = vmatprep.mubr.msk.bf16.mxu1 %vm8948_vm0, %v8947_v47  ;;  %8511 = vmatpush3.bf16.msra.mxu1 %v8910_v6  ;;  %v5375_v32 = vsel %vm5366_vm12, %v5372_v22, %v5374_v54  ;;  %v5870_v0 = vor.u32 %v5869_v19, %v5866_v62  ;;  %v8920_v6 = vld [vmem:[%s11108_s5 + $0xe8] sm:$0xff]   ;;  %v5884_v63 = vshrl.u32 %v10854_v3, 16  ;;  %v6221_v42 = vrot.slane %v6219_v33, 4 }
 0x3df   : > { %8512 = vmatprep.subr.bf16.mxu1 %v8947_v47  ;;  %v5583_v39 = vor.u32 %v5582_v14, %v5579_v10  ;;  %v5878_v49 = vsel %vm5862_vm13, %v5873_v2, %v5877_v34  ;;  %v6202_v10 = vshll.u32 %v8924_v16, 16  ;;  %v6225_v13 = vshrl.u32 %v8929_v20, 16 }
 0x3e0   : > { %v5874_v46 = vsel %vm5862_vm13, %v5870_v0, %v5873_v2  ;;  %v6228_v15 = vshll.u32 %v8929_v20, 16  ;;  %v8931_v2 = vld [vmem:[#allocation3 + $0x28] sm:$0xff]   ;;  %v6058_v0 = vrot.slane %v8924_v16, 3  ;;  %vm6620_vm3 = vcmask 1045508  }
 0x3e1   : > { %v5584_v9 = vsel %vm3363_vm5, %v5574_v60, %v5583_v39  ;;  %v5728_v60 = vrot.slane %v10744_v45, 2  ;;  %v6227_v62 = vrot.slane %v6225_v13, 3  ;;  %v6234_v28 = vshrl.u32 %v8931_v2, 16  ;;  %vm11030_vm10 = vmor %vm6619_vm2, %vm6620_vm3 }
 0x3e2   : > { %8395 = vmatmul.mubr.msk.bf16.gmra.mrb[32].mxu0 %vm5154_vm8, %v5129_v61  ;;  %8513 = vmatpush3.bf16.msra.mxu1 %v8911_v50  ;;  %v5880_v50 = vrot.slane %v5571_v1, 3  ;;  %v5724_v61 = vrot.slane %v10691_v11, 2  ;;  %v5887_v11 = vshll.u32 %v10854_v3, 16  ;;  %v6230_v19 = vrot.slane %v6228_v15, 4 }
 0x3e3   : > { %8434 = vmatprep.mubr.msk.bf16.mxu0 %vm8948_vm0, %v8947_v47  ;;  %8514 = vmatprep.subr.bf16.mxu1 %v8947_v47  ;;  %v6237_v26 = vshll.u32 %v8931_v2, 16  ;;  %vm6629_vm5 = vsmask.f32 7950  ;;  %vm6665_vm2 = vsmask.f32 1280 }
 0x3e4   : > { %v5881_v1 = vor.u32 %v5880_v50, %v5879_v18  ;;  %v5889_v27 = vrot.slane %v5887_v11, 3  ;;  %v8932_v18 = vld [vmem:[%s11108_s5 + $0x110] sm:$0xff]   ;;  %vm11035_vm12 = vmand %vm6628_vm4, %vm6629_vm5  ;;  %vm6682_vm5 = vsmask.f32 7942 }
 0x3e5   : > { %8467 = vmatmul.mubr.msk.bf16.gmra.mrb[56].mxu1 %vm5154_vm8, %v5566_v21  ;;  %v5886_v21 = vrot.slane %v5884_v63, 2  ;;  %v6065_v63 = vrot.slane %v8931_v2, 3 }
 0x3e6   : > { %8470 = vmatprep.mubr.msk.bf16.mxu1 %vm8948_vm0, %v8947_v47  ;;  %8515 = vmatpush3.bf16.msra.mxu1 %v8913_v51  ;;  %v5725_v51 = vsel %vm3818_vm6, %v5723_v48, %v5724_v61  ;;  %v5882_v44 = vsel %vm5862_vm13, %v5877_v34, %v5881_v1  ;;  %v8930_v34 = vld [vmem:[%s11108_s5 + $0x108] sm:$0xff]  }
 0x3e7   : > { %8516 = vmatprep.subr.bf16.mxu1 %v8947_v47  ;;  %v5890_v52 = vor.u32 %v5889_v27, %v5886_v21  ;;  %v8934_v21 = vld [vmem:[#allocation3 + $0x14] sm:$0xff]   ;;  %v8935_v27 = vld [vmem:[#allocation3 + $0x1c] sm:$0xff]  }
 0x3e9   : > { %v5891_v12 = vsel %vm5862_vm13, %v5881_v1, %v5890_v52 }
 0x3ea   : > { %8435 = vmatmul.mubr.msk.bf16.vlgmr.msra.gmra.mrb[36].mxu0 %vm5154_vm8, %v5369_v55  ;;  %8517 = vmatpush3.bf16.msra.mxu1 %v8915_v30  ;;  %v5727_v30 = vsel %vm3818_vm6, %v5724_v61, %v5726_v57 }
 0x3eb   : > { %8483 = vmatpush3.bf16.msra.mxu0 %v8905_v53  ;;  %8438 = vmatprep.mubr.msk.bf16.mxu0 %vm8948_vm0, %v8947_v47  ;;  %v10899_v53 = vld [vmem:[#allocation3 + $0x10] sm:$0xff]  }
 0x3ec   : > { %8484 = vmatprep.subr.bf16.mxu0 %v8947_v47  ;;  %8566 = vmatprep.subr.bf16.mxu1 %v8947_v47  ;;  %v6207_v23 = vshrl.u32 %v10899_v53, 16  ;;  %v6210_v55 = vshll.u32 %v10899_v53, 16 }
 0x3ed   : > { %8471 = vmatmul.mubr.msk.bf16.gmra.mrb[60].mxu1 %vm5154_vm8, %v5575_v24  ;;  %v6199_v24 = vshrl.u32 %v8924_v16, 16 }
 0x3ee   : > { %8474 = vmatprep.mubr.msk.bf16.mxu1 %vm8948_vm0, %v8947_v47  ;;  %v6209_v45 = vrot.slane %v6207_v23, 3  ;;  %v6212_v14 = vrot.slane %v6210_v55, 4 }
 0x3ef   : > { %8485 = vmatpush3.bf16.msra.mxu0 %v8907_v41  ;;  %v5729_v41 = vsel %vm3818_vm6, %v5726_v57, %v5728_v60  ;;  %v8936_v57 = vld [vmem:[#allocation3 + $0x24] sm:$0xff]  }
 0x3f0   : > { %8486 = vmatprep.subr.bf16.mxu0 %v8947_v47 }
 0x3f2   : > { %8439 = vmatmul.mubr.msk.bf16.gmra.mrb[40].mxu0 %vm5154_vm8, %v5371_v56  ;;  %v6204_v56 = vrot.slane %v6202_v10, 4 }
 0x3f3   : > { %8442 = vmatprep.mubr.msk.bf16.mxu0 %vm8948_vm0, %v8947_v47  ;;  %8487 = vmatpush3.bf16.msra.mxu0 %v8912_v36  ;;  %v5730_v36 = vrot.slane %v10854_v3, 2  ;;  %v6239_v3 = vrot.slane %v6237_v26, 4 }
 0x3f4   : > { %8488 = vmatprep.subr.bf16.mxu0 %v8947_v47 }
 0x3f5   : > { %8475 = vmatmul.mubr.msk.bf16.gmra.mrb[64].mxu1 %vm5154_vm8, %v5584_v9  ;;  %v6216_v9 = vshrl.u32 %v10913_v35, 16  ;;  %v5731_v22 = vsel %vm3818_vm6, %v5728_v60, %v5730_v36  ;;  %vm6634_vm6 = vcmask 518144  }
 0x3f6   : > { %8478 = vmatprep.mubr.msk.bf16.mxu1 %vm8948_vm0, %v8947_v47 }
 0x3f7   : > { %8489 = vmatpush3.bf16.msra.mxu0 %v8916_v25  ;;  %v6213_v25 = vor.u32 %v6212_v14, %v6209_v45 }
 0x3f8   : > { %8538 = vmatprep.subr.bf16.mxu0 %v8947_v47 }
 0x3fa   : > { %8443 = vmatmul.mubr.msk.bf16.gmra.mrb[44].mxu0 %vm5154_vm8, %v5373_v8  ;;  %v6218_v8 = vrot.slane %v6216_v9, 3 }
 0x3fb   : > { %8446 = vmatprep.mubr.msk.bf16.mxu0 %vm8948_vm0, %v8947_v47 }
 0x3fc   : > { %v6222_v43 = vor.u32 %v6221_v42, %v6218_v8 }
 0x3fd   : > { %8479 = vmatmul.mubr.msk.bf16.gmra.mrb[68].mxu1 %vm5154_vm8, %v5583_v39  ;;  %v6201_v39 = vrot.slane %v6199_v24, 3 }
 0x3fe   : > { %8518 = vmatprep.mubr.msk.bf16.mxu1 %vm8948_vm0, %v8947_v47 }
 0x3ff   : > { %v6205_v59 = vor.u32 %v6204_v56, %v6201_v39 }
 0x401   : > { %v6214_v37 = vsel %vm6197_vm14, %v6205_v59, %v6213_v25 }
 0x402   : > { %8447 = vmatmul.mubr.msk.bf16.gmra.mrb[48].mxu0 %vm5154_vm8, %v5375_v32  ;;  %v6059_v32 = vrot.slane %v10899_v53, 3 }
 0x403   : > { %8450 = vmatprep.mubr.msk.bf16.mxu0 %vm8948_vm0, %v8947_v47 }
 0x405   : > { %8519 = vmatmul.mubr.msk.bf16.vlgmr.msra.gmra.mrb[72].mxu1 %vm5154_vm8, %v5874_v46  ;;  %v6231_v46 = vor.u32 %v6230_v19, %v6227_v62 }
 0x406   : > { %8522 = vmatprep.mubr.msk.bf16.mxu1 %vm8948_vm0, %v8947_v47  ;;  %8567 = vmatpush3.bf16.msra.mxu1 %v8919_v4  ;;  %v8928_v4 = vld [vmem:[%s11108_s5 + $0x100] sm:$0xff]  }
 0x407   : > { %8568 = vmatprep.subr.bf16.mxu1 %v8947_v47  ;;  %v6232_v58 = vsel %vm6197_vm14, %v6222_v43, %v6231_v46 }
 0x40a   : > { %8451 = vmatmul.mubr.msk.bf16.gmra.mrb[52].mxu0 %vm5154_vm8, %v5374_v54  ;;  %8569 = vmatpush3.bf16.msra.mxu1 %v8920_v6  ;;  %v6223_v54 = vsel %vm6197_vm14, %v6213_v25, %v6222_v43  ;;  %v6060_v6 = vsel %vm6057_vm15, %v6058_v0, %v6059_v32 }
 0x40b   : > { %8490 = vmatprep.mubr.msk.bf16.mxu0 %vm8948_vm0, %v8947_v47  ;;  %8570 = vmatprep.subr.bf16.mxu1 %v8947_v47 }
 0x40d   : > { %8523 = vmatmul.mubr.msk.bf16.gmra.mrb[76].mxu1 %vm5154_vm8, %v5878_v49  ;;  %v6061_v49 = vrot.slane %v10913_v35, 3 }
 0x40e   : > { %8526 = vmatprep.mubr.msk.bf16.mxu1 %vm8948_vm0, %v8947_v47  ;;  %8571 = vmatpush3.bf16.msra.mxu1 %v8922_v31  ;;  %v6236_v31 = vrot.slane %v6234_v28, 3 }
 0x40f   : > { %8572 = vmatprep.subr.bf16.mxu1 %v8947_v47  ;;  %v6062_v61 = vsel %vm6057_vm15, %v6059_v32, %v6061_v49 }
 0x410   : > { %v6240_v50 = vor.u32 %v6239_v3, %v6236_v31 }
 0x412   : > { %8491 = vmatmul.mubr.msk.bf16.vlgmr.msra.gmra.mrb[56].mxu0 %vm5154_vm8, %v5725_v51  ;;  %8573 = vmatpush3.bf16.msra.mxu1 %v8923_v38  ;;  %v8933_v38 = vld [vmem:[%s11108_s5 + $0x118] sm:$0xff]   ;;  %v6241_v48 = vsel %vm6197_vm14, %v6231_v46, %v6240_v50  ;;  %v6365_v51 = vld [vmem:[#allocation3 + $0x10] sm:$0xf]  ;;  %vm6652_vm14 = vcmask 519170  }
 0x413   : > { %8539 = vmatpush3.bf16.msra.mxu0 %v8917_v17  ;;  %8494 = vmatprep.mubr.msk.bf16.mxu0 %vm8948_vm0, %v8947_v47  ;;  %v6063_v17 = vrot.slane %v8929_v20, 3 }
 0x414   : > { %8540 = vmatprep.subr.bf16.mxu0 %v8947_v47 }
 0x415   : > { %8527 = vmatmul.mubr.msk.bf16.gmra.mrb[80].mxu1 %vm5154_vm8, %v5882_v44  ;;  %v6064_v1 = vsel %vm6057_vm15, %v6061_v49, %v6063_v17  ;;  %v6066_v11 = vsel %vm6057_vm15, %v6063_v17, %v6065_v63  ;;  %vm6653_vm15 = vsmask.f32 7946 }
 0x416   : > { %8530 = vmatprep.mubr.msk.bf16.mxu1 %vm8948_vm0, %v8947_v47 }
 0x417   : > { %8541 = vmatpush3.bf16.msra.mxu0 %v8918_v7  ;;  %v6364_v7 = vld [vmem:[#allocation3 + $0xc] sm:$0xf] }
 0x418   : > { %8542 = vmatprep.subr.bf16.mxu0 %v8947_v47  ;;  %v7294_v44 = vcombine.low %v6364_v7, %v6365_v51 }
 0x41a   : > { %8495 = vmatmul.mubr.msk.bf16.gmra.mrb[60].mxu0 %vm5154_vm8, %v5727_v30 }
 0x41b   : > { %8498 = vmatprep.mubr.msk.bf16.mxu0 %vm8948_vm0, %v8947_v47  ;;  %8543 = vmatpush3.bf16.msra.mxu0 %v8921_v29  ;;  %v8937_v29 = vld [vmem:[#allocation3 + $0x2c] sm:$0x1f]  }
 0x41c   : > { %8544 = vmatprep.subr.bf16.mxu0 %v8947_v47 }
 0x41d   : > { %8531 = vmatmul.mubr.msk.bf16.gmra.mrb[84].mxu1 %vm5154_vm8, %v5891_v12 }
 0x41e   : > { %8534 = vmatprep.mubr.msk.bf16.mxu1 %vm8948_vm0, %v8947_v47 }
 0x41f   : > { %8545 = vmatpush3.bf16.msra.mxu0 %v8926_v40 }
 0x420   : > { %8594 = vmatprep.subr.bf16.mxu0 %v8947_v47 }
 0x422   : > { %8499 = vmatmul.mubr.msk.bf16.gmra.mrb[64].mxu0 %vm5154_vm8, %v5729_v41 }
 0x423   : > { %8502 = vmatprep.mubr.msk.bf16.mxu0 %vm8948_vm0, %v8947_v47 }
 0x425   : > { %8535 = vmatmul.mubr.msk.bf16.gmra.mrb[88].mxu1 %vm5154_vm8, %v5890_v52 }
 0x426   : > { %8574 = vmatprep.mubr.msk.bf16.mxu1 %vm8948_vm0, %v8947_v47 }
 0x42a   : > { %8503 = vmatmul.mubr.msk.bf16.gmra.mrb[68].mxu0 %vm5154_vm8, %v5731_v22 }
 0x42b   : > { %8506 = vmatprep.mubr.msk.bf16.mxu0 %vm8948_vm0, %v8947_v47 }
 0x42d   : > { %8575 = vmatmul.mubr.msk.bf16.vlgmr.msra.gmra.mrb[92].mxu1 %vm5154_vm8, %v6214_v37 }
 0x42e   : > { %8578 = vmatprep.mubr.msk.bf16.mxu1 %vm8948_vm0, %v8947_v47 }
 0x432   : > { %8507 = vmatmul.mubr.msk.bf16.gmra.mrb[72].mxu0 %vm5154_vm8, %v5730_v36 }
 0x433   : > { %8546 = vmatprep.mubr.msk.bf16.mxu0 %vm8948_vm0, %v8947_v47 }
 0x435   : > { %8579 = vmatmul.mubr.msk.bf16.gmra.mrb[96].mxu1 %vm5154_vm8, %v6223_v54 }
 0x436   : > { %8582 = vmatprep.mubr.msk.bf16.mxu1 %vm8948_vm0, %v8947_v47 }
 0x43a   : > { %8547 = vmatmul.mubr.msk.bf16.vlgmr.msra.gmra.mrb[76].mxu0 %vm5154_vm8, %v6060_v6 }
 0x43b   : > { %8595 = vmatpush3.bf16.msra.mxu0 %v8928_v4  ;;  %8550 = vmatprep.mubr.msk.bf16.mxu0 %vm8948_vm0, %v8947_v47 }
 0x43c   : > { %8596 = vmatprep.subr.bf16.mxu0 %v8947_v47 }
 0x43d   : > { %8583 = vmatmul.mubr.msk.bf16.gmra.mrb[100].mxu1 %vm5154_vm8, %v6232_v58 }
 0x43e   : > { %8586 = vmatprep.mubr.msk.bf16.mxu1 %vm8948_vm0, %v8947_v47 }
 0x43f   : > { %8597 = vmatpush3.bf16.msra.mxu0 %v8930_v34 }
 0x440   : > { %8598 = vmatprep.subr.bf16.mxu0 %v8947_v47 }
 0x442   : > { %8551 = vmatmul.mubr.msk.bf16.gmra.mrb[80].mxu0 %vm5154_vm8, %v6062_v61 }
 0x443   : > { %8554 = vmatprep.mubr.msk.bf16.mxu0 %vm8948_vm0, %v8947_v47  ;;  %8599 = vmatpush3.bf16.msra.mxu0 %v8932_v18 }
 0x444   : > { %8600 = vmatprep.subr.bf16.mxu0 %v8947_v47 }
 0x445   : > { %8587 = vmatmul.mubr.msk.bf16.gmra.mrb[104].mxu1 %vm5154_vm8, %v6241_v48 }
 0x446   : > { %8590 = vmatprep.mubr.msk.bf16.mxu1 %vm8948_vm0, %v8947_v47 }
 0x447   : > { %8601 = vmatpush3.bf16.msra.mxu0 %v8933_v38 }
 0x44a   : > { %8555 = vmatmul.mubr.msk.bf16.gmra.mrb[84].mxu0 %vm5154_vm8, %v6064_v1 }
 0x44b   : > { %8558 = vmatprep.mubr.msk.bf16.mxu0 %vm8948_vm0, %v8947_v47 }
 0x44d   : > { %8591 = vmatmul.mubr.msk.bf16.gmra.mrb[108].mxu1 %vm5154_vm8, %v6240_v50 }
 0x452   : > { %8559 = vmatmul.mubr.msk.bf16.gmra.mrb[88].mxu0 %vm5154_vm8, %v6066_v11 }
 0x453   : > { %8562 = vmatprep.mubr.msk.bf16.mxu0 %vm8948_vm0, %v8947_v47 }
 0x45a   : > { %8563 = vmatmul.mubr.msk.bf16.gmra.mrb[92].mxu0 %vm5154_vm8, %v6065_v63 }
 0x45b   : > { %8602 = vmatprep.mubr.msk.bf16.mxu0 %vm8948_vm0, %v8947_v47 }
 0x462   : > { %8603 = vmatmul.mubr.msk.bf16.vlgmr.msra.gmra.mrb[96].mxu0 %vm5154_vm8, %v7294_v44 }
 0x463   : > { %8606 = vmatprep.mubr.msk.bf16.mxu0 %vm8948_vm0, %v8947_v47 }
 0x46a   : > { %8607 = vmatmul.mubr.msk.bf16.gmra.mrb[100].mxu0 %vm5154_vm8, %v8934_v21 }
 0x46b   : > { %8610 = vmatprep.mubr.msk.bf16.mxu0 %vm8948_vm0, %v8947_v47 }
 0x472   : > { %8611 = vmatmul.mubr.msk.bf16.gmra.mrb[104].mxu0 %vm5154_vm8, %v8935_v27 }
 0x473   : > { %8614 = vmatprep.mubr.msk.bf16.mxu0 %vm8948_vm0, %v8947_v47 }
 0x47a   : > { %8615 = vmatmul.mubr.msk.bf16.gmra.mrb[108].mxu0 %vm5154_vm8, %v8936_v57 }
 0x47b   : > { %8618 = vmatprep.mubr.msk.bf16.mxu0 %vm8948_vm0, %v8947_v47  ;;  %vm6610_vm0 = vsmask.f32 3328 }
 0x47c   : > { %vm6611_vm1 = vmand %vm5021_vm7, %vm6610_vm0 }
 0x47d   : > { %vm11065_vm0 = vmand %vm6652_vm14, %vm6653_vm15 }
 0x482   : > { %8619 = vmatmul.mubr.msk.bf16.gmra.mrb[112].mxu0 %vm5154_vm8, %v8937_v29  ;;  %vm6641_vm8 = vsmask.f32 2304 }
 0x483   : > { %vm11041_vm13 = vmand %vm6634_vm6, %vm6641_vm8 }
 0x488   : > { %v5311_v52 = vpop.f32.mrb[32].mxu1 }
 0x489   : > { %v8408_v30 = vpop.f32.mrb[33].mxu1 }
 0x48a   : > { %v5314_v40 = vpop.f32.mrb[34].mxu1 }
 0x48b   : > { %v8409_v12 = vpop.f32.mrb[35].mxu1 }
 0x490   : > { %v5319_v53 = vpop.f32.mrb[36].mxu1 }
 0x491   : > { %v8412_v60 = vpop.f32.mrb[37].mxu1 }
 0x492   : > { %v5322_v16 = vpop.f32.mrb[38].mxu1 }
 0x493   : > { %v8413_v23 = vpop.f32.mrb[39].mxu1  ;;  %v5204_v55 = vpop.f32.mrb[16].mxu0 }
 0x494   : > { %v5312_v41 = vadd.f32 %v5311_v52, %v5204_v55  ;;  %v8380_v24 = vpop.f32.mrb[17].mxu0 }
 0x495   : > { %v5207_v10 = vpop.f32.mrb[18].mxu0 }
 0x496   : > { %v5315_v45 = vadd.f32 %v5314_v40, %v5207_v10  ;;  %v8381_v14 = vpop.f32.mrb[19].mxu0 }
 0x498   : > { %v5327_v35 = vpop.f32.mrb[40].mxu1 }
 0x499   : > { %v8416_v36 = vpop.f32.mrb[41].mxu1 }
 0x49a   : > { %v5330_v47 = vpop.f32.mrb[42].mxu1 }
 0x49b   : > { %v8417_v39 = vpop.f32.mrb[43].mxu1  ;;  %v5212_v56 = vpop.f32.mrb[20].mxu0 }
 0x49c   : > { %v5320_v25 = vadd.f32 %v5319_v53, %v5212_v56  ;;  %v8384_v9 = vpop.f32.mrb[21].mxu0 }
 0x49d   : > { %v5215_v33 = vpop.f32.mrb[22].mxu0 }
 0x49e   : > { %v5323_v22 = vadd.f32 %v5322_v16, %v5215_v33  ;;  %v8385_v59 = vpop.f32.mrb[23].mxu0 }
 0x4a0   : > { %v5335_v37 = vpop.f32.mrb[44].mxu1 }
 0x4a1   : > { %v8420_v8 = vpop.f32.mrb[45].mxu1 }
 0x4a2   : > { %v5338_v42 = vpop.f32.mrb[46].mxu1 }
 0x4a3   : > { %v8421_v20 = vpop.f32.mrb[47].mxu1  ;;  %v5220_v43 = vpop.f32.mrb[24].mxu0 }
 0x4a4   : > { %v5328_v13 = vadd.f32 %v5327_v35, %v5220_v43  ;;  %v8388_v15 = vpop.f32.mrb[25].mxu0 }
 0x4a5   : > { %v5223_v54 = vpop.f32.mrb[26].mxu0 }
 0x4a6   : > { %v5331_v62 = vadd.f32 %v5330_v47, %v5223_v54  ;;  %v8389_v19 = vpop.f32.mrb[27].mxu0 }
 0x4a8   : > { %v5343_v2 = vpop.f32.mrb[48].mxu1 }
 0x4a9   : > { %v8424_v32 = vpop.f32.mrb[49].mxu1 }
 0x4aa   : > { %v5346_v0 = vpop.f32.mrb[50].mxu1 }
 0x4ab   : > { %v8425_v4 = vpop.f32.mrb[51].mxu1 }
 0x4ad   : > { %v5228_v46 = vpop.f32.mrb[28].mxu0 }
 0x4ae   : > { %v5336_v28 = vadd.f32 %v5335_v37, %v5228_v46  ;;  %v8392_v26 = vpop.f32.mrb[29].mxu0 }
 0x4af   : > { %v5231_v6 = vpop.f32.mrb[30].mxu0 }
 0x4b0   : > { %v5339_v34 = vadd.f32 %v5338_v42, %v5231_v6  ;;  %v8393_v58 = vpop.f32.mrb[31].mxu0  ;;  %v5658_v31 = vpop.f32.mrb[52].mxu1 }
 0x4b1   : > { %v8464_v3 = vpop.f32.mrb[53].mxu1 }
 0x4b2   : > { %v5661_v49 = vpop.f32.mrb[54].mxu1 }
 0x4b3   : > { %v8465_v18 = vpop.f32.mrb[55].mxu1 }
 0x4b5   : > { %v5236_v50 = vpop.f32.mrb[32].mxu0 }
 0x4b6   : > { %v5344_v61 = vadd.f32 %v5343_v2, %v5236_v50  ;;  %v8396_v38 = vpop.f32.mrb[33].mxu0 }
 0x4b7   : > { %v5239_v48 = vpop.f32.mrb[34].mxu0 }
 0x4b8   : > { %v5347_v17 = vadd.f32 %v5346_v0, %v5239_v48  ;;  %v8397_v1 = vpop.f32.mrb[35].mxu0  ;;  %v5666_v63 = vpop.f32.mrb[56].mxu1 }
 0x4b9   : > { %v8468_v11 = vpop.f32.mrb[57].mxu1 }
 0x4ba   : > { %v5669_v51 = vpop.f32.mrb[58].mxu1 }
 0x4bb   : > { %v8469_v7 = vpop.f32.mrb[59].mxu1 }
 0x4bd   : > { %v5449_v44 = vpop.f32.mrb[36].mxu0 }
 0x4be   : > { %v5488_v21 = vadd.f32 %v5449_v44, %v5312_v41  ;;  %v8436_v27 = vpop.f32.mrb[37].mxu0 }
 0x4bf   : > { %v5452_v57 = vpop.f32.mrb[38].mxu0 }
 0x4c0   : > { %v5489_v29 = vadd.f32 %v5452_v57, %v5315_v45  ;;  %v8437_v52 = vpop.f32.mrb[39].mxu0  ;;  %v5674_v30 = vpop.f32.mrb[60].mxu1  ;;  %v5697_v40 = vadd.f32 %v5658_v31, %v5488_v21 }
 0x4c1   : > { %v8472_v12 = vpop.f32.mrb[61].mxu1 }
 0x4c2   : > { %v5677_v53 = vpop.f32.mrb[62].mxu1  ;;  %v5698_v60 = vadd.f32 %v5661_v49, %v5489_v29 }
 0x4c3   : > { %v8473_v16 = vpop.f32.mrb[63].mxu1 }
 0x4c5   : > { %v5457_v23 = vpop.f32.mrb[40].mxu0 }
 0x4c6   : > { %v5490_v55 = vadd.f32 %v5457_v23, %v5320_v25  ;;  %v8440_v24 = vpop.f32.mrb[41].mxu0 }
 0x4c7   : > { %v5460_v10 = vpop.f32.mrb[42].mxu0 }
 0x4c8   : > { %v5491_v14 = vadd.f32 %v5460_v10, %v5323_v22  ;;  %v8441_v35 = vpop.f32.mrb[43].mxu0  ;;  %v5682_v36 = vpop.f32.mrb[64].mxu1  ;;  %v5699_v47 = vadd.f32 %v5666_v63, %v5490_v55 }
 0x4c9   : > { %v8476_v39 = vpop.f32.mrb[65].mxu1 }
 0x4ca   : > { %v5685_v41 = vpop.f32.mrb[66].mxu1  ;;  %v5700_v56 = vadd.f32 %v5669_v51, %v5491_v14 }
 0x4cb   : > { %v8477_v9 = vpop.f32.mrb[67].mxu1 }
 0x4cd   : > { %v5465_v45 = vpop.f32.mrb[44].mxu0 }
 0x4ce   : > { %v5492_v33 = vadd.f32 %v5465_v45, %v5328_v13  ;;  %v8444_v59 = vpop.f32.mrb[45].mxu0 }
 0x4cf   : > { %v5468_v37 = vpop.f32.mrb[46].mxu0 }
 0x4d0   : > { %v5493_v8 = vadd.f32 %v5468_v37, %v5331_v62  ;;  %v8445_v42 = vpop.f32.mrb[47].mxu0  ;;  %v5690_v20 = vpop.f32.mrb[68].mxu1  ;;  %v5701_v43 = vadd.f32 %v5674_v30, %v5492_v33 }
 0x4d1   : > { %v8480_v15 = vpop.f32.mrb[69].mxu1 }
 0x4d2   : > { %v5693_v25 = vpop.f32.mrb[70].mxu1  ;;  %v5702_v54 = vadd.f32 %v5677_v53, %v5493_v8 }
 0x4d3   : > { %v8481_v19 = vpop.f32.mrb[71].mxu1 }
 0x4d5   : > { %v5473_v22 = vpop.f32.mrb[48].mxu0 }
 0x4d6   : > { %v5494_v2 = vadd.f32 %v5473_v22, %v5336_v28  ;;  %v8448_v32 = vpop.f32.mrb[49].mxu0 }
 0x4d7   : > { %v5476_v0 = vpop.f32.mrb[50].mxu0 }
 0x4d8   : > { %v5495_v4 = vadd.f32 %v5476_v0, %v5339_v34  ;;  %v8449_v46 = vpop.f32.mrb[51].mxu0  ;;  %v5965_v26 = vpop.f32.mrb[72].mxu1  ;;  %v5703_v6 = vadd.f32 %v5682_v36, %v5494_v2 }
 0x4d9   : > { %v8520_v58 = vpop.f32.mrb[73].mxu1 }
 0x4da   : > { %v5968_v13 = vpop.f32.mrb[74].mxu1  ;;  %v5704_v31 = vadd.f32 %v5685_v41, %v5495_v4 }
 0x4db   : > { %v8521_v3 = vpop.f32.mrb[75].mxu1 }
 0x4dd   : > { %v5481_v62 = vpop.f32.mrb[52].mxu0 }
 0x4de   : > { %v5496_v49 = vadd.f32 %v5481_v62, %v5344_v61  ;;  %v8452_v18 = vpop.f32.mrb[53].mxu0 }
 0x4df   : > { %v5484_v50 = vpop.f32.mrb[54].mxu0 }
 0x4e0   : > { %v5497_v38 = vadd.f32 %v5484_v50, %v5347_v17  ;;  %v8453_v48 = vpop.f32.mrb[55].mxu0  ;;  %v5973_v1 = vpop.f32.mrb[76].mxu1  ;;  %v5705_v63 = vadd.f32 %v5690_v20, %v5496_v49 }
 0x4e1   : > { %v8524_v11 = vpop.f32.mrb[77].mxu1 }
 0x4e2   : > { %v5976_v28 = vpop.f32.mrb[78].mxu1  ;;  %v5706_v51 = vadd.f32 %v5693_v25, %v5497_v38 }
 0x4e3   : > { %v8525_v7 = vpop.f32.mrb[79].mxu1 }
 0x4e5   : > { %v5805_v34 = vpop.f32.mrb[56].mxu0 }
 0x4e6   : > { %v5844_v44 = vadd.f32 %v5805_v34, %v5697_v40  ;;  %v8492_v21 = vpop.f32.mrb[57].mxu0 }
 0x4e7   : > { %v5808_v27 = vpop.f32.mrb[58].mxu0 }
 0x4e8   : > { %v5845_v57 = vadd.f32 %v5808_v27, %v5698_v60  ;;  %v8493_v29 = vpop.f32.mrb[59].mxu0  ;;  %v5981_v52 = vpop.f32.mrb[80].mxu1  ;;  %v6004_v30 = vadd.f32 %v5965_v26, %v5844_v44 }
 0x4e9   : > { %v8528_v12 = vpop.f32.mrb[81].mxu1 }
 0x4ea   : > { %v5984_v61 = vpop.f32.mrb[82].mxu1  ;;  %v6005_v53 = vadd.f32 %v5968_v13, %v5845_v57 }
 0x4eb   : > { %v8529_v16 = vpop.f32.mrb[83].mxu1 }
 0x4ed   : > { %v5813_v17 = vpop.f32.mrb[60].mxu0 }
 0x4ee   : > { %v5846_v23 = vadd.f32 %v5813_v17, %v5699_v47  ;;  %v8496_v55 = vpop.f32.mrb[61].mxu0 }
 0x4ef   : > { %v5816_v24 = vpop.f32.mrb[62].mxu0 }
 0x4f0   : > { %v5847_v10 = vadd.f32 %v5816_v24, %v5700_v56  ;;  %v8497_v14 = vpop.f32.mrb[63].mxu0  ;;  %v5989_v35 = vpop.f32.mrb[84].mxu1  ;;  %v6006_v36 = vadd.f32 %v5973_v1, %v5846_v23 }
 0x4f1   : > { %v8532_v39 = vpop.f32.mrb[85].mxu1 }
 0x4f2   : > { %v5992_v40 = vpop.f32.mrb[86].mxu1  ;;  %v6007_v41 = vadd.f32 %v5976_v28, %v5847_v10 }
 0x4f3   : > { %v8533_v9 = vpop.f32.mrb[87].mxu1 }
 0x4f5   : > { %v5821_v60 = vpop.f32.mrb[64].mxu0 }
 0x4f6   : > { %v5848_v45 = vadd.f32 %v5821_v60, %v5701_v43  ;;  %v8500_v33 = vpop.f32.mrb[65].mxu0 }
 0x4f7   : > { %v5824_v59 = vpop.f32.mrb[66].mxu0 }
 0x4f8   : > { %v5849_v37 = vadd.f32 %v5824_v59, %v5702_v54  ;;  %v8501_v8 = vpop.f32.mrb[67].mxu0  ;;  %v5997_v42 = vpop.f32.mrb[88].mxu1  ;;  %v6008_v20 = vadd.f32 %v5981_v52, %v5848_v45 }
 0x4f9   : > { %v8536_v15 = vpop.f32.mrb[89].mxu1 }
 0x4fa   : > { %v6000_v47 = vpop.f32.mrb[90].mxu1  ;;  %v6009_v25 = vadd.f32 %v5984_v61, %v5849_v37 }
 0x4fb   : > { %v8537_v19 = vpop.f32.mrb[91].mxu1 }
 0x4fd   : > { %v5829_v56 = vpop.f32.mrb[68].mxu0 }
 0x4fe   : > { %v5850_v22 = vadd.f32 %v5829_v56, %v5703_v6  ;;  %v8504_v2 = vpop.f32.mrb[69].mxu0 }
 0x4ff   : > { %v5832_v32 = vpop.f32.mrb[70].mxu0 }
 0x500   : > { %v5851_v0 = vadd.f32 %v5832_v32, %v5704_v31  ;;  %v8505_v4 = vpop.f32.mrb[71].mxu0  ;;  %v6315_v46 = vpop.f32.mrb[92].mxu1  ;;  %v6010_v26 = vadd.f32 %v5989_v35, %v5850_v22 }
 0x501   : > { %v8576_v58 = vpop.f32.mrb[93].mxu1 }
 0x502   : > { %v6318_v43 = vpop.f32.mrb[94].mxu1  ;;  %v6011_v13 = vadd.f32 %v5992_v40, %v5851_v0 }
 0x503   : > { %v8577_v3 = vpop.f32.mrb[95].mxu1 }
 0x505   : > { %v5837_v54 = vpop.f32.mrb[72].mxu0 }
 0x506   : > { %v5852_v62 = vadd.f32 %v5837_v54, %v5705_v63  ;;  %v8508_v49 = vpop.f32.mrb[73].mxu0 }
 0x507   : > { %v5840_v18 = vpop.f32.mrb[74].mxu0 }
 0x508   : > { %v5853_v50 = vadd.f32 %v5840_v18, %v5706_v51  ;;  %v8509_v38 = vpop.f32.mrb[75].mxu0  ;;  %v6323_v48 = vpop.f32.mrb[96].mxu1  ;;  %v6012_v1 = vadd.f32 %v5997_v42, %v5852_v62 }
 0x509   : > { %v8580_v11 = vpop.f32.mrb[97].mxu1 }
 0x50a   : > { %v6326_v6 = vpop.f32.mrb[98].mxu1  ;;  %v6013_v28 = vadd.f32 %v6000_v47, %v5853_v50 }
 0x50b   : > { %v8581_v7 = vpop.f32.mrb[99].mxu1 }
 0x50d   : > { %v6140_v31 = vpop.f32.mrb[76].mxu0 }
 0x50e   : > { %v6179_v34 = vadd.f32 %v6140_v31, %v6004_v30  ;;  %v8548_v44 = vpop.f32.mrb[77].mxu0 }
 0x50f   : > { %v6143_v21 = vpop.f32.mrb[78].mxu0 }
 0x510   : > { %v6180_v27 = vadd.f32 %v6143_v21, %v6005_v53  ;;  %v8549_v57 = vpop.f32.mrb[79].mxu0  ;;  %v6331_v29 = vpop.f32.mrb[100].mxu1  ;;  %v6354_v52 = vadd.f32 %v6315_v46, %v6179_v34 }
 0x511   : > { %v8584_v12 = vpop.f32.mrb[101].mxu1 }
 0x512   : > { %v6334_v63 = vpop.f32.mrb[102].mxu1  ;;  %v6355_v61 = vadd.f32 %v6318_v43, %v6180_v27 }
 0x513   : > { %v8585_v16 = vpop.f32.mrb[103].mxu1 }
 0x514   : > { %v6612_v16 = vld [vmem:[%s11017_s17] sm:$0xf] }
 0x515   : > { %v6148_v51 = vpop.f32.mrb[80].mxu0 }
 0x516   : > { %v6181_v17 = vadd.f32 %v6148_v51, %v6006_v36  ;;  %v8552_v23 = vpop.f32.mrb[81].mxu0 }
 0x517   : > { %v6151_v55 = vpop.f32.mrb[82].mxu0 }
 0x518   : > { %v6182_v24 = vadd.f32 %v6151_v55, %v6007_v41  ;;  %v8553_v10 = vpop.f32.mrb[83].mxu0  ;;  %v6339_v14 = vpop.f32.mrb[104].mxu1  ;;  %v6356_v35 = vadd.f32 %v6323_v48, %v6181_v17 }
 0x519   : > { %v8588_v39 = vpop.f32.mrb[105].mxu1 }
 0x51a   : > { %v6342_v30 = vpop.f32.mrb[106].mxu1  ;;  %v6357_v40 = vadd.f32 %v6326_v6, %v6182_v24 }
 0x51b   : > { %v8589_v9 = vpop.f32.mrb[107].mxu1 }
 0x51d   : > { %v6156_v53 = vpop.f32.mrb[84].mxu0 }
 0x51e   : > { %v6183_v60 = vadd.f32 %v6156_v53, %v6008_v20  ;;  %v8556_v45 = vpop.f32.mrb[85].mxu0 }
 0x51f   : > { %v6159_v33 = vpop.f32.mrb[86].mxu0 }
 0x520   : > { %v6184_v59 = vadd.f32 %v6159_v33, %v6009_v25  ;;  %v8557_v37 = vpop.f32.mrb[87].mxu0  ;;  %v6347_v8 = vpop.f32.mrb[108].mxu1  ;;  %v6358_v42 = vadd.f32 %v6331_v29, %v6183_v60 }
 0x521   : > { %v8592_v15 = vpop.f32.mrb[109].mxu1 }
 0x522   : > { %v6350_v36 = vpop.f32.mrb[110].mxu1  ;;  %v10994_v47 = vadd.f32 %v6334_v63, %v6184_v59 }
 0x523   : > { %v8593_v41 = vpop.f32.mrb[111].mxu1 }
 0x525   : > { %v6164_v19 = vpop.f32.mrb[88].mxu0 }
 0x526   : > { %v6185_v56 = vadd.f32 %v6164_v19, %v6010_v26  ;;  %v8560_v22 = vpop.f32.mrb[89].mxu0 }
 0x527   : > { %v6167_v2 = vpop.f32.mrb[90].mxu0 }
 0x528   : > { %v6186_v32 = vadd.f32 %v6167_v2, %v6011_v13  ;;  %v8561_v0 = vpop.f32.mrb[91].mxu0  ;;  %v10996_v4 = vadd.f32 %v6339_v14, %v6185_v56  ;;  %v11008_v13 = vld [vmem:[%s11109_s6] ss:$0 sm:$0xff] }
 0x52a   : > { %v10998_v20 = vadd.f32 %v6342_v30, %v6186_v32 }
 0x52d   : > { %v6172_v25 = vpop.f32.mrb[92].mxu0 }
 0x52e   : > { %v6187_v46 = vadd.f32 %v6172_v25, %v6012_v1  ;;  %v8564_v58 = vpop.f32.mrb[93].mxu0 }
 0x52f   : > { %v6175_v43 = vpop.f32.mrb[94].mxu0 }
 0x530   : > { %v6188_v3 = vadd.f32 %v6175_v43, %v6013_v28  ;;  %v8565_v54 = vpop.f32.mrb[95].mxu0  ;;  %v11000_v62 = vadd.f32 %v6347_v8, %v6187_v46  ;;  %v6643_v8 = vld [vmem:[%s11017_s17 + $0x8] sm:$0x7] }
 0x532   : > { %v11002_v49 = vadd.f32 %v6350_v36, %v6188_v3 }
 0x535   : > { %v6480_v26 = vpop.f32.mrb[96].mxu0 }
 0x536   : > { %v6519_v18 = vadd.f32 %v6480_v26, %v6354_v52  ;;  %v8604_v50 = vpop.f32.mrb[97].mxu0 }
 0x537   : > { %v6483_v38 = vpop.f32.mrb[98].mxu0 }
 0x538   : > { %v6536_v48 = vadd.f32 %v11008_v13, %v6519_v18  ;;  %v6520_v1 = vadd.f32 %v6483_v38, %v6355_v61  ;;  %v8605_v11 = vpop.f32.mrb[99].mxu0 }
 0x53a   : > { %v6546_v6 = vmax.f32 %v6536_v48, 0.0  ;;  %v6537_v28 = vadd.f32 %v11008_v13, %v6520_v1 }
 0x53c   : > { %v7391_v7 = vpack.c.bf16 %v6546_v6, %v6546_v6  ;;  %v6547_v31 = vmax.f32 %v6537_v28, 0.0 }
 0x53d   : > { %v6488_v34 = vpop.f32.mrb[100].mxu0 }
 0x53e   : > { %6596 = vst.msk [vmem:[#allocation4] sm:$0xf] %vm5021_vm7, %v7391_v7  ;;  %v7392_v44 = vpack.c.bf16 %v6547_v31, %v6547_v31  ;;  %v6521_v21 = vadd.f32 %v6488_v34, %v6356_v35  ;;  %v8608_v27 = vpop.f32.mrb[101].mxu0 }
 0x53f   : > { %v6491_v57 = vpop.f32.mrb[102].mxu0 }
 0x540   : > { %6597 = vst.msk [vmem:[#allocation4 + $0x4] sm:$0xf] %vm5021_vm7, %v7392_v44  ;;  %v6538_v29 = vadd.f32 %v11008_v13, %v6521_v21  ;;  %v6522_v52 = vadd.f32 %v6491_v57, %v6357_v40  ;;  %v8609_v12 = vpop.f32.mrb[103].mxu0 }
 0x542   : > { %v6548_v63 = vmax.f32 %v6538_v29, 0.0  ;;  %v6539_v61 = vadd.f32 %v11008_v13, %v6522_v52 }
 0x544   : > { %v7393_v51 = vpack.c.bf16 %v6548_v63, %v6548_v63  ;;  %v6549_v17 = vmax.f32 %v6539_v61, 0.0 }
 0x545   : > { %v6608_v23 = vld [vmem:[#allocation4] sm:$0xf]  ;;  %v6496_v55 = vpop.f32.mrb[104].mxu0 }
 0x546   : > { %v6613_v24 = vsel %vm6611_vm1, %v6608_v23, %v6612_v16  ;;  %6598 = vst.msk [vmem:[#allocation4 + $0x8] sm:$0xf] %vm5021_vm7, %v7393_v51  ;;  %v7394_v10 = vpack.c.bf16 %v6549_v17, %v6549_v17  ;;  %v6523_v14 = vadd.f32 %v6496_v55, %v6358_v42  ;;  %v8612_v35 = vpop.f32.mrb[105].mxu0  ;;  %vm6658_vm1 = vcmask 517120   ;;  %v6667_v16 = vld [vmem:[%s11017_s17 + $0x10] sm:$0x3] }
 0x547   : > { %6614 = vst [vmem:[%s11017_s17] sm:$0xf] %v6613_v24  ;;  %v6615_v39 = vld [vmem:[#allocation4 + $0x4] sm:$0xe]  ;;  %v6499_v30 = vpop.f32.mrb[106].mxu0  ;;  %vm6666_vm3 = vmand %vm6658_vm1, %vm6665_vm2  ;;  %v6605_v55 = vld [vmem:[#allocation4 + $0x24] sm:$0x1] }
 0x548   : > { %6599 = vst.msk [vmem:[#allocation4 + $0xc] sm:$0xf] %vm5021_vm7, %v7394_v10  ;;  %v6540_v40 = vadd.f32 %v11008_v13, %v6523_v14  ;;  %v6524_v9 = vadd.f32 %v6499_v30, %v10994_v47  ;;  %v8613_v53 = vpop.f32.mrb[107].mxu0  ;;  %v6622_v60 = vrot.slane %v6615_v39, 6 }
 0x54a   : > { %v6550_v45 = vmax.f32 %v6540_v40, 0.0  ;;  %v6541_v33 = vadd.f32 %v11008_v13, %v6524_v9  ;;  %v6623_v56 = vrot.slane %v6622_v60, 4 }
 0x54c   : > { %v7395_v42 = vpack.c.bf16 %v6550_v45, %v6550_v45  ;;  %v6551_v15 = vmax.f32 %v6541_v33, 0.0 }
 0x54d   : > { %v6616_v36 = vld [vmem:[#allocation4 + $0x8] sm:$0x1]  ;;  %v6636_v47 = vld [vmem:[#allocation4 + $0x8] sm:$0x8]  ;;  %v6504_v19 = vpop.f32.mrb[108].mxu0 }
 0x54e   : > { %v6624_v22 = vrot.slane %v6616_v36, 6  ;;  %v6631_v2 = vld [vmem:[%s11017_s17] sm:$0x8]  ;;  %6639 = vst.msk [vmem:[%s11017_s17 + $0x4] sm:$0x8] %vm6628_vm4, %v6636_v47  ;;  %v7396_v32 = vpack.c.bf16 %v6551_v15, %v6551_v15  ;;  %v6525_v0 = vadd.f32 %v6504_v19, %v10996_v4  ;;  %v8616_v25 = vpop.f32.mrb[109].mxu0 }
 0x54f   : > { %6600 = vst.msk [vmem:[#allocation4 + $0x10] sm:$0xf] %vm5021_vm7, %v7395_v42  ;;  %v6632_v46 = vsel %vm11035_vm12, %v6622_v60, %v6631_v2  ;;  %v6637_v58 = vld [vmem:[#allocation4 + $0xc] sm:$0x7]  ;;  %v6507_v43 = vpop.f32.mrb[110].mxu0  ;;  %vm6681_vm4 = vcmask 519169  }
 0x550   : > { %v6625_v3 = vsel %vm11030_vm10, %v6623_v56, %v6624_v22  ;;  %6633 = vst [vmem:[%s11017_s17] sm:$0x8] %v6632_v46  ;;  %v6644_v54 = vsel %vm11041_vm13, %v6637_v58, %v6643_v8  ;;  %6601 = vst.msk [vmem:[#allocation4 + $0x14] sm:$0xf] %vm5021_vm7, %v7396_v32  ;;  %v6542_v26 = vadd.f32 %v11008_v13, %v6525_v0  ;;  %v8617_v4 = vpop.f32.mrb[111].mxu0  ;;  %v6693_v60 = vld [vmem:[%s11017_s17 + $0x18] sm:$0x1] }
 0x551   : > { %v6526_v18 = vadd.f32 %v6507_v43, %v10998_v20  ;;  %6635 = vst.msk [vmem:[%s11017_s17 + $0x4] sm:$0x7] %vm6634_vm6, %v6625_v3  ;;  %6645 = vst [vmem:[%s11017_s17 + $0x8] sm:$0x7] %v6644_v54 }
 0x552   : > { %v6552_v50 = vmax.f32 %v6542_v26, 0.0 }
 0x553   : > { %v6543_v38 = vadd.f32 %v11008_v13, %v6526_v18 }
 0x554   : > { %v7397_v48 = vpack.c.bf16 %v6552_v50, %v6552_v50 }
 0x555   : > { %v6553_v1 = vmax.f32 %v6543_v38, 0.0  ;;  %v6512_v6 = vpop.f32.mrb[112].mxu0 }
 0x556   : > { %v6646_v11 = vld [vmem:[#allocation4 + $0x10] sm:$0xf]  ;;  %6602 = vst.msk [vmem:[#allocation4 + $0x18] sm:$0xf] %vm5021_vm7, %v7397_v48  ;;  %v6527_v31 = vadd.f32 %v6512_v6, %v11000_v62  ;;  %v8620_v34 = vpop.f32.mrb[113].mxu0 }
 0x557   : > { %v6648_v28 = vrot.slane %v6646_v11, 6  ;;  %v7398_v20 = vpack.c.bf16 %v6553_v1, %v6553_v1  ;;  %v6660_v44 = vld [vmem:[#allocation4 + $0x14] sm:$0xc]  ;;  %v6515_v21 = vpop.f32.mrb[114].mxu0 }
 0x558   : > { %v6655_v57 = vld [vmem:[%s11017_s17 + $0x8] sm:$0xc]  ;;  %6663 = vst.msk [vmem:[%s11017_s17 + $0xc] sm:$0xc] %vm6652_vm14, %v6660_v44  ;;  %v6544_v29 = vadd.f32 %v11008_v13, %v6527_v31  ;;  %v6528_v52 = vadd.f32 %v6515_v21, %v11002_v49  ;;  %v8621_v12 = vpop.f32.mrb[115].mxu0 }
 0x559   : > { %v6649_v27 = vrot.slane %v6648_v28, 4  ;;  %6603 = vst.msk [vmem:[#allocation4 + $0x1c] sm:$0xf] %vm5021_vm7, %v7398_v20  ;;  %v6656_v62 = vsel %vm11065_vm0, %v6648_v28, %v6655_v57 }
 0x55a   : > { %6657 = vst [vmem:[%s11017_s17 + $0x8] sm:$0xc] %v6656_v62  ;;  %v6554_v63 = vmax.f32 %v6544_v29, 0.0  ;;  %v6545_v61 = vadd.f32 %v11008_v13, %v6528_v52 }
 0x55b   : > { %6659 = vst.msk [vmem:[%s11017_s17 + $0xc] sm:$0x3] %vm6658_vm1, %v6649_v27 }
 0x55c   : > { %v7399_v51 = vpack.c.bf16 %v6554_v63, %v6554_v63  ;;  %v6555_v17 = vmax.f32 %v6545_v61, 0.0 }
 0x55d   : > { %v6661_v23 = vld [vmem:[#allocation4 + $0x18] sm:$0x3]  ;;  %v6670_v35 = vld [vmem:[#allocation4 + $0x18] sm:$0x8] }
 0x55e   : > { %v6668_v49 = vsel %vm6666_vm3, %v6661_v23, %v6667_v16  ;;  %6604 = vst.msk [vmem:[#allocation4 + $0x20] sm:$0xf] %vm5021_vm7, %v7399_v51  ;;  %v7400_v24 = vpack.c.bf16 %v6555_v17, %v6555_v17  ;;  %v7319_v30 = vrot.slane %v6670_v35, 10  ;;  %vm6683_vm7 = vmand %vm6681_vm4, %vm6682_vm5 }
 0x55f   : > { %6669 = vst [vmem:[%s11017_s17 + $0x10] sm:$0x3] %v6668_v49 }
 0x560   : > { %v6671_v10 = vld [vmem:[#allocation4 + $0x1c] sm:$0x7]  ;;  %v6606_v13 = vsel %vm10722_vm11, %v7400_v24, %v6605_v55 }
 0x561   : > { %v6676_v14 = vrot.slane %v6671_v10, 6  ;;  %6607 = vst [vmem:[#allocation4 + $0x24] sm:$0x1] %v6606_v13 }
 0x563   : > { %v6678_v39 = vrot.slane %v6676_v14, 4  ;;  %v6677_v9 = vsel %vm11030_vm10, %v7319_v30, %v6676_v14 }
 0x565   : > { %6688 = vst.msk [vmem:[%s11017_s17 + $0x14] sm:$0x1] %vm5034_vm9, %v6678_v39  ;;  %v6689_v40 = vld [vmem:[#allocation4 + $0x20] sm:$0xe] }
 0x566   : > { %v6684_v53 = vld [vmem:[%s11017_s17 + $0x10] sm:$0xe]  ;;  %6692 = vst.msk [vmem:[%s11017_s17 + $0x14] sm:$0xe] %vm6681_vm4, %v6689_v40 }
 0x567   : > { %v6685_v45 = vsel %vm6683_vm7, %v6677_v9, %v6684_v53 }
 0x568   : > { %6686 = vst [vmem:[%s11017_s17 + $0x10] sm:$0xe] %v6685_v45  ;;  %v6690_v33 = vld [vmem:[#allocation4 + $0x24] sm:$0x1] }
 0x569   : > { %v6694_v37 = vsel %vm10722_vm11, %v6690_v33, %v6693_v60 }
 0x56a   : > { %6695 = vst [vmem:[%s11017_s17 + $0x18] sm:$0x1] %v6694_v37 }
 0x56b PF: > { %s17_s24 = sadd.s32 1, %s8945_s24  }
 0x56c   : > { %p14_p5 = scmp.ge.s32.totalorder %s17_s24, 4  }
 0x56e   :  { %16 = sbr.rel (!%p14_p5) target bundleno = 1 (0x1), region = 84 }

</bundles_post_ra>
